<compile_context>
chip_gen: v7x
topology: tpu7x:2x2x1
jax: 0.10.0
libtpu: 0.0.40
codegen_flags: <defaults>
</compile_context>

<pallas_src>
import jax
import jax.numpy as jnp
import numpy as np
from jax import lax
from jax.experimental import pallas as pl
from jax.experimental.pallas import tpu as pltpu

OC = 32                       # out_channels per branch
NB = 3                        # number of conv branches
CP = 4 * OC                   # 128 = module output channels (and padded input channels)
KS = (40, 20, 10)             # inception kernel sizes
KMAX = KS[0]                  # 40
PAD_L = (KMAX - 1) // 2       # 19 (PyTorch 'same' left pad for k=40)
PAD_R = KMAX - 1 - PAD_L      # 20
GRP = 8                       # taps per grouped matmul  (K = GRP*OC = 256)
NGRP = KMAX // GRP            # 5 groups
IN0 = 24                      # row of t=0 inside the padded scratch (8-aligned, >= PAD_L)
BASE = IN0 - PAD_L            # 5
DEPTH = 8


def _round_up(x, m):
    return (x + m - 1) // m * m


# --------------------------------------------------------------------------- #
# Fused kernel: 8 inception modules + head, one batch element per grid step.
# --------------------------------------------------------------------------- #
def _fused_kernel(x_ref, wb_ref, wg_ref, wm_ref, hw_ref, hb_ref, o_ref, xp):
    L = x_ref.shape[1]
    Lz = L + GRP * (NGRP - 1)          # rows needed in the shift slab

    # Zero-init the padded activation scratch every grid step (each core has its
    # own scratch when batch is sharded); halo rows stay zero for the whole net.
    xp[...] = jnp.zeros_like(xp)
    xp[IN0:IN0 + L, :] = x_ref[0]

    ninf = jnp.float32(-jnp.inf)
    row = lax.broadcasted_iota(jnp.int32, (L, CP), 0)   # hoisted out of the layer loop

    for l in range(DEPTH):
        xf = xp[...]                                    # (LPAD, 128) f32, zero halo
        xb16 = xf.astype(jnp.bfloat16)

        # Bottleneck 1x1 conv (no bias): zero halo is preserved.
        xbt = jnp.dot(xb16, wb_ref[l],
                      preferred_element_type=jnp.float32)           # (LPAD, 32) f32

        # Shift slab: z[r, 32*i + c] = xbt[BASE + r + i, c]  (im2col for 8-tap groups)
        z = jnp.concatenate(
            [xbt[BASE + i:BASE + i + Lz, :] for i in range(GRP)], axis=-1)  # (Lz, 256)
        zb = z.astype(jnp.bfloat16)

        # Fused k=40/20/10 branches: 5 matmuls of (L,256)x(256,96).
        acc = jnp.zeros((L, NB * OC), jnp.float32)
        for g in range(NGRP):
            acc = acc + jnp.dot(zb[GRP * g:GRP * g + L, :], wg_ref[l, g],
                                preferred_element_type=jnp.float32)

        # MaxPool1d(3, stride=1, padding=1) on the layer input, then 1x1 conv.
        xc = xf[IN0:IN0 + L, :]
        xa = jnp.where(row == 0, ninf, xf[IN0 - 1:IN0 - 1 + L, :])
        xb2 = jnp.where(row == L - 1, ninf, xf[IN0 + 1:IN0 + 1 + L, :])
        mp = jnp.maximum(jnp.maximum(xa, xc), xb2)
        omp = jnp.dot(mp.astype(jnp.bfloat16), wm_ref[l],
                      preferred_element_type=jnp.float32)           # (L, 32)

        # Concat (40 | 20 | 10 | maxconv) on channels, ReLU, write back to interior.
        out = jnp.maximum(jnp.concatenate([acc, omp], axis=-1), 0.0)  # (L, 128)
        xp[IN0:IN0 + L, :] = out

    # Head: mean over time + Linear(128 -> num_out).
    act = xp[IN0:IN0 + L, :]
    xm = jnp.sum(act, axis=0, keepdims=True) * jnp.float32(1.0 / L)   # (1, 128)
    res = jnp.dot(xm.astype(jnp.bfloat16), hw_ref[...],
                  preferred_element_type=jnp.float32) + hb_ref[...]   # (1, NOUT)
    o_ref[0] = res


# --------------------------------------------------------------------------- #
# Weight packing (done once, outside the kernel).
# --------------------------------------------------------------------------- #
def pack_branch_weights(w40, w20, w10):
    """(k, OC_in, OC_out) branch weights -> grouped fused (NGRP, GRP*OC, 3*OC)."""
    wf = jnp.zeros((KMAX, OC, NB * OC), jnp.float32)
    wf = wf.at[:, :, 0 * OC:1 * OC].set(w40)
    off20 = PAD_L - (KS[1] - 1) // 2          # 10: aligns k=20's 'same' pad with k=40's
    off10 = PAD_L - (KS[2] - 1) // 2          # 15
    wf = wf.at[off20:off20 + KS[1], :, 1 * OC:2 * OC].set(w20)
    wf = wf.at[off10:off10 + KS[2], :, 2 * OC:3 * OC].set(w10)
    return wf.reshape(NGRP, GRP, OC, NB * OC).reshape(NGRP, GRP * OC, NB * OC)


def pack_params(mods, W, b):
    wb_s, wg_s, wm_s = [], [], []
    for wb, w40, w20, w10, wm in mods:
        cin = wb.shape[0]
        wb_s.append(jnp.pad(wb, ((0, CP - cin), (0, 0))))   # zero-pad Cin -> 128
        wm_s.append(jnp.pad(wm, ((0, CP - cin), (0, 0))))
        wg_s.append(pack_branch_weights(w40, w20, w10))
    WB = jnp.stack(wb_s).astype(jnp.bfloat16)               # (DEPTH, 128, 32)
    WG = jnp.stack(wg_s).astype(jnp.bfloat16)               # (DEPTH, 5, 256, 96)
    WM = jnp.stack(wm_s).astype(jnp.bfloat16)               # (DEPTH, 128, 32)
    HW = jnp.asarray(W).astype(jnp.bfloat16)                # (128, NOUT)
    HB = jnp.asarray(b).astype(jnp.float32)                 # (1, NOUT)
    return WB, WG, WM, HW, HB


# --------------------------------------------------------------------------- #
# Forward pass (Pallas).
# --------------------------------------------------------------------------- #
@jax.jit
def inception_time_forward_pallas(x_ncl, packed):
    WB, WG, WM, HW, HB = packed
    N, cin, L = x_ncl.shape
    nout = HW.shape[1]

    x = jnp.transpose(x_ncl, (0, 2, 1))                     # (N, C, L) -> (N, L, C)
    x = jnp.pad(x, ((0, 0), (0, 0), (0, CP - cin)))         # channel-pad to 128, once
    lpad = _round_up(IN0 + L + PAD_R, 8)

    out = pl.pallas_call(
        _fused_kernel,
        out_shape=jax.ShapeDtypeStruct((N, 1, nout), jnp.float32),
        grid_spec=pltpu.PrefetchScalarGridSpec(
            num_scalar_prefetch=0,
            grid=(N,),
            in_specs=[
                pl.BlockSpec((1, L, CP), lambda n: (n, 0, 0)),
                pl.BlockSpec((DEPTH, CP, OC), lambda n: (0, 0, 0)),
                pl.BlockSpec((DEPTH, NGRP, GRP * OC, NB * OC),
                             lambda n: (0, 0, 0, 0)),
                pl.BlockSpec((DEPTH, CP, OC), lambda n: (0, 0, 0)),
                pl.BlockSpec((CP, nout), lambda n: (0, 0)),
                pl.BlockSpec((1, nout), lambda n: (0, 0)),
            ],
            out_specs=pl.BlockSpec((1, 1, nout), lambda n: (n, 0, 0)),
            scratch_shapes=[pltpu.VMEM((lpad, CP), jnp.float32)],
        ),
        compiler_params=pltpu.CompilerParams(
            dimension_semantics=("parallel",)),
    )(x, WB, WG, WM, HW, HB)
    return out[:, 0, :]


# --------------------------------------------------------------------------- #
# Deterministic parameter init (same layout as before).
# --------------------------------------------------------------------------- #
def init_params(key, in_channels, depth=DEPTH, num_out=3):
    mods = []
    for d in range(depth):
        cin = in_channels if d == 0 else OC * 4
        key, kb, k0, k1, k2, km = jax.random.split(key, 6)
        wb = jax.random.normal(kb, (cin, OC), jnp.float32) * (1.0 / np.sqrt(cin))
        w40 = jax.random.normal(k0, (KS[0], OC, OC), jnp.float32) * np.sqrt(2.0 / (OC * KS[0]))
        w20 = jax.random.normal(k1, (KS[1], OC, OC), jnp.float32) * np.sqrt(2.0 / (OC * KS[1]))
        w10 = jax.random.normal(k2, (KS[2], OC, OC), jnp.float32) * np.sqrt(2.0 / (OC * KS[2]))
        wm = jax.random.normal(km, (cin, OC), jnp.float32) * (1.0 / np.sqrt(cin))
        mods.append((wb, w40, w20, w10, wm))
    key, kw, kbb = jax.random.split(key, 3)
    W = jax.random.normal(kw, (OC * 4, num_out), jnp.float32) * (1.0 / np.sqrt(OC * 4))
    b = jax.random.normal(kbb, (1, num_out), jnp.float32) * 0.01
    return mods, W, b


# --------------------------------------------------------------------------- #
# Pure-JAX reference (channels-first, mirrors the PyTorch module semantics).
# Operands are quantized through bf16 (same as the kernel's MXU inputs) but the
# dots/convs themselves run F32 x F32 -> F32, which every backend supports
# (fixes the "Unsupported element type ... BF16 x BF16 = F32" DotThunk error).
# --------------------------------------------------------------------------- #
def _q(x):
    """Quantize to bf16 precision, keep a float32 container."""
    return x.astype(jnp.bfloat16).astype(jnp.float32)


def _ref_inception_module(x_ncl, wb, w40, w20, w10, wm):
    def conv1x1(x, w):                                   # w: (Cin, OC)
        return jnp.einsum('ncl,co->nol', _q(x), _q(w))

    def conv_same(x, w_kio, k):                          # w: (k, Cin, OC)
        left = (k - 1) // 2
        w = _q(jnp.transpose(w_kio, (2, 1, 0)))          # (OC, Cin, k)
        return lax.conv_general_dilated(
            _q(x), w, window_strides=(1,),
            padding=[(left, k - 1 - left)],
            dimension_numbers=('NCH', 'OIH', 'NCH'))

    xb = conv1x1(x_ncl, wb)
    o40 = conv_same(xb, w40, KS[0])
    o20 = conv_same(xb, w20, KS[1])
    o10 = conv_same(xb, w10, KS[2])
    mp = lax.reduce_window(x_ncl, -jnp.inf, lax.max,
                           (1, 1, 3), (1, 1, 1), [(0, 0), (0, 0), (1, 1)])
    omc = conv1x1(mp, wm)
    return jax.nn.relu(jnp.concatenate([o40, o20, o10, omc], axis=1))


def inception_time_forward_ref(x_ncl, mods, W, b):
    x = x_ncl
    for p in mods:
        x = _ref_inception_module(x, *p)
    xm = jnp.mean(x, axis=-1)                            # (N, 128)
    return jnp.dot(_q(xm), _q(W)) + b


# --------------------------------------------------------------------------- #
if __name__ == "__main__":
    key = jax.random.PRNGKey(0)
    N, C_IN, L = 2, 4, 16
    NUM_CLASSES = 3

    key, kx = jax.random.split(key)
    x_ncl = jax.random.normal(kx, (N, C_IN, L), jnp.float32)   # PyTorch (N, C, L) input

    mods, W, b = init_params(key, C_IN, depth=DEPTH, num_out=NUM_CLASSES)
    packed = pack_params(mods, W, b)

    out = inception_time_forward_pallas(x_ncl, packed)
    out = jax.block_until_ready(out)

    ref = inception_time_forward_ref(x_ncl, mods, W, b)
    ref = jax.block_until_ready(ref)

    # Both paths use bf16-quantized operands with f32 accumulation; they differ
    # only in f32 accumulation order, so a 1e-2 tolerance is very loose.
    np.testing.assert_allclose(np.asarray(out), np.asarray(ref),
                               rtol=1e-2, atol=1e-2)
    print("KERNEL_OK")
</pallas_src>

<mosaic_0001>
module attributes {stable_mosaic.version = 11 : i64} {
  func.func @_fused_kernel(%arg0: i32, %arg1: memref<1x16x128xf32, #tpu.memory_space<vmem>>, %arg2: memref<8x128x32xbf16, #tpu.memory_space<vmem>>, %arg3: memref<8x5x256x96xbf16, #tpu.memory_space<vmem>>, %arg4: memref<8x128x32xbf16, #tpu.memory_space<vmem>>, %arg5: memref<128x3xbf16, #tpu.memory_space<vmem>>, %arg6: memref<1x3xf32, #tpu.memory_space<vmem>>, %arg7: memref<1x1x3xf32, #tpu.memory_space<vmem>>, %arg8: memref<64x128xf32, #tpu.memory_space<vmem>>) attributes {dimension_semantics = [#tpu.dimension_semantics<parallel>], iteration_bounds = array<i64: 2>, scalar_prefetch = 0 : i64, scratch_operands = 1 : i64, tpu.core_type = #tpu.core_type<tc>, window_params = [{transform_indices = @transform_0, window_bounds = array<i64: 1, 16, 128>}, {pipeline_mode = #tpu.pipeline_mode<synchronous>, transform_indices = @transform_1, window_bounds = array<i64: 8, 128, 32>}, {pipeline_mode = #tpu.pipeline_mode<synchronous>, transform_indices = @transform_2, window_bounds = array<i64: 8, 5, 256, 96>}, {pipeline_mode = #tpu.pipeline_mode<synchronous>, transform_indices = @transform_3, window_bounds = array<i64: 8, 128, 32>}, {pipeline_mode = #tpu.pipeline_mode<synchronous>, transform_indices = @transform_4, window_bounds = array<i64: 128, 3>}, {pipeline_mode = #tpu.pipeline_mode<synchronous>, transform_indices = @transform_5, window_bounds = array<i64: 1, 3>}, {transform_indices = @transform_6, window_bounds = array<i64: 1, 1, 3>}]} {
    %cst = arith.constant 0.000000e+00 : f32
    %0 = vector.broadcast %cst : f32 to vector<64x128xf32>
    %c0 = arith.constant 0 : index
    %c0_0 = arith.constant 0 : index
    %1 = vector.load %arg8[%c0, %c0_0] : memref<64x128xf32, #tpu.memory_space<vmem>>, vector<64x128xf32>
    tpu.vector_store %arg8[%c0, %c0_0], %0 {strides = array<i32>} : memref<64x128xf32, #tpu.memory_space<vmem>>, vector<64x128xf32>,
    %c0_1 = arith.constant 0 : index
    %c0_2 = arith.constant 0 : index
    %c0_3 = arith.constant 0 : index
    %2 = vector.load %arg1[%c0_1, %c0_2, %c0_3] : memref<1x16x128xf32, #tpu.memory_space<vmem>>, vector<1x16x128xf32>
    %3 = vector.shape_cast %2 : vector<1x16x128xf32> to vector<16x128xf32>
    %c24 = arith.constant 24 : index
    %c0_4 = arith.constant 0 : index
    %4 = vector.load %arg8[%c24, %c0_4] : memref<64x128xf32, #tpu.memory_space<vmem>>, vector<16x128xf32>
    tpu.vector_store %arg8[%c24, %c0_4], %3 {strides = array<i32>} : memref<64x128xf32, #tpu.memory_space<vmem>>, vector<16x128xf32>,
    %5 = tpu.iota {dimensions = array<i32: 0>} : vector<16x128xi32>
    %c0_5 = arith.constant 0 : index
    %c0_6 = arith.constant 0 : index
    %6 = vector.load %arg8[%c0_5, %c0_6] : memref<64x128xf32, #tpu.memory_space<vmem>>, vector<64x128xf32>
    %7 = arith.truncf %6 : vector<64x128xf32> to vector<64x128xbf16>
    %c0_7 = arith.constant 0 : index
    %c0_8 = arith.constant 0 : index
    %c0_9 = arith.constant 0 : index
    %8 = vector.load %arg2[%c0_7, %c0_8, %c0_9] : memref<8x128x32xbf16, #tpu.memory_space<vmem>>, vector<1x128x32xbf16>
    %9 = vector.shape_cast %8 : vector<1x128x32xbf16> to vector<128x32xbf16>
    %cst_10 = arith.constant dense<0.000000e+00> : vector<64x32xf32>
    %10 = tpu.matmul %7, %9, %cst_10 {dimension_numbers = #tpu.dot_dimension_numbers<[1], [0], [0], [1], [0, 0, 1, 1], [], []>} : vector<64x128xbf16>, vector<128x32xbf16>, vector<64x32xf32> -> vector<64x32xf32>
    %11 = vector.extract_strided_slice %10 {offsets = [5, 0], sizes = [48, 32], strides = [1, 1]} : vector<64x32xf32> to vector<48x32xf32>
    %12 = vector.extract_strided_slice %10 {offsets = [6, 0], sizes = [48, 32], strides = [1, 1]} : vector<64x32xf32> to vector<48x32xf32>
    %13 = vector.extract_strided_slice %10 {offsets = [7, 0], sizes = [48, 32], strides = [1, 1]} : vector<64x32xf32> to vector<48x32xf32>
    %14 = vector.extract_strided_slice %10 {offsets = [8, 0], sizes = [48, 32], strides = [1, 1]} : vector<64x32xf32> to vector<48x32xf32>
    %15 = vector.extract_strided_slice %10 {offsets = [9, 0], sizes = [48, 32], strides = [1, 1]} : vector<64x32xf32> to vector<48x32xf32>
    %16 = vector.extract_strided_slice %10 {offsets = [10, 0], sizes = [48, 32], strides = [1, 1]} : vector<64x32xf32> to vector<48x32xf32>
    %17 = vector.extract_strided_slice %10 {offsets = [11, 0], sizes = [48, 32], strides = [1, 1]} : vector<64x32xf32> to vector<48x32xf32>
    %18 = vector.extract_strided_slice %10 {offsets = [12, 0], sizes = [48, 32], strides = [1, 1]} : vector<64x32xf32> to vector<48x32xf32>
    %19 = tpu.concatenate %11, %12, %13, %14, %15, %16, %17, %18 in 1 : vector<48x32xf32>, vector<48x32xf32>, vector<48x32xf32>, vector<48x32xf32>, vector<48x32xf32>, vector<48x32xf32>, vector<48x32xf32>, vector<48x32xf32> -> vector<48x256xf32>
    %20 = arith.truncf %19 : vector<48x256xf32> to vector<48x256xbf16>
    %cst_11 = arith.constant 0.000000e+00 : f32
    %21 = vector.broadcast %cst_11 : f32 to vector<16x96xf32>
    %22 = vector.extract_strided_slice %20 {offsets = [0, 0], sizes = [16, 256], strides = [1, 1]} : vector<48x256xbf16> to vector<16x256xbf16>
    %c0_12 = arith.constant 0 : index
    %c0_13 = arith.constant 0 : index
    %c0_14 = arith.constant 0 : index
    %c0_15 = arith.constant 0 : index
    %23 = vector.load %arg3[%c0_12, %c0_13, %c0_14, %c0_15] : memref<8x5x256x96xbf16, #tpu.memory_space<vmem>>, vector<1x1x256x96xbf16>
    %24 = vector.shape_cast %23 : vector<1x1x256x96xbf16> to vector<256x96xbf16>
    %cst_16 = arith.constant dense<0.000000e+00> : vector<16x96xf32>
    %25 = tpu.matmul %22, %24, %cst_16 {dimension_numbers = #tpu.dot_dimension_numbers<[1], [0], [0], [1], [0, 0, 1, 1], [], []>} : vector<16x256xbf16>, vector<256x96xbf16>, vector<16x96xf32> -> vector<16x96xf32>
    %26 = arith.addf %21, %25 : vector<16x96xf32>
    %27 = vector.extract_strided_slice %20 {offsets = [8, 0], sizes = [16, 256], strides = [1, 1]} : vector<48x256xbf16> to vector<16x256xbf16>
    %c0_17 = arith.constant 0 : index
    %c1 = arith.constant 1 : index
    %c0_18 = arith.constant 0 : index
    %c0_19 = arith.constant 0 : index
    %28 = vector.load %arg3[%c0_17, %c1, %c0_18, %c0_19] : memref<8x5x256x96xbf16, #tpu.memory_space<vmem>>, vector<1x1x256x96xbf16>
    %29 = vector.shape_cast %28 : vector<1x1x256x96xbf16> to vector<256x96xbf16>
    %cst_20 = arith.constant dense<0.000000e+00> : vector<16x96xf32>
    %30 = tpu.matmul %27, %29, %cst_20 {dimension_numbers = #tpu.dot_dimension_numbers<[1], [0], [0], [1], [0, 0, 1, 1], [], []>} : vector<16x256xbf16>, vector<256x96xbf16>, vector<16x96xf32> -> vector<16x96xf32>
    %31 = arith.addf %26, %30 : vector<16x96xf32>
    %32 = vector.extract_strided_slice %20 {offsets = [16, 0], sizes = [16, 256], strides = [1, 1]} : vector<48x256xbf16> to vector<16x256xbf16>
    %c0_21 = arith.constant 0 : index
    %c2 = arith.constant 2 : index
    %c0_22 = arith.constant 0 : index
    %c0_23 = arith.constant 0 : index
    %33 = vector.load %arg3[%c0_21, %c2, %c0_22, %c0_23] : memref<8x5x256x96xbf16, #tpu.memory_space<vmem>>, vector<1x1x256x96xbf16>
    %34 = vector.shape_cast %33 : vector<1x1x256x96xbf16> to vector<256x96xbf16>
    %cst_24 = arith.constant dense<0.000000e+00> : vector<16x96xf32>
    %35 = tpu.matmul %32, %34, %cst_24 {dimension_numbers = #tpu.dot_dimension_numbers<[1], [0], [0], [1], [0, 0, 1, 1], [], []>} : vector<16x256xbf16>, vector<256x96xbf16>, vector<16x96xf32> -> vector<16x96xf32>
    %36 = arith.addf %31, %35 : vector<16x96xf32>
    %37 = vector.extract_strided_slice %20 {offsets = [24, 0], sizes = [16, 256], strides = [1, 1]} : vector<48x256xbf16> to vector<16x256xbf16>
    %c0_25 = arith.constant 0 : index
    %c3 = arith.constant 3 : index
    %c0_26 = arith.constant 0 : index
    %c0_27 = arith.constant 0 : index
    %38 = vector.load %arg3[%c0_25, %c3, %c0_26, %c0_27] : memref<8x5x256x96xbf16, #tpu.memory_space<vmem>>, vector<1x1x256x96xbf16>
    %39 = vector.shape_cast %38 : vector<1x1x256x96xbf16> to vector<256x96xbf16>
    %cst_28 = arith.constant dense<0.000000e+00> : vector<16x96xf32>
    %40 = tpu.matmul %37, %39, %cst_28 {dimension_numbers = #tpu.dot_dimension_numbers<[1], [0], [0], [1], [0, 0, 1, 1], [], []>} : vector<16x256xbf16>, vector<256x96xbf16>, vector<16x96xf32> -> vector<16x96xf32>
    %41 = arith.addf %36, %40 : vector<16x96xf32>
    %42 = vector.extract_strided_slice %20 {offsets = [32, 0], sizes = [16, 256], strides = [1, 1]} : vector<48x256xbf16> to vector<16x256xbf16>
    %c0_29 = arith.constant 0 : index
    %c4 = arith.constant 4 : index
    %c0_30 = arith.constant 0 : index
    %c0_31 = arith.constant 0 : index
    %43 = vector.load %arg3[%c0_29, %c4, %c0_30, %c0_31] : memref<8x5x256x96xbf16, #tpu.memory_space<vmem>>, vector<1x1x256x96xbf16>
    %44 = vector.shape_cast %43 : vector<1x1x256x96xbf16> to vector<256x96xbf16>
    %cst_32 = arith.constant dense<0.000000e+00> : vector<16x96xf32>
    %45 = tpu.matmul %42, %44, %cst_32 {dimension_numbers = #tpu.dot_dimension_numbers<[1], [0], [0], [1], [0, 0, 1, 1], [], []>} : vector<16x256xbf16>, vector<256x96xbf16>, vector<16x96xf32> -> vector<16x96xf32>
    %46 = arith.addf %41, %45 : vector<16x96xf32>
    %47 = vector.extract_strided_slice %6 {offsets = [24, 0], sizes = [16, 128], strides = [1, 1]} : vector<64x128xf32> to vector<16x128xf32>
    %c0_i32 = arith.constant 0 : i32
    %48 = vector.broadcast %c0_i32 : i32 to vector<16x128xi32>
    %49 = arith.cmpi eq, %5, %48 : vector<16x128xi32>
    %50 = vector.extract_strided_slice %6 {offsets = [23, 0], sizes = [16, 128], strides = [1, 1]} : vector<64x128xf32> to vector<16x128xf32>
    %cst_33 = arith.constant 0xFF800000 : f32
    %51 = vector.broadcast %cst_33 : f32 to vector<16x128xf32>
    %52 = arith.select %49, %51, %50 : vector<16x128xi1>, vector<16x128xf32>
    %c15_i32 = arith.constant 15 : i32
    %53 = vector.broadcast %c15_i32 : i32 to vector<16x128xi32>
    %54 = arith.cmpi eq, %5, %53 : vector<16x128xi32>
    %55 = vector.extract_strided_slice %6 {offsets = [25, 0], sizes = [16, 128], strides = [1, 1]} : vector<64x128xf32> to vector<16x128xf32>
    %cst_34 = arith.constant 0xFF800000 : f32
    %56 = vector.broadcast %cst_34 : f32 to vector<16x128xf32>
    %57 = arith.select %54, %56, %55 : vector<16x128xi1>, vector<16x128xf32>
    %58 = arith.maximumf %52, %47 : vector<16x128xf32>
    %59 = arith.maximumf %58, %57 : vector<16x128xf32>
    %60 = arith.truncf %59 : vector<16x128xf32> to vector<16x128xbf16>
    %c0_35 = arith.constant 0 : index
    %c0_36 = arith.constant 0 : index
    %c0_37 = arith.constant 0 : index
    %61 = vector.load %arg4[%c0_35, %c0_36, %c0_37] : memref<8x128x32xbf16, #tpu.memory_space<vmem>>, vector<1x128x32xbf16>
    %62 = vector.shape_cast %61 : vector<1x128x32xbf16> to vector<128x32xbf16>
    %cst_38 = arith.constant dense<0.000000e+00> : vector<16x32xf32>
    %63 = tpu.matmul %60, %62, %cst_38 {dimension_numbers = #tpu.dot_dimension_numbers<[1], [0], [0], [1], [0, 0, 1, 1], [], []>} : vector<16x128xbf16>, vector<128x32xbf16>, vector<16x32xf32> -> vector<16x32xf32>
    %64 = tpu.concatenate %46, %63 in 1 : vector<16x96xf32>, vector<16x32xf32> -> vector<16x128xf32>
    %cst_39 = arith.constant 0.000000e+00 : f32
    %65 = vector.broadcast %cst_39 : f32 to vector<16x128xf32>
    %66 = arith.maximumf %64, %65 : vector<16x128xf32>
    %c24_40 = arith.constant 24 : index
    %c0_41 = arith.constant 0 : index
    %67 = vector.load %arg8[%c24_40, %c0_41] : memref<64x128xf32, #tpu.memory_space<vmem>>, vector<16x128xf32>
    tpu.vector_store %arg8[%c24_40, %c0_41], %66 {strides = array<i32>} : memref<64x128xf32, #tpu.memory_space<vmem>>, vector<16x128xf32>,
    %c0_42 = arith.constant 0 : index
    %c0_43 = arith.constant 0 : index
    %68 = vector.load %arg8[%c0_42, %c0_43] : memref<64x128xf32, #tpu.memory_space<vmem>>, vector<64x128xf32>
    %69 = arith.truncf %68 : vector<64x128xf32> to vector<64x128xbf16>
    %c1_44 = arith.constant 1 : index
    %c0_45 = arith.constant 0 : index
    %c0_46 = arith.constant 0 : index
    %70 = vector.load %arg2[%c1_44, %c0_45, %c0_46] : memref<8x128x32xbf16, #tpu.memory_space<vmem>>, vector<1x128x32xbf16>
    %71 = vector.shape_cast %70 : vector<1x128x32xbf16> to vector<128x32xbf16>
    %cst_47 = arith.constant dense<0.000000e+00> : vector<64x32xf32>
    %72 = tpu.matmul %69, %71, %cst_47 {dimension_numbers = #tpu.dot_dimension_numbers<[1], [0], [0], [1], [0, 0, 1, 1], [], []>} : vector<64x128xbf16>, vector<128x32xbf16>, vector<64x32xf32> -> vector<64x32xf32>
    %73 = vector.extract_strided_slice %72 {offsets = [5, 0], sizes = [48, 32], strides = [1, 1]} : vector<64x32xf32> to vector<48x32xf32>
    %74 = vector.extract_strided_slice %72 {offsets = [6, 0], sizes = [48, 32], strides = [1, 1]} : vector<64x32xf32> to vector<48x32xf32>
    %75 = vector.extract_strided_slice %72 {offsets = [7, 0], sizes = [48, 32], strides = [1, 1]} : vector<64x32xf32> to vector<48x32xf32>
    %76 = vector.extract_strided_slice %72 {offsets = [8, 0], sizes = [48, 32], strides = [1, 1]} : vector<64x32xf32> to vector<48x32xf32>
    %77 = vector.extract_strided_slice %72 {offsets = [9, 0], sizes = [48, 32], strides = [1, 1]} : vector<64x32xf32> to vector<48x32xf32>
    %78 = vector.extract_strided_slice %72 {offsets = [10, 0], sizes = [48, 32], strides = [1, 1]} : vector<64x32xf32> to vector<48x32xf32>
    %79 = vector.extract_strided_slice %72 {offsets = [11, 0], sizes = [48, 32], strides = [1, 1]} : vector<64x32xf32> to vector<48x32xf32>
    %80 = vector.extract_strided_slice %72 {offsets = [12, 0], sizes = [48, 32], strides = [1, 1]} : vector<64x32xf32> to vector<48x32xf32>
    %81 = tpu.concatenate %73, %74, %75, %76, %77, %78, %79, %80 in 1 : vector<48x32xf32>, vector<48x32xf32>, vector<48x32xf32>, vector<48x32xf32>, vector<48x32xf32>, vector<48x32xf32>, vector<48x32xf32>, vector<48x32xf32> -> vector<48x256xf32>
    %82 = arith.truncf %81 : vector<48x256xf32> to vector<48x256xbf16>
    %cst_48 = arith.constant 0.000000e+00 : f32
    %83 = vector.broadcast %cst_48 : f32 to vector<16x96xf32>
    %84 = vector.extract_strided_slice %82 {offsets = [0, 0], sizes = [16, 256], strides = [1, 1]} : vector<48x256xbf16> to vector<16x256xbf16>
    %c1_49 = arith.constant 1 : index
    %c0_50 = arith.constant 0 : index
    %c0_51 = arith.constant 0 : index
    %c0_52 = arith.constant 0 : index
    %85 = vector.load %arg3[%c1_49, %c0_50, %c0_51, %c0_52] : memref<8x5x256x96xbf16, #tpu.memory_space<vmem>>, vector<1x1x256x96xbf16>
    %86 = vector.shape_cast %85 : vector<1x1x256x96xbf16> to vector<256x96xbf16>
    %cst_53 = arith.constant dense<0.000000e+00> : vector<16x96xf32>
    %87 = tpu.matmul %84, %86, %cst_53 {dimension_numbers = #tpu.dot_dimension_numbers<[1], [0], [0], [1], [0, 0, 1, 1], [], []>} : vector<16x256xbf16>, vector<256x96xbf16>, vector<16x96xf32> -> vector<16x96xf32>
    %88 = arith.addf %83, %87 : vector<16x96xf32>
    %89 = vector.extract_strided_slice %82 {offsets = [8, 0], sizes = [16, 256], strides = [1, 1]} : vector<48x256xbf16> to vector<16x256xbf16>
    %c1_54 = arith.constant 1 : index
    %c1_55 = arith.constant 1 : index
    %c0_56 = arith.constant 0 : index
    %c0_57 = arith.constant 0 : index
    %90 = vector.load %arg3[%c1_54, %c1_55, %c0_56, %c0_57] : memref<8x5x256x96xbf16, #tpu.memory_space<vmem>>, vector<1x1x256x96xbf16>
    %91 = vector.shape_cast %90 : vector<1x1x256x96xbf16> to vector<256x96xbf16>
    %cst_58 = arith.constant dense<0.000000e+00> : vector<16x96xf32>
    %92 = tpu.matmul %89, %91, %cst_58 {dimension_numbers = #tpu.dot_dimension_numbers<[1], [0], [0], [1], [0, 0, 1, 1], [], []>} : vector<16x256xbf16>, vector<256x96xbf16>, vector<16x96xf32> -> vector<16x96xf32>
    %93 = arith.addf %88, %92 : vector<16x96xf32>
    %94 = vector.extract_strided_slice %82 {offsets = [16, 0], sizes = [16, 256], strides = [1, 1]} : vector<48x256xbf16> to vector<16x256xbf16>
    %c1_59 = arith.constant 1 : index
    %c2_60 = arith.constant 2 : index
    %c0_61 = arith.constant 0 : index
    %c0_62 = arith.constant 0 : index
    %95 = vector.load %arg3[%c1_59, %c2_60, %c0_61, %c0_62] : memref<8x5x256x96xbf16, #tpu.memory_space<vmem>>, vector<1x1x256x96xbf16>
    %96 = vector.shape_cast %95 : vector<1x1x256x96xbf16> to vector<256x96xbf16>
    %cst_63 = arith.constant dense<0.000000e+00> : vector<16x96xf32>
    %97 = tpu.matmul %94, %96, %cst_63 {dimension_numbers = #tpu.dot_dimension_numbers<[1], [0], [0], [1], [0, 0, 1, 1], [], []>} : vector<16x256xbf16>, vector<256x96xbf16>, vector<16x96xf32> -> vector<16x96xf32>
    %98 = arith.addf %93, %97 : vector<16x96xf32>
    %99 = vector.extract_strided_slice %82 {offsets = [24, 0], sizes = [16, 256], strides = [1, 1]} : vector<48x256xbf16> to vector<16x256xbf16>
    %c1_64 = arith.constant 1 : index
    %c3_65 = arith.constant 3 : index
    %c0_66 = arith.constant 0 : index
    %c0_67 = arith.constant 0 : index
    %100 = vector.load %arg3[%c1_64, %c3_65, %c0_66, %c0_67] : memref<8x5x256x96xbf16, #tpu.memory_space<vmem>>, vector<1x1x256x96xbf16>
    %101 = vector.shape_cast %100 : vector<1x1x256x96xbf16> to vector<256x96xbf16>
    %cst_68 = arith.constant dense<0.000000e+00> : vector<16x96xf32>
    %102 = tpu.matmul %99, %101, %cst_68 {dimension_numbers = #tpu.dot_dimension_numbers<[1], [0], [0], [1], [0, 0, 1, 1], [], []>} : vector<16x256xbf16>, vector<256x96xbf16>, vector<16x96xf32> -> vector<16x96xf32>
    %103 = arith.addf %98, %102 : vector<16x96xf32>
    %104 = vector.extract_strided_slice %82 {offsets = [32, 0], sizes = [16, 256], strides = [1, 1]} : vector<48x256xbf16> to vector<16x256xbf16>
    %c1_69 = arith.constant 1 : index
    %c4_70 = arith.constant 4 : index
    %c0_71 = arith.constant 0 : index
    %c0_72 = arith.constant 0 : index
    %105 = vector.load %arg3[%c1_69, %c4_70, %c0_71, %c0_72] : memref<8x5x256x96xbf16, #tpu.memory_space<vmem>>, vector<1x1x256x96xbf16>
    %106 = vector.shape_cast %105 : vector<1x1x256x96xbf16> to vector<256x96xbf16>
    %cst_73 = arith.constant dense<0.000000e+00> : vector<16x96xf32>
    %107 = tpu.matmul %104, %106, %cst_73 {dimension_numbers = #tpu.dot_dimension_numbers<[1], [0], [0], [1], [0, 0, 1, 1], [], []>} : vector<16x256xbf16>, vector<256x96xbf16>, vector<16x96xf32> -> vector<16x96xf32>
    %108 = arith.addf %103, %107 : vector<16x96xf32>
    %109 = vector.extract_strided_slice %68 {offsets = [24, 0], sizes = [16, 128], strides = [1, 1]} : vector<64x128xf32> to vector<16x128xf32>
    %c0_i32_74 = arith.constant 0 : i32
    %110 = vector.broadcast %c0_i32_74 : i32 to vector<16x128xi32>
    %111 = arith.cmpi eq, %5, %110 : vector<16x128xi32>
    %112 = vector.extract_strided_slice %68 {offsets = [23, 0], sizes = [16, 128], strides = [1, 1]} : vector<64x128xf32> to vector<16x128xf32>
    %cst_75 = arith.constant 0xFF800000 : f32
    %113 = vector.broadcast %cst_75 : f32 to vector<16x128xf32>
    %114 = arith.select %111, %113, %112 : vector<16x128xi1>, vector<16x128xf32>
    %c15_i32_76 = arith.constant 15 : i32
    %115 = vector.broadcast %c15_i32_76 : i32 to vector<16x128xi32>
    %116 = arith.cmpi eq, %5, %115 : vector<16x128xi32>
    %117 = vector.extract_strided_slice %68 {offsets = [25, 0], sizes = [16, 128], strides = [1, 1]} : vector<64x128xf32> to vector<16x128xf32>
    %cst_77 = arith.constant 0xFF800000 : f32
    %118 = vector.broadcast %cst_77 : f32 to vector<16x128xf32>
    %119 = arith.select %116, %118, %117 : vector<16x128xi1>, vector<16x128xf32>
    %120 = arith.maximumf %114, %109 : vector<16x128xf32>
    %121 = arith.maximumf %120, %119 : vector<16x128xf32>
    %122 = arith.truncf %121 : vector<16x128xf32> to vector<16x128xbf16>
    %c1_78 = arith.constant 1 : index
    %c0_79 = arith.constant 0 : index
    %c0_80 = arith.constant 0 : index
    %123 = vector.load %arg4[%c1_78, %c0_79, %c0_80] : memref<8x128x32xbf16, #tpu.memory_space<vmem>>, vector<1x128x32xbf16>
    %124 = vector.shape_cast %123 : vector<1x128x32xbf16> to vector<128x32xbf16>
    %cst_81 = arith.constant dense<0.000000e+00> : vector<16x32xf32>
    %125 = tpu.matmul %122, %124, %cst_81 {dimension_numbers = #tpu.dot_dimension_numbers<[1], [0], [0], [1], [0, 0, 1, 1], [], []>} : vector<16x128xbf16>, vector<128x32xbf16>, vector<16x32xf32> -> vector<16x32xf32>
    %126 = tpu.concatenate %108, %125 in 1 : vector<16x96xf32>, vector<16x32xf32> -> vector<16x128xf32>
    %cst_82 = arith.constant 0.000000e+00 : f32
    %127 = vector.broadcast %cst_82 : f32 to vector<16x128xf32>
    %128 = arith.maximumf %126, %127 : vector<16x128xf32>
    %c24_83 = arith.constant 24 : index
    %c0_84 = arith.constant 0 : index
    %129 = vector.load %arg8[%c24_83, %c0_84] : memref<64x128xf32, #tpu.memory_space<vmem>>, vector<16x128xf32>
    tpu.vector_store %arg8[%c24_83, %c0_84], %128 {strides = array<i32>} : memref<64x128xf32, #tpu.memory_space<vmem>>, vector<16x128xf32>,
    %c0_85 = arith.constant 0 : index
    %c0_86 = arith.constant 0 : index
    %130 = vector.load %arg8[%c0_85, %c0_86] : memref<64x128xf32, #tpu.memory_space<vmem>>, vector<64x128xf32>
    %131 = arith.truncf %130 : vector<64x128xf32> to vector<64x128xbf16>
    %c2_87 = arith.constant 2 : index
    %c0_88 = arith.constant 0 : index
    %c0_89 = arith.constant 0 : index
    %132 = vector.load %arg2[%c2_87, %c0_88, %c0_89] : memref<8x128x32xbf16, #tpu.memory_space<vmem>>, vector<1x128x32xbf16>
    %133 = vector.shape_cast %132 : vector<1x128x32xbf16> to vector<128x32xbf16>
    %cst_90 = arith.constant dense<0.000000e+00> : vector<64x32xf32>
    %134 = tpu.matmul %131, %133, %cst_90 {dimension_numbers = #tpu.dot_dimension_numbers<[1], [0], [0], [1], [0, 0, 1, 1], [], []>} : vector<64x128xbf16>, vector<128x32xbf16>, vector<64x32xf32> -> vector<64x32xf32>
    %135 = vector.extract_strided_slice %134 {offsets = [5, 0], sizes = [48, 32], strides = [1, 1]} : vector<64x32xf32> to vector<48x32xf32>
    %136 = vector.extract_strided_slice %134 {offsets = [6, 0], sizes = [48, 32], strides = [1, 1]} : vector<64x32xf32> to vector<48x32xf32>
    %137 = vector.extract_strided_slice %134 {offsets = [7, 0], sizes = [48, 32], strides = [1, 1]} : vector<64x32xf32> to vector<48x32xf32>
    %138 = vector.extract_strided_slice %134 {offsets = [8, 0], sizes = [48, 32], strides = [1, 1]} : vector<64x32xf32> to vector<48x32xf32>
    %139 = vector.extract_strided_slice %134 {offsets = [9, 0], sizes = [48, 32], strides = [1, 1]} : vector<64x32xf32> to vector<48x32xf32>
    %140 = vector.extract_strided_slice %134 {offsets = [10, 0], sizes = [48, 32], strides = [1, 1]} : vector<64x32xf32> to vector<48x32xf32>
    %141 = vector.extract_strided_slice %134 {offsets = [11, 0], sizes = [48, 32], strides = [1, 1]} : vector<64x32xf32> to vector<48x32xf32>
    %142 = vector.extract_strided_slice %134 {offsets = [12, 0], sizes = [48, 32], strides = [1, 1]} : vector<64x32xf32> to vector<48x32xf32>
    %143 = tpu.concatenate %135, %136, %137, %138, %139, %140, %141, %142 in 1 : vector<48x32xf32>, vector<48x32xf32>, vector<48x32xf32>, vector<48x32xf32>, vector<48x32xf32>, vector<48x32xf32>, vector<48x32xf32>, vector<48x32xf32> -> vector<48x256xf32>
    %144 = arith.truncf %143 : vector<48x256xf32> to vector<48x256xbf16>
    %cst_91 = arith.constant 0.000000e+00 : f32
    %145 = vector.broadcast %cst_91 : f32 to vector<16x96xf32>
    %146 = vector.extract_strided_slice %144 {offsets = [0, 0], sizes = [16, 256], strides = [1, 1]} : vector<48x256xbf16> to vector<16x256xbf16>
    %c2_92 = arith.constant 2 : index
    %c0_93 = arith.constant 0 : index
    %c0_94 = arith.constant 0 : index
    %c0_95 = arith.constant 0 : index
    %147 = vector.load %arg3[%c2_92, %c0_93, %c0_94, %c0_95] : memref<8x5x256x96xbf16, #tpu.memory_space<vmem>>, vector<1x1x256x96xbf16>
    %148 = vector.shape_cast %147 : vector<1x1x256x96xbf16> to vector<256x96xbf16>
    %cst_96 = arith.constant dense<0.000000e+00> : vector<16x96xf32>
    %149 = tpu.matmul %146, %148, %cst_96 {dimension_numbers = #tpu.dot_dimension_numbers<[1], [0], [0], [1], [0, 0, 1, 1], [], []>} : vector<16x256xbf16>, vector<256x96xbf16>, vector<16x96xf32> -> vector<16x96xf32>
    %150 = arith.addf %145, %149 : vector<16x96xf32>
    %151 = vector.extract_strided_slice %144 {offsets = [8, 0], sizes = [16, 256], strides = [1, 1]} : vector<48x256xbf16> to vector<16x256xbf16>
    %c2_97 = arith.constant 2 : index
    %c1_98 = arith.constant 1 : index
    %c0_99 = arith.constant 0 : index
    %c0_100 = arith.constant 0 : index
    %152 = vector.load %arg3[%c2_97, %c1_98, %c0_99, %c0_100] : memref<8x5x256x96xbf16, #tpu.memory_space<vmem>>, vector<1x1x256x96xbf16>
    %153 = vector.shape_cast %152 : vector<1x1x256x96xbf16> to vector<256x96xbf16>
    %cst_101 = arith.constant dense<0.000000e+00> : vector<16x96xf32>
    %154 = tpu.matmul %151, %153, %cst_101 {dimension_numbers = #tpu.dot_dimension_numbers<[1], [0], [0], [1], [0, 0, 1, 1], [], []>} : vector<16x256xbf16>, vector<256x96xbf16>, vector<16x96xf32> -> vector<16x96xf32>
    %155 = arith.addf %150, %154 : vector<16x96xf32>
    %156 = vector.extract_strided_slice %144 {offsets = [16, 0], sizes = [16, 256], strides = [1, 1]} : vector<48x256xbf16> to vector<16x256xbf16>
    %c2_102 = arith.constant 2 : index
    %c2_103 = arith.constant 2 : index
    %c0_104 = arith.constant 0 : index
    %c0_105 = arith.constant 0 : index
    %157 = vector.load %arg3[%c2_102, %c2_103, %c0_104, %c0_105] : memref<8x5x256x96xbf16, #tpu.memory_space<vmem>>, vector<1x1x256x96xbf16>
    %158 = vector.shape_cast %157 : vector<1x1x256x96xbf16> to vector<256x96xbf16>
    %cst_106 = arith.constant dense<0.000000e+00> : vector<16x96xf32>
    %159 = tpu.matmul %156, %158, %cst_106 {dimension_numbers = #tpu.dot_dimension_numbers<[1], [0], [0], [1], [0, 0, 1, 1], [], []>} : vector<16x256xbf16>, vector<256x96xbf16>, vector<16x96xf32> -> vector<16x96xf32>
    %160 = arith.addf %155, %159 : vector<16x96xf32>
    %161 = vector.extract_strided_slice %144 {offsets = [24, 0], sizes = [16, 256], strides = [1, 1]} : vector<48x256xbf16> to vector<16x256xbf16>
    %c2_107 = arith.constant 2 : index
    %c3_108 = arith.constant 3 : index
    %c0_109 = arith.constant 0 : index
    %c0_110 = arith.constant 0 : index
    %162 = vector.load %arg3[%c2_107, %c3_108, %c0_109, %c0_110] : memref<8x5x256x96xbf16, #tpu.memory_space<vmem>>, vector<1x1x256x96xbf16>
    %163 = vector.shape_cast %162 : vector<1x1x256x96xbf16> to vector<256x96xbf16>
    %cst_111 = arith.constant dense<0.000000e+00> : vector<16x96xf32>
    %164 = tpu.matmul %161, %163, %cst_111 {dimension_numbers = #tpu.dot_dimension_numbers<[1], [0], [0], [1], [0, 0, 1, 1], [], []>} : vector<16x256xbf16>, vector<256x96xbf16>, vector<16x96xf32> -> vector<16x96xf32>
    %165 = arith.addf %160, %164 : vector<16x96xf32>
    %166 = vector.extract_strided_slice %144 {offsets = [32, 0], sizes = [16, 256], strides = [1, 1]} : vector<48x256xbf16> to vector<16x256xbf16>
    %c2_112 = arith.constant 2 : index
    %c4_113 = arith.constant 4 : index
    %c0_114 = arith.constant 0 : index
    %c0_115 = arith.constant 0 : index
    %167 = vector.load %arg3[%c2_112, %c4_113, %c0_114, %c0_115] : memref<8x5x256x96xbf16, #tpu.memory_space<vmem>>, vector<1x1x256x96xbf16>
    %168 = vector.shape_cast %167 : vector<1x1x256x96xbf16> to vector<256x96xbf16>
    %cst_116 = arith.constant dense<0.000000e+00> : vector<16x96xf32>
    %169 = tpu.matmul %166, %168, %cst_116 {dimension_numbers = #tpu.dot_dimension_numbers<[1], [0], [0], [1], [0, 0, 1, 1], [], []>} : vector<16x256xbf16>, vector<256x96xbf16>, vector<16x96xf32> -> vector<16x96xf32>
    %170 = arith.addf %165, %169 : vector<16x96xf32>
    %171 = vector.extract_strided_slice %130 {offsets = [24, 0], sizes = [16, 128], strides = [1, 1]} : vector<64x128xf32> to vector<16x128xf32>
    %c0_i32_117 = arith.constant 0 : i32
    %172 = vector.broadcast %c0_i32_117 : i32 to vector<16x128xi32>
    %173 = arith.cmpi eq, %5, %172 : vector<16x128xi32>
    %174 = vector.extract_strided_slice %130 {offsets = [23, 0], sizes = [16, 128], strides = [1, 1]} : vector<64x128xf32> to vector<16x128xf32>
    %cst_118 = arith.constant 0xFF800000 : f32
    %175 = vector.broadcast %cst_118 : f32 to vector<16x128xf32>
    %176 = arith.select %173, %175, %174 : vector<16x128xi1>, vector<16x128xf32>
    %c15_i32_119 = arith.constant 15 : i32
    %177 = vector.broadcast %c15_i32_119 : i32 to vector<16x128xi32>
    %178 = arith.cmpi eq, %5, %177 : vector<16x128xi32>
    %179 = vector.extract_strided_slice %130 {offsets = [25, 0], sizes = [16, 128], strides = [1, 1]} : vector<64x128xf32> to vector<16x128xf32>
    %cst_120 = arith.constant 0xFF800000 : f32
    %180 = vector.broadcast %cst_120 : f32 to vector<16x128xf32>
    %181 = arith.select %178, %180, %179 : vector<16x128xi1>, vector<16x128xf32>
    %182 = arith.maximumf %176, %171 : vector<16x128xf32>
    %183 = arith.maximumf %182, %181 : vector<16x128xf32>
    %184 = arith.truncf %183 : vector<16x128xf32> to vector<16x128xbf16>
    %c2_121 = arith.constant 2 : index
    %c0_122 = arith.constant 0 : index
    %c0_123 = arith.constant 0 : index
    %185 = vector.load %arg4[%c2_121, %c0_122, %c0_123] : memref<8x128x32xbf16, #tpu.memory_space<vmem>>, vector<1x128x32xbf16>
    %186 = vector.shape_cast %185 : vector<1x128x32xbf16> to vector<128x32xbf16>
    %cst_124 = arith.constant dense<0.000000e+00> : vector<16x32xf32>
    %187 = tpu.matmul %184, %186, %cst_124 {dimension_numbers = #tpu.dot_dimension_numbers<[1], [0], [0], [1], [0, 0, 1, 1], [], []>} : vector<16x128xbf16>, vector<128x32xbf16>, vector<16x32xf32> -> vector<16x32xf32>
    %188 = tpu.concatenate %170, %187 in 1 : vector<16x96xf32>, vector<16x32xf32> -> vector<16x128xf32>
    %cst_125 = arith.constant 0.000000e+00 : f32
    %189 = vector.broadcast %cst_125 : f32 to vector<16x128xf32>
    %190 = arith.maximumf %188, %189 : vector<16x128xf32>
    %c24_126 = arith.constant 24 : index
    %c0_127 = arith.constant 0 : index
    %191 = vector.load %arg8[%c24_126, %c0_127] : memref<64x128xf32, #tpu.memory_space<vmem>>, vector<16x128xf32>
    tpu.vector_store %arg8[%c24_126, %c0_127], %190 {strides = array<i32>} : memref<64x128xf32, #tpu.memory_space<vmem>>, vector<16x128xf32>,
    %c0_128 = arith.constant 0 : index
    %c0_129 = arith.constant 0 : index
    %192 = vector.load %arg8[%c0_128, %c0_129] : memref<64x128xf32, #tpu.memory_space<vmem>>, vector<64x128xf32>
    %193 = arith.truncf %192 : vector<64x128xf32> to vector<64x128xbf16>
    %c3_130 = arith.constant 3 : index
    %c0_131 = arith.constant 0 : index
    %c0_132 = arith.constant 0 : index
    %194 = vector.load %arg2[%c3_130, %c0_131, %c0_132] : memref<8x128x32xbf16, #tpu.memory_space<vmem>>, vector<1x128x32xbf16>
    %195 = vector.shape_cast %194 : vector<1x128x32xbf16> to vector<128x32xbf16>
    %cst_133 = arith.constant dense<0.000000e+00> : vector<64x32xf32>
    %196 = tpu.matmul %193, %195, %cst_133 {dimension_numbers = #tpu.dot_dimension_numbers<[1], [0], [0], [1], [0, 0, 1, 1], [], []>} : vector<64x128xbf16>, vector<128x32xbf16>, vector<64x32xf32> -> vector<64x32xf32>
    %197 = vector.extract_strided_slice %196 {offsets = [5, 0], sizes = [48, 32], strides = [1, 1]} : vector<64x32xf32> to vector<48x32xf32>
    %198 = vector.extract_strided_slice %196 {offsets = [6, 0], sizes = [48, 32], strides = [1, 1]} : vector<64x32xf32> to vector<48x32xf32>
    %199 = vector.extract_strided_slice %196 {offsets = [7, 0], sizes = [48, 32], strides = [1, 1]} : vector<64x32xf32> to vector<48x32xf32>
    %200 = vector.extract_strided_slice %196 {offsets = [8, 0], sizes = [48, 32], strides = [1, 1]} : vector<64x32xf32> to vector<48x32xf32>
    %201 = vector.extract_strided_slice %196 {offsets = [9, 0], sizes = [48, 32], strides = [1, 1]} : vector<64x32xf32> to vector<48x32xf32>
    %202 = vector.extract_strided_slice %196 {offsets = [10, 0], sizes = [48, 32], strides = [1, 1]} : vector<64x32xf32> to vector<48x32xf32>
    %203 = vector.extract_strided_slice %196 {offsets = [11, 0], sizes = [48, 32], strides = [1, 1]} : vector<64x32xf32> to vector<48x32xf32>
    %204 = vector.extract_strided_slice %196 {offsets = [12, 0], sizes = [48, 32], strides = [1, 1]} : vector<64x32xf32> to vector<48x32xf32>
    %205 = tpu.concatenate %197, %198, %199, %200, %201, %202, %203, %204 in 1 : vector<48x32xf32>, vector<48x32xf32>, vector<48x32xf32>, vector<48x32xf32>, vector<48x32xf32>, vector<48x32xf32>, vector<48x32xf32>, vector<48x32xf32> -> vector<48x256xf32>
    %206 = arith.truncf %205 : vector<48x256xf32> to vector<48x256xbf16>
    %cst_134 = arith.constant 0.000000e+00 : f32
    %207 = vector.broadcast %cst_134 : f32 to vector<16x96xf32>
    %208 = vector.extract_strided_slice %206 {offsets = [0, 0], sizes = [16, 256], strides = [1, 1]} : vector<48x256xbf16> to vector<16x256xbf16>
    %c3_135 = arith.constant 3 : index
    %c0_136 = arith.constant 0 : index
    %c0_137 = arith.constant 0 : index
    %c0_138 = arith.constant 0 : index
    %209 = vector.load %arg3[%c3_135, %c0_136, %c0_137, %c0_138] : memref<8x5x256x96xbf16, #tpu.memory_space<vmem>>, vector<1x1x256x96xbf16>
    %210 = vector.shape_cast %209 : vector<1x1x256x96xbf16> to vector<256x96xbf16>
    %cst_139 = arith.constant dense<0.000000e+00> : vector<16x96xf32>
    %211 = tpu.matmul %208, %210, %cst_139 {dimension_numbers = #tpu.dot_dimension_numbers<[1], [0], [0], [1], [0, 0, 1, 1], [], []>} : vector<16x256xbf16>, vector<256x96xbf16>, vector<16x96xf32> -> vector<16x96xf32>
    %212 = arith.addf %207, %211 : vector<16x96xf32>
    %213 = vector.extract_strided_slice %206 {offsets = [8, 0], sizes = [16, 256], strides = [1, 1]} : vector<48x256xbf16> to vector<16x256xbf16>
    %c3_140 = arith.constant 3 : index
    %c1_141 = arith.constant 1 : index
    %c0_142 = arith.constant 0 : index
    %c0_143 = arith.constant 0 : index
    %214 = vector.load %arg3[%c3_140, %c1_141, %c0_142, %c0_143] : memref<8x5x256x96xbf16, #tpu.memory_space<vmem>>, vector<1x1x256x96xbf16>
    %215 = vector.shape_cast %214 : vector<1x1x256x96xbf16> to vector<256x96xbf16>
    %cst_144 = arith.constant dense<0.000000e+00> : vector<16x96xf32>
    %216 = tpu.matmul %213, %215, %cst_144 {dimension_numbers = #tpu.dot_dimension_numbers<[1], [0], [0], [1], [0, 0, 1, 1], [], []>} : vector<16x256xbf16>, vector<256x96xbf16>, vector<16x96xf32> -> vector<16x96xf32>
    %217 = arith.addf %212, %216 : vector<16x96xf32>
    %218 = vector.extract_strided_slice %206 {offsets = [16, 0], sizes = [16, 256], strides = [1, 1]} : vector<48x256xbf16> to vector<16x256xbf16>
    %c3_145 = arith.constant 3 : index
    %c2_146 = arith.constant 2 : index
    %c0_147 = arith.constant 0 : index
    %c0_148 = arith.constant 0 : index
    %219 = vector.load %arg3[%c3_145, %c2_146, %c0_147, %c0_148] : memref<8x5x256x96xbf16, #tpu.memory_space<vmem>>, vector<1x1x256x96xbf16>
    %220 = vector.shape_cast %219 : vector<1x1x256x96xbf16> to vector<256x96xbf16>
    %cst_149 = arith.constant dense<0.000000e+00> : vector<16x96xf32>
    %221 = tpu.matmul %218, %220, %cst_149 {dimension_numbers = #tpu.dot_dimension_numbers<[1], [0], [0], [1], [0, 0, 1, 1], [], []>} : vector<16x256xbf16>, vector<256x96xbf16>, vector<16x96xf32> -> vector<16x96xf32>
    %222 = arith.addf %217, %221 : vector<16x96xf32>
    %223 = vector.extract_strided_slice %206 {offsets = [24, 0], sizes = [16, 256], strides = [1, 1]} : vector<48x256xbf16> to vector<16x256xbf16>
    %c3_150 = arith.constant 3 : index
    %c3_151 = arith.constant 3 : index
    %c0_152 = arith.constant 0 : index
    %c0_153 = arith.constant 0 : index
    %224 = vector.load %arg3[%c3_150, %c3_151, %c0_152, %c0_153] : memref<8x5x256x96xbf16, #tpu.memory_space<vmem>>, vector<1x1x256x96xbf16>
    %225 = vector.shape_cast %224 : vector<1x1x256x96xbf16> to vector<256x96xbf16>
    %cst_154 = arith.constant dense<0.000000e+00> : vector<16x96xf32>
    %226 = tpu.matmul %223, %225, %cst_154 {dimension_numbers = #tpu.dot_dimension_numbers<[1], [0], [0], [1], [0, 0, 1, 1], [], []>} : vector<16x256xbf16>, vector<256x96xbf16>, vector<16x96xf32> -> vector<16x96xf32>
    %227 = arith.addf %222, %226 : vector<16x96xf32>
    %228 = vector.extract_strided_slice %206 {offsets = [32, 0], sizes = [16, 256], strides = [1, 1]} : vector<48x256xbf16> to vector<16x256xbf16>
    %c3_155 = arith.constant 3 : index
    %c4_156 = arith.constant 4 : index
    %c0_157 = arith.constant 0 : index
    %c0_158 = arith.constant 0 : index
    %229 = vector.load %arg3[%c3_155, %c4_156, %c0_157, %c0_158] : memref<8x5x256x96xbf16, #tpu.memory_space<vmem>>, vector<1x1x256x96xbf16>
    %230 = vector.shape_cast %229 : vector<1x1x256x96xbf16> to vector<256x96xbf16>
    %cst_159 = arith.constant dense<0.000000e+00> : vector<16x96xf32>
    %231 = tpu.matmul %228, %230, %cst_159 {dimension_numbers = #tpu.dot_dimension_numbers<[1], [0], [0], [1], [0, 0, 1, 1], [], []>} : vector<16x256xbf16>, vector<256x96xbf16>, vector<16x96xf32> -> vector<16x96xf32>
    %232 = arith.addf %227, %231 : vector<16x96xf32>
    %233 = vector.extract_strided_slice %192 {offsets = [24, 0], sizes = [16, 128], strides = [1, 1]} : vector<64x128xf32> to vector<16x128xf32>
    %c0_i32_160 = arith.constant 0 : i32
    %234 = vector.broadcast %c0_i32_160 : i32 to vector<16x128xi32>
    %235 = arith.cmpi eq, %5, %234 : vector<16x128xi32>
    %236 = vector.extract_strided_slice %192 {offsets = [23, 0], sizes = [16, 128], strides = [1, 1]} : vector<64x128xf32> to vector<16x128xf32>
    %cst_161 = arith.constant 0xFF800000 : f32
    %237 = vector.broadcast %cst_161 : f32 to vector<16x128xf32>
    %238 = arith.select %235, %237, %236 : vector<16x128xi1>, vector<16x128xf32>
    %c15_i32_162 = arith.constant 15 : i32
    %239 = vector.broadcast %c15_i32_162 : i32 to vector<16x128xi32>
    %240 = arith.cmpi eq, %5, %239 : vector<16x128xi32>
    %241 = vector.extract_strided_slice %192 {offsets = [25, 0], sizes = [16, 128], strides = [1, 1]} : vector<64x128xf32> to vector<16x128xf32>
    %cst_163 = arith.constant 0xFF800000 : f32
    %242 = vector.broadcast %cst_163 : f32 to vector<16x128xf32>
    %243 = arith.select %240, %242, %241 : vector<16x128xi1>, vector<16x128xf32>
    %244 = arith.maximumf %238, %233 : vector<16x128xf32>
    %245 = arith.maximumf %244, %243 : vector<16x128xf32>
    %246 = arith.truncf %245 : vector<16x128xf32> to vector<16x128xbf16>
    %c3_164 = arith.constant 3 : index
    %c0_165 = arith.constant 0 : index
    %c0_166 = arith.constant 0 : index
    %247 = vector.load %arg4[%c3_164, %c0_165, %c0_166] : memref<8x128x32xbf16, #tpu.memory_space<vmem>>, vector<1x128x32xbf16>
    %248 = vector.shape_cast %247 : vector<1x128x32xbf16> to vector<128x32xbf16>
    %cst_167 = arith.constant dense<0.000000e+00> : vector<16x32xf32>
    %249 = tpu.matmul %246, %248, %cst_167 {dimension_numbers = #tpu.dot_dimension_numbers<[1], [0], [0], [1], [0, 0, 1, 1], [], []>} : vector<16x128xbf16>, vector<128x32xbf16>, vector<16x32xf32> -> vector<16x32xf32>
    %250 = tpu.concatenate %232, %249 in 1 : vector<16x96xf32>, vector<16x32xf32> -> vector<16x128xf32>
    %cst_168 = arith.constant 0.000000e+00 : f32
    %251 = vector.broadcast %cst_168 : f32 to vector<16x128xf32>
    %252 = arith.maximumf %250, %251 : vector<16x128xf32>
    %c24_169 = arith.constant 24 : index
    %c0_170 = arith.constant 0 : index
    %253 = vector.load %arg8[%c24_169, %c0_170] : memref<64x128xf32, #tpu.memory_space<vmem>>, vector<16x128xf32>
    tpu.vector_store %arg8[%c24_169, %c0_170], %252 {strides = array<i32>} : memref<64x128xf32, #tpu.memory_space<vmem>>, vector<16x128xf32>,
    %c0_171 = arith.constant 0 : index
    %c0_172 = arith.constant 0 : index
    %254 = vector.load %arg8[%c0_171, %c0_172] : memref<64x128xf32, #tpu.memory_space<vmem>>, vector<64x128xf32>
    %255 = arith.truncf %254 : vector<64x128xf32> to vector<64x128xbf16>
    %c4_173 = arith.constant 4 : index
    %c0_174 = arith.constant 0 : index
    %c0_175 = arith.constant 0 : index
    %256 = vector.load %arg2[%c4_173, %c0_174, %c0_175] : memref<8x128x32xbf16, #tpu.memory_space<vmem>>, vector<1x128x32xbf16>
    %257 = vector.shape_cast %256 : vector<1x128x32xbf16> to vector<128x32xbf16>
    %cst_176 = arith.constant dense<0.000000e+00> : vector<64x32xf32>
    %258 = tpu.matmul %255, %257, %cst_176 {dimension_numbers = #tpu.dot_dimension_numbers<[1], [0], [0], [1], [0, 0, 1, 1], [], []>} : vector<64x128xbf16>, vector<128x32xbf16>, vector<64x32xf32> -> vector<64x32xf32>
    %259 = vector.extract_strided_slice %258 {offsets = [5, 0], sizes = [48, 32], strides = [1, 1]} : vector<64x32xf32> to vector<48x32xf32>
    %260 = vector.extract_strided_slice %258 {offsets = [6, 0], sizes = [48, 32], strides = [1, 1]} : vector<64x32xf32> to vector<48x32xf32>
    %261 = vector.extract_strided_slice %258 {offsets = [7, 0], sizes = [48, 32], strides = [1, 1]} : vector<64x32xf32> to vector<48x32xf32>
    %262 = vector.extract_strided_slice %258 {offsets = [8, 0], sizes = [48, 32], strides = [1, 1]} : vector<64x32xf32> to vector<48x32xf32>
    %263 = vector.extract_strided_slice %258 {offsets = [9, 0], sizes = [48, 32], strides = [1, 1]} : vector<64x32xf32> to vector<48x32xf32>
    %264 = vector.extract_strided_slice %258 {offsets = [10, 0], sizes = [48, 32], strides = [1, 1]} : vector<64x32xf32> to vector<48x32xf32>
    %265 = vector.extract_strided_slice %258 {offsets = [11, 0], sizes = [48, 32], strides = [1, 1]} : vector<64x32xf32> to vector<48x32xf32>
    %266 = vector.extract_strided_slice %258 {offsets = [12, 0], sizes = [48, 32], strides = [1, 1]} : vector<64x32xf32> to vector<48x32xf32>
    %267 = tpu.concatenate %259, %260, %261, %262, %263, %264, %265, %266 in 1 : vector<48x32xf32>, vector<48x32xf32>, vector<48x32xf32>, vector<48x32xf32>, vector<48x32xf32>, vector<48x32xf32>, vector<48x32xf32>, vector<48x32xf32> -> vector<48x256xf32>
    %268 = arith.truncf %267 : vector<48x256xf32> to vector<48x256xbf16>
    %cst_177 = arith.constant 0.000000e+00 : f32
    %269 = vector.broadcast %cst_177 : f32 to vector<16x96xf32>
    %270 = vector.extract_strided_slice %268 {offsets = [0, 0], sizes = [16, 256], strides = [1, 1]} : vector<48x256xbf16> to vector<16x256xbf16>
    %c4_178 = arith.constant 4 : index
    %c0_179 = arith.constant 0 : index
    %c0_180 = arith.constant 0 : index
    %c0_181 = arith.constant 0 : index
    %271 = vector.load %arg3[%c4_178, %c0_179, %c0_180, %c0_181] : memref<8x5x256x96xbf16, #tpu.memory_space<vmem>>, vector<1x1x256x96xbf16>
    %272 = vector.shape_cast %271 : vector<1x1x256x96xbf16> to vector<256x96xbf16>
    %cst_182 = arith.constant dense<0.000000e+00> : vector<16x96xf32>
    %273 = tpu.matmul %270, %272, %cst_182 {dimension_numbers = #tpu.dot_dimension_numbers<[1], [0], [0], [1], [0, 0, 1, 1], [], []>} : vector<16x256xbf16>, vector<256x96xbf16>, vector<16x96xf32> -> vector<16x96xf32>
    %274 = arith.addf %269, %273 : vector<16x96xf32>
    %275 = vector.extract_strided_slice %268 {offsets = [8, 0], sizes = [16, 256], strides = [1, 1]} : vector<48x256xbf16> to vector<16x256xbf16>
    %c4_183 = arith.constant 4 : index
    %c1_184 = arith.constant 1 : index
    %c0_185 = arith.constant 0 : index
    %c0_186 = arith.constant 0 : index
    %276 = vector.load %arg3[%c4_183, %c1_184, %c0_185, %c0_186] : memref<8x5x256x96xbf16, #tpu.memory_space<vmem>>, vector<1x1x256x96xbf16>
    %277 = vector.shape_cast %276 : vector<1x1x256x96xbf16> to vector<256x96xbf16>
    %cst_187 = arith.constant dense<0.000000e+00> : vector<16x96xf32>
    %278 = tpu.matmul %275, %277, %cst_187 {dimension_numbers = #tpu.dot_dimension_numbers<[1], [0], [0], [1], [0, 0, 1, 1], [], []>} : vector<16x256xbf16>, vector<256x96xbf16>, vector<16x96xf32> -> vector<16x96xf32>
    %279 = arith.addf %274, %278 : vector<16x96xf32>
    %280 = vector.extract_strided_slice %268 {offsets = [16, 0], sizes = [16, 256], strides = [1, 1]} : vector<48x256xbf16> to vector<16x256xbf16>
    %c4_188 = arith.constant 4 : index
    %c2_189 = arith.constant 2 : index
    %c0_190 = arith.constant 0 : index
    %c0_191 = arith.constant 0 : index
    %281 = vector.load %arg3[%c4_188, %c2_189, %c0_190, %c0_191] : memref<8x5x256x96xbf16, #tpu.memory_space<vmem>>, vector<1x1x256x96xbf16>
    %282 = vector.shape_cast %281 : vector<1x1x256x96xbf16> to vector<256x96xbf16>
    %cst_192 = arith.constant dense<0.000000e+00> : vector<16x96xf32>
    %283 = tpu.matmul %280, %282, %cst_192 {dimension_numbers = #tpu.dot_dimension_numbers<[1], [0], [0], [1], [0, 0, 1, 1], [], []>} : vector<16x256xbf16>, vector<256x96xbf16>, vector<16x96xf32> -> vector<16x96xf32>
    %284 = arith.addf %279, %283 : vector<16x96xf32>
    %285 = vector.extract_strided_slice %268 {offsets = [24, 0], sizes = [16, 256], strides = [1, 1]} : vector<48x256xbf16> to vector<16x256xbf16>
    %c4_193 = arith.constant 4 : index
    %c3_194 = arith.constant 3 : index
    %c0_195 = arith.constant 0 : index
    %c0_196 = arith.constant 0 : index
    %286 = vector.load %arg3[%c4_193, %c3_194, %c0_195, %c0_196] : memref<8x5x256x96xbf16, #tpu.memory_space<vmem>>, vector<1x1x256x96xbf16>
    %287 = vector.shape_cast %286 : vector<1x1x256x96xbf16> to vector<256x96xbf16>
    %cst_197 = arith.constant dense<0.000000e+00> : vector<16x96xf32>
    %288 = tpu.matmul %285, %287, %cst_197 {dimension_numbers = #tpu.dot_dimension_numbers<[1], [0], [0], [1], [0, 0, 1, 1], [], []>} : vector<16x256xbf16>, vector<256x96xbf16>, vector<16x96xf32> -> vector<16x96xf32>
    %289 = arith.addf %284, %288 : vector<16x96xf32>
    %290 = vector.extract_strided_slice %268 {offsets = [32, 0], sizes = [16, 256], strides = [1, 1]} : vector<48x256xbf16> to vector<16x256xbf16>
    %c4_198 = arith.constant 4 : index
    %c4_199 = arith.constant 4 : index
    %c0_200 = arith.constant 0 : index
    %c0_201 = arith.constant 0 : index
    %291 = vector.load %arg3[%c4_198, %c4_199, %c0_200, %c0_201] : memref<8x5x256x96xbf16, #tpu.memory_space<vmem>>, vector<1x1x256x96xbf16>
    %292 = vector.shape_cast %291 : vector<1x1x256x96xbf16> to vector<256x96xbf16>
    %cst_202 = arith.constant dense<0.000000e+00> : vector<16x96xf32>
    %293 = tpu.matmul %290, %292, %cst_202 {dimension_numbers = #tpu.dot_dimension_numbers<[1], [0], [0], [1], [0, 0, 1, 1], [], []>} : vector<16x256xbf16>, vector<256x96xbf16>, vector<16x96xf32> -> vector<16x96xf32>
    %294 = arith.addf %289, %293 : vector<16x96xf32>
    %295 = vector.extract_strided_slice %254 {offsets = [24, 0], sizes = [16, 128], strides = [1, 1]} : vector<64x128xf32> to vector<16x128xf32>
    %c0_i32_203 = arith.constant 0 : i32
    %296 = vector.broadcast %c0_i32_203 : i32 to vector<16x128xi32>
    %297 = arith.cmpi eq, %5, %296 : vector<16x128xi32>
    %298 = vector.extract_strided_slice %254 {offsets = [23, 0], sizes = [16, 128], strides = [1, 1]} : vector<64x128xf32> to vector<16x128xf32>
    %cst_204 = arith.constant 0xFF800000 : f32
    %299 = vector.broadcast %cst_204 : f32 to vector<16x128xf32>
    %300 = arith.select %297, %299, %298 : vector<16x128xi1>, vector<16x128xf32>
    %c15_i32_205 = arith.constant 15 : i32
    %301 = vector.broadcast %c15_i32_205 : i32 to vector<16x128xi32>
    %302 = arith.cmpi eq, %5, %301 : vector<16x128xi32>
    %303 = vector.extract_strided_slice %254 {offsets = [25, 0], sizes = [16, 128], strides = [1, 1]} : vector<64x128xf32> to vector<16x128xf32>
    %cst_206 = arith.constant 0xFF800000 : f32
    %304 = vector.broadcast %cst_206 : f32 to vector<16x128xf32>
    %305 = arith.select %302, %304, %303 : vector<16x128xi1>, vector<16x128xf32>
    %306 = arith.maximumf %300, %295 : vector<16x128xf32>
    %307 = arith.maximumf %306, %305 : vector<16x128xf32>
    %308 = arith.truncf %307 : vector<16x128xf32> to vector<16x128xbf16>
    %c4_207 = arith.constant 4 : index
    %c0_208 = arith.constant 0 : index
    %c0_209 = arith.constant 0 : index
    %309 = vector.load %arg4[%c4_207, %c0_208, %c0_209] : memref<8x128x32xbf16, #tpu.memory_space<vmem>>, vector<1x128x32xbf16>
    %310 = vector.shape_cast %309 : vector<1x128x32xbf16> to vector<128x32xbf16>
    %cst_210 = arith.constant dense<0.000000e+00> : vector<16x32xf32>
    %311 = tpu.matmul %308, %310, %cst_210 {dimension_numbers = #tpu.dot_dimension_numbers<[1], [0], [0], [1], [0, 0, 1, 1], [], []>} : vector<16x128xbf16>, vector<128x32xbf16>, vector<16x32xf32> -> vector<16x32xf32>
    %312 = tpu.concatenate %294, %311 in 1 : vector<16x96xf32>, vector<16x32xf32> -> vector<16x128xf32>
    %cst_211 = arith.constant 0.000000e+00 : f32
    %313 = vector.broadcast %cst_211 : f32 to vector<16x128xf32>
    %314 = arith.maximumf %312, %313 : vector<16x128xf32>
    %c24_212 = arith.constant 24 : index
    %c0_213 = arith.constant 0 : index
    %315 = vector.load %arg8[%c24_212, %c0_213] : memref<64x128xf32, #tpu.memory_space<vmem>>, vector<16x128xf32>
    tpu.vector_store %arg8[%c24_212, %c0_213], %314 {strides = array<i32>} : memref<64x128xf32, #tpu.memory_space<vmem>>, vector<16x128xf32>,
    %c0_214 = arith.constant 0 : index
    %c0_215 = arith.constant 0 : index
    %316 = vector.load %arg8[%c0_214, %c0_215] : memref<64x128xf32, #tpu.memory_space<vmem>>, vector<64x128xf32>
    %317 = arith.truncf %316 : vector<64x128xf32> to vector<64x128xbf16>
    %c5 = arith.constant 5 : index
    %c0_216 = arith.constant 0 : index
    %c0_217 = arith.constant 0 : index
    %318 = vector.load %arg2[%c5, %c0_216, %c0_217] : memref<8x128x32xbf16, #tpu.memory_space<vmem>>, vector<1x128x32xbf16>
    %319 = vector.shape_cast %318 : vector<1x128x32xbf16> to vector<128x32xbf16>
    %cst_218 = arith.constant dense<0.000000e+00> : vector<64x32xf32>
    %320 = tpu.matmul %317, %319, %cst_218 {dimension_numbers = #tpu.dot_dimension_numbers<[1], [0], [0], [1], [0, 0, 1, 1], [], []>} : vector<64x128xbf16>, vector<128x32xbf16>, vector<64x32xf32> -> vector<64x32xf32>
    %321 = vector.extract_strided_slice %320 {offsets = [5, 0], sizes = [48, 32], strides = [1, 1]} : vector<64x32xf32> to vector<48x32xf32>
    %322 = vector.extract_strided_slice %320 {offsets = [6, 0], sizes = [48, 32], strides = [1, 1]} : vector<64x32xf32> to vector<48x32xf32>
    %323 = vector.extract_strided_slice %320 {offsets = [7, 0], sizes = [48, 32], strides = [1, 1]} : vector<64x32xf32> to vector<48x32xf32>
    %324 = vector.extract_strided_slice %320 {offsets = [8, 0], sizes = [48, 32], strides = [1, 1]} : vector<64x32xf32> to vector<48x32xf32>
    %325 = vector.extract_strided_slice %320 {offsets = [9, 0], sizes = [48, 32], strides = [1, 1]} : vector<64x32xf32> to vector<48x32xf32>
    %326 = vector.extract_strided_slice %320 {offsets = [10, 0], sizes = [48, 32], strides = [1, 1]} : vector<64x32xf32> to vector<48x32xf32>
    %327 = vector.extract_strided_slice %320 {offsets = [11, 0], sizes = [48, 32], strides = [1, 1]} : vector<64x32xf32> to vector<48x32xf32>
    %328 = vector.extract_strided_slice %320 {offsets = [12, 0], sizes = [48, 32], strides = [1, 1]} : vector<64x32xf32> to vector<48x32xf32>
    %329 = tpu.concatenate %321, %322, %323, %324, %325, %326, %327, %328 in 1 : vector<48x32xf32>, vector<48x32xf32>, vector<48x32xf32>, vector<48x32xf32>, vector<48x32xf32>, vector<48x32xf32>, vector<48x32xf32>, vector<48x32xf32> -> vector<48x256xf32>
    %330 = arith.truncf %329 : vector<48x256xf32> to vector<48x256xbf16>
    %cst_219 = arith.constant 0.000000e+00 : f32
    %331 = vector.broadcast %cst_219 : f32 to vector<16x96xf32>
    %332 = vector.extract_strided_slice %330 {offsets = [0, 0], sizes = [16, 256], strides = [1, 1]} : vector<48x256xbf16> to vector<16x256xbf16>
    %c5_220 = arith.constant 5 : index
    %c0_221 = arith.constant 0 : index
    %c0_222 = arith.constant 0 : index
    %c0_223 = arith.constant 0 : index
    %333 = vector.load %arg3[%c5_220, %c0_221, %c0_222, %c0_223] : memref<8x5x256x96xbf16, #tpu.memory_space<vmem>>, vector<1x1x256x96xbf16>
    %334 = vector.shape_cast %333 : vector<1x1x256x96xbf16> to vector<256x96xbf16>
    %cst_224 = arith.constant dense<0.000000e+00> : vector<16x96xf32>
    %335 = tpu.matmul %332, %334, %cst_224 {dimension_numbers = #tpu.dot_dimension_numbers<[1], [0], [0], [1], [0, 0, 1, 1], [], []>} : vector<16x256xbf16>, vector<256x96xbf16>, vector<16x96xf32> -> vector<16x96xf32>
    %336 = arith.addf %331, %335 : vector<16x96xf32>
    %337 = vector.extract_strided_slice %330 {offsets = [8, 0], sizes = [16, 256], strides = [1, 1]} : vector<48x256xbf16> to vector<16x256xbf16>
    %c5_225 = arith.constant 5 : index
    %c1_226 = arith.constant 1 : index
    %c0_227 = arith.constant 0 : index
    %c0_228 = arith.constant 0 : index
    %338 = vector.load %arg3[%c5_225, %c1_226, %c0_227, %c0_228] : memref<8x5x256x96xbf16, #tpu.memory_space<vmem>>, vector<1x1x256x96xbf16>
    %339 = vector.shape_cast %338 : vector<1x1x256x96xbf16> to vector<256x96xbf16>
    %cst_229 = arith.constant dense<0.000000e+00> : vector<16x96xf32>
    %340 = tpu.matmul %337, %339, %cst_229 {dimension_numbers = #tpu.dot_dimension_numbers<[1], [0], [0], [1], [0, 0, 1, 1], [], []>} : vector<16x256xbf16>, vector<256x96xbf16>, vector<16x96xf32> -> vector<16x96xf32>
    %341 = arith.addf %336, %340 : vector<16x96xf32>
    %342 = vector.extract_strided_slice %330 {offsets = [16, 0], sizes = [16, 256], strides = [1, 1]} : vector<48x256xbf16> to vector<16x256xbf16>
    %c5_230 = arith.constant 5 : index
    %c2_231 = arith.constant 2 : index
    %c0_232 = arith.constant 0 : index
    %c0_233 = arith.constant 0 : index
    %343 = vector.load %arg3[%c5_230, %c2_231, %c0_232, %c0_233] : memref<8x5x256x96xbf16, #tpu.memory_space<vmem>>, vector<1x1x256x96xbf16>
    %344 = vector.shape_cast %343 : vector<1x1x256x96xbf16> to vector<256x96xbf16>
    %cst_234 = arith.constant dense<0.000000e+00> : vector<16x96xf32>
    %345 = tpu.matmul %342, %344, %cst_234 {dimension_numbers = #tpu.dot_dimension_numbers<[1], [0], [0], [1], [0, 0, 1, 1], [], []>} : vector<16x256xbf16>, vector<256x96xbf16>, vector<16x96xf32> -> vector<16x96xf32>
    %346 = arith.addf %341, %345 : vector<16x96xf32>
    %347 = vector.extract_strided_slice %330 {offsets = [24, 0], sizes = [16, 256], strides = [1, 1]} : vector<48x256xbf16> to vector<16x256xbf16>
    %c5_235 = arith.constant 5 : index
    %c3_236 = arith.constant 3 : index
    %c0_237 = arith.constant 0 : index
    %c0_238 = arith.constant 0 : index
    %348 = vector.load %arg3[%c5_235, %c3_236, %c0_237, %c0_238] : memref<8x5x256x96xbf16, #tpu.memory_space<vmem>>, vector<1x1x256x96xbf16>
    %349 = vector.shape_cast %348 : vector<1x1x256x96xbf16> to vector<256x96xbf16>
    %cst_239 = arith.constant dense<0.000000e+00> : vector<16x96xf32>
    %350 = tpu.matmul %347, %349, %cst_239 {dimension_numbers = #tpu.dot_dimension_numbers<[1], [0], [0], [1], [0, 0, 1, 1], [], []>} : vector<16x256xbf16>, vector<256x96xbf16>, vector<16x96xf32> -> vector<16x96xf32>
    %351 = arith.addf %346, %350 : vector<16x96xf32>
    %352 = vector.extract_strided_slice %330 {offsets = [32, 0], sizes = [16, 256], strides = [1, 1]} : vector<48x256xbf16> to vector<16x256xbf16>
    %c5_240 = arith.constant 5 : index
    %c4_241 = arith.constant 4 : index
    %c0_242 = arith.constant 0 : index
    %c0_243 = arith.constant 0 : index
    %353 = vector.load %arg3[%c5_240, %c4_241, %c0_242, %c0_243] : memref<8x5x256x96xbf16, #tpu.memory_space<vmem>>, vector<1x1x256x96xbf16>
    %354 = vector.shape_cast %353 : vector<1x1x256x96xbf16> to vector<256x96xbf16>
    %cst_244 = arith.constant dense<0.000000e+00> : vector<16x96xf32>
    %355 = tpu.matmul %352, %354, %cst_244 {dimension_numbers = #tpu.dot_dimension_numbers<[1], [0], [0], [1], [0, 0, 1, 1], [], []>} : vector<16x256xbf16>, vector<256x96xbf16>, vector<16x96xf32> -> vector<16x96xf32>
    %356 = arith.addf %351, %355 : vector<16x96xf32>
    %357 = vector.extract_strided_slice %316 {offsets = [24, 0], sizes = [16, 128], strides = [1, 1]} : vector<64x128xf32> to vector<16x128xf32>
    %c0_i32_245 = arith.constant 0 : i32
    %358 = vector.broadcast %c0_i32_245 : i32 to vector<16x128xi32>
    %359 = arith.cmpi eq, %5, %358 : vector<16x128xi32>
    %360 = vector.extract_strided_slice %316 {offsets = [23, 0], sizes = [16, 128], strides = [1, 1]} : vector<64x128xf32> to vector<16x128xf32>
    %cst_246 = arith.constant 0xFF800000 : f32
    %361 = vector.broadcast %cst_246 : f32 to vector<16x128xf32>
    %362 = arith.select %359, %361, %360 : vector<16x128xi1>, vector<16x128xf32>
    %c15_i32_247 = arith.constant 15 : i32
    %363 = vector.broadcast %c15_i32_247 : i32 to vector<16x128xi32>
    %364 = arith.cmpi eq, %5, %363 : vector<16x128xi32>
    %365 = vector.extract_strided_slice %316 {offsets = [25, 0], sizes = [16, 128], strides = [1, 1]} : vector<64x128xf32> to vector<16x128xf32>
    %cst_248 = arith.constant 0xFF800000 : f32
    %366 = vector.broadcast %cst_248 : f32 to vector<16x128xf32>
    %367 = arith.select %364, %366, %365 : vector<16x128xi1>, vector<16x128xf32>
    %368 = arith.maximumf %362, %357 : vector<16x128xf32>
    %369 = arith.maximumf %368, %367 : vector<16x128xf32>
    %370 = arith.truncf %369 : vector<16x128xf32> to vector<16x128xbf16>
    %c5_249 = arith.constant 5 : index
    %c0_250 = arith.constant 0 : index
    %c0_251 = arith.constant 0 : index
    %371 = vector.load %arg4[%c5_249, %c0_250, %c0_251] : memref<8x128x32xbf16, #tpu.memory_space<vmem>>, vector<1x128x32xbf16>
    %372 = vector.shape_cast %371 : vector<1x128x32xbf16> to vector<128x32xbf16>
    %cst_252 = arith.constant dense<0.000000e+00> : vector<16x32xf32>
    %373 = tpu.matmul %370, %372, %cst_252 {dimension_numbers = #tpu.dot_dimension_numbers<[1], [0], [0], [1], [0, 0, 1, 1], [], []>} : vector<16x128xbf16>, vector<128x32xbf16>, vector<16x32xf32> -> vector<16x32xf32>
    %374 = tpu.concatenate %356, %373 in 1 : vector<16x96xf32>, vector<16x32xf32> -> vector<16x128xf32>
    %cst_253 = arith.constant 0.000000e+00 : f32
    %375 = vector.broadcast %cst_253 : f32 to vector<16x128xf32>
    %376 = arith.maximumf %374, %375 : vector<16x128xf32>
    %c24_254 = arith.constant 24 : index
    %c0_255 = arith.constant 0 : index
    %377 = vector.load %arg8[%c24_254, %c0_255] : memref<64x128xf32, #tpu.memory_space<vmem>>, vector<16x128xf32>
    tpu.vector_store %arg8[%c24_254, %c0_255], %376 {strides = array<i32>} : memref<64x128xf32, #tpu.memory_space<vmem>>, vector<16x128xf32>,
    %c0_256 = arith.constant 0 : index
    %c0_257 = arith.constant 0 : index
    %378 = vector.load %arg8[%c0_256, %c0_257] : memref<64x128xf32, #tpu.memory_space<vmem>>, vector<64x128xf32>
    %379 = arith.truncf %378 : vector<64x128xf32> to vector<64x128xbf16>
    %c6 = arith.constant 6 : index
    %c0_258 = arith.constant 0 : index
    %c0_259 = arith.constant 0 : index
    %380 = vector.load %arg2[%c6, %c0_258, %c0_259] : memref<8x128x32xbf16, #tpu.memory_space<vmem>>, vector<1x128x32xbf16>
    %381 = vector.shape_cast %380 : vector<1x128x32xbf16> to vector<128x32xbf16>
    %cst_260 = arith.constant dense<0.000000e+00> : vector<64x32xf32>
    %382 = tpu.matmul %379, %381, %cst_260 {dimension_numbers = #tpu.dot_dimension_numbers<[1], [0], [0], [1], [0, 0, 1, 1], [], []>} : vector<64x128xbf16>, vector<128x32xbf16>, vector<64x32xf32> -> vector<64x32xf32>
    %383 = vector.extract_strided_slice %382 {offsets = [5, 0], sizes = [48, 32], strides = [1, 1]} : vector<64x32xf32> to vector<48x32xf32>
    %384 = vector.extract_strided_slice %382 {offsets = [6, 0], sizes = [48, 32], strides = [1, 1]} : vector<64x32xf32> to vector<48x32xf32>
    %385 = vector.extract_strided_slice %382 {offsets = [7, 0], sizes = [48, 32], strides = [1, 1]} : vector<64x32xf32> to vector<48x32xf32>
    %386 = vector.extract_strided_slice %382 {offsets = [8, 0], sizes = [48, 32], strides = [1, 1]} : vector<64x32xf32> to vector<48x32xf32>
    %387 = vector.extract_strided_slice %382 {offsets = [9, 0], sizes = [48, 32], strides = [1, 1]} : vector<64x32xf32> to vector<48x32xf32>
    %388 = vector.extract_strided_slice %382 {offsets = [10, 0], sizes = [48, 32], strides = [1, 1]} : vector<64x32xf32> to vector<48x32xf32>
    %389 = vector.extract_strided_slice %382 {offsets = [11, 0], sizes = [48, 32], strides = [1, 1]} : vector<64x32xf32> to vector<48x32xf32>
    %390 = vector.extract_strided_slice %382 {offsets = [12, 0], sizes = [48, 32], strides = [1, 1]} : vector<64x32xf32> to vector<48x32xf32>
    %391 = tpu.concatenate %383, %384, %385, %386, %387, %388, %389, %390 in 1 : vector<48x32xf32>, vector<48x32xf32>, vector<48x32xf32>, vector<48x32xf32>, vector<48x32xf32>, vector<48x32xf32>, vector<48x32xf32>, vector<48x32xf32> -> vector<48x256xf32>
    %392 = arith.truncf %391 : vector<48x256xf32> to vector<48x256xbf16>
    %cst_261 = arith.constant 0.000000e+00 : f32
    %393 = vector.broadcast %cst_261 : f32 to vector<16x96xf32>
    %394 = vector.extract_strided_slice %392 {offsets = [0, 0], sizes = [16, 256], strides = [1, 1]} : vector<48x256xbf16> to vector<16x256xbf16>
    %c6_262 = arith.constant 6 : index
    %c0_263 = arith.constant 0 : index
    %c0_264 = arith.constant 0 : index
    %c0_265 = arith.constant 0 : index
    %395 = vector.load %arg3[%c6_262, %c0_263, %c0_264, %c0_265] : memref<8x5x256x96xbf16, #tpu.memory_space<vmem>>, vector<1x1x256x96xbf16>
    %396 = vector.shape_cast %395 : vector<1x1x256x96xbf16> to vector<256x96xbf16>
    %cst_266 = arith.constant dense<0.000000e+00> : vector<16x96xf32>
    %397 = tpu.matmul %394, %396, %cst_266 {dimension_numbers = #tpu.dot_dimension_numbers<[1], [0], [0], [1], [0, 0, 1, 1], [], []>} : vector<16x256xbf16>, vector<256x96xbf16>, vector<16x96xf32> -> vector<16x96xf32>
    %398 = arith.addf %393, %397 : vector<16x96xf32>
    %399 = vector.extract_strided_slice %392 {offsets = [8, 0], sizes = [16, 256], strides = [1, 1]} : vector<48x256xbf16> to vector<16x256xbf16>
    %c6_267 = arith.constant 6 : index
    %c1_268 = arith.constant 1 : index
    %c0_269 = arith.constant 0 : index
    %c0_270 = arith.constant 0 : index
    %400 = vector.load %arg3[%c6_267, %c1_268, %c0_269, %c0_270] : memref<8x5x256x96xbf16, #tpu.memory_space<vmem>>, vector<1x1x256x96xbf16>
    %401 = vector.shape_cast %400 : vector<1x1x256x96xbf16> to vector<256x96xbf16>
    %cst_271 = arith.constant dense<0.000000e+00> : vector<16x96xf32>
    %402 = tpu.matmul %399, %401, %cst_271 {dimension_numbers = #tpu.dot_dimension_numbers<[1], [0], [0], [1], [0, 0, 1, 1], [], []>} : vector<16x256xbf16>, vector<256x96xbf16>, vector<16x96xf32> -> vector<16x96xf32>
    %403 = arith.addf %398, %402 : vector<16x96xf32>
    %404 = vector.extract_strided_slice %392 {offsets = [16, 0], sizes = [16, 256], strides = [1, 1]} : vector<48x256xbf16> to vector<16x256xbf16>
    %c6_272 = arith.constant 6 : index
    %c2_273 = arith.constant 2 : index
    %c0_274 = arith.constant 0 : index
    %c0_275 = arith.constant 0 : index
    %405 = vector.load %arg3[%c6_272, %c2_273, %c0_274, %c0_275] : memref<8x5x256x96xbf16, #tpu.memory_space<vmem>>, vector<1x1x256x96xbf16>
    %406 = vector.shape_cast %405 : vector<1x1x256x96xbf16> to vector<256x96xbf16>
    %cst_276 = arith.constant dense<0.000000e+00> : vector<16x96xf32>
    %407 = tpu.matmul %404, %406, %cst_276 {dimension_numbers = #tpu.dot_dimension_numbers<[1], [0], [0], [1], [0, 0, 1, 1], [], []>} : vector<16x256xbf16>, vector<256x96xbf16>, vector<16x96xf32> -> vector<16x96xf32>
    %408 = arith.addf %403, %407 : vector<16x96xf32>
    %409 = vector.extract_strided_slice %392 {offsets = [24, 0], sizes = [16, 256], strides = [1, 1]} : vector<48x256xbf16> to vector<16x256xbf16>
    %c6_277 = arith.constant 6 : index
    %c3_278 = arith.constant 3 : index
    %c0_279 = arith.constant 0 : index
    %c0_280 = arith.constant 0 : index
    %410 = vector.load %arg3[%c6_277, %c3_278, %c0_279, %c0_280] : memref<8x5x256x96xbf16, #tpu.memory_space<vmem>>, vector<1x1x256x96xbf16>
    %411 = vector.shape_cast %410 : vector<1x1x256x96xbf16> to vector<256x96xbf16>
    %cst_281 = arith.constant dense<0.000000e+00> : vector<16x96xf32>
    %412 = tpu.matmul %409, %411, %cst_281 {dimension_numbers = #tpu.dot_dimension_numbers<[1], [0], [0], [1], [0, 0, 1, 1], [], []>} : vector<16x256xbf16>, vector<256x96xbf16>, vector<16x96xf32> -> vector<16x96xf32>
    %413 = arith.addf %408, %412 : vector<16x96xf32>
    %414 = vector.extract_strided_slice %392 {offsets = [32, 0], sizes = [16, 256], strides = [1, 1]} : vector<48x256xbf16> to vector<16x256xbf16>
    %c6_282 = arith.constant 6 : index
    %c4_283 = arith.constant 4 : index
    %c0_284 = arith.constant 0 : index
    %c0_285 = arith.constant 0 : index
    %415 = vector.load %arg3[%c6_282, %c4_283, %c0_284, %c0_285] : memref<8x5x256x96xbf16, #tpu.memory_space<vmem>>, vector<1x1x256x96xbf16>
    %416 = vector.shape_cast %415 : vector<1x1x256x96xbf16> to vector<256x96xbf16>
    %cst_286 = arith.constant dense<0.000000e+00> : vector<16x96xf32>
    %417 = tpu.matmul %414, %416, %cst_286 {dimension_numbers = #tpu.dot_dimension_numbers<[1], [0], [0], [1], [0, 0, 1, 1], [], []>} : vector<16x256xbf16>, vector<256x96xbf16>, vector<16x96xf32> -> vector<16x96xf32>
    %418 = arith.addf %413, %417 : vector<16x96xf32>
    %419 = vector.extract_strided_slice %378 {offsets = [24, 0], sizes = [16, 128], strides = [1, 1]} : vector<64x128xf32> to vector<16x128xf32>
    %c0_i32_287 = arith.constant 0 : i32
    %420 = vector.broadcast %c0_i32_287 : i32 to vector<16x128xi32>
    %421 = arith.cmpi eq, %5, %420 : vector<16x128xi32>
    %422 = vector.extract_strided_slice %378 {offsets = [23, 0], sizes = [16, 128], strides = [1, 1]} : vector<64x128xf32> to vector<16x128xf32>
    %cst_288 = arith.constant 0xFF800000 : f32
    %423 = vector.broadcast %cst_288 : f32 to vector<16x128xf32>
    %424 = arith.select %421, %423, %422 : vector<16x128xi1>, vector<16x128xf32>
    %c15_i32_289 = arith.constant 15 : i32
    %425 = vector.broadcast %c15_i32_289 : i32 to vector<16x128xi32>
    %426 = arith.cmpi eq, %5, %425 : vector<16x128xi32>
    %427 = vector.extract_strided_slice %378 {offsets = [25, 0], sizes = [16, 128], strides = [1, 1]} : vector<64x128xf32> to vector<16x128xf32>
    %cst_290 = arith.constant 0xFF800000 : f32
    %428 = vector.broadcast %cst_290 : f32 to vector<16x128xf32>
    %429 = arith.select %426, %428, %427 : vector<16x128xi1>, vector<16x128xf32>
    %430 = arith.maximumf %424, %419 : vector<16x128xf32>
    %431 = arith.maximumf %430, %429 : vector<16x128xf32>
    %432 = arith.truncf %431 : vector<16x128xf32> to vector<16x128xbf16>
    %c6_291 = arith.constant 6 : index
    %c0_292 = arith.constant 0 : index
    %c0_293 = arith.constant 0 : index
    %433 = vector.load %arg4[%c6_291, %c0_292, %c0_293] : memref<8x128x32xbf16, #tpu.memory_space<vmem>>, vector<1x128x32xbf16>
    %434 = vector.shape_cast %433 : vector<1x128x32xbf16> to vector<128x32xbf16>
    %cst_294 = arith.constant dense<0.000000e+00> : vector<16x32xf32>
    %435 = tpu.matmul %432, %434, %cst_294 {dimension_numbers = #tpu.dot_dimension_numbers<[1], [0], [0], [1], [0, 0, 1, 1], [], []>} : vector<16x128xbf16>, vector<128x32xbf16>, vector<16x32xf32> -> vector<16x32xf32>
    %436 = tpu.concatenate %418, %435 in 1 : vector<16x96xf32>, vector<16x32xf32> -> vector<16x128xf32>
    %cst_295 = arith.constant 0.000000e+00 : f32
    %437 = vector.broadcast %cst_295 : f32 to vector<16x128xf32>
    %438 = arith.maximumf %436, %437 : vector<16x128xf32>
    %c24_296 = arith.constant 24 : index
    %c0_297 = arith.constant 0 : index
    %439 = vector.load %arg8[%c24_296, %c0_297] : memref<64x128xf32, #tpu.memory_space<vmem>>, vector<16x128xf32>
    tpu.vector_store %arg8[%c24_296, %c0_297], %438 {strides = array<i32>} : memref<64x128xf32, #tpu.memory_space<vmem>>, vector<16x128xf32>,
    %c0_298 = arith.constant 0 : index
    %c0_299 = arith.constant 0 : index
    %440 = vector.load %arg8[%c0_298, %c0_299] : memref<64x128xf32, #tpu.memory_space<vmem>>, vector<64x128xf32>
    %441 = arith.truncf %440 : vector<64x128xf32> to vector<64x128xbf16>
    %c7 = arith.constant 7 : index
    %c0_300 = arith.constant 0 : index
    %c0_301 = arith.constant 0 : index
    %442 = vector.load %arg2[%c7, %c0_300, %c0_301] : memref<8x128x32xbf16, #tpu.memory_space<vmem>>, vector<1x128x32xbf16>
    %443 = vector.shape_cast %442 : vector<1x128x32xbf16> to vector<128x32xbf16>
    %cst_302 = arith.constant dense<0.000000e+00> : vector<64x32xf32>
    %444 = tpu.matmul %441, %443, %cst_302 {dimension_numbers = #tpu.dot_dimension_numbers<[1], [0], [0], [1], [0, 0, 1, 1], [], []>} : vector<64x128xbf16>, vector<128x32xbf16>, vector<64x32xf32> -> vector<64x32xf32>
    %445 = vector.extract_strided_slice %444 {offsets = [5, 0], sizes = [48, 32], strides = [1, 1]} : vector<64x32xf32> to vector<48x32xf32>
    %446 = vector.extract_strided_slice %444 {offsets = [6, 0], sizes = [48, 32], strides = [1, 1]} : vector<64x32xf32> to vector<48x32xf32>
    %447 = vector.extract_strided_slice %444 {offsets = [7, 0], sizes = [48, 32], strides = [1, 1]} : vector<64x32xf32> to vector<48x32xf32>
    %448 = vector.extract_strided_slice %444 {offsets = [8, 0], sizes = [48, 32], strides = [1, 1]} : vector<64x32xf32> to vector<48x32xf32>
    %449 = vector.extract_strided_slice %444 {offsets = [9, 0], sizes = [48, 32], strides = [1, 1]} : vector<64x32xf32> to vector<48x32xf32>
    %450 = vector.extract_strided_slice %444 {offsets = [10, 0], sizes = [48, 32], strides = [1, 1]} : vector<64x32xf32> to vector<48x32xf32>
    %451 = vector.extract_strided_slice %444 {offsets = [11, 0], sizes = [48, 32], strides = [1, 1]} : vector<64x32xf32> to vector<48x32xf32>
    %452 = vector.extract_strided_slice %444 {offsets = [12, 0], sizes = [48, 32], strides = [1, 1]} : vector<64x32xf32> to vector<48x32xf32>
    %453 = tpu.concatenate %445, %446, %447, %448, %449, %450, %451, %452 in 1 : vector<48x32xf32>, vector<48x32xf32>, vector<48x32xf32>, vector<48x32xf32>, vector<48x32xf32>, vector<48x32xf32>, vector<48x32xf32>, vector<48x32xf32> -> vector<48x256xf32>
    %454 = arith.truncf %453 : vector<48x256xf32> to vector<48x256xbf16>
    %cst_303 = arith.constant 0.000000e+00 : f32
    %455 = vector.broadcast %cst_303 : f32 to vector<16x96xf32>
    %456 = vector.extract_strided_slice %454 {offsets = [0, 0], sizes = [16, 256], strides = [1, 1]} : vector<48x256xbf16> to vector<16x256xbf16>
    %c7_304 = arith.constant 7 : index
    %c0_305 = arith.constant 0 : index
    %c0_306 = arith.constant 0 : index
    %c0_307 = arith.constant 0 : index
    %457 = vector.load %arg3[%c7_304, %c0_305, %c0_306, %c0_307] : memref<8x5x256x96xbf16, #tpu.memory_space<vmem>>, vector<1x1x256x96xbf16>
    %458 = vector.shape_cast %457 : vector<1x1x256x96xbf16> to vector<256x96xbf16>
    %cst_308 = arith.constant dense<0.000000e+00> : vector<16x96xf32>
    %459 = tpu.matmul %456, %458, %cst_308 {dimension_numbers = #tpu.dot_dimension_numbers<[1], [0], [0], [1], [0, 0, 1, 1], [], []>} : vector<16x256xbf16>, vector<256x96xbf16>, vector<16x96xf32> -> vector<16x96xf32>
    %460 = arith.addf %455, %459 : vector<16x96xf32>
    %461 = vector.extract_strided_slice %454 {offsets = [8, 0], sizes = [16, 256], strides = [1, 1]} : vector<48x256xbf16> to vector<16x256xbf16>
    %c7_309 = arith.constant 7 : index
    %c1_310 = arith.constant 1 : index
    %c0_311 = arith.constant 0 : index
    %c0_312 = arith.constant 0 : index
    %462 = vector.load %arg3[%c7_309, %c1_310, %c0_311, %c0_312] : memref<8x5x256x96xbf16, #tpu.memory_space<vmem>>, vector<1x1x256x96xbf16>
    %463 = vector.shape_cast %462 : vector<1x1x256x96xbf16> to vector<256x96xbf16>
    %cst_313 = arith.constant dense<0.000000e+00> : vector<16x96xf32>
    %464 = tpu.matmul %461, %463, %cst_313 {dimension_numbers = #tpu.dot_dimension_numbers<[1], [0], [0], [1], [0, 0, 1, 1], [], []>} : vector<16x256xbf16>, vector<256x96xbf16>, vector<16x96xf32> -> vector<16x96xf32>
    %465 = arith.addf %460, %464 : vector<16x96xf32>
    %466 = vector.extract_strided_slice %454 {offsets = [16, 0], sizes = [16, 256], strides = [1, 1]} : vector<48x256xbf16> to vector<16x256xbf16>
    %c7_314 = arith.constant 7 : index
    %c2_315 = arith.constant 2 : index
    %c0_316 = arith.constant 0 : index
    %c0_317 = arith.constant 0 : index
    %467 = vector.load %arg3[%c7_314, %c2_315, %c0_316, %c0_317] : memref<8x5x256x96xbf16, #tpu.memory_space<vmem>>, vector<1x1x256x96xbf16>
    %468 = vector.shape_cast %467 : vector<1x1x256x96xbf16> to vector<256x96xbf16>
    %cst_318 = arith.constant dense<0.000000e+00> : vector<16x96xf32>
    %469 = tpu.matmul %466, %468, %cst_318 {dimension_numbers = #tpu.dot_dimension_numbers<[1], [0], [0], [1], [0, 0, 1, 1], [], []>} : vector<16x256xbf16>, vector<256x96xbf16>, vector<16x96xf32> -> vector<16x96xf32>
    %470 = arith.addf %465, %469 : vector<16x96xf32>
    %471 = vector.extract_strided_slice %454 {offsets = [24, 0], sizes = [16, 256], strides = [1, 1]} : vector<48x256xbf16> to vector<16x256xbf16>
    %c7_319 = arith.constant 7 : index
    %c3_320 = arith.constant 3 : index
    %c0_321 = arith.constant 0 : index
    %c0_322 = arith.constant 0 : index
    %472 = vector.load %arg3[%c7_319, %c3_320, %c0_321, %c0_322] : memref<8x5x256x96xbf16, #tpu.memory_space<vmem>>, vector<1x1x256x96xbf16>
    %473 = vector.shape_cast %472 : vector<1x1x256x96xbf16> to vector<256x96xbf16>
    %cst_323 = arith.constant dense<0.000000e+00> : vector<16x96xf32>
    %474 = tpu.matmul %471, %473, %cst_323 {dimension_numbers = #tpu.dot_dimension_numbers<[1], [0], [0], [1], [0, 0, 1, 1], [], []>} : vector<16x256xbf16>, vector<256x96xbf16>, vector<16x96xf32> -> vector<16x96xf32>
    %475 = arith.addf %470, %474 : vector<16x96xf32>
    %476 = vector.extract_strided_slice %454 {offsets = [32, 0], sizes = [16, 256], strides = [1, 1]} : vector<48x256xbf16> to vector<16x256xbf16>
    %c7_324 = arith.constant 7 : index
    %c4_325 = arith.constant 4 : index
    %c0_326 = arith.constant 0 : index
    %c0_327 = arith.constant 0 : index
    %477 = vector.load %arg3[%c7_324, %c4_325, %c0_326, %c0_327] : memref<8x5x256x96xbf16, #tpu.memory_space<vmem>>, vector<1x1x256x96xbf16>
    %478 = vector.shape_cast %477 : vector<1x1x256x96xbf16> to vector<256x96xbf16>
    %cst_328 = arith.constant dense<0.000000e+00> : vector<16x96xf32>
    %479 = tpu.matmul %476, %478, %cst_328 {dimension_numbers = #tpu.dot_dimension_numbers<[1], [0], [0], [1], [0, 0, 1, 1], [], []>} : vector<16x256xbf16>, vector<256x96xbf16>, vector<16x96xf32> -> vector<16x96xf32>
    %480 = arith.addf %475, %479 : vector<16x96xf32>
    %481 = vector.extract_strided_slice %440 {offsets = [24, 0], sizes = [16, 128], strides = [1, 1]} : vector<64x128xf32> to vector<16x128xf32>
    %c0_i32_329 = arith.constant 0 : i32
    %482 = vector.broadcast %c0_i32_329 : i32 to vector<16x128xi32>
    %483 = arith.cmpi eq, %5, %482 : vector<16x128xi32>
    %484 = vector.extract_strided_slice %440 {offsets = [23, 0], sizes = [16, 128], strides = [1, 1]} : vector<64x128xf32> to vector<16x128xf32>
    %cst_330 = arith.constant 0xFF800000 : f32
    %485 = vector.broadcast %cst_330 : f32 to vector<16x128xf32>
    %486 = arith.select %483, %485, %484 : vector<16x128xi1>, vector<16x128xf32>
    %c15_i32_331 = arith.constant 15 : i32
    %487 = vector.broadcast %c15_i32_331 : i32 to vector<16x128xi32>
    %488 = arith.cmpi eq, %5, %487 : vector<16x128xi32>
    %489 = vector.extract_strided_slice %440 {offsets = [25, 0], sizes = [16, 128], strides = [1, 1]} : vector<64x128xf32> to vector<16x128xf32>
    %cst_332 = arith.constant 0xFF800000 : f32
    %490 = vector.broadcast %cst_332 : f32 to vector<16x128xf32>
    %491 = arith.select %488, %490, %489 : vector<16x128xi1>, vector<16x128xf32>
    %492 = arith.maximumf %486, %481 : vector<16x128xf32>
    %493 = arith.maximumf %492, %491 : vector<16x128xf32>
    %494 = arith.truncf %493 : vector<16x128xf32> to vector<16x128xbf16>
    %c7_333 = arith.constant 7 : index
    %c0_334 = arith.constant 0 : index
    %c0_335 = arith.constant 0 : index
    %495 = vector.load %arg4[%c7_333, %c0_334, %c0_335] : memref<8x128x32xbf16, #tpu.memory_space<vmem>>, vector<1x128x32xbf16>
    %496 = vector.shape_cast %495 : vector<1x128x32xbf16> to vector<128x32xbf16>
    %cst_336 = arith.constant dense<0.000000e+00> : vector<16x32xf32>
    %497 = tpu.matmul %494, %496, %cst_336 {dimension_numbers = #tpu.dot_dimension_numbers<[1], [0], [0], [1], [0, 0, 1, 1], [], []>} : vector<16x128xbf16>, vector<128x32xbf16>, vector<16x32xf32> -> vector<16x32xf32>
    %498 = tpu.concatenate %480, %497 in 1 : vector<16x96xf32>, vector<16x32xf32> -> vector<16x128xf32>
    %cst_337 = arith.constant 0.000000e+00 : f32
    %499 = vector.broadcast %cst_337 : f32 to vector<16x128xf32>
    %500 = arith.maximumf %498, %499 : vector<16x128xf32>
    %c24_338 = arith.constant 24 : index
    %c0_339 = arith.constant 0 : index
    %501 = vector.load %arg8[%c24_338, %c0_339] : memref<64x128xf32, #tpu.memory_space<vmem>>, vector<16x128xf32>
    tpu.vector_store %arg8[%c24_338, %c0_339], %500 {strides = array<i32>} : memref<64x128xf32, #tpu.memory_space<vmem>>, vector<16x128xf32>,
    %c24_340 = arith.constant 24 : index
    %c0_341 = arith.constant 0 : index
    %502 = vector.load %arg8[%c24_340, %c0_341] : memref<64x128xf32, #tpu.memory_space<vmem>>, vector<16x128xf32>
    %cst_342 = arith.constant dense<0.000000e+00> : vector<128xf32>
    %503 = vector.multi_reduction <add>, %502, %cst_342 [0] : vector<16x128xf32> to vector<128xf32>
    %504 = vector.shape_cast %503 : vector<128xf32> to vector<1x128xf32>
    %cst_343 = arith.constant 6.250000e-02 : f32
    %505 = vector.broadcast %cst_343 : f32 to vector<1x128xf32>
    %506 = arith.mulf %504, %505 : vector<1x128xf32>
    %507 = arith.truncf %506 : vector<1x128xf32> to vector<1x128xbf16>
    %c0_344 = arith.constant 0 : index
    %c0_345 = arith.constant 0 : index
    %508 = vector.load %arg5[%c0_344, %c0_345] : memref<128x3xbf16, #tpu.memory_space<vmem>>, vector<128x3xbf16>
    %cst_346 = arith.constant dense<0.000000e+00> : vector<1x3xf32>
    %509 = tpu.matmul %507, %508, %cst_346 {dimension_numbers = #tpu.dot_dimension_numbers<[1], [0], [0], [1], [0, 0, 1, 1], [], []>} : vector<1x128xbf16>, vector<128x3xbf16>, vector<1x3xf32> -> vector<1x3xf32>
    %c0_347 = arith.constant 0 : index
    %c0_348 = arith.constant 0 : index
    %510 = vector.load %arg6[%c0_347, %c0_348] : memref<1x3xf32, #tpu.memory_space<vmem>>, vector<1x3xf32>
    %511 = arith.addf %509, %510 : vector<1x3xf32>
    %c0_349 = arith.constant 0 : index
    %c0_350 = arith.constant 0 : index
    %c0_351 = arith.constant 0 : index
    %512 = vector.load %arg7[%c0_349, %c0_350, %c0_351] : memref<1x1x3xf32, #tpu.memory_space<vmem>>, vector<1x1x3xf32>
    %513 = vector.shape_cast %512 : vector<1x1x3xf32> to vector<1x3xf32>
    %514 = vector.shape_cast %511 : vector<1x3xf32> to vector<1x1x3xf32>
    tpu.vector_store %arg7[%c0_349, %c0_350, %c0_351], %514 {strides = array<i32>} : memref<1x1x3xf32, #tpu.memory_space<vmem>>, vector<1x1x3xf32>,
    return
  }
  func.func @transform_0(%arg0: i32) -> (i32, i32, i32) {
    %c0_i32 = arith.constant 0 : i32
    %c0_i32_0 = arith.constant 0 : i32
    %c0_i32_1 = arith.constant 0 : i32
    return %arg0, %c0_i32, %c0_i32_0 : i32, i32, i32
  }
  func.func @transform_1(%arg0: i32) -> (i32, i32, i32) {
    %c0_i32 = arith.constant 0 : i32
    %c0_i32_0 = arith.constant 0 : i32
    %c0_i32_1 = arith.constant 0 : i32
    %c0_i32_2 = arith.constant 0 : i32
    return %c0_i32, %c0_i32_0, %c0_i32_1 : i32, i32, i32
  }
  func.func @transform_2(%arg0: i32) -> (i32, i32, i32, i32) {
    %c0_i32 = arith.constant 0 : i32
    %c0_i32_0 = arith.constant 0 : i32
    %c0_i32_1 = arith.constant 0 : i32
    %c0_i32_2 = arith.constant 0 : i32
    %c0_i32_3 = arith.constant 0 : i32
    return %c0_i32, %c0_i32_0, %c0_i32_1, %c0_i32_2 : i32, i32, i32, i32
  }
  func.func @transform_3(%arg0: i32) -> (i32, i32, i32) {
    %c0_i32 = arith.constant 0 : i32
    %c0_i32_0 = arith.constant 0 : i32
    %c0_i32_1 = arith.constant 0 : i32
    %c0_i32_2 = arith.constant 0 : i32
    return %c0_i32, %c0_i32_0, %c0_i32_1 : i32, i32, i32
  }
  func.func @transform_4(%arg0: i32) -> (i32, i32) {
    %c0_i32 = arith.constant 0 : i32
    %c0_i32_0 = arith.constant 0 : i32
    %c0_i32_1 = arith.constant 0 : i32
    return %c0_i32, %c0_i32_0 : i32, i32
  }
  func.func @transform_5(%arg0: i32) -> (i32, i32) {
    %c0_i32 = arith.constant 0 : i32
    %c0_i32_0 = arith.constant 0 : i32
    %c0_i32_1 = arith.constant 0 : i32
    return %c0_i32, %c0_i32_0 : i32, i32
  }
  func.func @transform_6(%arg0: i32) -> (i32, i32, i32) {
    %c0_i32 = arith.constant 0 : i32
    %c0_i32_0 = arith.constant 0 : i32
    %c0_i32_1 = arith.constant 0 : i32
    return %arg0, %c0_i32, %c0_i32_0 : i32, i32, i32
  }
}

</mosaic_0001>

<bundles_post_ra>
// kernel: inception_time_forward_pallas.1
= control target key start
LH: loop header
LB: loop body
LE: loop exit
PB: predicated region body
PF: predicated region fallthrough
CT: control target
= control target key end

     0   :  { %11 = vsyncpa [#allocation4], 0  ;;  %s23662_s0 = inlined_call_operand.vmem [shape: f32[2,16,128], index: 0, kind: input, shape index: {}]   ;;  %s23663_s1 = inlined_call_operand.vmem [shape: bf16[8,128,32], index: 1, kind: input, shape index: {}]   ;;  %s23664_s2 = inlined_call_operand.vmem [shape: bf16[8,5,256,96], index: 2, kind: input, shape index: {}]   ;;  %s23665_s3 = inlined_call_operand.vmem [shape: bf16[8,128,32], index: 3, kind: input, shape index: {}]   ;;  %s23666_s4 = inlined_call_operand.vmem [shape: bf16[128,3], index: 4, kind: input, shape index: {}]   ;;  %s23667_s5 = inlined_call_operand.vmem [shape: f32[1,3], index: 5, kind: input, shape index: {}]   ;;  %s23668_s6 = inlined_call_operand.hbm [shape: f32[2,1,3], index: 6, kind: output, shape index: {}]  }
   0x1   :  { %13 = vsyncpa [#allocation4 + $0x1], 0  ;;  %s18138_s21 = smov 0   ;;  %s18140_s22 = smov 0  }
   0x2   :  { %s18142_s23 = smov 0   ;;  %s18144_s24 = smov 0  }
   0x3 LB: > { %s18159_s25 = sadd.s32 4294967295, %s18094_s24   ;;  %s12680_s26 = sadd.s32 4294967294, %s18094_s24   ;;  %s18094_s24 = sphi %s18144_s24, %s23687_s24   ;;  %s18090_s23 = sphi %s18142_s23, %s23686_s23   ;;  %s18086_s22 = sphi %s18140_s22, %s23685_s22   ;;  %s18082_s21 = sphi %s18138_s21, %s23684_s21  }
   0x4   : > { %s18163_s27 = sadd.s32 1, %s18094_s24   ;;  %s157_s28 = sadd.s32 1, %s18090_s23 }
   0x5   : > { %s154_s29 = ssub.s32 %s18094_s24, %s18163_s27  ;;  %p167_p0 = scmp.ne.s32.totalorder %s18090_s23, %s18086_s22 }
   0x6   : > { %p155_p1 = scmp.eq.s32.totalorder %s154_s29, 0  ;;  %p168_p2 = scmp.eq.s32.totalorder %s18159_s25, 1 }
   0x7   : > { %p173_p3 = scmp.ne.s32.totalorder %s18086_s22, %s18082_s21  ;;  %p174_p4 = scmp.eq.s32.totalorder %s12680_s26, 1 }
   0x8   : > { %s18174_s30 = scalar_select %p155_p1, %s18090_s23, %s157_s28  }
   0x9   : > { %p18176_p5 = por %p168_p2, %p167_p0  ;;  %p18180_p6 = por %p174_p4, %p173_p3 }
   0xa   : > { %p12683_p7 = scmp.ge.s32.totalorder %s18094_s24, 1  ;;  %p215_p8 = scmp.lt.s32.totalorder %s18094_s24, 3 }
   0xc   : > { %p216_p9 = pnand %p12683_p7, %p215_p8 }
   0xd   : > { %v17252_v0 = vld [vmem:[%s23663_s1] sm:$0xff] (!%p216_p9)   ;;  %v17253_v1 = vld [vmem:[%s23663_s1 + $0x8] sm:$0xff] (!%p216_p9)   ;;  %v23669_v2 = vmov (!%p216_p9), 0.0|0.0   ;;  %p244_p10 = scmp.lt.s32.totalorder (!%p216_p9), %s18159_s25, 1  ;;  %v17254_v3 = vld [vmem:[%s23663_s1 + $0x10] sm:$0xff] (!%p216_p9)   ;;  %v23671_v11 = vmov (!%p216_p9), 0.0  }
   0xe   : > { %219 = sbr.rel (%p216_p9) target bundleno = 6485 (0x1955), region = 44  ;;  %16011 = vmatprep.mubr.bf16.mxu0 (!%p216_p9), %v23669_v2  ;;  %15995 = vmatprep.subr.bf16.mxu0 (!%p216_p9), %v17252_v0  ;;  %v17255_v4 = vld [vmem:[%s23663_s1 + $0x18] sm:$0xff] (!%p216_p9)   ;;  %v17256_v5 = vld [vmem:[%s23663_s1 + $0x20] sm:$0xff] (!%p216_p9)   ;;  %v17257_v6 = vld [vmem:[%s23663_s1 + $0x28] sm:$0xff] (!%p216_p9)   ;;  %vm538_vm0 = vcmask (!%p216_p9), 1042432   ;;  %vm413_vm1 = vcmask (!%p216_p9), 1046528  }
   0xf   : > { %15996 = vmatpush3.bf16.msra.mxu0 (!%p216_p9), %v17252_v0  ;;  %v17258_v7 = vld [vmem:[%s23663_s1 + $0x30] sm:$0xff] (!%p216_p9)   ;;  %v17259_v8 = vld [vmem:[%s23663_s1 + $0x38] sm:$0xff] (!%p216_p9)   ;;  %vm573_vm2 = vcmask (!%p216_p9), 1041408   ;;  %v17260_v14 = vld [vmem:[%s23664_s2 + $0xc0] sm:$0xff] (!%p216_p9)   ;;  %vm448_vm3 = vcmask (!%p216_p9), 1045504   ;;  %vm608_vm4 = vcmask (!%p216_p9), 1040384  }
  0x10   : > { %15997 = vmatprep.subr.bf16.mxu0 (!%p216_p9), %v17253_v1  ;;  %v17261_v15 = vld [vmem:[%s23664_s2 + $0x40] sm:$0xff] (!%p216_p9)   ;;  %14950 = vmatprep.subr.bf16.mxu1 (!%p216_p9), %v17260_v14  ;;  %v17264_v29 = vld [vmem:[%s23664_s2 + $0xc8] sm:$0xff] (!%p216_p9)   ;;  %vm483_vm5 = vcmask (!%p216_p9), 1044480   ;;  %v17268_v50 = vld [vmem:[%s23664_s2 + $0xd0] sm:$0xff] (!%p216_p9)   ;;  %s18098_s10 = smov (!%p216_p9), 32   ;;  %vm517_vm6 = vcmask (!%p216_p9), 1043456  }
  0x11   : > { %v17262_v16 = vld [vmem:[%s23664_s2 + $0x80] sm:$0xff] (!%p216_p9)   ;;  %v17265_v35 = vld [vmem:[%s23664_s2 + $0x48] sm:$0xff] (!%p216_p9)   ;;  %v17269_v51 = vld [vmem:[%s23664_s2 + $0x50] sm:$0xff] (!%p216_p9)   ;;  %s18100_s26 = smov (!%p216_p9), 96   ;;  %vm643_vm9 = vcmask (!%p216_p9), 261120   ;;  %vm651_vm10 = vcmask (!%p216_p9), 523264  }
  0x12   : > { %v17263_v17 = vld [vmem:[%s23664_s2] sm:$0xff] (!%p216_p9)   ;;  %14951 = vmatpush3.bf16.msra.mxu1 (!%p216_p9), %v17262_v16  ;;  %v17266_v40 = vld [vmem:[%s23664_s2 + $0x88] sm:$0xff] (!%p216_p9)   ;;  %v17270_v52 = vld [vmem:[%s23664_s2 + $0x90] sm:$0xff] (!%p216_p9)   ;;  %vm659_vm11 = vcmask (!%p216_p9), 785408   ;;  %vm761_vm12 = vsmask.f32 (!%p216_p9), 1280 }
  0x13   : > { %15998 = vmatpush3.bf16.msra.mxu0 (!%p216_p9), %v17253_v1  ;;  %14952 = vmatprep.subr.bf16.mxu1 (!%p216_p9), %v17264_v29  ;;  %v17267_v41 = vld [vmem:[%s23664_s2 + $0x8] sm:$0xff] (!%p216_p9)   ;;  %v17271_v57 = vld [vmem:[%s23664_s2 + $0x10] sm:$0xff] (!%p216_p9)   ;;  %v17272_v16 = vld [vmem:[%s23664_s2 + $0xd8] sm:$0xff] (!%p216_p9)   ;;  %vm935_vm13 = vsmask.f32 (!%p216_p9), 5376  ;;  %vm18101_vm14 = vmmov (!%p216_p9), 0  }
  0x14   : > { %15999 = vmatprep.subr.bf16.mxu0 (!%p216_p9), %v17254_v3  ;;  %s242_s17 = sand.u32 (!%p216_p9), 1, %s18086_s22   ;;  %vm12610_vm15 = vcmask (!%p216_p9), 16384   ;;  %s18102_s12 = smov (!%p216_p9), [#allocation3]  }
  0x15   : > { %s245_s15 = scalar_select %p244_p10, %s18159_s25, 1 }
  0x16   : > { %14953 = vmatpush3.bf16.msra.mxu1 %v17266_v40 }
  0x17   : > { %s14937_s20 = sshll.u32 %s245_s15, 4  ;;  %16000 = vmatpush3.bf16.msra.mxu0 %v17254_v3  ;;  %14954 = vmatprep.subr.bf16.mxu1 %v17268_v50 }
  0x18   : > { %16001 = vmatprep.subr.bf16.mxu0 %v17255_v4  ;;  %s18216_s14 = scalar_lea.vmem %s23662_s0, %s14937_s20  ;;  %s18099_s20 = smov 64  }
  0x19   : > { %v258_v9 = vld [vmem:[%s18216_s14] sm:$0xff]  ;;  %v259_v10 = vld [vmem:[%s18216_s14 + $0x8] sm:$0xff] }
  0x1a   : > { %v274_v12 = vpack.c.bf16 %v258_v9, %v23671_v11  ;;  %v275_v13 = vpack.c.bf16 %v23671_v11, %v259_v10  ;;  %14955 = vmatpush3.bf16.msra.mxu1 %v17270_v52  ;;  %v17279_v52 = vld [vmem:[%s23664_s2 + $0x20] sm:$0xff]  }
  0x1b   : > { %16002 = vmatpush3.bf16.msra.mxu0 %v17255_v4  ;;  %14956 = vmatprep.subr.bf16.mxu1 %v17272_v16 }
  0x1c   : > { %16003 = vmatprep.subr.bf16.mxu0 %v17256_v5 }
  0x1f   : > { %16004 = vmatpush3.bf16.msra.mxu0 %v17256_v5 }
  0x20   : > { %16005 = vmatprep.subr.bf16.mxu0 %v17257_v6 }
  0x23   : > { %16006 = vmatpush3.bf16.msra.mxu0 %v17257_v6 }
  0x24   : > { %16007 = vmatprep.subr.bf16.mxu0 %v17258_v7 }
  0x27   : > { %16008 = vmatpush3.bf16.msra.mxu0 %v17258_v7 }
  0x28   : > { %16009 = vmatprep.subr.bf16.mxu0 %v17259_v8 }
  0x2b   : > { %16010 = vmatpush3.bf16.msra.mxu0 %v17259_v8 }
  0x2c   : > { %14972 = vmatprep.subr.bf16.mxu0 %v17261_v15 }
  0x2e   : > { %16012 = vmatmul.mubr.bf16.vlgmr.msra.gmra.mrb[0].mxu0 %v274_v12 }
  0x2f   : > { %16015 = vmatprep.mubr.bf16.mxu0 %v275_v13  ;;  %14973 = vmatpush3.bf16.msra.mxu0 %v17263_v17 }
  0x30   : > { %14974 = vmatprep.subr.bf16.mxu0 %v17265_v35 }
  0x33   : > { %14975 = vmatpush3.bf16.msra.mxu0 %v17267_v41 }
  0x34   : > { %14976 = vmatprep.subr.bf16.mxu0 %v17269_v51  ;;  %v17278_v51 = vld [vmem:[%s23664_s2 + $0xa0] sm:$0xff]  }
  0x36   : > { %16016 = vmatmul.mubr.bf16.gmra.mrb[4].mxu0 %v23669_v2 }
  0x37   : > { %14977 = vmatpush3.bf16.msra.mxu0 %v17271_v57 }
 0x101   : > { %v18235_v18 = vpop.f32.mrb[0].mxu0 }
 0x102   : > { %v18237_v19 = vpop.f32.mrb[1].mxu0  ;;  %v540_v20 = vrot.slane %v18235_v18, 5  ;;  %v417_v21 = vrot.slane %v18235_v18, 1  ;;  %v575_v22 = vrot.slane %v18235_v18, 6  ;;  %v452_v23 = vrot.slane %v18235_v18, 2 }
 0x103   : > { %v414_v24 = vrot.slane %v18237_v19, 1  ;;  %v449_v25 = vrot.slane %v18237_v19, 2  ;;  %v18245_v26 = vpop.f32.mrb[2].mxu0  ;;  %v610_v27 = vrot.slane %v18235_v18, 7  ;;  %v485_v28 = vrot.slane %v18235_v18, 3 }
 0x104   : > { %v18252_v30 = vpop.f32.mrb[3].mxu0  ;;  %v419_v31 = vrot.slane %v18245_v26, 1  ;;  %v577_v32 = vrot.slane %v18245_v26, 6  ;;  %v454_v33 = vrot.slane %v18245_v26, 2  ;;  %v542_v34 = vrot.slane %v18245_v26, 5 }
 0x105   : > { %v539_v36 = vrot.slane %v18252_v30, 5  ;;  %v415_v37 = vrot.slane %v18252_v30, 1  ;;  %v574_v38 = vrot.slane %v18252_v30, 6  ;;  %v450_v39 = vrot.slane %v18252_v30, 2 }
 0x106   : > { %v18272_v42 = vsel %vm413_vm1, %v417_v21, %v419_v31  ;;  %v18275_v43 = vsel %vm573_vm2, %v575_v22, %v577_v32  ;;  %v609_v44 = vrot.slane %v18252_v30, 7  ;;  %v18279_v45 = vsel %vm448_vm3, %v452_v23, %v454_v33 }
 0x107   : > { %v541_v46 = vsel %vm538_vm0, %v539_v36, %v540_v20  ;;  %v416_v47 = vsel %vm413_vm1, %v414_v24, %v415_v37  ;;  %v418_v48 = vsel %vm413_vm1, %v415_v37, %v417_v21  ;;  %v576_v49 = vsel %vm573_vm2, %v574_v38, %v575_v22  ;;  %v17274_v24 = vld [vmem:[%s23664_s2 + $0x98] sm:$0xff]  }
 0x108   : > { %v16412_v53 = vpack.i.bf16 %v541_v46, %v539_v36  ;;  %v16417_v54 = vpack.i.bf16 %v418_v48, %v416_v47  ;;  %v16422_v55 = vpack.i.bf16 %v576_v49, %v574_v38  ;;  %v18295_v56 = vsel %vm448_vm3, %v449_v25, %v450_v39  ;;  %v17275_v25 = vld [vmem:[%s23664_s2 + $0x18] sm:$0xff]   ;;  %v17276_v38 = vld [vmem:[%s23664_s2 + $0xe0] sm:$0xff]   ;;  %14957 = vmatpush3.bf16.msra.mxu1 %v17274_v24  ;;  %v17282_v24 = vld [vmem:[%s23664_s2 + $0xa8] sm:$0xff]  }
 0x109   : > { %v18300_v58 = vpop.f32.mrb[4].mxu0  ;;  %v453_v59 = vsel %vm448_vm3, %v450_v39, %v452_v23  ;;  %v611_v60 = vsel %vm608_vm4, %v609_v44, %v610_v27  ;;  %v18307_v61 = vsel %vm538_vm0, %v540_v20, %v542_v34  ;;  %v612_v62 = vrot.slane %v18245_v26, 7  ;;  %v17273_v23 = vld [vmem:[%s23664_s2 + $0x58] sm:$0xff]   ;;  %14958 = vmatprep.subr.bf16.mxu1 %v17276_v38 }
 0x10a   : > { %16413 = vrot.lane.b32.xlu0 %v16412_v53, %s18098_s10  ;;  %16418 = vrot.lane.b32.xlu1 %v16417_v54, %s18098_s10  ;;  %v18312_v63 = vpop.f32.mrb[5].mxu0  ;;  %v16427_v0 = vpack.i.bf16 %v453_v59, %v18295_v56  ;;  %v18315_v1 = vpack.i.bf16 %v611_v60, %v609_v44  ;;  %v484_v3 = vrot.slane %v18252_v30, 3  ;;  %v487_v4 = vrot.slane %v18245_v26, 3 }
 0x10b   : > { %v18319_v5 = vpop.f32.mrb[6].mxu0  ;;  %v421_v6 = vrot.slane %v18312_v63, 1  ;;  %v579_v7 = vrot.slane %v18312_v63, 6  ;;  %v456_v8 = vrot.slane %v18312_v63, 2  ;;  %v544_v9 = vrot.slane %v18312_v63, 5  ;;  %14978 = vmatprep.subr.bf16.mxu0 %v17273_v23 }
 0x10c   : > { %v529_v10 = vrot.slane %v18319_v5, 4  ;;  %v550_v12 = vrot.slane %v18319_v5, 5  ;;  %v585_v13 = vrot.slane %v18319_v5, 6  ;;  %v620_v14 = vrot.slane %v18319_v5, 7  ;;  %v18329_v15 = vpop.f32.mrb[7].mxu0  ;;  %14979 = vmatpush3.bf16.msra.mxu0 %v17275_v25  ;;  %14959 = vmatpush3.bf16.msra.mxu1 %v17278_v51  ;;  %v18564_v5 = vld [vmem:[%s18216_s14] sm:$0xff] }
 0x10d   : > { %v422_v17 = vsel %vm413_vm1, %v419_v31, %v421_v6  ;;  %v580_v20 = vsel %vm573_vm2, %v577_v32, %v579_v7  ;;  %v18339_v21 = vsel %vm448_vm3, %v454_v33, %v456_v8  ;;  %v18342_v22 = vsel %vm538_vm0, %v542_v34, %v544_v9 }
 0x10e   : > { %16423 = vrot.lane.b32.xlu0 %v16422_v55, %s18099_s20  ;;  %v16447_v29 = vpack.i.bf16 %v422_v17, %v18272_v42  ;;  %v16452_v31 = vpack.i.bf16 %v580_v20, %v18275_v43  ;;  %v16457_v32 = vpack.i.bf16 %v18339_v21, %v18279_v45  ;;  %v16437_v33 = vpack.i.bf16 %v18342_v22, %v18307_v61  ;;  %v17286_v45 = vld [vmem:[%s23664_s2 + $0xb0] sm:$0xff]   ;;  %v17289_v61 = vld [vmem:[%s23664_s2 + $0x78] sm:$0xff]  }
 0x10f   : > { %v18363_v34 = vsel %vm608_vm4, %v610_v27, %v612_v62  ;;  %v614_v35 = vrot.slane %v18312_v63, 7  ;;  %v486_v36 = vsel %vm483_vm5, %v484_v3, %v485_v28  ;;  %v18372_v37 = vsel %vm483_vm5, %v485_v28, %v487_v4  ;;  %v17277_v27 = vld [vmem:[%s23664_s2 + $0x60] sm:$0xff]   ;;  %v17287_v21 = vld [vmem:[%s23664_s2 + $0x30] sm:$0xff]  }
 0x110   : > { %16448 = vrot.lane.b32.xlu1 %v16447_v29, %s18098_s10  ;;  %v18381_v39 = vpack.i.bf16 %v486_v36, %v484_v3  ;;  %v489_v40 = vrot.slane %v18312_v63, 3  ;;  %v546_v41 = vrot.slane %v18329_v15, 5  ;;  %v548_v28 = vrot.slane %v18300_v58, 5  ;;  %14980 = vmatprep.subr.bf16.mxu0 %v17277_v27  ;;  %v17281_v3 = vld [vmem:[%s23664_s2 + $0x68] sm:$0xff]   ;;  %v17285_v36 = vld [vmem:[%s23664_s2 + $0x70] sm:$0xff]  }
 0x111   : > { %v18387_v42 = vsel %vm608_vm4, %v612_v62, %v614_v35  ;;  %v423_v43 = vrot.slane %v18329_v15, 1  ;;  %v425_v44 = vrot.slane %v18300_v58, 1  ;;  %v581_v46 = vrot.slane %v18329_v15, 6  ;;  %14981 = vmatpush3.bf16.msra.mxu0 %v17279_v52 }
 0x112   : > { %16428 = vrot.lane.b32.xlu0 %v16427_v0, %s18099_s20  ;;  %v16462_v47 = vpack.i.bf16 %v18387_v42, %v18363_v34  ;;  %v18396_v48 = vsel %vm483_vm5, %v487_v4, %v489_v40  ;;  %v18399_v49 = vsel %vm538_vm0, %v544_v9, %v546_v41  ;;  %v18402_v50 = vsel %vm538_vm0, %v546_v41, %v548_v28  ;;  %v17280_v0 = vld [vmem:[%s23664_s2 + $0xe8] sm:$0xff]   ;;  %v17290_v34 = vld [vmem:[%s23664_s2 + $0xb8] sm:$0xff]  }
 0x113   : > { %v16467_v53 = vpack.i.bf16 %v18396_v48, %v18372_v37  ;;  %v16472_v54 = vpack.i.bf16 %v18402_v50, %v18399_v49  ;;  %v18415_v55 = vsel %vm413_vm1, %v421_v6, %v423_v43  ;;  %v18418_v56 = vsel %vm413_vm1, %v423_v43, %v425_v44  ;;  %14960 = vmatprep.subr.bf16.mxu1 %v17280_v0  ;;  %v17291_v42 = vld [vmem:[%s23664_s2 + $0x38] sm:$0xff]   ;;  %v18568_v37 = vld [vmem:[%s18216_s14 + $0x8] sm:$0xff] }
 0x114   : > { %16453 = vrot.lane.b32.xlu1 %v16452_v31, %s18099_s20  ;;  %v16477_v57 = vpack.i.bf16 %v18418_v56, %v18415_v55  ;;  %v18424_v59 = vsel %vm573_vm2, %v579_v7, %v581_v46  ;;  %v583_v60 = vrot.slane %v18300_v58, 6  ;;  %v458_v62 = vrot.slane %v18329_v15, 2  ;;  %14982 = vmatprep.subr.bf16.mxu0 %v17281_v3 }
 0x115   : > { %v460_v4 = vrot.slane %v18300_v58, 2  ;;  %v616_v6 = vrot.slane %v18329_v15, 7  ;;  %v618_v7 = vrot.slane %v18300_v58, 7  ;;  %v491_v9 = vrot.slane %v18329_v15, 3  ;;  %14961 = vmatpush3.bf16.msra.mxu1 %v17282_v24 }
 0x116   : > { %16433 = vrot.lane.b32.xlu0 %v18315_v1, %s18100_s26  ;;  %v18441_v16 = vsel %vm573_vm2, %v581_v46, %v583_v60  ;;  %v18446_v17 = vsel %vm448_vm3, %v456_v8, %v458_v62  ;;  %v493_v20 = vrot.slane %v18300_v58, 3  ;;  %v551_v23 = vsel %vm538_vm0, %v548_v28, %v550_v12  ;;  %v17283_v1 = vld [vmem:[%s23664_s2 + $0x28] sm:$0xff]   ;;  %v17284_v12 = vld [vmem:[%s23664_s2 + $0xf0] sm:$0xff]  }
 0x117   : > { %v16482_v25 = vpack.i.bf16 %v18441_v16, %v18424_v59  ;;  %v461_v8 = vsel %vm448_vm3, %v458_v62, %v460_v4  ;;  %v617_v29 = vsel %vm608_vm4, %v614_v35, %v616_v6  ;;  %v619_v31 = vsel %vm608_vm4, %v616_v6, %v618_v7  ;;  %14983 = vmatpush3.bf16.msra.mxu0 %v17283_v1  ;;  %v17288_v59 = vld [vmem:[%s23664_s2 + $0xf8] sm:$0xff]   ;;  %v17293_v6 = vld [vmem:[%s23664_s2 + $0x1c0] sm:$0xff]  }
 0x118   : > { %16458 = vrot.lane.b32.xlu1 %v16457_v32, %s18099_s20  ;;  %v16487_v38 = vpack.i.bf16 %v461_v8, %v18446_v17  ;;  %v16492_v27 = vpack.i.bf16 %v619_v31, %v617_v29  ;;  %v492_v35 = vsel %vm483_vm5, %v489_v40, %v491_v9  ;;  %v494_v41 = vsel %vm483_vm5, %v491_v9, %v493_v20 }
 0x119   : > { %v16497_v28 = vpack.i.bf16 %v494_v41, %v492_v35  ;;  %v16502_v43 = vpack.i.bf16 %v425_v44, %v551_v23  ;;  %v586_v46 = vsel %vm573_vm2, %v583_v60, %v585_v13  ;;  %v621_v51 = vsel %vm608_vm4, %v618_v7, %v620_v14  ;;  %14962 = vmatprep.subr.bf16.mxu1 %v17284_v12 }
 0x11a   : > { %16438 = vrot.lane.b32.xlu0 %v16437_v33, %s18098_s10  ;;  %v16507_v32 = vpack.i.bf16 %v460_v4, %v586_v46  ;;  %v16512_v13 = vpack.i.bf16 %v493_v20, %v621_v51  ;;  %v519_v40 = vrot.slane %v18235_v18, 4  ;;  %v518_v14 = vrot.slane %v18252_v30, 4  ;;  %14984 = vmatprep.subr.bf16.mxu0 %v17285_v36 }
 0x11b   : > { %v521_v44 = vrot.slane %v18245_v26, 4  ;;  %v523_v52 = vrot.slane %v18312_v63, 4  ;;  %v527_v33 = vrot.slane %v18300_v58, 4  ;;  %v525_v60 = vrot.slane %v18329_v15, 4  ;;  %14963 = vmatpush3.bf16.msra.mxu1 %v17286_v45  ;;  %14985 = vmatpush3.bf16.msra.mxu0 %v17287_v21 }
 0x11c   : > { %16463 = vrot.lane.b32.xlu1 %v16462_v47, %s18100_s26  ;;  %v18509_v22 = vsel %vm517_vm6, %v518_v14, %v519_v40  ;;  %14964 = vmatprep.subr.bf16.mxu1 %v17288_v59  ;;  %v1673_v48 = vrot.slane %v18568_v37, 1  ;;  %v262_v49 = vlaneseq  ;;  %v18572_v50 = vrot.slane %v23671_v11, 7 }
 0x11d   : > { %v18514_v62 = vsel %vm517_vm6, %v519_v40, %v521_v44  ;;  %v18517_v0 = vsel %vm517_vm6, %v521_v44, %v523_v52  ;;  %v18528_v47 = vsel %vm517_vm6, %v523_v52, %v525_v60  ;;  %v18531_v3 = vsel %vm517_vm6, %v525_v60, %v527_v33  ;;  %14986 = vmatprep.subr.bf16.mxu0 %v17289_v61 }
 0x11e   : > { %16443 = vrot.lane.b32.xlu0 %v18381_v39, %s18100_s26  ;;  %v18536_v4 = vsel %vm517_vm6, %v527_v33, %v529_v10  ;;  %v17292_v39 = vld [vmem:[%s23664_s2 + $0x140] sm:$0xff]   ;;  %v1661_v10 = vrot.slane %v18564_v5, 7  ;;  %v1672_v7 = vrot.slane %v18564_v5, 1  ;;  %v1663_v9 = vrot.slane %v18568_v37, 7 }
 0x11f   : > { %14965 = vmatpush3.bf16.msra.mxu1 %v17290_v34  ;;  %14987 = vmatpush3.bf16.msra.mxu0 %v17291_v42  ;;  %v17348_v5 = vld [vmem:[%s23663_s1 + $0x40] sm:$0xff]  }
 0x120   : > { %16468 = vrot.lane.b32.xlu1 %v16467_v53, %s18100_s26  ;;  %14994 = vmatprep.subr.bf16.mxu1 %v17292_v39  ;;  %v18575_v53 = vrot.slane %v23671_v11, 1  ;;  %v1662_v56 = vsel %vm608_vm4, %v18572_v50, %v1661_v10 }
 0x121   : > { %15016 = vmatprep.subr.bf16.mxu0 %v17293_v6 }
 0x122   : > { %16473 = vrot.lane.b32.xlu0 %v16472_v54, %s18098_s10  ;;  %v18577_v54 = vshrl.u32 %v262_v49, 7 }
 0x124   : > { %16478 = vrot.lane.b32.xlu1 %v16477_v57, %s18098_s10  ;;  %v18580_v55 = vadd.s32 8, %v18577_v54  ;;  %vm1655_vm7 = vcmp.eq.s32.totalorder %v18577_v54, 0  ;;  %v1676_v57 = vsel %vm413_vm1, %v1673_v48, %v18575_v53 }
 0x125   : > { %v18596_v16 = vsel %vm1655_vm7, -inf, %v1662_v56 }
 0x126   : > { %16483 = vrot.lane.b32.xlu0 %v16482_v25, %s18099_s20  ;;  %vm1670_vm8 = vcmp.eq.s32.totalorder %v18580_v55, 15 }
 0x127   : > { %v18600_v17 = vsel %vm1670_vm8, -inf, %v1676_v57 }
 0x128   : > { %16488 = vrot.lane.b32.xlu1 %v16487_v38, %s18099_s20 }
 0x12a   : > { %16493 = vrot.lane.b32.xlu0 %v16492_v27, %s18100_s26 }
 0x12c   : > { %16498 = vrot.lane.b32.xlu1 %v16497_v28, %s18100_s26 }
 0x12e   : > { %16503 = vrot.lane.b32.xlu0 %v16502_v43, %s18098_s10 }
 0x130   : > { %16508 = vrot.lane.b32.xlu1 %v16507_v32, %s18099_s20 }
 0x132   : > { %16513 = vrot.lane.b32.xlu0 %v16512_v13, %s18100_s26 }
 0x17c   : > { %v16414_v20 = vpop.permute.xlu0 %16413  ;;  %v16419_v23 = vpop.permute.xlu1 %16418 }
 0x17d   : > { %v16415_v25 = vunpack.i.l.bf16 %v16414_v20  ;;  %v16416_v29 = vunpack.i.h.bf16 %v16414_v20  ;;  %v16421_v31 = vunpack.i.h.bf16 %v16419_v23  ;;  %v16420_v12 = vunpack.i.l.bf16 %v16419_v23 }
 0x17f   : > { %v667_v41 = vsel %vm643_vm9, %v518_v14, %v16415_v25  ;;  %v668_v45 = vsel %vm643_vm9, %v18509_v22, %v16416_v29  ;;  %v645_v21 = vsel %vm643_vm9, %v18252_v30, %v16421_v31  ;;  %v644_v40 = vsel %vm643_vm9, %v18237_v19, %v16420_v12 }
 0x180   : > { %v16424_v24 = vpop.permute.xlu0 %16423 }
 0x181   : > { %v16426_v36 = vunpack.i.h.bf16 %v16424_v24  ;;  %v16425_v38 = vunpack.i.l.bf16 %v16424_v24 }
 0x182   : > { %v16449_v1 = vpop.permute.xlu1 %16448 }
 0x183   : > { %v16451_v27 = vunpack.i.h.bf16 %v16449_v1  ;;  %v16450_v28 = vunpack.i.l.bf16 %v16449_v1  ;;  %v674_v44 = vsel %vm651_vm10, %v667_v41, %v16425_v38  ;;  %v675_v52 = vsel %vm651_vm10, %v668_v45, %v16426_v36 }
 0x184   : > { %v16429_v8 = vpop.permute.xlu0 %16428 }
 0x185   : > { %v16431_v43 = vunpack.i.h.bf16 %v16429_v8  ;;  %v16430_v46 = vunpack.i.l.bf16 %v16429_v8  ;;  %v647_v14 = vsel %vm643_vm9, %v18245_v26, %v16451_v27  ;;  %v646_v30 = vsel %vm643_vm9, %v18235_v18, %v16450_v28 }
 0x186   : > { %v16454_v35 = vpop.permute.xlu1 %16453 }
 0x187   : > { %v652_v34 = vsel %vm651_vm10, %v644_v40, %v16430_v46  ;;  %v653_v19 = vsel %vm651_vm10, %v645_v21, %v16431_v43  ;;  %v16456_v6 = vunpack.i.h.bf16 %v16454_v35  ;;  %v16455_v49 = vunpack.i.l.bf16 %v16454_v35 }
 0x188   : > { %v16434_v51 = vpop.permute.xlu0 %16433 }
 0x189   : > { %v16436_v32 = vunpack.i.h.bf16 %v16434_v51  ;;  %v16435_v13 = vunpack.i.l.bf16 %v16434_v51 }
 0x18a   : > { %v16459_v59 = vpop.permute.xlu1 %16458 }
 0x18b   : > { %v682_v61 = vsel %vm659_vm11, %v675_v52, %v16436_v32  ;;  %v681_v22 = vsel %vm659_vm11, %v674_v44, %v16435_v13  ;;  %v16461_v33 = vunpack.i.h.bf16 %v16459_v59  ;;  %v16460_v60 = vunpack.i.l.bf16 %v16459_v59 }
 0x18c   : > { %v689_v42 = vpack.c.bf16 %v682_v61, %v681_v22  ;;  %v16439_v39 = vpop.permute.xlu0 %16438 }
 0x18d   : > { %v16441_v56 = vunpack.i.h.bf16 %v16439_v39  ;;  %v16440_v26 = vunpack.i.l.bf16 %v16439_v39  ;;  %v654_v57 = vsel %vm651_vm10, %v646_v30, %v16460_v60  ;;  %v655_v20 = vsel %vm651_vm10, %v647_v14, %v16461_v33 }
 0x18e   : > { %v16464_v23 = vpop.permute.xlu1 %16463  ;;  %v780_v24 = vshrl.u32 %v689_v42, 16  ;;  %v783_v1 = vshll.u32 %v689_v42, 16 }
 0x18f   : > { %v669_v18 = vsel %vm643_vm9, %v18514_v62, %v16440_v26  ;;  %v670_v25 = vsel %vm643_vm9, %v18517_v0, %v16441_v56  ;;  %v16466_v8 = vunpack.i.h.bf16 %v16464_v23  ;;  %v16465_v29 = vunpack.i.l.bf16 %v16464_v23 }
 0x190   : > { %v676_v31 = vsel %vm651_vm10, %v669_v18, %v16455_v49  ;;  %v677_v12 = vsel %vm651_vm10, %v670_v25, %v16456_v6  ;;  %v16444_v36 = vpop.permute.xlu0 %16443  ;;  %v782_v38 = vrot.slane %v780_v24, 6  ;;  %v785_v27 = vrot.slane %v783_v1, 7 }
 0x191   : > { %v683_v35 = vsel %vm659_vm11, %v676_v31, %v16465_v29  ;;  %v684_v41 = vsel %vm659_vm11, %v677_v12, %v16466_v8  ;;  %v16446_v28 = vunpack.i.h.bf16 %v16444_v36  ;;  %v16445_v43 = vunpack.i.l.bf16 %v16444_v36 }
 0x192   : > { %v691_v62 = vpack.c.bf16 %v684_v41, %v683_v35  ;;  %v16469_v46 = vpop.permute.xlu1 %16468  ;;  %v786_v0 = vor.u32 %v785_v27, %v782_v38  ;;  %v943_v51 = vrot.slane %v780_v24, 2  ;;  %v944_v45 = vrot.slane %v783_v1, 3 }
 0x193   : > { %v661_v21 = vsel %vm659_vm11, %v653_v19, %v16446_v28  ;;  %v660_v32 = vsel %vm659_vm11, %v652_v34, %v16445_v43  ;;  %v16471_v13 = vunpack.i.h.bf16 %v16469_v46  ;;  %v16470_v40 = vunpack.i.l.bf16 %v16469_v46 }
 0x194   : > { %v688_v44 = vpack.c.bf16 %v661_v21, %v660_v32  ;;  %v16474_v52 = vpop.permute.xlu0 %16473  ;;  %v788_v14 = vshrl.u32 %v691_v62, 16  ;;  %v791_v59 = vshll.u32 %v691_v62, 16  ;;  %v945_v61 = vor.u32 %v944_v45, %v943_v51 }
 0x195   : > { %v662_v22 = vsel %vm659_vm11, %v654_v57, %v16470_v40  ;;  %v663_v33 = vsel %vm659_vm11, %v655_v20, %v16471_v13  ;;  %v16476_v60 = vunpack.i.h.bf16 %v16474_v52  ;;  %v16475_v30 = vunpack.i.l.bf16 %v16474_v52 }
 0x196   : > { %v690_v42 = vpack.c.bf16 %v663_v33, %v662_v22  ;;  %v16479_v39 = vpop.permute.xlu1 %16478  ;;  %v790_v6 = vrot.slane %v788_v14, 6  ;;  %v793_v49 = vrot.slane %v791_v59, 7  ;;  %v946_v19 = vrot.slane %v788_v14, 2 }
 0x197   : > { %v671_v34 = vsel %vm643_vm9, %v18528_v47, %v16475_v30  ;;  %v672_v56 = vsel %vm643_vm9, %v18531_v3, %v16476_v60  ;;  %v16481_v26 = vunpack.i.h.bf16 %v16479_v39  ;;  %v16480_v23 = vunpack.i.l.bf16 %v16479_v39  ;;  %v17294_v39 = vld [vmem:[%s23664_s2 + $0x100] sm:$0xff]  }
 0x198   : > { %v16484_v24 = vpop.permute.xlu0 %16483  ;;  %v18639_v1 = vor.u32 %v793_v49, %v790_v6  ;;  %v947_v57 = vrot.slane %v791_v59, 3  ;;  %v763_v20 = vshrl.u32 %v688_v44, 16  ;;  %v766_v18 = vshll.u32 %v688_v44, 16 }
 0x199   : > { %v649_v25 = vsel %vm643_vm9, %v18329_v15, %v16481_v26  ;;  %v648_v8 = vsel %vm643_vm9, %v18312_v63, %v16480_v23  ;;  %v16486_v29 = vunpack.i.h.bf16 %v16484_v24  ;;  %v16485_v31 = vunpack.i.l.bf16 %v16484_v24  ;;  %v17296_v23 = vld [vmem:[%s23664_s2 + $0x148] sm:$0xff]  }
 0x19a   : > { %v16489_v47 = vpop.permute.xlu1 %16488  ;;  %v795_v3 = vsel %vm761_vm12, %v786_v0, %v18639_v1  ;;  %v18647_v12 = vor.u32 %v947_v57, %v946_v19  ;;  %v765_v36 = vrot.slane %v763_v20, 6  ;;  %v768_v38 = vrot.slane %v766_v18, 7 }
 0x19b   : > { %v678_v27 = vsel %vm651_vm10, %v671_v34, %v16485_v31  ;;  %v679_v35 = vsel %vm651_vm10, %v672_v56, %v16486_v29  ;;  %v16491_v41 = vunpack.i.h.bf16 %v16489_v47  ;;  %v16490_v28 = vunpack.i.l.bf16 %v16489_v47  ;;  %926 = vmatprep.mubr.bf16.mxu1 %v795_v3  ;;  %v17295_v56 = vld [vmem:[%s23664_s2 + $0x180] sm:$0xff]  }
 0x19c   : > { %v949_v63 = vsel %vm935_vm13, %v945_v61, %v18647_v12  ;;  %v16494_v15 = vpop.permute.xlu0 %16493  ;;  %v769_v43 = vor.u32 %v768_v38, %v765_v36  ;;  %v771_v62 = vshrl.u32 %v690_v42, 16  ;;  %v774_v46 = vshll.u32 %v690_v42, 16 }
 0x19d   : > { %v656_v0 = vsel %vm651_vm10, %v648_v8, %v16490_v28  ;;  %v657_v51 = vsel %vm651_vm10, %v649_v25, %v16491_v41  ;;  %1080 = vmatprep.mubr.bf16.mxu0 %v949_v63  ;;  %v16496_v45 = vunpack.i.h.bf16 %v16494_v15  ;;  %v16495_v21 = vunpack.i.l.bf16 %v16494_v15  ;;  %v17298_v8 = vld [vmem:[%s23664_s2 + $0x108] sm:$0xff]   ;;  %v17300_v28 = vld [vmem:[%s23664_s2 + $0x150] sm:$0xff]  }
 0x19e   : > { %v16499_v32 = vpop.permute.xlu1 %16498  ;;  %v773_v13 = vrot.slane %v771_v62, 6  ;;  %v776_v40 = vrot.slane %v774_v46, 7  ;;  %v936_v44 = vrot.slane %v763_v20, 2  ;;  %v937_v52 = vrot.slane %v766_v18, 3  ;;  %v17297_v18 = vld [vmem:[%s23664_s2 + $0x1c8] sm:$0xff]  }
 0x19f   : > { %v685_v14 = vsel %vm659_vm11, %v678_v27, %v16495_v21  ;;  %v686_v59 = vsel %vm659_vm11, %v679_v35, %v16496_v45  ;;  %v16501_v61 = vunpack.i.h.bf16 %v16499_v32  ;;  %v16500_v22 = vunpack.i.l.bf16 %v16499_v32 }
 0x1a0   : > { %v693_v33 = vpack.c.bf16 %v686_v59, %v685_v14  ;;  %v18657_v60 = vor.u32 %v776_v40, %v773_v13  ;;  %v938_v30 = vor.u32 %v937_v52, %v936_v44  ;;  %v939_v42 = vrot.slane %v771_v62, 2  ;;  %v16504_v6 = vpop.permute.xlu0 %16503  ;;  %v17299_v62 = vld [vmem:[%s23664_s2 + $0x188] sm:$0xff]   ;;  %v17302_v13 = vld [vmem:[%s23664_s2 + $0x110] sm:$0xff]  }
 0x1a1   : > { %v664_v49 = vsel %vm659_vm11, %v656_v0, %v16500_v22  ;;  %v665_v19 = vsel %vm659_vm11, %v657_v51, %v16501_v61  ;;  %v940_v34 = vrot.slane %v774_v46, 3  ;;  %v16506_v26 = vunpack.i.h.bf16 %v16504_v6  ;;  %v17301_v0 = vld [vmem:[%s23664_s2 + $0x1d0] sm:$0xff]  }
 0x1a2   : > { %v692_v24 = vpack.c.bf16 %v665_v19, %v664_v49  ;;  %v778_v57 = vsel %vm761_vm12, %v769_v43, %v18657_v60  ;;  %v16505_v20 = vunpack.i.l.bf16 %v16504_v6  ;;  %v16509_v25 = vpop.permute.xlu1 %16508  ;;  %v1132_v29 = vshrl.u32 %v693_v33, 16 }
 0x1a3   : > { %927 = vmatmul.mubr.bf16.vlgmr.msra.gmra.mrb[0].mxu1 %v778_v57  ;;  %v941_v31 = vor.u32 %v940_v34, %v939_v42  ;;  %v650_v47 = vsel %vm643_vm9, %v18300_v58, %v16506_v26  ;;  %v16511_v3 = vunpack.i.h.bf16 %v16509_v25  ;;  %v16510_v36 = vunpack.i.l.bf16 %v16509_v25  ;;  %v17303_v42 = vld [vmem:[%s23664_s2 + $0x190] sm:$0xff]   ;;  %v17305_v26 = vld [vmem:[%s23664_s2 + $0x1d8] sm:$0xff]  }
 0x1a4   : > { %v1123_v38 = vshrl.u32 %v692_v24, 16  ;;  %v1126_v27 = vshll.u32 %v692_v24, 16  ;;  %14995 = vmatpush3.bf16.msra.mxu1 %v17294_v39  ;;  %v673_v35 = vsel %vm643_vm9, %v18536_v4, %v16505_v20  ;;  %v16514_v41 = vpop.permute.xlu0 %16513  ;;  %v1134_v63 = vrot.slane %v1132_v29, 2  ;;  %v17308_v24 = vld [vmem:[%s23664_s2 + $0x160] sm:$0xff]  }
 0x1a5   : > { %v942_v15 = vsel %vm935_vm13, %v938_v30, %v941_v31  ;;  %14996 = vmatprep.subr.bf16.mxu1 %v17296_v23  ;;  %v658_v43 = vsel %vm651_vm10, %v650_v47, %v16511_v3  ;;  %v680_v58 = vsel %vm651_vm10, %v673_v35, %v16510_v36  ;;  %v16516_v46 = vunpack.i.h.bf16 %v16514_v41  ;;  %v17306_v23 = vld [vmem:[%s23664_s2 + $0x118] sm:$0xff]  }
 0x1a6   : > { %1081 = vmatmul.mubr.bf16.vlgmr.msra.gmra.mrb[8].mxu0 %v942_v15  ;;  %v16515_v4 = vunpack.i.l.bf16 %v16514_v41  ;;  %v1135_v51 = vshll.u32 %v693_v33, 16  ;;  %v1318_v45 = vrot.slane %v1132_v29, 6  ;;  %v1125_v21 = vrot.slane %v1123_v38, 2  ;;  %v17304_v33 = vld [vmem:[%s23664_s2 + $0x158] sm:$0xff]   ;;  %v17313_v15 = vld [vmem:[%s23664_s2 + $0x1e8] sm:$0xff]  }
 0x1a7   : > { %15017 = vmatpush3.bf16.msra.mxu0 %v17295_v56  ;;  %v666_v32 = vsel %vm659_vm11, %v658_v43, %v16516_v46  ;;  %v1128_v40 = vrot.slane %v1126_v27, 3  ;;  %v1314_v44 = vrot.slane %v1123_v38, 6  ;;  %v1315_v52 = vrot.slane %v1126_v27, 7  ;;  %v17309_v38 = vld [vmem:[%s23664_s2 + $0x1e0] sm:$0xff]   ;;  %v17312_v27 = vld [vmem:[%s23664_s2 + $0x168] sm:$0xff]   ;;  %v17317_v46 = vld [vmem:[%s23664_s2 + $0x1f0] sm:$0xff]  }
 0x1a8   : > { %15018 = vmatprep.subr.bf16.mxu0 %v17297_v18  ;;  %14997 = vmatpush3.bf16.msra.mxu1 %v17298_v8  ;;  %v687_v14 = vsel %vm659_vm11, %v680_v58, %v16515_v4  ;;  %v694_v59 = vpack.c.bf16 %v666_v32, %v666_v32  ;;  %v1137_v61 = vrot.slane %v1135_v51, 3  ;;  %v1319_v22 = vrot.slane %v1135_v51, 7  ;;  %v17314_v43 = vld [vmem:[%s23664_s2 + $0x128] sm:$0xff]   ;;  %v17316_v58 = vld [vmem:[%s23664_s2 + $0x170] sm:$0xff]   ;;  %v17324_v32 = vld [vmem:[%s23664_s2 + $0x240] sm:$0xff]  }
 0x1a9   : > { %v695_v30 = vpack.c.bf16 %v687_v14, %v687_v14  ;;  %14998 = vmatprep.subr.bf16.mxu1 %v17300_v28  ;;  %v1129_v39 = vor.u32 %v1128_v40, %v1125_v21  ;;  %v1316_v6 = vor.u32 %v1315_v52, %v1314_v44  ;;  %v17311_v28 = vld [vmem:[%s23664_s2 + $0x1a0] sm:$0xff]   ;;  %v17318_v4 = vld [vmem:[%s23664_s2 + $0x130] sm:$0xff]   ;;  %v17322_v21 = vld [vmem:[%s23664_s2 + $0x138] sm:$0xff]  }
 0x1aa   : > { %v1497_v49 = vshrl.u32 %v694_v59, 16  ;;  %v1500_v19 = vshll.u32 %v694_v59, 16  ;;  %v1138_v34 = vor.u32 %v1137_v61, %v1134_v63  ;;  %v1320_v56 = vor.u32 %v1319_v22, %v1318_v45  ;;  %v17319_v51 = vld [vmem:[%s23664_s2 + $0x1b0] sm:$0xff]   ;;  %v17321_v45 = vld [vmem:[%s23664_s2 + $0x1f8] sm:$0xff]   ;;  %v17325_v40 = vld [vmem:[%s23664_s2 + $0x200] sm:$0xff]  }
 0x1ab   : > { %15019 = vmatpush3.bf16.msra.mxu0 %v17299_v62  ;;  %v1130_v57 = vsel %vm935_vm13, %v941_v31, %v1129_v39  ;;  %v18717_v20 = vsel %vm761_vm12, %v18657_v60, %v1316_v6  ;;  %v1506_v18 = vshrl.u32 %v695_v30, 16  ;;  %v1509_v25 = vshll.u32 %v695_v30, 16  ;;  %v17307_v31 = vld [vmem:[%s23664_s2 + $0x198] sm:$0xff]   ;;  %v17315_v62 = vld [vmem:[%s23664_s2 + $0x1a8] sm:$0xff]   ;;  %v17326_v52 = vld [vmem:[%s23665_s3] sm:$0xff]  }
 0x1ac   : > { %15020 = vmatprep.subr.bf16.mxu0 %v17301_v0  ;;  %14999 = vmatpush3.bf16.msra.mxu1 %v17302_v13  ;;  %v1139_v8 = vsel %vm935_vm13, %v18647_v12, %v1138_v34  ;;  %v1321_v29 = vsel %vm761_vm12, %v18639_v1, %v1320_v56  ;;  %v1499_v47 = vrot.slane %v1497_v49, 2  ;;  %v1502_v3 = vrot.slane %v1500_v19, 3  ;;  %v17310_v12 = vld [vmem:[%s23664_s2 + $0x120] sm:$0xff]   ;;  %v17320_v0 = vld [vmem:[%s23664_s2 + $0x178] sm:$0xff]   ;;  %v17327_v44 = vld [vmem:[%s23664_s2 + $0x248] sm:$0xff]  }
 0x1ad   : > { %1270 = vmatprep.mubr.bf16.mxu1 %v1139_v8  ;;  %1452 = vmatprep.mubr.bf16.mxu0 %v1321_v29  ;;  %v1508_v60 = vrot.slane %v1506_v18, 2  ;;  %v1511_v36 = vrot.slane %v1509_v25, 3  ;;  %v17323_v13 = vld [vmem:[%s23664_s2 + $0x1b8] sm:$0xff]   ;;  %v17328_v14 = vld [vmem:[%s23664_s2 + $0x208] sm:$0xff]   ;;  %v17330_v59 = vld [vmem:[%s23664_s2 + $0x250] sm:$0xff]  }
 0x1ae   : > { %15000 = vmatprep.subr.bf16.mxu1 %v17304_v33  ;;  %v1503_v1 = vor.u32 %v1502_v3, %v1499_v47  ;;  %v17329_v61 = vld [vmem:[%s23665_s3 + $0x8] sm:$0xff]   ;;  %v17331_v22 = vld [vmem:[%s23664_s2 + $0x210] sm:$0xff]   ;;  %v17333_v33 = vld [vmem:[%s23664_s2 + $0x258] sm:$0xff]  }
 0x1af   : > { %15021 = vmatpush3.bf16.msra.mxu0 %v17303_v42  ;;  %v1512_v35 = vor.u32 %v1511_v36, %v1508_v60  ;;  %v17332_v30 = vld [vmem:[%s23665_s3 + $0x10] sm:$0xff]   ;;  %v17334_v42 = vld [vmem:[%s23664_s2 + $0x218] sm:$0xff]   ;;  %v17337_v49 = vld [vmem:[%s23664_s2 + $0x220] sm:$0xff]  }
 0x1b0   : > { %15022 = vmatprep.subr.bf16.mxu0 %v17305_v26  ;;  %15001 = vmatpush3.bf16.msra.mxu1 %v17306_v23  ;;  %v18736_v41 = vsel %vm935_vm13, %v1129_v39, %v1503_v1  ;;  %v17336_v39 = vld [vmem:[%s23664_s2 + $0x260] sm:$0xff]   ;;  %v17335_v6 = vld [vmem:[%s23665_s3 + $0x18] sm:$0xff]   ;;  %v17339_v19 = vld [vmem:[%s23664_s2 + $0x268] sm:$0xff]  }
 0x1b1   : > { %15002 = vmatprep.subr.bf16.mxu1 %v17308_v24  ;;  %v1513_v63 = vsel %vm935_vm13, %v1138_v34, %v1512_v35  ;;  %v17338_v34 = vld [vmem:[%s23665_s3 + $0x20] sm:$0xff]   ;;  %v17340_v56 = vld [vmem:[%s23664_s2 + $0x228] sm:$0xff]   ;;  %v17342_v26 = vld [vmem:[%s23664_s2 + $0x270] sm:$0xff]  }
 0x1b2   : > { %v17341_v23 = vld [vmem:[%s23665_s3 + $0x28] sm:$0xff]   ;;  %v17343_v24 = vld [vmem:[%s23664_s2 + $0x230] sm:$0xff]   ;;  %v17346_v25 = vld [vmem:[%s23664_s2 + $0x238] sm:$0xff]  }
 0x1b3   : > { %15023 = vmatpush3.bf16.msra.mxu0 %v17307_v31  ;;  %v17344_v18 = vld [vmem:[%s23665_s3 + $0x30] sm:$0xff]   ;;  %v18030_v8 = vld [vmem:[%s18216_s14] sm:$0xff]  ;;  %v18031_v47 = vld [vmem:[%s18216_s14 + $0x8] sm:$0xff] }
 0x1b4   : > { %15024 = vmatprep.subr.bf16.mxu0 %v17309_v38  ;;  %15003 = vmatpush3.bf16.msra.mxu1 %v17310_v12  ;;  %v1681_v29 = vmax.f32 %v18596_v16, %v18030_v8  ;;  %v17352_v60 = vld [vmem:[%s23663_s1 + $0x60] sm:$0xff]   ;;  %v17353_v36 = vld [vmem:[%s23663_s1 + $0x68] sm:$0xff]   ;;  %v17354_v38 = vld [vmem:[%s23663_s1 + $0x70] sm:$0xff]  }
 0x1b5   : > { %15004 = vmatprep.subr.bf16.mxu1 %v17312_v27 }
 0x1b7   : > { %15025 = vmatpush3.bf16.msra.mxu0 %v17311_v28 }
 0x1b8   : > { %15026 = vmatprep.subr.bf16.mxu0 %v17313_v15  ;;  %15005 = vmatpush3.bf16.msra.mxu1 %v17314_v43 }
 0x1b9   : > { %15006 = vmatprep.subr.bf16.mxu1 %v17316_v58 }
 0x1bb   : > { %15027 = vmatpush3.bf16.msra.mxu0 %v17315_v62 }
 0x1bc   : > { %15028 = vmatprep.subr.bf16.mxu0 %v17317_v46  ;;  %15007 = vmatpush3.bf16.msra.mxu1 %v17318_v4 }
 0x1bd   : > { %15008 = vmatprep.subr.bf16.mxu1 %v17320_v0 }
 0x1bf   : > { %15029 = vmatpush3.bf16.msra.mxu0 %v17319_v51 }
 0x1c0   : > { %15030 = vmatprep.subr.bf16.mxu0 %v17321_v45  ;;  %15009 = vmatpush3.bf16.msra.mxu1 %v17322_v21 }
 0x1c1   : > { %15038 = vmatprep.subr.bf16.mxu1 %v17324_v32 }
 0x1c3   : > { %15031 = vmatpush3.bf16.msra.mxu0 %v17323_v13  ;;  %1271 = vmatmul.mubr.bf16.vlgmr.msra.gmra.mrb[4].mxu1 %v1130_v57  ;;  %v17345_v57 = vld [vmem:[%s23664_s2 + $0x278] sm:$0xff]  }
 0x1c4   : > { %16019 = vmatprep.subr.bf16.mxu0 %v23671_v11  ;;  %15039 = vmatpush3.bf16.msra.mxu1 %v17325_v40 }
 0x1c5   : > { %1644 = vmatprep.mubr.bf16.mxu1 %v1513_v63  ;;  %15040 = vmatprep.subr.bf16.mxu1 %v17327_v44 }
 0x1c6   : > { %1453 = vmatmul.mubr.bf16.vlgmr.msra.gmra.mrb[12].mxu0 %v18717_v20  ;;  %v1664_v20 = vsel %vm608_vm4, %v1661_v10, %v1663_v9  ;;  %v1674_v10 = vsel %vm413_vm1, %v1672_v7, %v1673_v48  ;;  %v17347_v9 = vld [vmem:[%s23665_s3 + $0x38] sm:$0xff]   ;;  %v17349_v48 = vld [vmem:[%s23663_s1 + $0x48] sm:$0xff]   ;;  %v17350_v7 = vld [vmem:[%s23663_s1 + $0x50] sm:$0xff]  }
 0x1c7   : > { %16020 = vmatpush3.bf16.msra.mxu0 %v17326_v52  ;;  %16035 = vmatprep.mubr.msk.bf16.mxu0 %vm18101_vm14, %v23671_v11  ;;  %v1682_v3 = vmax.f32 %v1664_v20, %v18031_v47  ;;  %v1683_v31 = vmax.f32 %v1681_v29, %v1674_v10 }
 0x1c8   : > { %16021 = vmatprep.subr.bf16.mxu0 %v23671_v11  ;;  %15041 = vmatpush3.bf16.msra.mxu1 %v17328_v14 }
 0x1c9   : > { %15042 = vmatprep.subr.bf16.mxu1 %v17330_v59  ;;  %v1684_v16 = vmax.f32 %v1682_v3, %v18600_v17  ;;  %v17351_v17 = vld [vmem:[%s23663_s1 + $0x58] sm:$0xff]  }
 0x1cb   : > { %16022 = vmatpush3.bf16.msra.mxu0 %v17329_v61  ;;  %v1685_v37 = vpack.c.bf16 %v1684_v16, %v1683_v31 }
 0x1cc   : > { %16023 = vmatprep.subr.bf16.mxu0 %v23671_v11  ;;  %15043 = vmatpush3.bf16.msra.mxu1 %v17331_v22 }
 0x1cd   : > { %15044 = vmatprep.subr.bf16.mxu1 %v17333_v33 }
 0x1cf   : > { %16024 = vmatpush3.bf16.msra.mxu0 %v17332_v30 }
 0x1d0   : > { %16025 = vmatprep.subr.bf16.mxu0 %v23671_v11  ;;  %15045 = vmatpush3.bf16.msra.mxu1 %v17334_v42 }
 0x1d1   : > { %15046 = vmatprep.subr.bf16.mxu1 %v17336_v39 }
 0x1d3   : > { %16026 = vmatpush3.bf16.msra.mxu0 %v17335_v6  ;;  %v17355_v6 = vld [vmem:[%s23663_s1 + $0x78] sm:$0xff]  }
 0x1d4   : > { %16027 = vmatprep.subr.bf16.mxu0 %v23671_v11  ;;  %15047 = vmatpush3.bf16.msra.mxu1 %v17337_v49 }
 0x1d5   : > { %15048 = vmatprep.subr.bf16.mxu1 %v17339_v19 }
 0x1d7   : > { %16028 = vmatpush3.bf16.msra.mxu0 %v17338_v34 }
 0x1d8   : > { %16029 = vmatprep.subr.bf16.mxu0 %v23671_v11  ;;  %15049 = vmatpush3.bf16.msra.mxu1 %v17340_v56 }
 0x1d9   : > { %15050 = vmatprep.subr.bf16.mxu1 %v17342_v26 }
 0x1db   : > { %16030 = vmatpush3.bf16.msra.mxu0 %v17341_v23 }
 0x1dc   : > { %16031 = vmatprep.subr.bf16.mxu0 %v23671_v11  ;;  %15051 = vmatpush3.bf16.msra.mxu1 %v17343_v24 }
 0x1dd   : > { %15052 = vmatprep.subr.bf16.mxu1 %v17345_v57 }
 0x1df   : > { %16032 = vmatpush3.bf16.msra.mxu0 %v17344_v18 }
 0x1e0   : > { %16033 = vmatprep.subr.bf16.mxu0 %v23671_v11  ;;  %15053 = vmatpush3.bf16.msra.mxu1 %v17346_v25 }
 0x1e1   : > { %16039 = vmatprep.subr.bf16.mxu1 %v17348_v5 }
 0x1e3   : > { %16034 = vmatpush3.bf16.msra.mxu0 %v17347_v9  ;;  %1645 = vmatmul.mubr.bf16.vlgmr.msra.gmra.mrb[8].mxu1 %v18736_v41 }
 0x1e4   : > { %16055 = vmatprep.mubr.bf16.mxu1 %v23669_v2  ;;  %16040 = vmatpush3.bf16.msra.mxu1 %v17348_v5 }
 0x1e5   : > { %16041 = vmatprep.subr.bf16.mxu1 %v17349_v48 }
 0x1e6   : > { %16036 = vmatmul.mubr.bf16.vlgmr.msra.gmra.mrb[16].mxu0 %v1685_v37 }
 0x1e8   : > { %16042 = vmatpush3.bf16.msra.mxu1 %v17349_v48 }
 0x1e9   : > { %16043 = vmatprep.subr.bf16.mxu1 %v17350_v7 }
 0x1ec   : > { %16044 = vmatpush3.bf16.msra.mxu1 %v17350_v7 }
 0x1ed   : > { %16045 = vmatprep.subr.bf16.mxu1 %v17351_v17 }
 0x1f0   : > { %16046 = vmatpush3.bf16.msra.mxu1 %v17351_v17 }
 0x1f1   : > { %16047 = vmatprep.subr.bf16.mxu1 %v17352_v60 }
 0x1f4   : > { %16048 = vmatpush3.bf16.msra.mxu1 %v17352_v60 }
 0x1f5   : > { %16049 = vmatprep.subr.bf16.mxu1 %v17353_v36 }
 0x1f8   : > { %16050 = vmatpush3.bf16.msra.mxu1 %v17353_v36 }
 0x1f9   : > { %16051 = vmatprep.subr.bf16.mxu1 %v17354_v38 }
 0x1fc   : > { %16052 = vmatpush3.bf16.msra.mxu1 %v17354_v38 }
 0x1fd   : > { %16053 = vmatprep.subr.bf16.mxu1 %v17355_v6 }
 0x200   : > { %16054 = vmatpush3.bf16.msra.mxu1 %v17355_v6  ;;  %v17358_v6 = vld [vmem:[%s23664_s2 + $0x300] sm:$0xff]  }
 0x276   : > { %v14966_v12 = vpop.f32.mrb[0].mxu1 }
 0x277   : > { %v14967_v1 = vpop.f32.mrb[1].mxu1 }
 0x278   : > { %v14968_v27 = vadd.f32 %v14967_v1, %v14966_v12  ;;  %v14969_v35 = vpop.f32.mrb[2].mxu1 }
 0x279   : > { %v14988_v41 = vpop.f32.mrb[8].mxu0  ;;  %v14970_v28 = vpop.f32.mrb[3].mxu1 }
 0x27a   : > { %v14989_v63 = vpop.f32.mrb[9].mxu0  ;;  %v14971_v15 = vadd.f32 %v14970_v28, %v14969_v35 }
 0x27b   : > { %v14990_v43 = vadd.f32 %v14989_v63, %v14988_v41  ;;  %v14991_v58 = vpop.f32.mrb[10].mxu0 }
 0x27c   : > { %v14992_v62 = vpop.f32.mrb[11].mxu0 }
 0x27d   : > { %v1083_v46 = vadd.f32 %v14990_v43, %v14968_v27  ;;  %v14993_v4 = vadd.f32 %v14992_v62, %v14991_v58 }
 0x27f   : > { %v1086_v0 = vadd.f32 %v14993_v4, %v14971_v15 }
 0x296   : > { %v15010_v51 = vpop.f32.mrb[4].mxu1 }
 0x297   : > { %v15011_v45 = vpop.f32.mrb[5].mxu1 }
 0x298   : > { %v15012_v21 = vadd.f32 %v15011_v45, %v15010_v51  ;;  %v15013_v32 = vpop.f32.mrb[6].mxu1 }
 0x299   : > { %v15032_v13 = vpop.f32.mrb[12].mxu0  ;;  %v15014_v40 = vpop.f32.mrb[7].mxu1 }
 0x29a   : > { %v1279_v44 = vadd.f32 %v15012_v21, %v1083_v46  ;;  %v15033_v52 = vpop.f32.mrb[13].mxu0  ;;  %v15015_v14 = vadd.f32 %v15014_v40, %v15013_v32  ;;  %v17356_v40 = vld [vmem:[%s23664_s2 + $0x340] sm:$0xff]  }
 0x29b   : > { %v15034_v59 = vadd.f32 %v15033_v52, %v15032_v13  ;;  %v15035_v61 = vpop.f32.mrb[14].mxu0  ;;  %15081 = vmatprep.subr.bf16.mxu0 %v17356_v40  ;;  %v17365_v40 = vld [vmem:[%s23664_s2 + $0x2d0] sm:$0xff]  }
 0x29c   : > { %v1280_v22 = vadd.f32 %v15015_v14, %v1086_v0  ;;  %v15036_v33 = vpop.f32.mrb[15].mxu0  ;;  %15082 = vmatpush3.bf16.msra.mxu0 %v17358_v6  ;;  %v17367_v6 = vld [vmem:[%s23664_s2 + $0x290] sm:$0xff]  }
 0x29d   : > { %v1461_v30 = vadd.f32 %v15034_v59, %v1279_v44  ;;  %v15037_v42 = vadd.f32 %v15036_v33, %v15035_v61 }
 0x29f   : > { %v1462_v39 = vadd.f32 %v15037_v42, %v1280_v22  ;;  %v17357_v22 = vld [vmem:[%s23664_s2 + $0x2c0] sm:$0xff]  }
 0x2a0   : > { %15103 = vmatprep.subr.bf16.mxu1 %v17357_v22 }
 0x2b6   : > { %v15054_v49 = vpop.f32.mrb[8].mxu1 }
 0x2b7   : > { %v15055_v19 = vpop.f32.mrb[9].mxu1 }
 0x2b8   : > { %v15056_v34 = vadd.f32 %v15055_v19, %v15054_v49  ;;  %v15057_v56 = vpop.f32.mrb[10].mxu1  ;;  %v17359_v49 = vld [vmem:[%s23664_s2 + $0x280] sm:$0xff]  }
 0x2b9   : > { %v1784_v26 = vpop.f32.mrb[16].mxu0  ;;  %v15058_v23 = vpop.f32.mrb[11].mxu1 }
 0x2ba   : > { %1793 = vrot.lane.b32.xlu1 %v1784_v26, %s18100_s26  ;;  %v1653_v24 = vadd.f32 %v15056_v34, %v1461_v30  ;;  %v16037_v57 = vpop.f32.mrb[17].mxu0  ;;  %v15059_v20 = vadd.f32 %v15058_v23, %v15057_v56 }
 0x2bb   : > { %v1787_v18 = vpop.f32.mrb[18].mxu0 }
 0x2bc   : > { %1795 = vrot.lane.b32.xlu0 %v1787_v18, %s18100_s26  ;;  %v1654_v25 = vadd.f32 %v15059_v20, %v1462_v39  ;;  %v16038_v8 = vpop.f32.mrb[19].mxu0  ;;  %v17360_v18 = vld [vmem:[%s23664_s2 + $0x348] sm:$0xff]  }
 0x2bd   : > { %15083 = vmatprep.subr.bf16.mxu0 %v17360_v18 }
 0x32c   : > { %v1794_v29 = vpop.permute.xlu1 %1793 }
 0x32d   : > { %v1799_v47 = vsel %vm659_vm11, %v1653_v24, %v1794_v29 }
 0x32e   : > { %v1801_v3 = vmax.f32 %v1799_v47, 0.0  ;;  %v1796_v10 = vpop.permute.xlu0 %1795 }
 0x32f   : > { %v1800_v9 = vsel %vm659_vm11, %v1654_v25, %v1796_v10  ;;  %v17361_v25 = vld [vmem:[%s23664_s2 + $0x2c8] sm:$0xff]  }
 0x330   : > { %v3189_v31 = vrot.slane %v1801_v3, 7  ;;  %v1802_v16 = vmax.f32 %v1800_v9, 0.0  ;;  %v1814_v37 = vpack.c.bf16 %v1801_v3, %v23671_v11  ;;  %v3198_v5 = vrot.slane %v1801_v3, 1 }
 0x332   : > { %v3190_v48 = vsel %vm608_vm4, %v18572_v50, %v3189_v31  ;;  %v3191_v7 = vrot.slane %v1802_v16, 7  ;;  %v3199_v17 = vrot.slane %v1802_v16, 1  ;;  %16056 = vmatmul.mubr.bf16.vlgmr.msra.gmra.mrb[12].mxu1 %v1814_v37  ;;  %v1815_v60 = vpack.c.bf16 %v23671_v11, %v1802_v16 }
 0x333   : > { %v3195_v36 = vsel %vm1655_vm7, -inf, %v3190_v48  ;;  %15104 = vmatpush3.bf16.msra.mxu1 %v17359_v49  ;;  %v17363_v48 = vld [vmem:[%s23664_s2 + $0x288] sm:$0xff]  }
 0x334   : > { %v3207_v38 = vmax.f32 %v3195_v36, %v1801_v3  ;;  %v3192_v12 = vsel %vm608_vm4, %v3189_v31, %v3191_v7  ;;  %16059 = vmatprep.mubr.bf16.mxu1 %v1815_v60  ;;  %v3200_v1 = vsel %vm413_vm1, %v3198_v5, %v3199_v17  ;;  %v3202_v27 = vsel %vm413_vm1, %v3199_v17, %v18575_v53  ;;  %v17362_v5 = vld [vmem:[%s23664_s2 + $0x308] sm:$0xff]  }
 0x335   : > { %v3208_v35 = vmax.f32 %v3192_v12, %v1802_v16  ;;  %v3206_v41 = vsel %vm1670_vm8, -inf, %v3202_v27  ;;  %15105 = vmatprep.subr.bf16.mxu1 %v17361_v25  ;;  %15084 = vmatpush3.bf16.msra.mxu0 %v17362_v5 }
 0x336   : > { %v18914_v28 = vmax.f32 %v3207_v38, %v3200_v1 }
 0x337   : > { %v18916_v63 = vmax.f32 %v3208_v35, %v3206_v41  ;;  %15106 = vmatpush3.bf16.msra.mxu1 %v17363_v48 }
 0x338   : > { %15107 = vmatprep.subr.bf16.mxu1 %v17365_v40 }
 0x339   : > { %v3211_v15 = vpack.c.bf16 %v18916_v63, %v18914_v28  ;;  %v17447_v28 = vld [vmem:[%s23663_s1 + $0x98] sm:$0xff]   ;;  %v17448_v63 = vld [vmem:[%s23663_s1 + $0xa0] sm:$0xff]  }
 0x33a   : > { %16060 = vmatmul.mubr.bf16.gmra.mrb[16].mxu1 %v23669_v2 }
 0x33b   : > { %15108 = vmatpush3.bf16.msra.mxu1 %v17367_v6 }
 0x405   : > { %v18921_v43 = vpop.f32.mrb[12].mxu1 }
 0x406   : > { %v18923_v58 = vpop.f32.mrb[13].mxu1  ;;  %v2076_v62 = vrot.slane %v18921_v43, 5  ;;  %v1957_v46 = vrot.slane %v18921_v43, 1  ;;  %v2110_v4 = vrot.slane %v18921_v43, 6  ;;  %v1991_v0 = vrot.slane %v18921_v43, 2 }
 0x407   : > { %v1954_v51 = vrot.slane %v18923_v58, 1  ;;  %v1988_v45 = vrot.slane %v18923_v58, 2  ;;  %v18931_v21 = vpop.f32.mrb[14].mxu1  ;;  %v2144_v32 = vrot.slane %v18921_v43, 7  ;;  %v2023_v13 = vrot.slane %v18921_v43, 3 }
 0x408   : > { %v18938_v44 = vpop.f32.mrb[15].mxu1  ;;  %v2078_v52 = vrot.slane %v18931_v21, 5  ;;  %v1959_v14 = vrot.slane %v18931_v21, 1  ;;  %v2112_v59 = vrot.slane %v18931_v21, 6  ;;  %v1993_v61 = vrot.slane %v18931_v21, 2 }
 0x409   : > { %v2075_v33 = vrot.slane %v18938_v44, 5  ;;  %v1955_v30 = vrot.slane %v18938_v44, 1  ;;  %v2109_v42 = vrot.slane %v18938_v44, 6  ;;  %v1989_v39 = vrot.slane %v18938_v44, 2 }
 0x40a   : > { %v18958_v19 = vsel %vm538_vm0, %v2076_v62, %v2078_v52  ;;  %v18961_v34 = vsel %vm413_vm1, %v1957_v46, %v1959_v14  ;;  %v18964_v56 = vsel %vm573_vm2, %v2110_v4, %v2112_v59  ;;  %v2143_v26 = vrot.slane %v18938_v44, 7 }
 0x40b   : > { %v2077_v23 = vsel %vm538_vm0, %v2075_v33, %v2076_v62  ;;  %v1956_v24 = vsel %vm413_vm1, %v1954_v51, %v1955_v30  ;;  %v1958_v57 = vsel %vm413_vm1, %v1955_v30, %v1957_v46  ;;  %v2111_v20 = vsel %vm573_vm2, %v2109_v42, %v2110_v4  ;;  %v17364_v62 = vld [vmem:[%s23664_s2 + $0x350] sm:$0xff]  }
 0x40c   : > { %v16517_v8 = vpack.i.bf16 %v2077_v23, %v2075_v33  ;;  %v16522_v29 = vpack.i.bf16 %v1958_v57, %v1956_v24  ;;  %v18977_v47 = vpack.i.bf16 %v2111_v20, %v2109_v42  ;;  %v18980_v3 = vsel %vm448_vm3, %v1988_v45, %v1989_v39  ;;  %15085 = vmatprep.subr.bf16.mxu0 %v17364_v62  ;;  %v17369_v20 = vld [vmem:[%s23664_s2 + $0x2d8] sm:$0xff]  }
 0x40d   : > { %v18982_v10 = vpop.f32.mrb[16].mxu1  ;;  %v18985_v9 = vsel %vm448_vm3, %v1989_v39, %v1991_v0  ;;  %v2145_v31 = vsel %vm608_vm4, %v2143_v26, %v2144_v32  ;;  %v18991_v16 = vsel %vm448_vm3, %v1991_v0, %v1993_v61  ;;  %v2022_v37 = vrot.slane %v18938_v44, 3  ;;  %v17366_v39 = vld [vmem:[%s23664_s2 + $0x310] sm:$0xff]   ;;  %15109 = vmatprep.subr.bf16.mxu1 %v17369_v20  ;;  %v17376_v20 = vld [vmem:[%s23664_s2 + $0x368] sm:$0xff]  }
 0x40e   : > { %16518 = vrot.lane.b32.xlu1 %v16517_v8, %s18098_s10  ;;  %v19001_v7 = vpop.f32.mrb[17].mxu1  ;;  %v16532_v17 = vpack.i.bf16 %v18985_v9, %v18980_v3  ;;  %v19005_v60 = vpack.i.bf16 %v2145_v31, %v2143_v26  ;;  %v2146_v36 = vrot.slane %v18931_v21, 7  ;;  %v2084_v38 = vrot.slane %v18982_v10, 5  ;;  %15086 = vmatpush3.bf16.msra.mxu0 %v17366_v39  ;;  %v17370_v31 = vld [vmem:[%s23664_s2 + $0x318] sm:$0xff]   ;;  %v17373_v3 = vld [vmem:[%s23664_s2 + $0x2e0] sm:$0xff]  }
 0x40f   : > { %v19009_v12 = vpop.f32.mrb[18].mxu1  ;;  %v2080_v1 = vrot.slane %v19001_v7, 5  ;;  %v1961_v27 = vrot.slane %v19001_v7, 1  ;;  %v2114_v35 = vrot.slane %v19001_v7, 6  ;;  %v1995_v41 = vrot.slane %v19001_v7, 2  ;;  %v17374_v9 = vld [vmem:[%s23664_s2 + $0x320] sm:$0xff]  }
 0x410   : > { %v2066_v46 = vrot.slane %v19009_v12, 4  ;;  %v2086_v4 = vrot.slane %v19009_v12, 5  ;;  %v2120_v0 = vrot.slane %v19009_v12, 6  ;;  %v2154_v51 = vrot.slane %v19009_v12, 7  ;;  %v19022_v45 = vpop.f32.mrb[19].mxu1  ;;  %v17385_v12 = vld [vmem:[%s23664_s2 + $0x2f8] sm:$0xff]  }
 0x411   : > { %v2081_v22 = vsel %vm538_vm0, %v2078_v52, %v2080_v1  ;;  %v1962_v33 = vsel %vm413_vm1, %v1959_v14, %v1961_v27  ;;  %v19030_v30 = vsel %vm573_vm2, %v2112_v59, %v2114_v35  ;;  %v19035_v42 = vsel %vm448_vm3, %v1993_v61, %v1995_v41 }
 0x412   : > { %16523 = vrot.lane.b32.xlu1 %v16522_v29, %s18098_s10  ;;  %v16547_v52 = vpack.i.bf16 %v2081_v22, %v18958_v19  ;;  %v16552_v14 = vpack.i.bf16 %v1962_v33, %v18961_v34  ;;  %v16557_v59 = vpack.i.bf16 %v19030_v30, %v18964_v56  ;;  %v16562_v61 = vpack.i.bf16 %v19035_v42, %v18991_v16  ;;  %v17381_v42 = vld [vmem:[%s23664_s2 + $0x2f0] sm:$0xff]  }
 0x413   : > { %v2024_v49 = vsel %vm483_vm5, %v2022_v37, %v2023_v13  ;;  %v19056_v26 = vsel %vm608_vm4, %v2144_v32, %v2146_v36  ;;  %v2148_v23 = vrot.slane %v19001_v7, 7  ;;  %v2082_v19 = vrot.slane %v19022_v45, 5  ;;  %v17368_v32 = vld [vmem:[%s23664_s2 + $0x358] sm:$0xff]  }
 0x414   : > { %16548 = vrot.lane.b32.xlu0 %v16547_v52, %s18098_s10  ;;  %v19061_v34 = vpack.i.bf16 %v2024_v49, %v2022_v37  ;;  %v2025_v56 = vrot.slane %v18931_v21, 3  ;;  %v2027_v24 = vrot.slane %v19001_v7, 3  ;;  %v2116_v57 = vrot.slane %v19022_v45, 6  ;;  %v17371_v37 = vld [vmem:[%s23664_s2 + $0x298] sm:$0xff]   ;;  %15087 = vmatprep.subr.bf16.mxu0 %v17368_v32  ;;  %v17375_v32 = vld [vmem:[%s23664_s2 + $0x2a0] sm:$0xff]  }
 0x415   : > { %v19073_v18 = vsel %vm608_vm4, %v2146_v36, %v2148_v23  ;;  %v19076_v25 = vsel %vm538_vm0, %v2080_v1, %v2082_v19  ;;  %v19081_v8 = vsel %vm538_vm0, %v2082_v19, %v2084_v38  ;;  %v2118_v29 = vrot.slane %v18982_v10, 6  ;;  %15088 = vmatpush3.bf16.msra.mxu0 %v17370_v31  ;;  %15110 = vmatpush3.bf16.msra.mxu1 %v17371_v37 }
 0x416   : > { %16528 = vrot.lane.b32.xlu1 %v18977_v47, %s18099_s20  ;;  %v16567_v5 = vpack.i.bf16 %v19073_v18, %v19056_v26  ;;  %v16577_v48 = vpack.i.bf16 %v19081_v8, %v19076_v25  ;;  %v19099_v36 = vsel %vm483_vm5, %v2023_v13, %v2025_v56  ;;  %v19102_v1 = vsel %vm483_vm5, %v2025_v56, %v2027_v24  ;;  %v17387_v26 = vld [vmem:[%s23664_s2 + $0x2b8] sm:$0xff]   ;;  %v17388_v18 = vld [vmem:[%s23664_s2 + $0x3c0] sm:$0xff]  }
 0x417   : > { %v16572_v62 = vpack.i.bf16 %v19102_v1, %v19099_v36  ;;  %v19107_v40 = vsel %vm573_vm2, %v2114_v35, %v2116_v57  ;;  %v19110_v47 = vsel %vm573_vm2, %v2116_v57, %v2118_v29  ;;  %v1963_v22 = vrot.slane %v19022_v45, 1  ;;  %15111 = vmatprep.subr.bf16.mxu1 %v17373_v3  ;;  %v17389_v25 = vld [vmem:[%s23664_s2 + $0x440] sm:$0xff]  }
 0x418   : > { %16553 = vrot.lane.b32.xlu0 %v16552_v14, %s18098_s10  ;;  %v16587_v13 = vpack.i.bf16 %v19110_v47, %v19107_v40  ;;  %v1965_v33 = vrot.slane %v18982_v10, 1  ;;  %v2150_v30 = vrot.slane %v19022_v45, 7  ;;  %v2152_v39 = vrot.slane %v18982_v10, 7 }
 0x419   : > { %v19120_v35 = vsel %vm413_vm1, %v1961_v27, %v1963_v22  ;;  %v1997_v6 = vrot.slane %v19022_v45, 2  ;;  %v1999_v52 = vrot.slane %v18982_v10, 2  ;;  %v2087_v14 = vsel %vm538_vm0, %v2084_v38, %v2086_v4  ;;  %v17372_v38 = vld [vmem:[%s23664_s2 + $0x360] sm:$0xff]   ;;  %15112 = vmatpush3.bf16.msra.mxu1 %v17375_v32  ;;  %v17380_v32 = vld [vmem:[%s23664_s2 + $0x370] sm:$0xff]  }
 0x41a   : > { %16533 = vrot.lane.b32.xlu1 %v16532_v17, %s18099_s20  ;;  %v19132_v49 = vsel %vm413_vm1, %v1963_v22, %v1965_v33  ;;  %v19135_v27 = vsel %vm608_vm4, %v2148_v23, %v2150_v30  ;;  %v19138_v19 = vsel %vm608_vm4, %v2150_v30, %v2152_v39  ;;  %v19140_v56 = vpack.i.bf16 %v1965_v33, %v2087_v14  ;;  %v17377_v33 = vld [vmem:[%s23664_s2 + $0x2e8] sm:$0xff]  }
 0x41b   : > { %v16582_v17 = vpack.i.bf16 %v19132_v49, %v19120_v35  ;;  %v16597_v4 = vpack.i.bf16 %v19138_v19, %v19135_v27  ;;  %v19158_v23 = vsel %vm448_vm3, %v1995_v41, %v1997_v6  ;;  %v19161_v57 = vsel %vm448_vm3, %v1997_v6, %v1999_v52  ;;  %15089 = vmatprep.subr.bf16.mxu0 %v17372_v38 }
 0x41c   : > { %16558 = vrot.lane.b32.xlu0 %v16557_v59, %s18099_s20  ;;  %v16592_v31 = vpack.i.bf16 %v19161_v57, %v19158_v23  ;;  %v2029_v37 = vrot.slane %v19022_v45, 3  ;;  %v2031_v41 = vrot.slane %v18982_v10, 3  ;;  %v2155_v22 = vsel %vm608_vm4, %v2152_v39, %v2154_v51  ;;  %15090 = vmatpush3.bf16.msra.mxu0 %v17374_v9  ;;  %v17379_v9 = vld [vmem:[%s23664_s2 + $0x2a8] sm:$0xff]  }
 0x41d   : > { %v2121_v59 = vsel %vm573_vm2, %v2118_v29, %v2120_v0  ;;  %v2056_v30 = vrot.slane %v18921_v43, 4  ;;  %v2055_v6 = vrot.slane %v18938_v44, 4  ;;  %v2058_v14 = vrot.slane %v18931_v21, 4  ;;  %15091 = vmatprep.subr.bf16.mxu0 %v17376_v20  ;;  %15113 = vmatprep.subr.bf16.mxu1 %v17377_v33 }
 0x41e   : > { %16538 = vrot.lane.b32.xlu1 %v19005_v60, %s18100_s26  ;;  %v2030_v51 = vsel %vm483_vm5, %v2027_v24, %v2029_v37  ;;  %v2032_v39 = vsel %vm483_vm5, %v2029_v37, %v2031_v41  ;;  %v16617_v38 = vpack.i.bf16 %v2031_v41, %v2155_v22  ;;  %v16612_v23 = vpack.i.bf16 %v1999_v52, %v2121_v59  ;;  %v17378_v52 = vld [vmem:[%s23664_s2 + $0x328] sm:$0xff]   ;;  %v17382_v37 = vld [vmem:[%s23664_s2 + $0x330] sm:$0xff]   ;;  %v17384_v22 = vld [vmem:[%s23664_s2 + $0x378] sm:$0xff]  }
 0x41f   : > { %v16602_v57 = vpack.i.bf16 %v2032_v39, %v2030_v51  ;;  %v19193_v0 = vsel %vm517_vm6, %v2055_v6, %v2056_v30  ;;  %v19196_v29 = vsel %vm517_vm6, %v2056_v30, %v2058_v14  ;;  %v2060_v3 = vrot.slane %v19001_v7, 4  ;;  %15114 = vmatpush3.bf16.msra.mxu1 %v17379_v9 }
 0x420   : > { %16563 = vrot.lane.b32.xlu0 %v16562_v61, %s18099_s20  ;;  %v2064_v60 = vrot.slane %v18982_v10, 4  ;;  %v2062_v24 = vrot.slane %v19022_v45, 4  ;;  %15092 = vmatpush3.bf16.msra.mxu0 %v17378_v52 }
 0x421   : > { %v19215_v16 = vsel %vm517_vm6, %v2058_v14, %v2060_v3  ;;  %15093 = vmatprep.subr.bf16.mxu0 %v17380_v32  ;;  %15115 = vmatprep.subr.bf16.mxu1 %v17381_v42 }
 0x422   : > { %16543 = vrot.lane.b32.xlu1 %v19061_v34, %s18100_s26  ;;  %v19223_v61 = vsel %vm517_vm6, %v2060_v3, %v2062_v24  ;;  %v19226_v20 = vsel %vm517_vm6, %v2062_v24, %v2064_v60  ;;  %v19234_v41 = vsel %vm517_vm6, %v2064_v60, %v2066_v46  ;;  %v17383_v34 = vld [vmem:[%s23664_s2 + $0x2b0] sm:$0xff]   ;;  %v17386_v46 = vld [vmem:[%s23664_s2 + $0x338] sm:$0xff]  }
 0x423   : > { %15116 = vmatpush3.bf16.msra.mxu1 %v17383_v34 }
 0x424   : > { %16568 = vrot.lane.b32.xlu0 %v16567_v5, %s18100_s26  ;;  %15094 = vmatpush3.bf16.msra.mxu0 %v17382_v37 }
 0x425   : > { %15095 = vmatprep.subr.bf16.mxu0 %v17384_v22  ;;  %15117 = vmatprep.subr.bf16.mxu1 %v17385_v12 }
 0x426   : > { %16578 = vrot.lane.b32.xlu1 %v16577_v48, %s18098_s10 }
 0x427   : > { %15118 = vmatpush3.bf16.msra.mxu1 %v17387_v26 }
 0x428   : > { %16573 = vrot.lane.b32.xlu0 %v16572_v62, %s18100_s26  ;;  %15096 = vmatpush3.bf16.msra.mxu0 %v17386_v46 }
 0x429   : > { %15125 = vmatprep.subr.bf16.mxu0 %v17388_v18  ;;  %15147 = vmatprep.subr.bf16.mxu1 %v17389_v25 }
 0x42a   : > { %16588 = vrot.lane.b32.xlu1 %v16587_v13, %s18099_s20 }
 0x42c   : > { %16583 = vrot.lane.b32.xlu0 %v16582_v17, %s18098_s10 }
 0x42e   : > { %16598 = vrot.lane.b32.xlu1 %v16597_v4, %s18100_s26 }
 0x430   : > { %16593 = vrot.lane.b32.xlu0 %v16592_v31, %s18099_s20 }
 0x432   : > { %16608 = vrot.lane.b32.xlu1 %v19140_v56, %s18098_s10 }
 0x434   : > { %16603 = vrot.lane.b32.xlu0 %v16602_v57, %s18100_s26 }
 0x436   : > { %16618 = vrot.lane.b32.xlu1 %v16617_v38, %s18100_s26 }
 0x438   : > { %16613 = vrot.lane.b32.xlu0 %v16612_v23, %s18099_s20 }
 0x480   : > { %v16519_v8 = vpop.permute.xlu1 %16518 }
 0x481   : > { %v16521_v62 = vunpack.i.h.bf16 %v16519_v8  ;;  %v16520_v40 = vunpack.i.l.bf16 %v16519_v8 }
 0x483   : > { %v2198_v17 = vsel %vm643_vm9, %v2055_v6, %v16520_v40  ;;  %v2199_v4 = vsel %vm643_vm9, %v19193_v0, %v16521_v62 }
 0x484   : > { %v16524_v5 = vpop.permute.xlu1 %16523 }
 0x485   : > { %v16526_v47 = vunpack.i.h.bf16 %v16524_v5  ;;  %v16525_v13 = vunpack.i.l.bf16 %v16524_v5 }
 0x486   : > { %v16549_v48 = vpop.permute.xlu0 %16548 }
 0x487   : > { %v16550_v49 = vunpack.i.l.bf16 %v16549_v48  ;;  %v16551_v31 = vunpack.i.h.bf16 %v16549_v48  ;;  %v2178_v59 = vsel %vm643_vm9, %v18938_v44, %v16526_v47  ;;  %v2177_v30 = vsel %vm643_vm9, %v18923_v58, %v16525_v13 }
 0x488   : > { %v16529_v36 = vpop.permute.xlu1 %16528 }
 0x489   : > { %v16531_v27 = vunpack.i.h.bf16 %v16529_v36  ;;  %v16530_v19 = vunpack.i.l.bf16 %v16529_v36  ;;  %v2200_v38 = vsel %vm643_vm9, %v19196_v29, %v16550_v49  ;;  %v2201_v44 = vsel %vm643_vm9, %v19215_v16, %v16551_v31 }
 0x48a   : > { %v16554_v1 = vpop.permute.xlu0 %16553 }
 0x48b   : > { %v16556_v33 = vunpack.i.h.bf16 %v16554_v1  ;;  %v16555_v14 = vunpack.i.l.bf16 %v16554_v1  ;;  %v2206_v3 = vsel %vm651_vm10, %v2199_v4, %v16531_v27  ;;  %v2205_v0 = vsel %vm651_vm10, %v2198_v17, %v16530_v19 }
 0x48c   : > { %v16534_v35 = vpop.permute.xlu1 %16533 }
 0x48d   : > { %v16535_v51 = vunpack.i.l.bf16 %v16534_v35  ;;  %v16536_v23 = vunpack.i.h.bf16 %v16534_v35  ;;  %v2180_v58 = vsel %vm643_vm9, %v18931_v21, %v16556_v33  ;;  %v2179_v32 = vsel %vm643_vm9, %v18921_v43, %v16555_v14 }
 0x48e   : > { %v16559_v56 = vpop.permute.xlu0 %16558 }
 0x48f   : > { %v16561_v60 = vunpack.i.h.bf16 %v16559_v56  ;;  %v16560_v24 = vunpack.i.l.bf16 %v16559_v56  ;;  %v2184_v42 = vsel %vm651_vm10, %v2177_v30, %v16535_v51  ;;  %v2185_v12 = vsel %vm651_vm10, %v2178_v59, %v16536_v23 }
 0x490   : > { %v16539_v39 = vpop.permute.xlu1 %16538 }
 0x491   : > { %v16541_v57 = vunpack.i.h.bf16 %v16539_v39  ;;  %v16540_v6 = vunpack.i.l.bf16 %v16539_v39  ;;  %v2208_v18 = vsel %vm651_vm10, %v2201_v44, %v16561_v60  ;;  %v2207_v21 = vsel %vm651_vm10, %v2200_v38, %v16560_v24 }
 0x492   : > { %v16564_v52 = vpop.permute.xlu0 %16563 }
 0x493   : > { %v2212_v9 = vsel %vm659_vm11, %v2205_v0, %v16540_v6  ;;  %v2213_v29 = vsel %vm659_vm11, %v2206_v3, %v16541_v57  ;;  %v16565_v34 = vunpack.i.l.bf16 %v16564_v52  ;;  %v16566_v46 = vunpack.i.h.bf16 %v16564_v52 }
 0x494   : > { %v2220_v37 = vpack.c.bf16 %v2213_v29, %v2212_v9  ;;  %v16544_v22 = vpop.permute.xlu1 %16543 }
 0x495   : > { %v16546_v26 = vunpack.i.h.bf16 %v16544_v22  ;;  %v16545_v16 = vunpack.i.l.bf16 %v16544_v22  ;;  %v2186_v62 = vsel %vm651_vm10, %v2179_v32, %v16565_v34  ;;  %v2187_v49 = vsel %vm651_vm10, %v2180_v58, %v16566_v46 }
 0x496   : > { %v16569_v25 = vpop.permute.xlu0 %16568  ;;  %v2311_v8 = vshrl.u32 %v2220_v37, 16  ;;  %v2314_v5 = vshll.u32 %v2220_v37, 16 }
 0x497   : > { %v2191_v48 = vsel %vm659_vm11, %v2184_v42, %v16545_v16  ;;  %v2192_v43 = vsel %vm659_vm11, %v2185_v12, %v16546_v26  ;;  %v16571_v36 = vunpack.i.h.bf16 %v16569_v25  ;;  %v16570_v1 = vunpack.i.l.bf16 %v16569_v25 }
 0x498   : > { %v19315_v40 = vpack.c.bf16 %v2192_v43, %v2191_v48  ;;  %v16579_v47 = vpop.permute.xlu1 %16578  ;;  %v2313_v13 = vrot.slane %v2311_v8, 6  ;;  %v2316_v35 = vrot.slane %v2314_v5, 7  ;;  %v2473_v59 = vrot.slane %v2311_v8, 2 }
 0x499   : > { %v2214_v27 = vsel %vm659_vm11, %v2207_v21, %v16570_v1  ;;  %v2215_v19 = vsel %vm659_vm11, %v2208_v18, %v16571_v36  ;;  %v16580_v56 = vunpack.i.l.bf16 %v16579_v47  ;;  %v16581_v31 = vunpack.i.h.bf16 %v16579_v47 }
 0x49a   : > { %v2294_v17 = vshrl.u32 %v19315_v40, 16  ;;  %v2222_v4 = vpack.c.bf16 %v2215_v19, %v2214_v27  ;;  %v16574_v33 = vpop.permute.xlu0 %16573  ;;  %v2297_v30 = vshll.u32 %v19315_v40, 16  ;;  %v2317_v39 = vor.u32 %v2316_v35, %v2313_v13 }
 0x49b   : > { %v16576_v14 = vunpack.i.h.bf16 %v16574_v33  ;;  %v16575_v51 = vunpack.i.l.bf16 %v16574_v33  ;;  %v2202_v38 = vsel %vm643_vm9, %v19223_v61, %v16580_v56  ;;  %v2474_v3 = vrot.slane %v2314_v5, 3 }
 0x49c   : > { %v16589_v23 = vpop.permute.xlu1 %16588  ;;  %v2319_v57 = vshrl.u32 %v2222_v4, 16  ;;  %v2322_v6 = vshll.u32 %v2222_v4, 16  ;;  %v2203_v44 = vsel %vm643_vm9, %v19226_v20, %v16581_v31  ;;  %v2296_v34 = vrot.slane %v2294_v17, 6 }
 0x49d   : > { %v2193_v0 = vsel %vm659_vm11, %v2186_v62, %v16575_v51  ;;  %v2194_v60 = vsel %vm659_vm11, %v2187_v49, %v16576_v14  ;;  %v16591_v24 = vunpack.i.h.bf16 %v16589_v23  ;;  %v16590_v52 = vunpack.i.l.bf16 %v16589_v23 }
 0x49e   : > { %v2221_v58 = vpack.c.bf16 %v2194_v60, %v2193_v0  ;;  %v16584_v9 = vpop.permute.xlu0 %16583  ;;  %v2321_v29 = vrot.slane %v2319_v57, 6  ;;  %v2324_v32 = vrot.slane %v2322_v6, 7  ;;  %v2475_v37 = vor.u32 %v2474_v3, %v2473_v59  ;;  %v17392_v3 = vld [vmem:[%s23664_s2 + $0x3c8] sm:$0xff]  }
 0x49f   : > { %v2209_v42 = vsel %vm651_vm10, %v2202_v38, %v16590_v52  ;;  %v16586_v61 = vunpack.i.h.bf16 %v16584_v9  ;;  %v2476_v16 = vrot.slane %v2319_v57, 2  ;;  %v2210_v18 = vsel %vm651_vm10, %v2203_v44, %v16591_v24 }
 0x4a0   : > { %v2302_v22 = vshrl.u32 %v2221_v58, 16  ;;  %v2305_v12 = vshll.u32 %v2221_v58, 16  ;;  %v16599_v46 = vpop.permute.xlu1 %16598  ;;  %v19329_v26 = vor.u32 %v2324_v32, %v2321_v29  ;;  %v16585_v21 = vunpack.i.l.bf16 %v16584_v9 }
 0x4a1   : > { %v16601_v25 = vunpack.i.h.bf16 %v16599_v46  ;;  %v16600_v20 = vunpack.i.l.bf16 %v16599_v46  ;;  %v2477_v48 = vrot.slane %v2322_v6, 3  ;;  %v2299_v43 = vrot.slane %v2297_v30, 7 }
 0x4a2   : > { %v16594_v8 = vpop.permute.xlu0 %16593  ;;  %v2326_v5 = vsel %vm761_vm12, %v2317_v39, %v19329_v26  ;;  %v2304_v36 = vrot.slane %v2302_v22, 6  ;;  %v2182_v13 = vsel %vm643_vm9, %v19022_v45, %v16586_v61  ;;  %v2307_v19 = vrot.slane %v2305_v12, 7  ;;  %v17390_v45 = vld [vmem:[%s23664_s2 + $0x380] sm:$0xff]   ;;  %v17394_v61 = vld [vmem:[%s23664_s2 + $0x388] sm:$0xff]  }
 0x4a3   : > { %v2216_v1 = vsel %vm659_vm11, %v2209_v42, %v16600_v20  ;;  %v2217_v62 = vsel %vm659_vm11, %v2210_v18, %v16601_v25  ;;  %v16596_v40 = vunpack.i.h.bf16 %v16594_v8  ;;  %v16595_v47 = vunpack.i.l.bf16 %v16594_v8  ;;  %2457 = vmatprep.mubr.bf16.mxu0 %v2326_v5  ;;  %v17396_v18 = vld [vmem:[%s23664_s2 + $0x3d0] sm:$0xff]  }
 0x4a4   : > { %v2224_v35 = vpack.c.bf16 %v2217_v62, %v2216_v1  ;;  %v19338_v49 = vor.u32 %v2477_v48, %v2476_v16  ;;  %v16609_v27 = vpop.permute.xlu1 %16608  ;;  %v2181_v56 = vsel %vm643_vm9, %v19001_v7, %v16585_v21  ;;  %v2300_v33 = vor.u32 %v2299_v43, %v2296_v34 }
 0x4a5   : > { %v16611_v4 = vunpack.i.h.bf16 %v16609_v27  ;;  %v16610_v31 = vunpack.i.l.bf16 %v16609_v27  ;;  %v19344_v51 = vor.u32 %v2307_v19, %v2304_v36  ;;  %v2466_v39 = vrot.slane %v2294_v17, 2 }
 0x4a6   : > { %v2479_v59 = vsel %vm935_vm13, %v2475_v37, %v19338_v49  ;;  %v16604_v14 = vpop.permute.xlu0 %16603  ;;  %v2467_v38 = vrot.slane %v2297_v30, 3  ;;  %v2188_v23 = vsel %vm651_vm10, %v2181_v56, %v16595_v47  ;;  %v2189_v57 = vsel %vm651_vm10, %v2182_v13, %v16596_v40  ;;  %v17395_v40 = vld [vmem:[%s23664_s2 + $0x408] sm:$0xff]   ;;  %v17397_v56 = vld [vmem:[%s23664_s2 + $0x450] sm:$0xff]  }
 0x4a7   : > { %2610 = vmatprep.mubr.bf16.mxu1 %v2479_v59  ;;  %v16606_v7 = vunpack.i.h.bf16 %v16604_v14  ;;  %v16605_v6 = vunpack.i.l.bf16 %v16604_v14  ;;  %v2183_v0 = vsel %vm643_vm9, %v18982_v10, %v16611_v4  ;;  %v2309_v17 = vsel %vm761_vm12, %v2300_v33, %v19344_v51  ;;  %v17391_v10 = vld [vmem:[%s23664_s2 + $0x400] sm:$0xff]   ;;  %v17398_v33 = vld [vmem:[%s23664_s2 + $0x390] sm:$0xff]  }
 0x4a8   : > { %v2469_v30 = vrot.slane %v2302_v22, 2  ;;  %v2470_v60 = vrot.slane %v2305_v12, 3  ;;  %v16619_v24 = vpop.permute.xlu1 %16618  ;;  %v2204_v52 = vsel %vm643_vm9, %v19234_v41, %v16610_v31  ;;  %2458 = vmatmul.mubr.bf16.vlgmr.msra.gmra.mrb[20].mxu0 %v2309_v17  ;;  %v2468_v9 = vor.u32 %v2467_v38, %v2466_v39  ;;  %v17393_v12 = vld [vmem:[%s23664_s2 + $0x448] sm:$0xff]   ;;  %v17400_v38 = vld [vmem:[%s23664_s2 + $0x3d8] sm:$0xff]  }
 0x4a9   : > { %v2195_v44 = vsel %vm659_vm11, %v2188_v23, %v16605_v6  ;;  %v2196_v58 = vsel %vm659_vm11, %v2189_v57, %v16606_v7  ;;  %15126 = vmatpush3.bf16.msra.mxu0 %v17390_v45  ;;  %v2662_v37 = vshrl.u32 %v2224_v35, 16  ;;  %v2665_v41 = vshll.u32 %v2224_v35, 16  ;;  %v17399_v6 = vld [vmem:[%s23664_s2 + $0x410] sm:$0xff]  }
 0x4aa   : > { %v2223_v29 = vpack.c.bf16 %v2196_v58, %v2195_v44  ;;  %v2471_v32 = vor.u32 %v2470_v60, %v2469_v30  ;;  %v16614_v42 = vpop.permute.xlu0 %16613  ;;  %v16621_v34 = vunpack.i.h.bf16 %v16619_v24  ;;  %v16620_v22 = vunpack.i.l.bf16 %v16619_v24  ;;  %15127 = vmatprep.subr.bf16.mxu0 %v17392_v3 }
 0x4ab   : > { %v16616_v46 = vunpack.i.h.bf16 %v16614_v42  ;;  %v16615_v16 = vunpack.i.l.bf16 %v16614_v42  ;;  %v2664_v8 = vrot.slane %v2662_v37, 2  ;;  %v2667_v43 = vrot.slane %v2665_v41, 3  ;;  %v17405_v42 = vld [vmem:[%s23664_s2 + $0x460] sm:$0xff]  }
 0x4ac   : > { %v2653_v21 = vshrl.u32 %v2223_v29, 16  ;;  %v2656_v25 = vshll.u32 %v2223_v29, 16  ;;  %v2472_v20 = vsel %vm935_vm13, %v2468_v9, %v2471_v32  ;;  %v2848_v36 = vrot.slane %v2662_v37, 6  ;;  %v17404_v9 = vld [vmem:[%s23664_s2 + $0x3e0] sm:$0xff]  }
 0x4ad   : > { %2611 = vmatmul.mubr.bf16.vlgmr.msra.gmra.mrb[20].mxu1 %v2472_v20  ;;  %v2190_v5 = vsel %vm651_vm10, %v2183_v0, %v16616_v46  ;;  %v2211_v48 = vsel %vm651_vm10, %v2204_v52, %v16615_v16  ;;  %15128 = vmatpush3.bf16.msra.mxu0 %v17394_v61  ;;  %v2849_v47 = vrot.slane %v2665_v41, 7  ;;  %v2668_v19 = vor.u32 %v2667_v43, %v2664_v8  ;;  %v17406_v61 = vld [vmem:[%s23664_s2 + $0x3a0] sm:$0xff]   ;;  %v17408_v41 = vld [vmem:[%s23664_s2 + $0x3e8] sm:$0xff]   ;;  %v17412_v46 = vld [vmem:[%s23664_s2 + $0x3f0] sm:$0xff]  }
 0x4ae   : > { %15148 = vmatpush3.bf16.msra.mxu1 %v17391_v10  ;;  %v2197_v1 = vsel %vm659_vm11, %v2190_v5, %v16621_v34  ;;  %v2218_v62 = vsel %vm659_vm11, %v2211_v48, %v16620_v22  ;;  %v2655_v13 = vrot.slane %v2653_v21, 2  ;;  %15129 = vmatprep.subr.bf16.mxu0 %v17396_v18  ;;  %v2658_v4 = vrot.slane %v2656_v25, 3  ;;  %v17407_v34 = vld [vmem:[%s23664_s2 + $0x420] sm:$0xff]   ;;  %v17409_v22 = vld [vmem:[%s23664_s2 + $0x468] sm:$0xff]   ;;  %v17413_v18 = vld [vmem:[%s23664_s2 + $0x470] sm:$0xff]  }
 0x4af   : > { %15149 = vmatprep.subr.bf16.mxu1 %v17393_v12  ;;  %v2225_v35 = vpack.c.bf16 %v2197_v1, %v2197_v1  ;;  %v2226_v27 = vpack.c.bf16 %v2218_v62, %v2218_v62  ;;  %v2850_v31 = vor.u32 %v2849_v47, %v2848_v36  ;;  %v2844_v59 = vrot.slane %v2653_v21, 6  ;;  %v17410_v12 = vld [vmem:[%s23664_s2 + $0x3a8] sm:$0xff]   ;;  %v17414_v21 = vld [vmem:[%s23664_s2 + $0x3b0] sm:$0xff]   ;;  %v17417_v8 = vld [vmem:[%s23664_s2 + $0x478] sm:$0xff]  }
 0x4b0   : > { %v2845_v14 = vrot.slane %v2656_v25, 7  ;;  %v2669_v39 = vsel %vm935_vm13, %v19338_v49, %v2668_v19  ;;  %v2659_v45 = vor.u32 %v2658_v4, %v2655_v13  ;;  %v17401_v49 = vld [vmem:[%s23664_s2 + $0x458] sm:$0xff]   ;;  %v17411_v16 = vld [vmem:[%s23664_s2 + $0x428] sm:$0xff]   ;;  %v17415_v20 = vld [vmem:[%s23664_s2 + $0x430] sm:$0xff]  }
 0x4b1   : > { %v3036_v23 = vshrl.u32 %v2226_v27, 16  ;;  %v3039_v57 = vshll.u32 %v2226_v27, 16  ;;  %2800 = vmatprep.mubr.bf16.mxu0 %v2669_v39  ;;  %v2851_v7 = vsel %vm761_vm12, %v19329_v26, %v2850_v31  ;;  %v3027_v0 = vshrl.u32 %v2225_v35, 16  ;;  %15130 = vmatpush3.bf16.msra.mxu0 %v17398_v33  ;;  %v17402_v26 = vld [vmem:[%s23664_s2 + $0x398] sm:$0xff]   ;;  %v17420_v48 = vld [vmem:[%s23664_s2 + $0x4c0] sm:$0xff]   ;;  %v17423_v1 = vld [vmem:[%s23664_s2 + $0x4c8] sm:$0xff]  }
 0x4b2   : > { %15150 = vmatpush3.bf16.msra.mxu1 %v17395_v40  ;;  %v2846_v3 = vor.u32 %v2845_v14, %v2844_v59  ;;  %v3030_v17 = vshll.u32 %v2225_v35, 16  ;;  %2982 = vmatprep.mubr.bf16.mxu1 %v2851_v7  ;;  %v2660_v30 = vsel %vm935_vm13, %v2471_v32, %v2659_v45  ;;  %v17403_v32 = vld [vmem:[%s23664_s2 + $0x418] sm:$0xff]   ;;  %v17421_v36 = vld [vmem:[%s23664_s2 + $0x480] sm:$0xff]   ;;  %v17424_v40 = vld [vmem:[%s23664_s2 + $0x488] sm:$0xff]  }
 0x4b3   : > { %15151 = vmatprep.subr.bf16.mxu1 %v17397_v56  ;;  %v3038_v60 = vrot.slane %v3036_v23, 2  ;;  %v3041_v24 = vrot.slane %v3039_v57, 3  ;;  %v3029_v44 = vrot.slane %v3027_v0, 2  ;;  %15131 = vmatprep.subr.bf16.mxu0 %v17400_v38  ;;  %v17416_v25 = vld [vmem:[%s23664_s2 + $0x3f8] sm:$0xff]   ;;  %v17422_v62 = vld [vmem:[%s23665_s3 + $0x40] sm:$0xff]   ;;  %v17426_v47 = vld [vmem:[%s23664_s2 + $0x4d0] sm:$0xff]  }
 0x4b4   : > { %v2847_v52 = vsel %vm761_vm12, %v19344_v51, %v2846_v3  ;;  %v3032_v58 = vrot.slane %v3030_v17, 3  ;;  %v17418_v5 = vld [vmem:[%s23664_s2 + $0x3b8] sm:$0xff]   ;;  %v17425_v13 = vld [vmem:[%s23665_s3 + $0x48] sm:$0xff]   ;;  %v17427_v35 = vld [vmem:[%s23664_s2 + $0x490] sm:$0xff]  }
 0x4b5   : > { %v3042_v29 = vor.u32 %v3041_v24, %v3038_v60  ;;  %15132 = vmatpush3.bf16.msra.mxu0 %v17402_v26  ;;  %v17419_v43 = vld [vmem:[%s23664_s2 + $0x438] sm:$0xff]   ;;  %v17432_v4 = vld [vmem:[%s23664_s2 + $0x4e0] sm:$0xff]   ;;  %v17435_v59 = vld [vmem:[%s23664_s2 + $0x4e8] sm:$0xff]  }
 0x4b6   : > { %15152 = vmatpush3.bf16.msra.mxu1 %v17399_v6  ;;  %v3033_v10 = vor.u32 %v3032_v58, %v3029_v44  ;;  %15133 = vmatprep.subr.bf16.mxu0 %v17404_v9  ;;  %v17429_v27 = vld [vmem:[%s23664_s2 + $0x4d8] sm:$0xff]   ;;  %v17433_v33 = vld [vmem:[%s23664_s2 + $0x4a0] sm:$0xff]   ;;  %v17436_v39 = vld [vmem:[%s23664_s2 + $0x4a8] sm:$0xff]  }
 0x4b7   : > { %15153 = vmatprep.subr.bf16.mxu1 %v17401_v49  ;;  %v3043_v51 = vsel %vm935_vm13, %v2668_v19, %v3042_v29  ;;  %v17428_v19 = vld [vmem:[%s23665_s3 + $0x50] sm:$0xff]   ;;  %v17430_v56 = vld [vmem:[%s23664_s2 + $0x498] sm:$0xff]   ;;  %v17434_v14 = vld [vmem:[%s23665_s3 + $0x60] sm:$0xff]  }
 0x4b8   : > { %v19421_v37 = vsel %vm935_vm13, %v2659_v45, %v3033_v10  ;;  %v17431_v31 = vld [vmem:[%s23665_s3 + $0x58] sm:$0xff]   ;;  %v17438_v38 = vld [vmem:[%s23664_s2 + $0x4f0] sm:$0xff]   ;;  %v17437_v45 = vld [vmem:[%s23665_s3 + $0x68] sm:$0xff]  }
 0x4b9   : > { %15134 = vmatpush3.bf16.msra.mxu0 %v17406_v61  ;;  %v17439_v23 = vld [vmem:[%s23664_s2 + $0x4b0] sm:$0xff]   ;;  %v17441_v57 = vld [vmem:[%s23664_s2 + $0x4f8] sm:$0xff]   ;;  %v17444_v0 = vld [vmem:[%s23663_s1 + $0x80] sm:$0xff]  }
 0x4ba   : > { %15154 = vmatpush3.bf16.msra.mxu1 %v17403_v32  ;;  %15135 = vmatprep.subr.bf16.mxu0 %v17408_v41  ;;  %v17440_v7 = vld [vmem:[%s23665_s3 + $0x70] sm:$0xff]   ;;  %v17442_v6 = vld [vmem:[%s23664_s2 + $0x4b8] sm:$0xff]   ;;  %v17445_v17 = vld [vmem:[%s23663_s1 + $0x88] sm:$0xff]  }
 0x4bb   : > { %15155 = vmatprep.subr.bf16.mxu1 %v17405_v42  ;;  %v17443_v3 = vld [vmem:[%s23665_s3 + $0x78] sm:$0xff]   ;;  %v17446_v49 = vld [vmem:[%s23663_s1 + $0x90] sm:$0xff]  }
 0x4bd   : > { %15136 = vmatpush3.bf16.msra.mxu0 %v17410_v12 }
 0x4be   : > { %15156 = vmatpush3.bf16.msra.mxu1 %v17407_v34  ;;  %15137 = vmatprep.subr.bf16.mxu0 %v17412_v46 }
 0x4bf   : > { %15157 = vmatprep.subr.bf16.mxu1 %v17409_v22 }
 0x4c1   : > { %15138 = vmatpush3.bf16.msra.mxu0 %v17414_v21 }
 0x4c2   : > { %15158 = vmatpush3.bf16.msra.mxu1 %v17411_v16  ;;  %15139 = vmatprep.subr.bf16.mxu0 %v17416_v25 }
 0x4c3   : > { %15159 = vmatprep.subr.bf16.mxu1 %v17413_v18 }
 0x4c5   : > { %15140 = vmatpush3.bf16.msra.mxu0 %v17418_v5 }
 0x4c6   : > { %15160 = vmatpush3.bf16.msra.mxu1 %v17415_v20  ;;  %15169 = vmatprep.subr.bf16.mxu0 %v17420_v48 }
 0x4c7   : > { %15161 = vmatprep.subr.bf16.mxu1 %v17417_v8 }
 0x4c8   : > { %2801 = vmatmul.mubr.bf16.vlgmr.msra.gmra.mrb[24].mxu0 %v2660_v30  ;;  %v17450_v30 = vld [vmem:[%s23663_s1 + $0xb0] sm:$0xff]  }
 0x4c9   : > { %15170 = vmatpush3.bf16.msra.mxu0 %v17421_v36  ;;  %3174 = vmatprep.mubr.bf16.mxu0 %v3043_v51 }
 0x4ca   : > { %15162 = vmatpush3.bf16.msra.mxu1 %v17419_v43  ;;  %15171 = vmatprep.subr.bf16.mxu0 %v17423_v1 }
 0x4cb   : > { %16063 = vmatprep.subr.bf16.mxu1 %v23671_v11 }
 0x4cd   : > { %2983 = vmatmul.mubr.bf16.vlgmr.msra.gmra.mrb[24].mxu1 %v2847_v52  ;;  %15172 = vmatpush3.bf16.msra.mxu0 %v17424_v40 }
 0x4ce   : > { %16064 = vmatpush3.bf16.msra.mxu1 %v17422_v62  ;;  %16079 = vmatprep.mubr.msk.bf16.mxu1 %vm18101_vm14, %v23671_v11  ;;  %v17451_v62 = vld [vmem:[%s23663_s1 + $0xb8] sm:$0xff]  }
 0x4cf   : > { %16065 = vmatprep.subr.bf16.mxu1 %v23671_v11  ;;  %15173 = vmatprep.subr.bf16.mxu0 %v17426_v47 }
 0x4d1   : > { %15174 = vmatpush3.bf16.msra.mxu0 %v17427_v35 }
 0x4d2   : > { %16066 = vmatpush3.bf16.msra.mxu1 %v17425_v13  ;;  %15175 = vmatprep.subr.bf16.mxu0 %v17429_v27 }
 0x4d3   : > { %16067 = vmatprep.subr.bf16.mxu1 %v23671_v11 }
 0x4d5   : > { %15176 = vmatpush3.bf16.msra.mxu0 %v17430_v56 }
 0x4d6   : > { %16068 = vmatpush3.bf16.msra.mxu1 %v17428_v19  ;;  %15177 = vmatprep.subr.bf16.mxu0 %v17432_v4 }
 0x4d7   : > { %16069 = vmatprep.subr.bf16.mxu1 %v23671_v11 }
 0x4d9   : > { %15178 = vmatpush3.bf16.msra.mxu0 %v17433_v33 }
 0x4da   : > { %16070 = vmatpush3.bf16.msra.mxu1 %v17431_v31  ;;  %15179 = vmatprep.subr.bf16.mxu0 %v17435_v59 }
 0x4db   : > { %16071 = vmatprep.subr.bf16.mxu1 %v23671_v11 }
 0x4dd   : > { %15180 = vmatpush3.bf16.msra.mxu0 %v17436_v39 }
 0x4de   : > { %16072 = vmatpush3.bf16.msra.mxu1 %v17434_v14  ;;  %15181 = vmatprep.subr.bf16.mxu0 %v17438_v38 }
 0x4df   : > { %16073 = vmatprep.subr.bf16.mxu1 %v23671_v11 }
 0x4e1   : > { %15182 = vmatpush3.bf16.msra.mxu0 %v17439_v23 }
 0x4e2   : > { %16074 = vmatpush3.bf16.msra.mxu1 %v17437_v45  ;;  %15183 = vmatprep.subr.bf16.mxu0 %v17441_v57 }
 0x4e3   : > { %16075 = vmatprep.subr.bf16.mxu1 %v23671_v11 }
 0x4e5   : > { %15184 = vmatpush3.bf16.msra.mxu0 %v17442_v6 }
 0x4e6   : > { %16076 = vmatpush3.bf16.msra.mxu1 %v17440_v7  ;;  %16083 = vmatprep.subr.bf16.mxu0 %v17444_v0 }
 0x4e7   : > { %16077 = vmatprep.subr.bf16.mxu1 %v23671_v11 }
 0x4e8   : > { %3175 = vmatmul.mubr.bf16.vlgmr.msra.gmra.mrb[28].mxu0 %v19421_v37 }
 0x4e9   : > { %16099 = vmatprep.mubr.bf16.mxu0 %v23669_v2  ;;  %16084 = vmatpush3.bf16.msra.mxu0 %v17444_v0 }
 0x4ea   : > { %16078 = vmatpush3.bf16.msra.mxu1 %v17443_v3  ;;  %16085 = vmatprep.subr.bf16.mxu0 %v17445_v17 }
 0x4ed   : > { %16080 = vmatmul.mubr.bf16.vlgmr.msra.gmra.mrb[28].mxu1 %v3211_v15  ;;  %16086 = vmatpush3.bf16.msra.mxu0 %v17445_v17  ;;  %v17449_v15 = vld [vmem:[%s23663_s1 + $0xa8] sm:$0xff]  }
 0x4ee   : > { %16087 = vmatprep.subr.bf16.mxu0 %v17446_v49 }
 0x4f1   : > { %16088 = vmatpush3.bf16.msra.mxu0 %v17446_v49 }
 0x4f2   : > { %16089 = vmatprep.subr.bf16.mxu0 %v17447_v28 }
 0x4f5   : > { %16090 = vmatpush3.bf16.msra.mxu0 %v17447_v28 }
 0x4f6   : > { %16091 = vmatprep.subr.bf16.mxu0 %v17448_v63 }
 0x4f9   : > { %16092 = vmatpush3.bf16.msra.mxu0 %v17448_v63 }
 0x4fa   : > { %16093 = vmatprep.subr.bf16.mxu0 %v17449_v15 }
 0x4fd   : > { %16094 = vmatpush3.bf16.msra.mxu0 %v17449_v15 }
 0x4fe   : > { %16095 = vmatprep.subr.bf16.mxu0 %v17450_v30 }
 0x501   : > { %16096 = vmatpush3.bf16.msra.mxu0 %v17450_v30 }
 0x502   : > { %16097 = vmatprep.subr.bf16.mxu0 %v17451_v62 }
 0x505   : > { %16098 = vmatpush3.bf16.msra.mxu0 %v17451_v62  ;;  %v17454_v62 = vld [vmem:[%s23664_s2 + $0x580] sm:$0xff]  }
 0x57b   : > { %v15097_v60 = vpop.f32.mrb[20].mxu0 }
 0x57c   : > { %v15098_v24 = vpop.f32.mrb[21].mxu0 }
 0x57d   : > { %v15099_v26 = vadd.f32 %v15098_v24, %v15097_v60  ;;  %v15100_v52 = vpop.f32.mrb[22].mxu0 }
 0x57e   : > { %v15101_v44 = vpop.f32.mrb[23].mxu0 }
 0x57f   : > { %v15102_v9 = vadd.f32 %v15101_v44, %v15100_v52 }
 0x580   : > { %v15119_v58 = vpop.f32.mrb[20].mxu1 }
 0x581   : > { %v15120_v29 = vpop.f32.mrb[21].mxu1 }
 0x582   : > { %v15121_v32 = vadd.f32 %v15120_v29, %v15119_v58  ;;  %v15122_v10 = vpop.f32.mrb[22].mxu1 }
 0x583   : > { %v15123_v42 = vpop.f32.mrb[23].mxu1 }
 0x584   : > { %v2613_v51 = vadd.f32 %v15121_v32, %v15099_v26  ;;  %v15124_v61 = vadd.f32 %v15123_v42, %v15122_v10 }
 0x586   : > { %v2616_v37 = vadd.f32 %v15124_v61, %v15102_v9 }
 0x59b   : > { %v15141_v41 = vpop.f32.mrb[24].mxu0 }
 0x59c   : > { %v15142_v34 = vpop.f32.mrb[25].mxu0 }
 0x59d   : > { %v15143_v12 = vadd.f32 %v15142_v34, %v15141_v41  ;;  %v15144_v46 = vpop.f32.mrb[26].mxu0 }
 0x59e   : > { %v15145_v18 = vpop.f32.mrb[27].mxu0 }
 0x59f   : > { %v2809_v21 = vadd.f32 %v15143_v12, %v2613_v51  ;;  %v15146_v8 = vadd.f32 %v15145_v18, %v15144_v46 }
 0x5a0   : > { %v15163_v22 = vpop.f32.mrb[24].mxu1 }
 0x5a1   : > { %v15164_v16 = vpop.f32.mrb[25].mxu1  ;;  %v2810_v43 = vadd.f32 %v15146_v8, %v2616_v37 }
 0x5a2   : > { %v15165_v25 = vadd.f32 %v15164_v16, %v15163_v22  ;;  %v15166_v20 = vpop.f32.mrb[26].mxu1  ;;  %v17452_v16 = vld [vmem:[%s23664_s2 + $0x5c0] sm:$0xff]  }
 0x5a3   : > { %v15167_v5 = vpop.f32.mrb[27].mxu1  ;;  %15212 = vmatprep.subr.bf16.mxu1 %v17452_v16  ;;  %v17461_v16 = vld [vmem:[%s23664_s2 + $0x550] sm:$0xff]  }
 0x5a4   : > { %v2991_v48 = vadd.f32 %v15165_v25, %v2809_v21  ;;  %v15168_v36 = vadd.f32 %v15167_v5, %v15166_v20  ;;  %v17453_v5 = vld [vmem:[%s23664_s2 + $0x540] sm:$0xff]   ;;  %15213 = vmatpush3.bf16.msra.mxu1 %v17454_v62  ;;  %v17463_v62 = vld [vmem:[%s23664_s2 + $0x510] sm:$0xff]  }
 0x5a5   : > { %15234 = vmatprep.subr.bf16.mxu0 %v17453_v5 }
 0x5a6   : > { %v2992_v1 = vadd.f32 %v15168_v36, %v2810_v43 }
 0x5bb   : > { %v15185_v40 = vpop.f32.mrb[28].mxu0 }
 0x5bc   : > { %v15186_v47 = vpop.f32.mrb[29].mxu0 }
 0x5bd   : > { %v15187_v35 = vadd.f32 %v15186_v47, %v15185_v40  ;;  %v15188_v27 = vpop.f32.mrb[30].mxu0  ;;  %v17455_v40 = vld [vmem:[%s23664_s2 + $0x500] sm:$0xff]  }
 0x5be   : > { %v15189_v56 = vpop.f32.mrb[31].mxu0 }
 0x5bf   : > { %v3183_v4 = vadd.f32 %v15187_v35, %v2991_v48  ;;  %v15190_v33 = vadd.f32 %v15189_v56, %v15188_v27 }
 0x5c0   : > { %v3311_v13 = vpop.f32.mrb[28].mxu1 }
 0x5c1   : > { %3320 = vrot.lane.b32.xlu0 %v3311_v13, %s18100_s26  ;;  %v16081_v19 = vpop.f32.mrb[29].mxu1  ;;  %v3184_v14 = vadd.f32 %v15190_v33, %v2992_v1  ;;  %v17456_v33 = vld [vmem:[%s23664_s2 + $0x5c8] sm:$0xff]  }
 0x5c2   : > { %v3314_v31 = vpop.f32.mrb[30].mxu1  ;;  %15214 = vmatprep.subr.bf16.mxu1 %v17456_v33 }
 0x5c3   : > { %3322 = vrot.lane.b32.xlu1 %v3314_v31, %s18100_s26  ;;  %v16082_v59 = vpop.f32.mrb[31].mxu1 }
 0x5c4   : > { %v17457_v59 = vld [vmem:[%s23664_s2 + $0x548] sm:$0xff]  }
 0x633   : > { %v3321_v39 = vpop.permute.xlu0 %3320 }
 0x634   : > { %v3326_v38 = vsel %vm659_vm11, %v3183_v4, %v3321_v39 }
 0x635   : > { %v3328_v45 = vmax.f32 %v3326_v38, 0.0  ;;  %v3323_v23 = vpop.permute.xlu1 %3322 }
 0x636   : > { %v3327_v57 = vsel %vm659_vm11, %v3184_v14, %v3323_v23 }
 0x637   : > { %v4716_v7 = vrot.slane %v3328_v45, 7  ;;  %v3329_v6 = vmax.f32 %v3327_v57, 0.0  ;;  %v3341_v3 = vpack.c.bf16 %v3328_v45, %v23671_v11  ;;  %v4725_v0 = vrot.slane %v3328_v45, 1 }
 0x639   : > { %v4717_v17 = vsel %vm608_vm4, %v18572_v50, %v4716_v7  ;;  %v4718_v49 = vrot.slane %v3329_v6, 7  ;;  %v4726_v28 = vrot.slane %v3329_v6, 1  ;;  %16100 = vmatmul.mubr.bf16.vlgmr.msra.gmra.mrb[32].mxu0 %v3341_v3  ;;  %v3342_v63 = vpack.c.bf16 %v23671_v11, %v3329_v6 }
 0x63a   : > { %v4722_v15 = vsel %vm1655_vm7, -inf, %v4717_v17  ;;  %15235 = vmatpush3.bf16.msra.mxu0 %v17455_v40  ;;  %v17459_v17 = vld [vmem:[%s23664_s2 + $0x508] sm:$0xff]  }
 0x63b   : > { %v4734_v30 = vmax.f32 %v4722_v15, %v3328_v45  ;;  %v4719_v60 = vsel %vm608_vm4, %v4716_v7, %v4718_v49  ;;  %16103 = vmatprep.mubr.bf16.mxu0 %v3342_v63  ;;  %v4727_v24 = vsel %vm413_vm1, %v4725_v0, %v4726_v28  ;;  %v4729_v26 = vsel %vm413_vm1, %v4726_v28, %v18575_v53  ;;  %v17458_v0 = vld [vmem:[%s23664_s2 + $0x588] sm:$0xff]  }
 0x63c   : > { %v4735_v52 = vmax.f32 %v4719_v60, %v3329_v6  ;;  %v4733_v44 = vsel %vm1670_vm8, -inf, %v4729_v26  ;;  %15236 = vmatprep.subr.bf16.mxu0 %v17457_v59  ;;  %15215 = vmatpush3.bf16.msra.mxu1 %v17458_v0 }
 0x63d   : > { %v19589_v58 = vmax.f32 %v4734_v30, %v4727_v24 }
 0x63e   : > { %v19591_v9 = vmax.f32 %v4735_v52, %v4733_v44  ;;  %15237 = vmatpush3.bf16.msra.mxu0 %v17459_v17 }
 0x63f   : > { %15238 = vmatprep.subr.bf16.mxu0 %v17461_v16 }
 0x640   : > { %v4738_v29 = vpack.c.bf16 %v19591_v9, %v19589_v58  ;;  %v17543_v58 = vld [vmem:[%s23663_s1 + $0xd8] sm:$0xff]   ;;  %v17544_v9 = vld [vmem:[%s23663_s1 + $0xe0] sm:$0xff]  }
 0x641   : > { %16104 = vmatmul.mubr.bf16.gmra.mrb[36].mxu0 %v23669_v2 }
 0x642   : > { %15239 = vmatpush3.bf16.msra.mxu0 %v17463_v62 }
 0x70c   : > { %v19596_v32 = vpop.f32.mrb[32].mxu0 }
 0x70d   : > { %v19598_v10 = vpop.f32.mrb[33].mxu0  ;;  %v3603_v42 = vrot.slane %v19596_v32, 5  ;;  %v3484_v51 = vrot.slane %v19596_v32, 1  ;;  %v3637_v61 = vrot.slane %v19596_v32, 6  ;;  %v3518_v37 = vrot.slane %v19596_v32, 2 }
 0x70e   : > { %v3481_v41 = vrot.slane %v19598_v10, 1  ;;  %v3515_v34 = vrot.slane %v19598_v10, 2  ;;  %v19606_v22 = vpop.f32.mrb[34].mxu0  ;;  %v3671_v12 = vrot.slane %v19596_v32, 7  ;;  %v3550_v46 = vrot.slane %v19596_v32, 3 }
 0x70f   : > { %v19613_v18 = vpop.f32.mrb[35].mxu0  ;;  %v3605_v21 = vrot.slane %v19606_v22, 5  ;;  %v3486_v25 = vrot.slane %v19606_v22, 1  ;;  %v3639_v20 = vrot.slane %v19606_v22, 6  ;;  %v3520_v8 = vrot.slane %v19606_v22, 2 }
 0x710   : > { %v3602_v48 = vrot.slane %v19613_v18, 5  ;;  %v3482_v43 = vrot.slane %v19613_v18, 1  ;;  %v3636_v36 = vrot.slane %v19613_v18, 6  ;;  %v3516_v1 = vrot.slane %v19613_v18, 2 }
 0x711   : > { %v19633_v47 = vsel %vm538_vm0, %v3603_v42, %v3605_v21  ;;  %v19636_v13 = vsel %vm413_vm1, %v3484_v51, %v3486_v25  ;;  %v19639_v35 = vsel %vm573_vm2, %v3637_v61, %v3639_v20  ;;  %v3670_v27 = vrot.slane %v19613_v18, 7 }
 0x712   : > { %v3604_v19 = vsel %vm538_vm0, %v3602_v48, %v3603_v42  ;;  %v3483_v56 = vsel %vm413_vm1, %v3481_v41, %v3482_v43  ;;  %v3485_v4 = vsel %vm413_vm1, %v3482_v43, %v3484_v51  ;;  %v3638_v31 = vsel %vm573_vm2, %v3636_v36, %v3637_v61  ;;  %v17460_v42 = vld [vmem:[%s23664_s2 + $0x5d0] sm:$0xff]  }
 0x713   : > { %v16622_v14 = vpack.i.bf16 %v3604_v19, %v3602_v48  ;;  %v16627_v39 = vpack.i.bf16 %v3485_v4, %v3483_v56  ;;  %v19652_v38 = vpack.i.bf16 %v3638_v31, %v3636_v36  ;;  %v19655_v45 = vsel %vm448_vm3, %v3515_v34, %v3516_v1  ;;  %15216 = vmatprep.subr.bf16.mxu1 %v17460_v42  ;;  %v17465_v31 = vld [vmem:[%s23664_s2 + $0x558] sm:$0xff]  }
 0x714   : > { %v19657_v23 = vpop.f32.mrb[36].mxu0  ;;  %v19660_v57 = vsel %vm448_vm3, %v3516_v1, %v3518_v37  ;;  %v3672_v7 = vsel %vm608_vm4, %v3670_v27, %v3671_v12  ;;  %v19666_v6 = vsel %vm448_vm3, %v3518_v37, %v3520_v8  ;;  %v3549_v3 = vrot.slane %v19613_v18, 3  ;;  %v17462_v1 = vld [vmem:[%s23664_s2 + $0x590] sm:$0xff]   ;;  %15240 = vmatprep.subr.bf16.mxu0 %v17465_v31  ;;  %v17472_v31 = vld [vmem:[%s23664_s2 + $0x5e8] sm:$0xff]  }
 0x715   : > { %16623 = vrot.lane.b32.xlu0 %v16622_v14, %s18098_s10  ;;  %v19676_v49 = vpop.f32.mrb[37].mxu0  ;;  %v16637_v28 = vpack.i.bf16 %v19660_v57, %v19655_v45  ;;  %v19680_v63 = vpack.i.bf16 %v3672_v7, %v3670_v27  ;;  %v3673_v15 = vrot.slane %v19606_v22, 7  ;;  %v3611_v30 = vrot.slane %v19657_v23, 5  ;;  %15217 = vmatpush3.bf16.msra.mxu1 %v17462_v1  ;;  %v17466_v7 = vld [vmem:[%s23664_s2 + $0x598] sm:$0xff]   ;;  %v17469_v45 = vld [vmem:[%s23664_s2 + $0x560] sm:$0xff]  }
 0x716   : > { %v19684_v60 = vpop.f32.mrb[38].mxu0  ;;  %v3607_v24 = vrot.slane %v19676_v49, 5  ;;  %v3488_v26 = vrot.slane %v19676_v49, 1  ;;  %v3641_v52 = vrot.slane %v19676_v49, 6  ;;  %v3522_v44 = vrot.slane %v19676_v49, 2  ;;  %v17470_v57 = vld [vmem:[%s23664_s2 + $0x5a0] sm:$0xff]  }
 0x717   : > { %v3593_v51 = vrot.slane %v19684_v60, 4  ;;  %v3613_v61 = vrot.slane %v19684_v60, 5  ;;  %v3647_v37 = vrot.slane %v19684_v60, 6  ;;  %v3681_v41 = vrot.slane %v19684_v60, 7  ;;  %v19697_v34 = vpop.f32.mrb[39].mxu0  ;;  %v17481_v60 = vld [vmem:[%s23664_s2 + $0x578] sm:$0xff]  }
 0x718   : > { %v3608_v5 = vsel %vm538_vm0, %v3605_v21, %v3607_v24  ;;  %v3489_v48 = vsel %vm413_vm1, %v3486_v25, %v3488_v26  ;;  %v19705_v43 = vsel %vm573_vm2, %v3639_v20, %v3641_v52  ;;  %v19710_v36 = vsel %vm448_vm3, %v3520_v8, %v3522_v44 }
 0x719   : > { %16628 = vrot.lane.b32.xlu0 %v16627_v39, %s18098_s10  ;;  %v16652_v21 = vpack.i.bf16 %v3608_v5, %v19633_v47  ;;  %v16657_v25 = vpack.i.bf16 %v3489_v48, %v19636_v13  ;;  %v16662_v20 = vpack.i.bf16 %v19705_v43, %v19639_v35  ;;  %v16667_v8 = vpack.i.bf16 %v19710_v36, %v19666_v6  ;;  %v17477_v36 = vld [vmem:[%s23664_s2 + $0x570] sm:$0xff]  }
 0x71a   : > { %v3551_v40 = vsel %vm483_vm5, %v3549_v3, %v3550_v46  ;;  %v19731_v27 = vsel %vm608_vm4, %v3671_v12, %v3673_v15  ;;  %v3675_v19 = vrot.slane %v19676_v49, 7  ;;  %v3609_v47 = vrot.slane %v19697_v34, 5  ;;  %v17464_v12 = vld [vmem:[%s23664_s2 + $0x5d8] sm:$0xff]  }
 0x71b   : > { %16653 = vrot.lane.b32.xlu1 %v16652_v21, %s18098_s10  ;;  %v19736_v13 = vpack.i.bf16 %v3551_v40, %v3549_v3  ;;  %v3552_v35 = vrot.slane %v19606_v22, 3  ;;  %v3554_v56 = vrot.slane %v19676_v49, 3  ;;  %v3643_v4 = vrot.slane %v19697_v34, 6  ;;  %v17467_v3 = vld [vmem:[%s23664_s2 + $0x518] sm:$0xff]   ;;  %15218 = vmatprep.subr.bf16.mxu1 %v17464_v12  ;;  %v17471_v12 = vld [vmem:[%s23664_s2 + $0x520] sm:$0xff]  }
 0x71c   : > { %v19748_v33 = vsel %vm608_vm4, %v3673_v15, %v3675_v19  ;;  %v19751_v59 = vsel %vm538_vm0, %v3607_v24, %v3609_v47  ;;  %v19756_v14 = vsel %vm538_vm0, %v3609_v47, %v3611_v30  ;;  %v3645_v39 = vrot.slane %v19657_v23, 6  ;;  %15219 = vmatpush3.bf16.msra.mxu1 %v17466_v7  ;;  %15241 = vmatpush3.bf16.msra.mxu0 %v17467_v3 }
 0x71d   : > { %16633 = vrot.lane.b32.xlu0 %v19652_v38, %s18099_s20  ;;  %v16672_v0 = vpack.i.bf16 %v19748_v33, %v19731_v27  ;;  %v16682_v17 = vpack.i.bf16 %v19756_v14, %v19751_v59  ;;  %v19774_v15 = vsel %vm483_vm5, %v3550_v46, %v3552_v35  ;;  %v19777_v24 = vsel %vm483_vm5, %v3552_v35, %v3554_v56  ;;  %v17483_v27 = vld [vmem:[%s23664_s2 + $0x538] sm:$0xff]   ;;  %v17484_v33 = vld [vmem:[%s23664_s2 + $0x640] sm:$0xff]  }
 0x71e   : > { %v16677_v42 = vpack.i.bf16 %v19777_v24, %v19774_v15  ;;  %v19782_v16 = vsel %vm573_vm2, %v3641_v52, %v3643_v4  ;;  %v19785_v38 = vsel %vm573_vm2, %v3643_v4, %v3645_v39  ;;  %v3490_v5 = vrot.slane %v19697_v34, 1  ;;  %15242 = vmatprep.subr.bf16.mxu0 %v17469_v45  ;;  %v17485_v59 = vld [vmem:[%s23664_s2 + $0x6c0] sm:$0xff]  }
 0x71f   : > { %16658 = vrot.lane.b32.xlu1 %v16657_v25, %s18098_s10  ;;  %v16692_v46 = vpack.i.bf16 %v19785_v38, %v19782_v16  ;;  %v3492_v48 = vrot.slane %v19657_v23, 1  ;;  %v3677_v43 = vrot.slane %v19697_v34, 7  ;;  %v3679_v1 = vrot.slane %v19657_v23, 7 }
 0x720   : > { %v19795_v52 = vsel %vm413_vm1, %v3488_v26, %v3490_v5  ;;  %v3524_v62 = vrot.slane %v19697_v34, 2  ;;  %v3526_v21 = vrot.slane %v19657_v23, 2  ;;  %v3614_v25 = vsel %vm538_vm0, %v3611_v30, %v3613_v61  ;;  %v17468_v30 = vld [vmem:[%s23664_s2 + $0x5e0] sm:$0xff]   ;;  %15243 = vmatpush3.bf16.msra.mxu0 %v17471_v12  ;;  %v17476_v12 = vld [vmem:[%s23664_s2 + $0x5f0] sm:$0xff]  }
 0x721   : > { %16638 = vrot.lane.b32.xlu0 %v16637_v28, %s18099_s20  ;;  %v19807_v40 = vsel %vm413_vm1, %v3490_v5, %v3492_v48  ;;  %v19810_v26 = vsel %vm608_vm4, %v3675_v19, %v3677_v43  ;;  %v19813_v47 = vsel %vm608_vm4, %v3677_v43, %v3679_v1  ;;  %v19815_v35 = vpack.i.bf16 %v3492_v48, %v3614_v25  ;;  %v17473_v48 = vld [vmem:[%s23664_s2 + $0x568] sm:$0xff]  }
 0x722   : > { %v16687_v28 = vpack.i.bf16 %v19807_v40, %v19795_v52  ;;  %v16702_v61 = vpack.i.bf16 %v19813_v47, %v19810_v26  ;;  %v19833_v19 = vsel %vm448_vm3, %v3522_v44, %v3524_v62  ;;  %v19836_v4 = vsel %vm448_vm3, %v3524_v62, %v3526_v21  ;;  %15220 = vmatprep.subr.bf16.mxu1 %v17468_v30 }
 0x723   : > { %16663 = vrot.lane.b32.xlu1 %v16662_v20, %s18099_s20  ;;  %v16697_v7 = vpack.i.bf16 %v19836_v4, %v19833_v19  ;;  %v3556_v3 = vrot.slane %v19697_v34, 3  ;;  %v3558_v44 = vrot.slane %v19657_v23, 3  ;;  %v3682_v5 = vsel %vm608_vm4, %v3679_v1, %v3681_v41  ;;  %15221 = vmatpush3.bf16.msra.mxu1 %v17470_v57  ;;  %v17475_v57 = vld [vmem:[%s23664_s2 + $0x528] sm:$0xff]  }
 0x724   : > { %v3648_v20 = vsel %vm573_vm2, %v3645_v39, %v3647_v37  ;;  %v3583_v43 = vrot.slane %v19596_v32, 4  ;;  %v3582_v62 = vrot.slane %v19613_v18, 4  ;;  %v3585_v25 = vrot.slane %v19606_v22, 4  ;;  %15222 = vmatprep.subr.bf16.mxu1 %v17472_v31  ;;  %15244 = vmatprep.subr.bf16.mxu0 %v17473_v48 }
 0x725   : > { %16643 = vrot.lane.b32.xlu0 %v19680_v63, %s18100_s26  ;;  %v3557_v41 = vsel %vm483_vm5, %v3554_v56, %v3556_v3  ;;  %v3559_v1 = vsel %vm483_vm5, %v3556_v3, %v3558_v44  ;;  %v16722_v30 = vpack.i.bf16 %v3558_v44, %v3682_v5  ;;  %v16717_v19 = vpack.i.bf16 %v3526_v21, %v3648_v20  ;;  %v17474_v21 = vld [vmem:[%s23664_s2 + $0x5a8] sm:$0xff]   ;;  %v17478_v3 = vld [vmem:[%s23664_s2 + $0x5b0] sm:$0xff]   ;;  %v17480_v5 = vld [vmem:[%s23664_s2 + $0x5f8] sm:$0xff]  }
 0x726   : > { %v16707_v4 = vpack.i.bf16 %v3559_v1, %v3557_v41  ;;  %v19868_v37 = vsel %vm517_vm6, %v3582_v62, %v3583_v43  ;;  %v19871_v39 = vsel %vm517_vm6, %v3583_v43, %v3585_v25  ;;  %v3587_v45 = vrot.slane %v19676_v49, 4  ;;  %15245 = vmatpush3.bf16.msra.mxu0 %v17475_v57 }
 0x727   : > { %16668 = vrot.lane.b32.xlu1 %v16667_v8, %s18099_s20  ;;  %v3591_v63 = vrot.slane %v19657_v23, 4  ;;  %v3589_v56 = vrot.slane %v19697_v34, 4  ;;  %15223 = vmatpush3.bf16.msra.mxu1 %v17474_v21 }
 0x728   : > { %v19890_v6 = vsel %vm517_vm6, %v3585_v25, %v3587_v45  ;;  %15224 = vmatprep.subr.bf16.mxu1 %v17476_v12  ;;  %15246 = vmatprep.subr.bf16.mxu0 %v17477_v36 }
 0x729   : > { %16648 = vrot.lane.b32.xlu0 %v19736_v13, %s18100_s26  ;;  %v19898_v8 = vsel %vm517_vm6, %v3587_v45, %v3589_v56  ;;  %v19901_v31 = vsel %vm517_vm6, %v3589_v56, %v3591_v63  ;;  %v19909_v44 = vsel %vm517_vm6, %v3591_v63, %v3593_v51  ;;  %v17479_v13 = vld [vmem:[%s23664_s2 + $0x530] sm:$0xff]   ;;  %v17482_v51 = vld [vmem:[%s23664_s2 + $0x5b8] sm:$0xff]  }
 0x72a   : > { %15247 = vmatpush3.bf16.msra.mxu0 %v17479_v13 }
 0x72b   : > { %16673 = vrot.lane.b32.xlu1 %v16672_v0, %s18100_s26  ;;  %15225 = vmatpush3.bf16.msra.mxu1 %v17478_v3 }
 0x72c   : > { %15226 = vmatprep.subr.bf16.mxu1 %v17480_v5  ;;  %15248 = vmatprep.subr.bf16.mxu0 %v17481_v60 }
 0x72d   : > { %16683 = vrot.lane.b32.xlu0 %v16682_v17, %s18098_s10 }
 0x72e   : > { %15249 = vmatpush3.bf16.msra.mxu0 %v17483_v27 }
 0x72f   : > { %16678 = vrot.lane.b32.xlu1 %v16677_v42, %s18100_s26  ;;  %15227 = vmatpush3.bf16.msra.mxu1 %v17482_v51 }
 0x730   : > { %15256 = vmatprep.subr.bf16.mxu1 %v17484_v33  ;;  %15278 = vmatprep.subr.bf16.mxu0 %v17485_v59 }
 0x731   : > { %16693 = vrot.lane.b32.xlu0 %v16692_v46, %s18099_s20 }
 0x733   : > { %16688 = vrot.lane.b32.xlu1 %v16687_v28, %s18098_s10 }
 0x735   : > { %16703 = vrot.lane.b32.xlu0 %v16702_v61, %s18100_s26 }
 0x737   : > { %16698 = vrot.lane.b32.xlu1 %v16697_v7, %s18099_s20 }
 0x739   : > { %16713 = vrot.lane.b32.xlu0 %v19815_v35, %s18098_s10 }
 0x73b   : > { %16708 = vrot.lane.b32.xlu1 %v16707_v4, %s18100_s26 }
 0x73d   : > { %16723 = vrot.lane.b32.xlu0 %v16722_v30, %s18100_s26 }
 0x73f   : > { %16718 = vrot.lane.b32.xlu1 %v16717_v19, %s18099_s20 }
 0x787   : > { %v16624_v14 = vpop.permute.xlu0 %16623 }
 0x788   : > { %v16626_v42 = vunpack.i.h.bf16 %v16624_v14  ;;  %v16625_v16 = vunpack.i.l.bf16 %v16624_v14 }
 0x78a   : > { %v3725_v28 = vsel %vm643_vm9, %v3582_v62, %v16625_v16  ;;  %v3726_v61 = vsel %vm643_vm9, %v19868_v37, %v16626_v42 }
 0x78b   : > { %v16629_v0 = vpop.permute.xlu0 %16628 }
 0x78c   : > { %v16631_v38 = vunpack.i.h.bf16 %v16629_v0  ;;  %v16630_v46 = vunpack.i.l.bf16 %v16629_v0 }
 0x78d   : > { %v16654_v17 = vpop.permute.xlu1 %16653 }
 0x78e   : > { %v16655_v40 = vunpack.i.l.bf16 %v16654_v17  ;;  %v16656_v7 = vunpack.i.h.bf16 %v16654_v17  ;;  %v3705_v20 = vsel %vm643_vm9, %v19613_v18, %v16631_v38  ;;  %v3704_v43 = vsel %vm643_vm9, %v19598_v10, %v16630_v46 }
 0x78f   : > { %v16634_v15 = vpop.permute.xlu0 %16633 }
 0x790   : > { %v16636_v26 = vunpack.i.h.bf16 %v16634_v15  ;;  %v16635_v47 = vunpack.i.l.bf16 %v16634_v15  ;;  %v3727_v30 = vsel %vm643_vm9, %v19871_v39, %v16655_v40  ;;  %v3728_v18 = vsel %vm643_vm9, %v19890_v6, %v16656_v7 }
 0x791   : > { %v16659_v24 = vpop.permute.xlu1 %16658 }
 0x792   : > { %v16661_v48 = vunpack.i.h.bf16 %v16659_v24  ;;  %v16660_v25 = vunpack.i.l.bf16 %v16659_v24  ;;  %v3733_v45 = vsel %vm651_vm10, %v3726_v61, %v16636_v26  ;;  %v3732_v37 = vsel %vm651_vm10, %v3725_v28, %v16635_v47 }
 0x793   : > { %v16639_v52 = vpop.permute.xlu0 %16638 }
 0x794   : > { %v16640_v41 = vunpack.i.l.bf16 %v16639_v52  ;;  %v16641_v19 = vunpack.i.h.bf16 %v16639_v52  ;;  %v3707_v10 = vsel %vm643_vm9, %v19606_v22, %v16661_v48  ;;  %v3706_v12 = vsel %vm643_vm9, %v19596_v32, %v16660_v25 }
 0x795   : > { %v16664_v35 = vpop.permute.xlu1 %16663 }
 0x796   : > { %v16666_v63 = vunpack.i.h.bf16 %v16664_v35  ;;  %v16665_v56 = vunpack.i.l.bf16 %v16664_v35  ;;  %v3711_v36 = vsel %vm651_vm10, %v3704_v43, %v16640_v41  ;;  %v3712_v60 = vsel %vm651_vm10, %v3705_v20, %v16641_v19 }
 0x797   : > { %v16644_v1 = vpop.permute.xlu0 %16643 }
 0x798   : > { %v16646_v4 = vunpack.i.h.bf16 %v16644_v1  ;;  %v16645_v62 = vunpack.i.l.bf16 %v16644_v1  ;;  %v3735_v33 = vsel %vm651_vm10, %v3728_v18, %v16666_v63  ;;  %v3734_v22 = vsel %vm651_vm10, %v3727_v30, %v16665_v56 }
 0x799   : > { %v16669_v21 = vpop.permute.xlu1 %16668 }
 0x79a   : > { %v3739_v57 = vsel %vm659_vm11, %v3732_v37, %v16645_v62  ;;  %v3740_v39 = vsel %vm659_vm11, %v3733_v45, %v16646_v4  ;;  %v16670_v13 = vunpack.i.l.bf16 %v16669_v21  ;;  %v16671_v51 = vunpack.i.h.bf16 %v16669_v21 }
 0x79b   : > { %v3747_v3 = vpack.c.bf16 %v3740_v39, %v3739_v57  ;;  %v16649_v5 = vpop.permute.xlu0 %16648 }
 0x79c   : > { %v16651_v27 = vunpack.i.h.bf16 %v16649_v5  ;;  %v16650_v6 = vunpack.i.l.bf16 %v16649_v5  ;;  %v3713_v42 = vsel %vm651_vm10, %v3706_v12, %v16670_v13  ;;  %v3714_v40 = vsel %vm651_vm10, %v3707_v10, %v16671_v51 }
 0x79d   : > { %v16674_v59 = vpop.permute.xlu1 %16673  ;;  %v3838_v14 = vshrl.u32 %v3747_v3, 16  ;;  %v3841_v0 = vshll.u32 %v3747_v3, 16 }
 0x79e   : > { %v3718_v17 = vsel %vm659_vm11, %v3711_v36, %v16650_v6  ;;  %v3719_v32 = vsel %vm659_vm11, %v3712_v60, %v16651_v27  ;;  %v16676_v15 = vunpack.i.h.bf16 %v16674_v59  ;;  %v16675_v24 = vunpack.i.l.bf16 %v16674_v59 }
 0x79f   : > { %v19990_v16 = vpack.c.bf16 %v3719_v32, %v3718_v17  ;;  %v16684_v38 = vpop.permute.xlu0 %16683  ;;  %v3840_v46 = vrot.slane %v3838_v14, 6  ;;  %v3843_v52 = vrot.slane %v3841_v0, 7  ;;  %v4000_v20 = vrot.slane %v3838_v14, 2 }
 0x7a0   : > { %v3741_v26 = vsel %vm659_vm11, %v3734_v22, %v16675_v24  ;;  %v3742_v47 = vsel %vm659_vm11, %v3735_v33, %v16676_v15  ;;  %v16685_v35 = vunpack.i.l.bf16 %v16684_v38  ;;  %v16686_v7 = vunpack.i.h.bf16 %v16684_v38 }
 0x7a1   : > { %v3821_v28 = vshrl.u32 %v19990_v16, 16  ;;  %v3749_v61 = vpack.c.bf16 %v3742_v47, %v3741_v26  ;;  %v16679_v48 = vpop.permute.xlu1 %16678  ;;  %v3824_v43 = vshll.u32 %v19990_v16, 16  ;;  %v3844_v1 = vor.u32 %v3843_v52, %v3840_v46 }
 0x7a2   : > { %v16681_v25 = vunpack.i.h.bf16 %v16679_v48  ;;  %v16680_v41 = vunpack.i.l.bf16 %v16679_v48  ;;  %v3729_v30 = vsel %vm643_vm9, %v19898_v8, %v16685_v35  ;;  %v4001_v45 = vrot.slane %v3841_v0, 3 }
 0x7a3   : > { %v16694_v19 = vpop.permute.xlu0 %16693  ;;  %v3846_v4 = vshrl.u32 %v3749_v61, 16  ;;  %v3849_v62 = vshll.u32 %v3749_v61, 16  ;;  %v3730_v18 = vsel %vm643_vm9, %v19901_v31, %v16686_v7  ;;  %v3823_v13 = vrot.slane %v3821_v28, 6 }
 0x7a4   : > { %v3720_v37 = vsel %vm659_vm11, %v3713_v42, %v16680_v41  ;;  %v3721_v63 = vsel %vm659_vm11, %v3714_v40, %v16681_v25  ;;  %v16696_v56 = vunpack.i.h.bf16 %v16694_v19  ;;  %v16695_v21 = vunpack.i.l.bf16 %v16694_v19 }
 0x7a5   : > { %v3748_v10 = vpack.c.bf16 %v3721_v63, %v3720_v37  ;;  %v16689_v57 = vpop.permute.xlu1 %16688  ;;  %v3848_v39 = vrot.slane %v3846_v4, 6  ;;  %v3851_v12 = vrot.slane %v3849_v62, 7  ;;  %v4002_v3 = vor.u32 %v4001_v45, %v4000_v20  ;;  %v17488_v45 = vld [vmem:[%s23664_s2 + $0x648] sm:$0xff]  }
 0x7a6   : > { %v3736_v36 = vsel %vm651_vm10, %v3729_v30, %v16695_v21  ;;  %v16691_v8 = vunpack.i.h.bf16 %v16689_v57  ;;  %v4003_v6 = vrot.slane %v3846_v4, 2  ;;  %v3737_v33 = vsel %vm651_vm10, %v3730_v18, %v16696_v56 }
 0x7a7   : > { %v3829_v5 = vshrl.u32 %v3748_v10, 16  ;;  %v3832_v60 = vshll.u32 %v3748_v10, 16  ;;  %v16704_v51 = vpop.permute.xlu0 %16703  ;;  %v20004_v27 = vor.u32 %v3851_v12, %v3848_v39  ;;  %v16690_v22 = vunpack.i.l.bf16 %v16689_v57 }
 0x7a8   : > { %v16706_v59 = vunpack.i.h.bf16 %v16704_v51  ;;  %v16705_v31 = vunpack.i.l.bf16 %v16704_v51  ;;  %v4004_v17 = vrot.slane %v3849_v62, 3  ;;  %v3826_v32 = vrot.slane %v3824_v43, 7 }
 0x7a9   : > { %v16699_v14 = vpop.permute.xlu1 %16698  ;;  %v3853_v0 = vsel %vm761_vm12, %v3844_v1, %v20004_v27  ;;  %v3831_v15 = vrot.slane %v3829_v5, 6  ;;  %v3709_v46 = vsel %vm643_vm9, %v19697_v34, %v16691_v8  ;;  %v3834_v47 = vrot.slane %v3832_v60, 7  ;;  %v17486_v34 = vld [vmem:[%s23664_s2 + $0x600] sm:$0xff]   ;;  %v17490_v8 = vld [vmem:[%s23664_s2 + $0x608] sm:$0xff]  }
 0x7aa   : > { %v3743_v24 = vsel %vm659_vm11, %v3736_v36, %v16705_v31  ;;  %v3744_v42 = vsel %vm659_vm11, %v3737_v33, %v16706_v59  ;;  %v16701_v16 = vunpack.i.h.bf16 %v16699_v14  ;;  %v16700_v38 = vunpack.i.l.bf16 %v16699_v14  ;;  %3984 = vmatprep.mubr.bf16.mxu1 %v3853_v0  ;;  %v17492_v33 = vld [vmem:[%s23664_s2 + $0x650] sm:$0xff]  }
 0x7ab   : > { %v3751_v52 = vpack.c.bf16 %v3744_v42, %v3743_v24  ;;  %v20013_v40 = vor.u32 %v4004_v17, %v4003_v6  ;;  %v16714_v26 = vpop.permute.xlu0 %16713  ;;  %v3708_v35 = vsel %vm643_vm9, %v19676_v49, %v16690_v22  ;;  %v3827_v48 = vor.u32 %v3826_v32, %v3823_v13 }
 0x7ac   : > { %v16716_v61 = vunpack.i.h.bf16 %v16714_v26  ;;  %v16715_v7 = vunpack.i.l.bf16 %v16714_v26  ;;  %v20019_v41 = vor.u32 %v3834_v47, %v3831_v15  ;;  %v3993_v1 = vrot.slane %v3821_v28, 2 }
 0x7ad   : > { %v4006_v20 = vsel %vm935_vm13, %v4002_v3, %v20013_v40  ;;  %v16709_v25 = vpop.permute.xlu1 %16708  ;;  %v3994_v30 = vrot.slane %v3824_v43, 3  ;;  %v3715_v19 = vsel %vm651_vm10, %v3708_v35, %v16700_v38  ;;  %v3716_v4 = vsel %vm651_vm10, %v3709_v46, %v16701_v16  ;;  %v17491_v16 = vld [vmem:[%s23664_s2 + $0x688] sm:$0xff]   ;;  %v17493_v35 = vld [vmem:[%s23664_s2 + $0x6d0] sm:$0xff]  }
 0x7ae   : > { %4137 = vmatprep.mubr.bf16.mxu0 %v4006_v20  ;;  %v16711_v49 = vunpack.i.h.bf16 %v16709_v25  ;;  %v16710_v62 = vunpack.i.l.bf16 %v16709_v25  ;;  %v3710_v37 = vsel %vm643_vm9, %v19657_v23, %v16716_v61  ;;  %v3836_v28 = vsel %vm761_vm12, %v3827_v48, %v20019_v41  ;;  %v17487_v23 = vld [vmem:[%s23664_s2 + $0x680] sm:$0xff]   ;;  %v17494_v48 = vld [vmem:[%s23664_s2 + $0x610] sm:$0xff]  }
 0x7af   : > { %v3996_v43 = vrot.slane %v3829_v5, 2  ;;  %v3997_v63 = vrot.slane %v3832_v60, 3  ;;  %v16724_v56 = vpop.permute.xlu0 %16723  ;;  %v3731_v21 = vsel %vm643_vm9, %v19909_v44, %v16715_v7  ;;  %3985 = vmatmul.mubr.bf16.vlgmr.msra.gmra.mrb[32].mxu1 %v3836_v28  ;;  %v3995_v57 = vor.u32 %v3994_v30, %v3993_v1  ;;  %v17489_v60 = vld [vmem:[%s23664_s2 + $0x6c8] sm:$0xff]   ;;  %v17496_v30 = vld [vmem:[%s23664_s2 + $0x658] sm:$0xff]  }
 0x7b0   : > { %v3722_v18 = vsel %vm659_vm11, %v3715_v19, %v16710_v62  ;;  %v3723_v10 = vsel %vm659_vm11, %v3716_v4, %v16711_v49  ;;  %15257 = vmatpush3.bf16.msra.mxu1 %v17486_v34  ;;  %v4189_v3 = vshrl.u32 %v3751_v52, 16  ;;  %v4192_v44 = vshll.u32 %v3751_v52, 16  ;;  %v17495_v62 = vld [vmem:[%s23664_s2 + $0x690] sm:$0xff]  }
 0x7b1   : > { %v3750_v39 = vpack.c.bf16 %v3723_v10, %v3722_v18  ;;  %v3998_v12 = vor.u32 %v3997_v63, %v3996_v43  ;;  %v16719_v36 = vpop.permute.xlu1 %16718  ;;  %v16726_v13 = vunpack.i.h.bf16 %v16724_v56  ;;  %v16725_v5 = vunpack.i.l.bf16 %v16724_v56  ;;  %15258 = vmatprep.subr.bf16.mxu1 %v17488_v45 }
 0x7b2   : > { %v16721_v51 = vunpack.i.h.bf16 %v16719_v36  ;;  %v16720_v6 = vunpack.i.l.bf16 %v16719_v36  ;;  %v4191_v14 = vrot.slane %v4189_v3, 2  ;;  %v4194_v32 = vrot.slane %v4192_v44, 3  ;;  %v17501_v36 = vld [vmem:[%s23664_s2 + $0x6e0] sm:$0xff]  }
 0x7b3   : > { %v4180_v22 = vshrl.u32 %v3750_v39, 16  ;;  %v4183_v59 = vshll.u32 %v3750_v39, 16  ;;  %v3999_v31 = vsel %vm935_vm13, %v3995_v57, %v3998_v12  ;;  %v4375_v15 = vrot.slane %v4189_v3, 6  ;;  %v17500_v57 = vld [vmem:[%s23664_s2 + $0x660] sm:$0xff]  }
 0x7b4   : > { %4138 = vmatmul.mubr.bf16.vlgmr.msra.gmra.mrb[40].mxu0 %v3999_v31  ;;  %v3717_v0 = vsel %vm651_vm10, %v3710_v37, %v16721_v51  ;;  %v3738_v17 = vsel %vm651_vm10, %v3731_v21, %v16720_v6  ;;  %15259 = vmatpush3.bf16.msra.mxu1 %v17490_v8  ;;  %v4376_v38 = vrot.slane %v4192_v44, 7  ;;  %v4195_v47 = vor.u32 %v4194_v32, %v4191_v14  ;;  %v17502_v8 = vld [vmem:[%s23664_s2 + $0x620] sm:$0xff]   ;;  %v17504_v44 = vld [vmem:[%s23664_s2 + $0x668] sm:$0xff]   ;;  %v17508_v51 = vld [vmem:[%s23664_s2 + $0x670] sm:$0xff]  }
 0x7b5   : > { %15279 = vmatpush3.bf16.msra.mxu0 %v17487_v23  ;;  %v3724_v24 = vsel %vm659_vm11, %v3717_v0, %v16726_v13  ;;  %v3745_v42 = vsel %vm659_vm11, %v3738_v17, %v16725_v5  ;;  %v4182_v46 = vrot.slane %v4180_v22, 2  ;;  %15260 = vmatprep.subr.bf16.mxu1 %v17492_v33  ;;  %v4185_v61 = vrot.slane %v4183_v59, 3  ;;  %v17503_v13 = vld [vmem:[%s23664_s2 + $0x6a0] sm:$0xff]   ;;  %v17505_v5 = vld [vmem:[%s23664_s2 + $0x6e8] sm:$0xff]   ;;  %v17509_v33 = vld [vmem:[%s23664_s2 + $0x6f0] sm:$0xff]  }
 0x7b6   : > { %15280 = vmatprep.subr.bf16.mxu0 %v17489_v60  ;;  %v3752_v52 = vpack.c.bf16 %v3724_v24, %v3724_v24  ;;  %v3753_v26 = vpack.c.bf16 %v3745_v42, %v3745_v42  ;;  %v4377_v7 = vor.u32 %v4376_v38, %v4375_v15  ;;  %v4371_v20 = vrot.slane %v4180_v22, 6  ;;  %v17506_v60 = vld [vmem:[%s23664_s2 + $0x628] sm:$0xff]   ;;  %v17510_v22 = vld [vmem:[%s23664_s2 + $0x630] sm:$0xff]   ;;  %v17513_v14 = vld [vmem:[%s23664_s2 + $0x6f8] sm:$0xff]  }
 0x7b7   : > { %v4372_v25 = vrot.slane %v4183_v59, 7  ;;  %v4196_v1 = vsel %vm935_vm13, %v20013_v40, %v4195_v47  ;;  %v4186_v34 = vor.u32 %v4185_v61, %v4182_v46  ;;  %v17497_v40 = vld [vmem:[%s23664_s2 + $0x6d8] sm:$0xff]   ;;  %v17507_v6 = vld [vmem:[%s23664_s2 + $0x6a8] sm:$0xff]   ;;  %v17511_v31 = vld [vmem:[%s23664_s2 + $0x6b0] sm:$0xff]  }
 0x7b8   : > { %v4563_v19 = vshrl.u32 %v3753_v26, 16  ;;  %v4566_v4 = vshll.u32 %v3753_v26, 16  ;;  %4327 = vmatprep.mubr.bf16.mxu1 %v4196_v1  ;;  %v4378_v49 = vsel %vm761_vm12, %v20004_v27, %v4377_v7  ;;  %v4554_v37 = vshrl.u32 %v3752_v52, 16  ;;  %15261 = vmatpush3.bf16.msra.mxu1 %v17494_v48  ;;  %v17498_v27 = vld [vmem:[%s23664_s2 + $0x618] sm:$0xff]   ;;  %v17516_v17 = vld [vmem:[%s23664_s2 + $0x740] sm:$0xff]   ;;  %v17519_v24 = vld [vmem:[%s23664_s2 + $0x748] sm:$0xff]  }
 0x7b9   : > { %15281 = vmatpush3.bf16.msra.mxu0 %v17491_v16  ;;  %v4373_v45 = vor.u32 %v4372_v25, %v4371_v20  ;;  %v4557_v28 = vshll.u32 %v3752_v52, 16  ;;  %4509 = vmatprep.mubr.bf16.mxu0 %v4378_v49  ;;  %v4187_v43 = vsel %vm935_vm13, %v3998_v12, %v4186_v34  ;;  %v17499_v12 = vld [vmem:[%s23664_s2 + $0x698] sm:$0xff]   ;;  %v17517_v15 = vld [vmem:[%s23664_s2 + $0x700] sm:$0xff]   ;;  %v17520_v16 = vld [vmem:[%s23664_s2 + $0x708] sm:$0xff]  }
 0x7ba   : > { %15282 = vmatprep.subr.bf16.mxu0 %v17493_v35  ;;  %v4565_v63 = vrot.slane %v4563_v19, 2  ;;  %v4568_v56 = vrot.slane %v4566_v4, 3  ;;  %v4556_v18 = vrot.slane %v4554_v37, 2  ;;  %15262 = vmatprep.subr.bf16.mxu1 %v17496_v30  ;;  %v17512_v59 = vld [vmem:[%s23664_s2 + $0x678] sm:$0xff]   ;;  %v17518_v42 = vld [vmem:[%s23665_s3 + $0x80] sm:$0xff]   ;;  %v17522_v38 = vld [vmem:[%s23664_s2 + $0x750] sm:$0xff]  }
 0x7bb   : > { %v4374_v21 = vsel %vm761_vm12, %v20019_v41, %v4373_v45  ;;  %v4559_v10 = vrot.slane %v4557_v28, 3  ;;  %v17514_v0 = vld [vmem:[%s23664_s2 + $0x638] sm:$0xff]   ;;  %v17521_v46 = vld [vmem:[%s23665_s3 + $0x88] sm:$0xff]   ;;  %v17523_v52 = vld [vmem:[%s23664_s2 + $0x710] sm:$0xff]  }
 0x7bc   : > { %v4569_v39 = vor.u32 %v4568_v56, %v4565_v63  ;;  %15263 = vmatpush3.bf16.msra.mxu1 %v17498_v27  ;;  %v17515_v32 = vld [vmem:[%s23664_s2 + $0x6b8] sm:$0xff]   ;;  %v17528_v61 = vld [vmem:[%s23664_s2 + $0x760] sm:$0xff]   ;;  %v17531_v20 = vld [vmem:[%s23664_s2 + $0x768] sm:$0xff]  }
 0x7bd   : > { %15283 = vmatpush3.bf16.msra.mxu0 %v17495_v62  ;;  %v4560_v23 = vor.u32 %v4559_v10, %v4556_v18  ;;  %15264 = vmatprep.subr.bf16.mxu1 %v17500_v57  ;;  %v17525_v26 = vld [vmem:[%s23664_s2 + $0x758] sm:$0xff]   ;;  %v17529_v48 = vld [vmem:[%s23664_s2 + $0x720] sm:$0xff]   ;;  %v17532_v1 = vld [vmem:[%s23664_s2 + $0x728] sm:$0xff]  }
 0x7be   : > { %15284 = vmatprep.subr.bf16.mxu0 %v17497_v40  ;;  %v4570_v41 = vsel %vm935_vm13, %v4195_v47, %v4569_v39  ;;  %v17524_v47 = vld [vmem:[%s23665_s3 + $0x90] sm:$0xff]   ;;  %v17526_v35 = vld [vmem:[%s23664_s2 + $0x718] sm:$0xff]   ;;  %v17530_v25 = vld [vmem:[%s23665_s3 + $0xa0] sm:$0xff]  }
 0x7bf   : > { %v20096_v3 = vsel %vm935_vm13, %v4186_v34, %v4560_v23  ;;  %v17527_v7 = vld [vmem:[%s23665_s3 + $0x98] sm:$0xff]   ;;  %v17534_v30 = vld [vmem:[%s23664_s2 + $0x770] sm:$0xff]   ;;  %v17533_v34 = vld [vmem:[%s23665_s3 + $0xa8] sm:$0xff]  }
 0x7c0   : > { %15265 = vmatpush3.bf16.msra.mxu1 %v17502_v8  ;;  %v17535_v19 = vld [vmem:[%s23664_s2 + $0x730] sm:$0xff]   ;;  %v17537_v4 = vld [vmem:[%s23664_s2 + $0x778] sm:$0xff]   ;;  %v17540_v37 = vld [vmem:[%s23663_s1 + $0xc0] sm:$0xff]  }
 0x7c1   : > { %15285 = vmatpush3.bf16.msra.mxu0 %v17499_v12  ;;  %15266 = vmatprep.subr.bf16.mxu1 %v17504_v44  ;;  %v17536_v49 = vld [vmem:[%s23665_s3 + $0xb0] sm:$0xff]   ;;  %v17538_v62 = vld [vmem:[%s23664_s2 + $0x738] sm:$0xff]   ;;  %v17541_v28 = vld [vmem:[%s23663_s1 + $0xc8] sm:$0xff]  }
 0x7c2   : > { %15286 = vmatprep.subr.bf16.mxu0 %v17501_v36  ;;  %v17539_v45 = vld [vmem:[%s23665_s3 + $0xb8] sm:$0xff]   ;;  %v17542_v40 = vld [vmem:[%s23663_s1 + $0xd0] sm:$0xff]  }
 0x7c4   : > { %15267 = vmatpush3.bf16.msra.mxu1 %v17506_v60 }
 0x7c5   : > { %15287 = vmatpush3.bf16.msra.mxu0 %v17503_v13  ;;  %15268 = vmatprep.subr.bf16.mxu1 %v17508_v51 }
 0x7c6   : > { %15288 = vmatprep.subr.bf16.mxu0 %v17505_v5 }
 0x7c8   : > { %15269 = vmatpush3.bf16.msra.mxu1 %v17510_v22 }
 0x7c9   : > { %15289 = vmatpush3.bf16.msra.mxu0 %v17507_v6  ;;  %15270 = vmatprep.subr.bf16.mxu1 %v17512_v59 }
 0x7ca   : > { %15290 = vmatprep.subr.bf16.mxu0 %v17509_v33 }
 0x7cc   : > { %15271 = vmatpush3.bf16.msra.mxu1 %v17514_v0 }
 0x7cd   : > { %15291 = vmatpush3.bf16.msra.mxu0 %v17511_v31  ;;  %15300 = vmatprep.subr.bf16.mxu1 %v17516_v17 }
 0x7ce   : > { %15292 = vmatprep.subr.bf16.mxu0 %v17513_v14 }
 0x7cf   : > { %4328 = vmatmul.mubr.bf16.vlgmr.msra.gmra.mrb[36].mxu1 %v4187_v43  ;;  %v17546_v43 = vld [vmem:[%s23663_s1 + $0xf0] sm:$0xff]  }
 0x7d0   : > { %15301 = vmatpush3.bf16.msra.mxu1 %v17517_v15  ;;  %4701 = vmatprep.mubr.bf16.mxu1 %v4570_v41 }
 0x7d1   : > { %15293 = vmatpush3.bf16.msra.mxu0 %v17515_v32  ;;  %15302 = vmatprep.subr.bf16.mxu1 %v17519_v24 }
 0x7d2   : > { %16107 = vmatprep.subr.bf16.mxu0 %v23671_v11 }
 0x7d4   : > { %4510 = vmatmul.mubr.bf16.vlgmr.msra.gmra.mrb[44].mxu0 %v4374_v21  ;;  %15303 = vmatpush3.bf16.msra.mxu1 %v17520_v16 }
 0x7d5   : > { %16108 = vmatpush3.bf16.msra.mxu0 %v17518_v42  ;;  %16123 = vmatprep.mubr.msk.bf16.mxu0 %vm18101_vm14, %v23671_v11  ;;  %v17547_v42 = vld [vmem:[%s23663_s1 + $0xf8] sm:$0xff]  }
 0x7d6   : > { %16109 = vmatprep.subr.bf16.mxu0 %v23671_v11  ;;  %15304 = vmatprep.subr.bf16.mxu1 %v17522_v38 }
 0x7d8   : > { %15305 = vmatpush3.bf16.msra.mxu1 %v17523_v52 }
 0x7d9   : > { %16110 = vmatpush3.bf16.msra.mxu0 %v17521_v46  ;;  %15306 = vmatprep.subr.bf16.mxu1 %v17525_v26 }
 0x7da   : > { %16111 = vmatprep.subr.bf16.mxu0 %v23671_v11 }
 0x7dc   : > { %15307 = vmatpush3.bf16.msra.mxu1 %v17526_v35 }
 0x7dd   : > { %16112 = vmatpush3.bf16.msra.mxu0 %v17524_v47  ;;  %15308 = vmatprep.subr.bf16.mxu1 %v17528_v61 }
 0x7de   : > { %16113 = vmatprep.subr.bf16.mxu0 %v23671_v11 }
 0x7e0   : > { %15309 = vmatpush3.bf16.msra.mxu1 %v17529_v48 }
 0x7e1   : > { %16114 = vmatpush3.bf16.msra.mxu0 %v17527_v7  ;;  %15310 = vmatprep.subr.bf16.mxu1 %v17531_v20 }
 0x7e2   : > { %16115 = vmatprep.subr.bf16.mxu0 %v23671_v11 }
 0x7e4   : > { %15311 = vmatpush3.bf16.msra.mxu1 %v17532_v1 }
 0x7e5   : > { %16116 = vmatpush3.bf16.msra.mxu0 %v17530_v25  ;;  %15312 = vmatprep.subr.bf16.mxu1 %v17534_v30 }
 0x7e6   : > { %16117 = vmatprep.subr.bf16.mxu0 %v23671_v11 }
 0x7e8   : > { %15313 = vmatpush3.bf16.msra.mxu1 %v17535_v19 }
 0x7e9   : > { %16118 = vmatpush3.bf16.msra.mxu0 %v17533_v34  ;;  %15314 = vmatprep.subr.bf16.mxu1 %v17537_v4 }
 0x7ea   : > { %16119 = vmatprep.subr.bf16.mxu0 %v23671_v11 }
 0x7ec   : > { %15315 = vmatpush3.bf16.msra.mxu1 %v17538_v62 }
 0x7ed   : > { %16120 = vmatpush3.bf16.msra.mxu0 %v17536_v49  ;;  %16127 = vmatprep.subr.bf16.mxu1 %v17540_v37 }
 0x7ee   : > { %16121 = vmatprep.subr.bf16.mxu0 %v23671_v11 }
 0x7ef   : > { %4702 = vmatmul.mubr.bf16.vlgmr.msra.gmra.mrb[40].mxu1 %v20096_v3 }
 0x7f0   : > { %16143 = vmatprep.mubr.bf16.mxu1 %v23669_v2  ;;  %16128 = vmatpush3.bf16.msra.mxu1 %v17540_v37 }
 0x7f1   : > { %16122 = vmatpush3.bf16.msra.mxu0 %v17539_v45  ;;  %16129 = vmatprep.subr.bf16.mxu1 %v17541_v28 }
 0x7f4   : > { %16124 = vmatmul.mubr.bf16.vlgmr.msra.gmra.mrb[48].mxu0 %v4738_v29  ;;  %16130 = vmatpush3.bf16.msra.mxu1 %v17541_v28  ;;  %v17545_v29 = vld [vmem:[%s23663_s1 + $0xe8] sm:$0xff]  }
 0x7f5   : > { %16131 = vmatprep.subr.bf16.mxu1 %v17542_v40 }
 0x7f8   : > { %16132 = vmatpush3.bf16.msra.mxu1 %v17542_v40 }
 0x7f9   : > { %16133 = vmatprep.subr.bf16.mxu1 %v17543_v58 }
 0x7fc   : > { %16134 = vmatpush3.bf16.msra.mxu1 %v17543_v58 }
 0x7fd   : > { %16135 = vmatprep.subr.bf16.mxu1 %v17544_v9 }
 0x800   : > { %16136 = vmatpush3.bf16.msra.mxu1 %v17544_v9 }
 0x801   : > { %16137 = vmatprep.subr.bf16.mxu1 %v17545_v29 }
 0x804   : > { %16138 = vmatpush3.bf16.msra.mxu1 %v17545_v29 }
 0x805   : > { %16139 = vmatprep.subr.bf16.mxu1 %v17546_v43 }
 0x808   : > { %16140 = vmatpush3.bf16.msra.mxu1 %v17546_v43 }
 0x809   : > { %16141 = vmatprep.subr.bf16.mxu1 %v17547_v42 }
 0x80c   : > { %16142 = vmatpush3.bf16.msra.mxu1 %v17547_v42  ;;  %v17550_v42 = vld [vmem:[%s23664_s2 + $0x800] sm:$0xff]  }
 0x882   : > { %v15228_v63 = vpop.f32.mrb[32].mxu1 }
 0x883   : > { %v15229_v56 = vpop.f32.mrb[33].mxu1 }
 0x884   : > { %v15230_v27 = vadd.f32 %v15229_v56, %v15228_v63  ;;  %v15231_v21 = vpop.f32.mrb[34].mxu1 }
 0x885   : > { %v15232_v18 = vpop.f32.mrb[35].mxu1 }
 0x886   : > { %v15233_v57 = vadd.f32 %v15232_v18, %v15231_v21 }
 0x887   : > { %v15250_v10 = vpop.f32.mrb[40].mxu0 }
 0x888   : > { %v15251_v39 = vpop.f32.mrb[41].mxu0 }
 0x889   : > { %v15252_v12 = vadd.f32 %v15251_v39, %v15250_v10  ;;  %v15253_v23 = vpop.f32.mrb[42].mxu0 }
 0x88a   : > { %v15254_v36 = vpop.f32.mrb[43].mxu0 }
 0x88b   : > { %v4140_v41 = vadd.f32 %v15252_v12, %v15230_v27  ;;  %v15255_v8 = vadd.f32 %v15254_v36, %v15253_v23 }
 0x88d   : > { %v4143_v3 = vadd.f32 %v15255_v8, %v15233_v57 }
 0x8a2   : > { %v15272_v44 = vpop.f32.mrb[36].mxu1 }
 0x8a3   : > { %v15273_v13 = vpop.f32.mrb[37].mxu1 }
 0x8a4   : > { %v15274_v60 = vadd.f32 %v15273_v13, %v15272_v44  ;;  %v15275_v51 = vpop.f32.mrb[38].mxu1 }
 0x8a5   : > { %v15276_v33 = vpop.f32.mrb[39].mxu1 }
 0x8a6   : > { %v4336_v22 = vadd.f32 %v15274_v60, %v4140_v41  ;;  %v15277_v14 = vadd.f32 %v15276_v33, %v15275_v51 }
 0x8a7   : > { %v15294_v5 = vpop.f32.mrb[44].mxu0 }
 0x8a8   : > { %v15295_v6 = vpop.f32.mrb[45].mxu0  ;;  %v4337_v32 = vadd.f32 %v15277_v14, %v4143_v3 }
 0x8a9   : > { %v15296_v59 = vadd.f32 %v15295_v6, %v15294_v5  ;;  %v15297_v31 = vpop.f32.mrb[46].mxu0  ;;  %v17548_v6 = vld [vmem:[%s23664_s2 + $0x840] sm:$0xff]  }
 0x8aa   : > { %v15298_v0 = vpop.f32.mrb[47].mxu0  ;;  %15343 = vmatprep.subr.bf16.mxu0 %v17548_v6  ;;  %v17557_v6 = vld [vmem:[%s23664_s2 + $0x7d0] sm:$0xff]  }
 0x8ab   : > { %v4518_v17 = vadd.f32 %v15296_v59, %v4336_v22  ;;  %v15299_v15 = vadd.f32 %v15298_v0, %v15297_v31  ;;  %v17549_v0 = vld [vmem:[%s23664_s2 + $0x7c0] sm:$0xff]   ;;  %15344 = vmatpush3.bf16.msra.mxu0 %v17550_v42  ;;  %v17559_v42 = vld [vmem:[%s23664_s2 + $0x790] sm:$0xff]  }
 0x8ac   : > { %15365 = vmatprep.subr.bf16.mxu1 %v17549_v0 }
 0x8ad   : > { %v4519_v24 = vadd.f32 %v15299_v15, %v4337_v32 }
 0x8c2   : > { %v15316_v16 = vpop.f32.mrb[40].mxu1 }
 0x8c3   : > { %v15317_v38 = vpop.f32.mrb[41].mxu1 }
 0x8c4   : > { %v15318_v52 = vadd.f32 %v15317_v38, %v15316_v16  ;;  %v15319_v26 = vpop.f32.mrb[42].mxu1  ;;  %v17551_v16 = vld [vmem:[%s23664_s2 + $0x780] sm:$0xff]  }
 0x8c5   : > { %v15320_v35 = vpop.f32.mrb[43].mxu1 }
 0x8c6   : > { %v4710_v61 = vadd.f32 %v15318_v52, %v4518_v17  ;;  %v15321_v48 = vadd.f32 %v15320_v35, %v15319_v26 }
 0x8c7   : > { %v4838_v46 = vpop.f32.mrb[48].mxu0 }
 0x8c8   : > { %4847 = vrot.lane.b32.xlu1 %v4838_v46, %s18100_s26  ;;  %v16125_v47 = vpop.f32.mrb[49].mxu0  ;;  %v4711_v25 = vadd.f32 %v15321_v48, %v4519_v24  ;;  %v17552_v48 = vld [vmem:[%s23664_s2 + $0x848] sm:$0xff]  }
 0x8c9   : > { %v4841_v7 = vpop.f32.mrb[50].mxu0  ;;  %15345 = vmatprep.subr.bf16.mxu0 %v17552_v48 }
 0x8ca   : > { %4849 = vrot.lane.b32.xlu0 %v4841_v7, %s18100_s26  ;;  %v16126_v20 = vpop.f32.mrb[51].mxu0 }
 0x8cb   : > { %v17553_v20 = vld [vmem:[%s23664_s2 + $0x7c8] sm:$0xff]  }
 0x93a   : > { %v4848_v1 = vpop.permute.xlu1 %4847 }
 0x93b   : > { %v4853_v30 = vsel %vm659_vm11, %v4710_v61, %v4848_v1 }
 0x93c   : > { %v4855_v34 = vmax.f32 %v4853_v30, 0.0  ;;  %v4850_v19 = vpop.permute.xlu0 %4849 }
 0x93d   : > { %v4854_v4 = vsel %vm659_vm11, %v4711_v25, %v4850_v19 }
 0x93e   : > { %v6243_v49 = vrot.slane %v4855_v34, 7  ;;  %v4856_v62 = vmax.f32 %v4854_v4, 0.0  ;;  %v4868_v45 = vpack.c.bf16 %v4855_v34, %v23671_v11  ;;  %v6252_v37 = vrot.slane %v4855_v34, 1 }
 0x940   : > { %v6244_v28 = vsel %vm608_vm4, %v18572_v50, %v6243_v49  ;;  %v6245_v40 = vrot.slane %v4856_v62, 7  ;;  %v6253_v58 = vrot.slane %v4856_v62, 1  ;;  %16144 = vmatmul.mubr.bf16.vlgmr.msra.gmra.mrb[44].mxu1 %v4868_v45  ;;  %v4869_v9 = vpack.c.bf16 %v23671_v11, %v4856_v62 }
 0x941   : > { %v6249_v29 = vsel %vm1655_vm7, -inf, %v6244_v28  ;;  %15366 = vmatpush3.bf16.msra.mxu1 %v17551_v16  ;;  %v17555_v28 = vld [vmem:[%s23664_s2 + $0x788] sm:$0xff]  }
 0x942   : > { %v6261_v43 = vmax.f32 %v6249_v29, %v4855_v34  ;;  %v6246_v63 = vsel %vm608_vm4, %v6243_v49, %v6245_v40  ;;  %16147 = vmatprep.mubr.bf16.mxu1 %v4869_v9  ;;  %v6254_v56 = vsel %vm413_vm1, %v6252_v37, %v6253_v58  ;;  %v6256_v27 = vsel %vm413_vm1, %v6253_v58, %v18575_v53  ;;  %v17554_v37 = vld [vmem:[%s23664_s2 + $0x808] sm:$0xff]  }
 0x943   : > { %v6262_v21 = vmax.f32 %v6246_v63, %v4856_v62  ;;  %v6260_v18 = vsel %vm1670_vm8, -inf, %v6256_v27  ;;  %15367 = vmatprep.subr.bf16.mxu1 %v17553_v20  ;;  %15346 = vmatpush3.bf16.msra.mxu0 %v17554_v37 }
 0x944   : > { %v20264_v10 = vmax.f32 %v6261_v43, %v6254_v56 }
 0x945   : > { %v20266_v57 = vmax.f32 %v6262_v21, %v6260_v18  ;;  %15368 = vmatpush3.bf16.msra.mxu1 %v17555_v28 }
 0x946   : > { %15369 = vmatprep.subr.bf16.mxu1 %v17557_v6 }
 0x947   : > { %v6265_v39 = vpack.c.bf16 %v20266_v57, %v20264_v10  ;;  %v17639_v10 = vld [vmem:[%s23663_s1 + $0x118] sm:$0xff]   ;;  %v17640_v57 = vld [vmem:[%s23663_s1 + $0x120] sm:$0xff]  }
 0x948   : > { %16148 = vmatmul.mubr.bf16.gmra.mrb[48].mxu1 %v23669_v2 }
 0x949   : > { %15370 = vmatpush3.bf16.msra.mxu1 %v17559_v42 }
 0xa13   : > { %v20271_v12 = vpop.f32.mrb[44].mxu1 }
 0xa14   : > { %v20273_v23 = vpop.f32.mrb[45].mxu1  ;;  %v5130_v36 = vrot.slane %v20271_v12, 5  ;;  %v5011_v41 = vrot.slane %v20271_v12, 1  ;;  %v5164_v8 = vrot.slane %v20271_v12, 6  ;;  %v5045_v3 = vrot.slane %v20271_v12, 2 }
 0xa15   : > { %v5008_v44 = vrot.slane %v20273_v23, 1  ;;  %v5042_v13 = vrot.slane %v20273_v23, 2  ;;  %v20281_v5 = vpop.f32.mrb[46].mxu1  ;;  %v5198_v60 = vrot.slane %v20271_v12, 7  ;;  %v5077_v51 = vrot.slane %v20271_v12, 3 }
 0xa16   : > { %v20288_v33 = vpop.f32.mrb[47].mxu1  ;;  %v5132_v22 = vrot.slane %v20281_v5, 5  ;;  %v5013_v59 = vrot.slane %v20281_v5, 1  ;;  %v5166_v31 = vrot.slane %v20281_v5, 6  ;;  %v5047_v14 = vrot.slane %v20281_v5, 2 }
 0xa17   : > { %v5129_v17 = vrot.slane %v20288_v33, 5  ;;  %v5009_v32 = vrot.slane %v20288_v33, 1  ;;  %v5163_v15 = vrot.slane %v20288_v33, 6  ;;  %v5043_v24 = vrot.slane %v20288_v33, 2 }
 0xa18   : > { %v20308_v38 = vsel %vm538_vm0, %v5130_v36, %v5132_v22  ;;  %v20311_v46 = vsel %vm413_vm1, %v5011_v41, %v5013_v59  ;;  %v20314_v52 = vsel %vm573_vm2, %v5164_v8, %v5166_v31  ;;  %v5197_v26 = vrot.slane %v20288_v33, 7 }
 0xa19   : > { %v5131_v47 = vsel %vm538_vm0, %v5129_v17, %v5130_v36  ;;  %v5010_v35 = vsel %vm413_vm1, %v5008_v44, %v5009_v32  ;;  %v5012_v61 = vsel %vm413_vm1, %v5009_v32, %v5011_v41  ;;  %v5165_v7 = vsel %vm573_vm2, %v5163_v15, %v5164_v8  ;;  %v17556_v36 = vld [vmem:[%s23664_s2 + $0x850] sm:$0xff]  }
 0xa1a   : > { %v16727_v25 = vpack.i.bf16 %v5131_v47, %v5129_v17  ;;  %v16732_v1 = vpack.i.bf16 %v5012_v61, %v5010_v35  ;;  %v20327_v30 = vpack.i.bf16 %v5165_v7, %v5163_v15  ;;  %v20330_v34 = vsel %vm448_vm3, %v5042_v13, %v5043_v24  ;;  %15347 = vmatprep.subr.bf16.mxu0 %v17556_v36  ;;  %v17561_v7 = vld [vmem:[%s23664_s2 + $0x7d8] sm:$0xff]  }
 0xa1b   : > { %v20332_v19 = vpop.f32.mrb[48].mxu1  ;;  %v20335_v4 = vsel %vm448_vm3, %v5043_v24, %v5045_v3  ;;  %v5199_v49 = vsel %vm608_vm4, %v5197_v26, %v5198_v60  ;;  %v20341_v62 = vsel %vm448_vm3, %v5045_v3, %v5047_v14  ;;  %v5076_v45 = vrot.slane %v20288_v33, 3  ;;  %v17558_v24 = vld [vmem:[%s23664_s2 + $0x810] sm:$0xff]   ;;  %15371 = vmatprep.subr.bf16.mxu1 %v17561_v7  ;;  %v17568_v7 = vld [vmem:[%s23664_s2 + $0x868] sm:$0xff]  }
 0xa1c   : > { %16728 = vrot.lane.b32.xlu1 %v16727_v25, %s18098_s10  ;;  %v20351_v40 = vpop.f32.mrb[49].mxu1  ;;  %v16742_v58 = vpack.i.bf16 %v20335_v4, %v20330_v34  ;;  %v20355_v9 = vpack.i.bf16 %v5199_v49, %v5197_v26  ;;  %v5200_v29 = vrot.slane %v20281_v5, 7  ;;  %v5138_v43 = vrot.slane %v20332_v19, 5  ;;  %15348 = vmatpush3.bf16.msra.mxu0 %v17558_v24  ;;  %v17562_v49 = vld [vmem:[%s23664_s2 + $0x818] sm:$0xff]   ;;  %v17565_v34 = vld [vmem:[%s23664_s2 + $0x7e0] sm:$0xff]  }
 0xa1d   : > { %v20359_v63 = vpop.f32.mrb[50].mxu1  ;;  %v5134_v56 = vrot.slane %v20351_v40, 5  ;;  %v5015_v27 = vrot.slane %v20351_v40, 1  ;;  %v5168_v21 = vrot.slane %v20351_v40, 6  ;;  %v5049_v18 = vrot.slane %v20351_v40, 2  ;;  %v17566_v4 = vld [vmem:[%s23664_s2 + $0x820] sm:$0xff]  }
 0xa1e   : > { %v5120_v41 = vrot.slane %v20359_v63, 4  ;;  %v5140_v8 = vrot.slane %v20359_v63, 5  ;;  %v5174_v3 = vrot.slane %v20359_v63, 6  ;;  %v5208_v44 = vrot.slane %v20359_v63, 7  ;;  %v20372_v13 = vpop.f32.mrb[51].mxu1  ;;  %v17577_v63 = vld [vmem:[%s23664_s2 + $0x7f8] sm:$0xff]  }
 0xa1f   : > { %v5135_v0 = vsel %vm538_vm0, %v5132_v22, %v5134_v56  ;;  %v5016_v17 = vsel %vm413_vm1, %v5013_v59, %v5015_v27  ;;  %v20380_v32 = vsel %vm573_vm2, %v5166_v31, %v5168_v21  ;;  %v20385_v15 = vsel %vm448_vm3, %v5047_v14, %v5049_v18 }
 0xa20   : > { %16733 = vrot.lane.b32.xlu1 %v16732_v1, %s18098_s10  ;;  %v16757_v22 = vpack.i.bf16 %v5135_v0, %v20308_v38  ;;  %v16762_v59 = vpack.i.bf16 %v5016_v17, %v20311_v46  ;;  %v16767_v31 = vpack.i.bf16 %v20380_v32, %v20314_v52  ;;  %v16772_v14 = vpack.i.bf16 %v20385_v15, %v20341_v62  ;;  %v17573_v15 = vld [vmem:[%s23664_s2 + $0x7f0] sm:$0xff]  }
 0xa21   : > { %v5078_v16 = vsel %vm483_vm5, %v5076_v45, %v5077_v51  ;;  %v20406_v26 = vsel %vm608_vm4, %v5198_v60, %v5200_v29  ;;  %v5202_v47 = vrot.slane %v20351_v40, 7  ;;  %v5136_v38 = vrot.slane %v20372_v13, 5  ;;  %v17560_v60 = vld [vmem:[%s23664_s2 + $0x858] sm:$0xff]  }
 0xa22   : > { %16758 = vrot.lane.b32.xlu0 %v16757_v22, %s18098_s10  ;;  %v20411_v46 = vpack.i.bf16 %v5078_v16, %v5076_v45  ;;  %v5079_v52 = vrot.slane %v20281_v5, 3  ;;  %v5081_v35 = vrot.slane %v20351_v40, 3  ;;  %v5170_v61 = vrot.slane %v20372_v13, 6  ;;  %v17563_v45 = vld [vmem:[%s23664_s2 + $0x798] sm:$0xff]   ;;  %15349 = vmatprep.subr.bf16.mxu0 %v17560_v60  ;;  %v17567_v60 = vld [vmem:[%s23664_s2 + $0x7a0] sm:$0xff]  }
 0xa23   : > { %v20423_v48 = vsel %vm608_vm4, %v5200_v29, %v5202_v47  ;;  %v20426_v20 = vsel %vm538_vm0, %v5134_v56, %v5136_v38  ;;  %v20431_v25 = vsel %vm538_vm0, %v5136_v38, %v5138_v43  ;;  %v5172_v1 = vrot.slane %v20332_v19, 6  ;;  %15350 = vmatpush3.bf16.msra.mxu0 %v17562_v49  ;;  %15372 = vmatpush3.bf16.msra.mxu1 %v17563_v45 }
 0xa24   : > { %16738 = vrot.lane.b32.xlu1 %v20327_v30, %s18099_s20  ;;  %v16777_v37 = vpack.i.bf16 %v20423_v48, %v20406_v26  ;;  %v16787_v28 = vpack.i.bf16 %v20431_v25, %v20426_v20  ;;  %v20449_v29 = vsel %vm483_vm5, %v5077_v51, %v5079_v52  ;;  %v20452_v56 = vsel %vm483_vm5, %v5079_v52, %v5081_v35  ;;  %v17579_v26 = vld [vmem:[%s23664_s2 + $0x7b8] sm:$0xff]   ;;  %v17580_v48 = vld [vmem:[%s23664_s2 + $0x8c0] sm:$0xff]  }
 0xa25   : > { %v16782_v36 = vpack.i.bf16 %v20452_v56, %v20449_v29  ;;  %v20457_v6 = vsel %vm573_vm2, %v5168_v21, %v5170_v61  ;;  %v20460_v30 = vsel %vm573_vm2, %v5170_v61, %v5172_v1  ;;  %v5017_v0 = vrot.slane %v20372_v13, 1  ;;  %15373 = vmatprep.subr.bf16.mxu1 %v17565_v34  ;;  %v17581_v20 = vld [vmem:[%s23664_s2 + $0x940] sm:$0xff]  }
 0xa26   : > { %16763 = vrot.lane.b32.xlu0 %v16762_v59, %s18098_s10  ;;  %v16797_v51 = vpack.i.bf16 %v20460_v30, %v20457_v6  ;;  %v5019_v17 = vrot.slane %v20332_v19, 1  ;;  %v5204_v32 = vrot.slane %v20372_v13, 7  ;;  %v5206_v24 = vrot.slane %v20332_v19, 7 }
 0xa27   : > { %v20470_v21 = vsel %vm413_vm1, %v5015_v27, %v5017_v0  ;;  %v5051_v42 = vrot.slane %v20372_v13, 2  ;;  %v5053_v22 = vrot.slane %v20332_v19, 2  ;;  %v5141_v59 = vsel %vm538_vm0, %v5138_v43, %v5140_v8  ;;  %v17564_v43 = vld [vmem:[%s23664_s2 + $0x860] sm:$0xff]   ;;  %15374 = vmatpush3.bf16.msra.mxu1 %v17567_v60  ;;  %v17572_v60 = vld [vmem:[%s23664_s2 + $0x870] sm:$0xff]  }
 0xa28   : > { %16743 = vrot.lane.b32.xlu1 %v16742_v58, %s18099_s20  ;;  %v20482_v16 = vsel %vm413_vm1, %v5017_v0, %v5019_v17  ;;  %v20485_v27 = vsel %vm608_vm4, %v5202_v47, %v5204_v32  ;;  %v20488_v38 = vsel %vm608_vm4, %v5204_v32, %v5206_v24  ;;  %v20490_v52 = vpack.i.bf16 %v5019_v17, %v5141_v59  ;;  %v17569_v17 = vld [vmem:[%s23664_s2 + $0x7e8] sm:$0xff]  }
 0xa29   : > { %v16792_v58 = vpack.i.bf16 %v20482_v16, %v20470_v21  ;;  %v16807_v8 = vpack.i.bf16 %v20488_v38, %v20485_v27  ;;  %v20508_v47 = vsel %vm448_vm3, %v5049_v18, %v5051_v42  ;;  %v20511_v61 = vsel %vm448_vm3, %v5051_v42, %v5053_v22  ;;  %15351 = vmatprep.subr.bf16.mxu0 %v17564_v43 }
 0xa2a   : > { %16768 = vrot.lane.b32.xlu0 %v16767_v31, %s18099_s20  ;;  %v16802_v49 = vpack.i.bf16 %v20511_v61, %v20508_v47  ;;  %v5083_v45 = vrot.slane %v20372_v13, 3  ;;  %v5085_v18 = vrot.slane %v20332_v19, 3  ;;  %v5209_v0 = vsel %vm608_vm4, %v5206_v24, %v5208_v44  ;;  %15352 = vmatpush3.bf16.msra.mxu0 %v17566_v4  ;;  %v17571_v4 = vld [vmem:[%s23664_s2 + $0x7a8] sm:$0xff]  }
 0xa2b   : > { %v5175_v31 = vsel %vm573_vm2, %v5172_v1, %v5174_v3  ;;  %v5110_v32 = vrot.slane %v20271_v12, 4  ;;  %v5109_v42 = vrot.slane %v20288_v33, 4  ;;  %v5112_v59 = vrot.slane %v20281_v5, 4  ;;  %15353 = vmatprep.subr.bf16.mxu0 %v17568_v7  ;;  %15375 = vmatprep.subr.bf16.mxu1 %v17569_v17 }
 0xa2c   : > { %16748 = vrot.lane.b32.xlu1 %v20355_v9, %s18100_s26  ;;  %v5084_v44 = vsel %vm483_vm5, %v5081_v35, %v5083_v45  ;;  %v5086_v24 = vsel %vm483_vm5, %v5083_v45, %v5085_v18  ;;  %v16827_v43 = vpack.i.bf16 %v5085_v18, %v5209_v0  ;;  %v16822_v47 = vpack.i.bf16 %v5053_v22, %v5175_v31  ;;  %v17570_v22 = vld [vmem:[%s23664_s2 + $0x828] sm:$0xff]   ;;  %v17574_v45 = vld [vmem:[%s23664_s2 + $0x830] sm:$0xff]   ;;  %v17576_v0 = vld [vmem:[%s23664_s2 + $0x878] sm:$0xff]  }
 0xa2d   : > { %v16812_v61 = vpack.i.bf16 %v5086_v24, %v5084_v44  ;;  %v20543_v3 = vsel %vm517_vm6, %v5109_v42, %v5110_v32  ;;  %v20546_v1 = vsel %vm517_vm6, %v5110_v32, %v5112_v59  ;;  %v5114_v34 = vrot.slane %v20351_v40, 4  ;;  %15376 = vmatpush3.bf16.msra.mxu1 %v17571_v4 }
 0xa2e   : > { %16773 = vrot.lane.b32.xlu0 %v16772_v14, %s18099_s20  ;;  %v5118_v9 = vrot.slane %v20332_v19, 4  ;;  %v5116_v35 = vrot.slane %v20372_v13, 4  ;;  %15354 = vmatpush3.bf16.msra.mxu0 %v17570_v22 }
 0xa2f   : > { %v20565_v62 = vsel %vm517_vm6, %v5112_v59, %v5114_v34  ;;  %15355 = vmatprep.subr.bf16.mxu0 %v17572_v60  ;;  %15377 = vmatprep.subr.bf16.mxu1 %v17573_v15 }
 0xa30   : > { %16753 = vrot.lane.b32.xlu1 %v20411_v46, %s18100_s26  ;;  %v20573_v14 = vsel %vm517_vm6, %v5114_v34, %v5116_v35  ;;  %v20576_v7 = vsel %vm517_vm6, %v5116_v35, %v5118_v9  ;;  %v20584_v18 = vsel %vm517_vm6, %v5118_v9, %v5120_v41  ;;  %v17575_v46 = vld [vmem:[%s23664_s2 + $0x7b0] sm:$0xff]   ;;  %v17578_v41 = vld [vmem:[%s23664_s2 + $0x838] sm:$0xff]  }
 0xa31   : > { %15378 = vmatpush3.bf16.msra.mxu1 %v17575_v46 }
 0xa32   : > { %16778 = vrot.lane.b32.xlu0 %v16777_v37, %s18100_s26  ;;  %15356 = vmatpush3.bf16.msra.mxu0 %v17574_v45 }
 0xa33   : > { %15357 = vmatprep.subr.bf16.mxu0 %v17576_v0  ;;  %15379 = vmatprep.subr.bf16.mxu1 %v17577_v63 }
 0xa34   : > { %16788 = vrot.lane.b32.xlu1 %v16787_v28, %s18098_s10 }
 0xa35   : > { %15380 = vmatpush3.bf16.msra.mxu1 %v17579_v26 }
 0xa36   : > { %16783 = vrot.lane.b32.xlu0 %v16782_v36, %s18100_s26  ;;  %15358 = vmatpush3.bf16.msra.mxu0 %v17578_v41 }
 0xa37   : > { %15387 = vmatprep.subr.bf16.mxu0 %v17580_v48  ;;  %15409 = vmatprep.subr.bf16.mxu1 %v17581_v20 }
 0xa38   : > { %16798 = vrot.lane.b32.xlu1 %v16797_v51, %s18099_s20 }
 0xa3a   : > { %16793 = vrot.lane.b32.xlu0 %v16792_v58, %s18098_s10 }
 0xa3c   : > { %16808 = vrot.lane.b32.xlu1 %v16807_v8, %s18100_s26 }
 0xa3e   : > { %16803 = vrot.lane.b32.xlu0 %v16802_v49, %s18099_s20 }
 0xa40   : > { %16818 = vrot.lane.b32.xlu1 %v20490_v52, %s18098_s10 }
 0xa42   : > { %16813 = vrot.lane.b32.xlu0 %v16812_v61, %s18100_s26 }
 0xa44   : > { %16828 = vrot.lane.b32.xlu1 %v16827_v43, %s18100_s26 }
 0xa46   : > { %16823 = vrot.lane.b32.xlu0 %v16822_v47, %s18099_s20 }
 0xa8e   : > { %v16729_v25 = vpop.permute.xlu1 %16728 }
 0xa8f   : > { %v16731_v36 = vunpack.i.h.bf16 %v16729_v25  ;;  %v16730_v6 = vunpack.i.l.bf16 %v16729_v25 }
 0xa91   : > { %v5252_v58 = vsel %vm643_vm9, %v5109_v42, %v16730_v6  ;;  %v5253_v8 = vsel %vm643_vm9, %v20543_v3, %v16731_v36 }
 0xa92   : > { %v16734_v37 = vpop.permute.xlu1 %16733 }
 0xa93   : > { %v16736_v30 = vunpack.i.h.bf16 %v16734_v37  ;;  %v16735_v51 = vunpack.i.l.bf16 %v16734_v37 }
 0xa94   : > { %v16759_v28 = vpop.permute.xlu0 %16758 }
 0xa95   : > { %v16760_v16 = vunpack.i.l.bf16 %v16759_v28  ;;  %v16761_v49 = vunpack.i.h.bf16 %v16759_v28  ;;  %v5232_v31 = vsel %vm643_vm9, %v20288_v33, %v16736_v30  ;;  %v5231_v32 = vsel %vm643_vm9, %v20273_v23, %v16735_v51 }
 0xa96   : > { %v16739_v29 = vpop.permute.xlu1 %16738 }
 0xa97   : > { %v16741_v27 = vunpack.i.h.bf16 %v16739_v29  ;;  %v16740_v38 = vunpack.i.l.bf16 %v16739_v29  ;;  %v5254_v43 = vsel %vm643_vm9, %v20546_v1, %v16760_v16  ;;  %v5255_v33 = vsel %vm643_vm9, %v20565_v62, %v16761_v49 }
 0xa98   : > { %v16764_v56 = vpop.permute.xlu0 %16763 }
 0xa99   : > { %v16766_v17 = vunpack.i.h.bf16 %v16764_v56  ;;  %v16765_v59 = vunpack.i.l.bf16 %v16764_v56  ;;  %v5260_v34 = vsel %vm651_vm10, %v5253_v8, %v16741_v27  ;;  %v5259_v3 = vsel %vm651_vm10, %v5252_v58, %v16740_v38 }
 0xa9a   : > { %v16744_v21 = vpop.permute.xlu1 %16743 }
 0xa9b   : > { %v16745_v44 = vunpack.i.l.bf16 %v16744_v21  ;;  %v16746_v47 = vunpack.i.h.bf16 %v16744_v21  ;;  %v5234_v23 = vsel %vm643_vm9, %v20281_v5, %v16766_v17  ;;  %v5233_v60 = vsel %vm643_vm9, %v20271_v12, %v16765_v59 }
 0xa9c   : > { %v16769_v52 = vpop.permute.xlu0 %16768 }
 0xa9d   : > { %v16771_v9 = vunpack.i.h.bf16 %v16769_v52  ;;  %v16770_v35 = vunpack.i.l.bf16 %v16769_v52  ;;  %v5238_v15 = vsel %vm651_vm10, %v5231_v32, %v16745_v44  ;;  %v5239_v63 = vsel %vm651_vm10, %v5232_v31, %v16746_v47 }
 0xa9e   : > { %v16749_v24 = vpop.permute.xlu1 %16748 }
 0xa9f   : > { %v16751_v61 = vunpack.i.h.bf16 %v16749_v24  ;;  %v16750_v42 = vunpack.i.l.bf16 %v16749_v24  ;;  %v5262_v48 = vsel %vm651_vm10, %v5255_v33, %v16771_v9  ;;  %v5261_v5 = vsel %vm651_vm10, %v5254_v43, %v16770_v35 }
 0xaa0   : > { %v16774_v22 = vpop.permute.xlu0 %16773 }
 0xaa1   : > { %v5266_v4 = vsel %vm659_vm11, %v5259_v3, %v16750_v42  ;;  %v5267_v1 = vsel %vm659_vm11, %v5260_v34, %v16751_v61  ;;  %v16775_v46 = vunpack.i.l.bf16 %v16774_v22  ;;  %v16776_v41 = vunpack.i.h.bf16 %v16774_v22 }
 0xaa2   : > { %v5274_v45 = vpack.c.bf16 %v5267_v1, %v5266_v4  ;;  %v16754_v0 = vpop.permute.xlu1 %16753 }
 0xaa3   : > { %v16756_v26 = vunpack.i.h.bf16 %v16754_v0  ;;  %v16755_v62 = vunpack.i.l.bf16 %v16754_v0  ;;  %v5240_v36 = vsel %vm651_vm10, %v5233_v60, %v16775_v46  ;;  %v5241_v16 = vsel %vm651_vm10, %v5234_v23, %v16776_v41 }
 0xaa4   : > { %v16779_v20 = vpop.permute.xlu0 %16778  ;;  %v5365_v25 = vshrl.u32 %v5274_v45, 16  ;;  %v5368_v37 = vshll.u32 %v5274_v45, 16 }
 0xaa5   : > { %v5245_v28 = vsel %vm659_vm11, %v5238_v15, %v16755_v62  ;;  %v5246_v12 = vsel %vm659_vm11, %v5239_v63, %v16756_v26  ;;  %v16781_v29 = vunpack.i.h.bf16 %v16779_v20  ;;  %v16780_v56 = vunpack.i.l.bf16 %v16779_v20 }
 0xaa6   : > { %v20665_v6 = vpack.c.bf16 %v5246_v12, %v5245_v28  ;;  %v16789_v30 = vpop.permute.xlu1 %16788  ;;  %v5367_v51 = vrot.slane %v5365_v25, 6  ;;  %v5370_v21 = vrot.slane %v5368_v37, 7  ;;  %v5527_v31 = vrot.slane %v5365_v25, 2 }
 0xaa7   : > { %v5268_v27 = vsel %vm659_vm11, %v5261_v5, %v16780_v56  ;;  %v5269_v38 = vsel %vm659_vm11, %v5262_v48, %v16781_v29  ;;  %v16790_v52 = vunpack.i.l.bf16 %v16789_v30  ;;  %v16791_v49 = vunpack.i.h.bf16 %v16789_v30 }
 0xaa8   : > { %v5348_v58 = vshrl.u32 %v20665_v6, 16  ;;  %v5276_v8 = vpack.c.bf16 %v5269_v38, %v5268_v27  ;;  %v16784_v17 = vpop.permute.xlu0 %16783  ;;  %v5351_v32 = vshll.u32 %v20665_v6, 16  ;;  %v5371_v24 = vor.u32 %v5370_v21, %v5367_v51 }
 0xaa9   : > { %v16786_v59 = vunpack.i.h.bf16 %v16784_v17  ;;  %v16785_v44 = vunpack.i.l.bf16 %v16784_v17  ;;  %v5256_v43 = vsel %vm643_vm9, %v20573_v14, %v16790_v52  ;;  %v5528_v34 = vrot.slane %v5368_v37, 3 }
 0xaaa   : > { %v16799_v47 = vpop.permute.xlu1 %16798  ;;  %v5373_v61 = vshrl.u32 %v5276_v8, 16  ;;  %v5376_v42 = vshll.u32 %v5276_v8, 16  ;;  %v5257_v33 = vsel %vm643_vm9, %v20576_v7, %v16791_v49  ;;  %v5350_v46 = vrot.slane %v5348_v58, 6 }
 0xaab   : > { %v5247_v3 = vsel %vm659_vm11, %v5240_v36, %v16785_v44  ;;  %v5248_v9 = vsel %vm659_vm11, %v5241_v16, %v16786_v59  ;;  %v16801_v35 = vunpack.i.h.bf16 %v16799_v47  ;;  %v16800_v22 = vunpack.i.l.bf16 %v16799_v47 }
 0xaac   : > { %v5275_v23 = vpack.c.bf16 %v5248_v9, %v5247_v3  ;;  %v16794_v4 = vpop.permute.xlu0 %16793  ;;  %v5375_v1 = vrot.slane %v5373_v61, 6  ;;  %v5378_v60 = vrot.slane %v5376_v42, 7  ;;  %v5529_v45 = vor.u32 %v5528_v34, %v5527_v31  ;;  %v17584_v34 = vld [vmem:[%s23664_s2 + $0x8c8] sm:$0xff]  }
 0xaad   : > { %v5263_v15 = vsel %vm651_vm10, %v5256_v43, %v16800_v22  ;;  %v16796_v14 = vunpack.i.h.bf16 %v16794_v4  ;;  %v5530_v62 = vrot.slane %v5373_v61, 2  ;;  %v5264_v48 = vsel %vm651_vm10, %v5257_v33, %v16801_v35 }
 0xaae   : > { %v5356_v0 = vshrl.u32 %v5275_v23, 16  ;;  %v5359_v63 = vshll.u32 %v5275_v23, 16  ;;  %v16809_v41 = vpop.permute.xlu1 %16808  ;;  %v20679_v26 = vor.u32 %v5378_v60, %v5375_v1  ;;  %v16795_v5 = vunpack.i.l.bf16 %v16794_v4 }
 0xaaf   : > { %v16811_v20 = vunpack.i.h.bf16 %v16809_v41  ;;  %v16810_v7 = vunpack.i.l.bf16 %v16809_v41  ;;  %v5531_v28 = vrot.slane %v5376_v42, 3  ;;  %v5353_v12 = vrot.slane %v5351_v32, 7 }
 0xab0   : > { %v16804_v25 = vpop.permute.xlu0 %16803  ;;  %v5380_v37 = vsel %vm761_vm12, %v5371_v24, %v20679_v26  ;;  %v5358_v29 = vrot.slane %v5356_v0, 6  ;;  %v5236_v51 = vsel %vm643_vm9, %v20372_v13, %v16796_v14  ;;  %v5361_v38 = vrot.slane %v5359_v63, 7  ;;  %v17582_v13 = vld [vmem:[%s23664_s2 + $0x880] sm:$0xff]   ;;  %v17586_v14 = vld [vmem:[%s23664_s2 + $0x888] sm:$0xff]  }
 0xab1   : > { %v5270_v56 = vsel %vm659_vm11, %v5263_v15, %v16810_v7  ;;  %v5271_v36 = vsel %vm659_vm11, %v5264_v48, %v16811_v20  ;;  %v16806_v6 = vunpack.i.h.bf16 %v16804_v25  ;;  %v16805_v30 = vunpack.i.l.bf16 %v16804_v25  ;;  %5511 = vmatprep.mubr.bf16.mxu0 %v5380_v37  ;;  %v17588_v48 = vld [vmem:[%s23664_s2 + $0x8d0] sm:$0xff]  }
 0xab2   : > { %v5278_v21 = vpack.c.bf16 %v5271_v36, %v5270_v56  ;;  %v20688_v16 = vor.u32 %v5531_v28, %v5530_v62  ;;  %v16819_v27 = vpop.permute.xlu1 %16818  ;;  %v5235_v52 = vsel %vm643_vm9, %v20351_v40, %v16795_v5  ;;  %v5354_v17 = vor.u32 %v5353_v12, %v5350_v46 }
 0xab3   : > { %v16821_v8 = vunpack.i.h.bf16 %v16819_v27  ;;  %v16820_v49 = vunpack.i.l.bf16 %v16819_v27  ;;  %v20694_v44 = vor.u32 %v5361_v38, %v5358_v29  ;;  %v5520_v24 = vrot.slane %v5348_v58, 2 }
 0xab4   : > { %v5533_v31 = vsel %vm935_vm13, %v5529_v45, %v20688_v16  ;;  %v16814_v59 = vpop.permute.xlu0 %16813  ;;  %v5521_v43 = vrot.slane %v5351_v32, 3  ;;  %v5242_v47 = vsel %vm651_vm10, %v5235_v52, %v16805_v30  ;;  %v5243_v61 = vsel %vm651_vm10, %v5236_v51, %v16806_v6  ;;  %v17587_v6 = vld [vmem:[%s23664_s2 + $0x908] sm:$0xff]   ;;  %v17589_v52 = vld [vmem:[%s23664_s2 + $0x950] sm:$0xff]  }
 0xab5   : > { %5664 = vmatprep.mubr.bf16.mxu1 %v5533_v31  ;;  %v16816_v40 = vunpack.i.h.bf16 %v16814_v59  ;;  %v16815_v42 = vunpack.i.l.bf16 %v16814_v59  ;;  %v5237_v3 = vsel %vm643_vm9, %v20332_v19, %v16821_v8  ;;  %v5363_v58 = vsel %vm761_vm12, %v5354_v17, %v20694_v44  ;;  %v17583_v19 = vld [vmem:[%s23664_s2 + $0x900] sm:$0xff]   ;;  %v17590_v17 = vld [vmem:[%s23664_s2 + $0x890] sm:$0xff]  }
 0xab6   : > { %v5523_v32 = vrot.slane %v5356_v0, 2  ;;  %v5524_v9 = vrot.slane %v5359_v63, 3  ;;  %v16829_v35 = vpop.permute.xlu1 %16828  ;;  %v5258_v22 = vsel %vm643_vm9, %v20584_v18, %v16820_v49  ;;  %5512 = vmatmul.mubr.bf16.vlgmr.msra.gmra.mrb[52].mxu0 %v5363_v58  ;;  %v5522_v4 = vor.u32 %v5521_v43, %v5520_v24  ;;  %v17585_v63 = vld [vmem:[%s23664_s2 + $0x948] sm:$0xff]   ;;  %v17592_v43 = vld [vmem:[%s23664_s2 + $0x8d8] sm:$0xff]  }
 0xab7   : > { %v5249_v33 = vsel %vm659_vm11, %v5242_v47, %v16815_v42  ;;  %v5250_v23 = vsel %vm659_vm11, %v5243_v61, %v16816_v40  ;;  %15388 = vmatpush3.bf16.msra.mxu0 %v17582_v13  ;;  %v5716_v45 = vshrl.u32 %v5278_v21, 16  ;;  %v5719_v18 = vshll.u32 %v5278_v21, 16  ;;  %v17591_v42 = vld [vmem:[%s23664_s2 + $0x910] sm:$0xff]  }
 0xab8   : > { %v5277_v1 = vpack.c.bf16 %v5250_v23, %v5249_v33  ;;  %v5525_v60 = vor.u32 %v5524_v9, %v5523_v32  ;;  %v16824_v15 = vpop.permute.xlu0 %16823  ;;  %v16831_v46 = vunpack.i.h.bf16 %v16829_v35  ;;  %v16830_v0 = vunpack.i.l.bf16 %v16829_v35  ;;  %15389 = vmatprep.subr.bf16.mxu0 %v17584_v34 }
 0xab9   : > { %v16826_v41 = vunpack.i.h.bf16 %v16824_v15  ;;  %v16825_v62 = vunpack.i.l.bf16 %v16824_v15  ;;  %v5718_v25 = vrot.slane %v5716_v45, 2  ;;  %v5721_v12 = vrot.slane %v5719_v18, 3  ;;  %v17597_v15 = vld [vmem:[%s23664_s2 + $0x960] sm:$0xff]  }
 0xaba   : > { %v5707_v5 = vshrl.u32 %v5277_v1, 16  ;;  %v5710_v20 = vshll.u32 %v5277_v1, 16  ;;  %v5526_v7 = vsel %vm935_vm13, %v5522_v4, %v5525_v60  ;;  %v5902_v29 = vrot.slane %v5716_v45, 6  ;;  %v17596_v4 = vld [vmem:[%s23664_s2 + $0x8e0] sm:$0xff]  }
 0xabb   : > { %5665 = vmatmul.mubr.bf16.vlgmr.msra.gmra.mrb[52].mxu1 %v5526_v7  ;;  %v5244_v37 = vsel %vm651_vm10, %v5237_v3, %v16826_v41  ;;  %v5265_v28 = vsel %vm651_vm10, %v5258_v22, %v16825_v62  ;;  %15390 = vmatpush3.bf16.msra.mxu0 %v17586_v14  ;;  %v5903_v30 = vrot.slane %v5719_v18, 7  ;;  %v5722_v38 = vor.u32 %v5721_v12, %v5718_v25  ;;  %v17598_v14 = vld [vmem:[%s23664_s2 + $0x8a0] sm:$0xff]   ;;  %v17600_v18 = vld [vmem:[%s23664_s2 + $0x8e8] sm:$0xff]   ;;  %v17604_v41 = vld [vmem:[%s23664_s2 + $0x8f0] sm:$0xff]  }
 0xabc   : > { %15410 = vmatpush3.bf16.msra.mxu1 %v17583_v19  ;;  %v5251_v56 = vsel %vm659_vm11, %v5244_v37, %v16831_v46  ;;  %v5272_v36 = vsel %vm659_vm11, %v5265_v28, %v16830_v0  ;;  %v5709_v51 = vrot.slane %v5707_v5, 2  ;;  %15391 = vmatprep.subr.bf16.mxu0 %v17588_v48  ;;  %v5712_v8 = vrot.slane %v5710_v20, 3  ;;  %v17599_v46 = vld [vmem:[%s23664_s2 + $0x920] sm:$0xff]   ;;  %v17601_v0 = vld [vmem:[%s23664_s2 + $0x968] sm:$0xff]   ;;  %v17605_v48 = vld [vmem:[%s23664_s2 + $0x970] sm:$0xff]  }
 0xabd   : > { %15411 = vmatprep.subr.bf16.mxu1 %v17585_v63  ;;  %v5279_v21 = vpack.c.bf16 %v5251_v56, %v5251_v56  ;;  %v5280_v27 = vpack.c.bf16 %v5272_v36, %v5272_v36  ;;  %v5904_v49 = vor.u32 %v5903_v30, %v5902_v29  ;;  %v5898_v31 = vrot.slane %v5707_v5, 6  ;;  %v17602_v63 = vld [vmem:[%s23664_s2 + $0x8a8] sm:$0xff]   ;;  %v17606_v5 = vld [vmem:[%s23664_s2 + $0x8b0] sm:$0xff]   ;;  %v17609_v25 = vld [vmem:[%s23664_s2 + $0x978] sm:$0xff]  }
 0xabe   : > { %v5899_v59 = vrot.slane %v5710_v20, 7  ;;  %v5723_v24 = vsel %vm935_vm13, %v20688_v16, %v5722_v38  ;;  %v5713_v13 = vor.u32 %v5712_v8, %v5709_v51  ;;  %v17593_v16 = vld [vmem:[%s23664_s2 + $0x958] sm:$0xff]   ;;  %v17603_v62 = vld [vmem:[%s23664_s2 + $0x928] sm:$0xff]   ;;  %v17607_v7 = vld [vmem:[%s23664_s2 + $0x930] sm:$0xff]  }
 0xabf   : > { %v6090_v47 = vshrl.u32 %v5280_v27, 16  ;;  %v6093_v61 = vshll.u32 %v5280_v27, 16  ;;  %5854 = vmatprep.mubr.bf16.mxu0 %v5723_v24  ;;  %v5905_v40 = vsel %vm761_vm12, %v20679_v26, %v5904_v49  ;;  %v6081_v3 = vshrl.u32 %v5279_v21, 16  ;;  %15392 = vmatpush3.bf16.msra.mxu0 %v17590_v17  ;;  %v17594_v26 = vld [vmem:[%s23664_s2 + $0x898] sm:$0xff]   ;;  %v17612_v28 = vld [vmem:[%s23664_s2 + $0x9c0] sm:$0xff]   ;;  %v17615_v56 = vld [vmem:[%s23664_s2 + $0x9c8] sm:$0xff]  }
 0xac0   : > { %15412 = vmatpush3.bf16.msra.mxu1 %v17587_v6  ;;  %v5900_v34 = vor.u32 %v5899_v59, %v5898_v31  ;;  %v6084_v58 = vshll.u32 %v5279_v21, 16  ;;  %6036 = vmatprep.mubr.bf16.mxu1 %v5905_v40  ;;  %v5714_v32 = vsel %vm935_vm13, %v5525_v60, %v5713_v13  ;;  %v17595_v60 = vld [vmem:[%s23664_s2 + $0x918] sm:$0xff]   ;;  %v17613_v29 = vld [vmem:[%s23664_s2 + $0x980] sm:$0xff]   ;;  %v17616_v6 = vld [vmem:[%s23664_s2 + $0x988] sm:$0xff]  }
 0xac1   : > { %15413 = vmatprep.subr.bf16.mxu1 %v17589_v52  ;;  %v6092_v9 = vrot.slane %v6090_v47, 2  ;;  %v6095_v35 = vrot.slane %v6093_v61, 3  ;;  %v6083_v33 = vrot.slane %v6081_v3, 2  ;;  %15393 = vmatprep.subr.bf16.mxu0 %v17592_v43  ;;  %v17608_v20 = vld [vmem:[%s23664_s2 + $0x8f8] sm:$0xff]   ;;  %v17614_v36 = vld [vmem:[%s23665_s3 + $0xc0] sm:$0xff]   ;;  %v17618_v30 = vld [vmem:[%s23664_s2 + $0x9d0] sm:$0xff]  }
 0xac2   : > { %v5901_v22 = vsel %vm761_vm12, %v20694_v44, %v5900_v34  ;;  %v6086_v23 = vrot.slane %v6084_v58, 3  ;;  %v17610_v37 = vld [vmem:[%s23664_s2 + $0x8b8] sm:$0xff]   ;;  %v17617_v51 = vld [vmem:[%s23665_s3 + $0xc8] sm:$0xff]   ;;  %v17619_v21 = vld [vmem:[%s23664_s2 + $0x990] sm:$0xff]  }
 0xac3   : > { %v6096_v1 = vor.u32 %v6095_v35, %v6092_v9  ;;  %15394 = vmatpush3.bf16.msra.mxu0 %v17594_v26  ;;  %v17611_v12 = vld [vmem:[%s23664_s2 + $0x938] sm:$0xff]   ;;  %v17624_v8 = vld [vmem:[%s23664_s2 + $0x9e0] sm:$0xff]   ;;  %v17627_v31 = vld [vmem:[%s23664_s2 + $0x9e8] sm:$0xff]  }
 0xac4   : > { %15414 = vmatpush3.bf16.msra.mxu1 %v17591_v42  ;;  %v6087_v19 = vor.u32 %v6086_v23, %v6083_v33  ;;  %15395 = vmatprep.subr.bf16.mxu0 %v17596_v4  ;;  %v17621_v27 = vld [vmem:[%s23664_s2 + $0x9d8] sm:$0xff]   ;;  %v17625_v17 = vld [vmem:[%s23664_s2 + $0x9a0] sm:$0xff]   ;;  %v17628_v24 = vld [vmem:[%s23664_s2 + $0x9a8] sm:$0xff]  }
 0xac5   : > { %15415 = vmatprep.subr.bf16.mxu1 %v17593_v16  ;;  %v6097_v44 = vsel %vm935_vm13, %v5722_v38, %v6096_v1  ;;  %v17620_v38 = vld [vmem:[%s23665_s3 + $0xd0] sm:$0xff]   ;;  %v17622_v52 = vld [vmem:[%s23664_s2 + $0x998] sm:$0xff]   ;;  %v17626_v59 = vld [vmem:[%s23665_s3 + $0xe0] sm:$0xff]  }
 0xac6   : > { %v20771_v45 = vsel %vm935_vm13, %v5713_v13, %v6087_v19  ;;  %v17623_v49 = vld [vmem:[%s23665_s3 + $0xd8] sm:$0xff]   ;;  %v17630_v43 = vld [vmem:[%s23664_s2 + $0x9f0] sm:$0xff]   ;;  %v17629_v13 = vld [vmem:[%s23665_s3 + $0xe8] sm:$0xff]  }
 0xac7   : > { %15396 = vmatpush3.bf16.msra.mxu0 %v17598_v14  ;;  %v17631_v47 = vld [vmem:[%s23664_s2 + $0x9b0] sm:$0xff]   ;;  %v17633_v61 = vld [vmem:[%s23664_s2 + $0x9f8] sm:$0xff]   ;;  %v17636_v3 = vld [vmem:[%s23663_s1 + $0x100] sm:$0xff]  }
 0xac8   : > { %15416 = vmatpush3.bf16.msra.mxu1 %v17595_v60  ;;  %15397 = vmatprep.subr.bf16.mxu0 %v17600_v18  ;;  %v17632_v40 = vld [vmem:[%s23665_s3 + $0xf0] sm:$0xff]   ;;  %v17634_v42 = vld [vmem:[%s23664_s2 + $0x9b8] sm:$0xff]   ;;  %v17637_v58 = vld [vmem:[%s23663_s1 + $0x108] sm:$0xff]  }
 0xac9   : > { %15417 = vmatprep.subr.bf16.mxu1 %v17597_v15  ;;  %v17635_v34 = vld [vmem:[%s23665_s3 + $0xf8] sm:$0xff]   ;;  %v17638_v16 = vld [vmem:[%s23663_s1 + $0x110] sm:$0xff]  }
 0xacb   : > { %15398 = vmatpush3.bf16.msra.mxu0 %v17602_v63 }
 0xacc   : > { %15418 = vmatpush3.bf16.msra.mxu1 %v17599_v46  ;;  %15399 = vmatprep.subr.bf16.mxu0 %v17604_v41 }
 0xacd   : > { %15419 = vmatprep.subr.bf16.mxu1 %v17601_v0 }
 0xacf   : > { %15400 = vmatpush3.bf16.msra.mxu0 %v17606_v5 }
 0xad0   : > { %15420 = vmatpush3.bf16.msra.mxu1 %v17603_v62  ;;  %15401 = vmatprep.subr.bf16.mxu0 %v17608_v20 }
 0xad1   : > { %15421 = vmatprep.subr.bf16.mxu1 %v17605_v48 }
 0xad3   : > { %15402 = vmatpush3.bf16.msra.mxu0 %v17610_v37 }
 0xad4   : > { %15422 = vmatpush3.bf16.msra.mxu1 %v17607_v7  ;;  %15431 = vmatprep.subr.bf16.mxu0 %v17612_v28 }
 0xad5   : > { %15423 = vmatprep.subr.bf16.mxu1 %v17609_v25 }
 0xad6   : > { %5855 = vmatmul.mubr.bf16.vlgmr.msra.gmra.mrb[56].mxu0 %v5714_v32  ;;  %v17642_v32 = vld [vmem:[%s23663_s1 + $0x130] sm:$0xff]  }
 0xad7   : > { %15432 = vmatpush3.bf16.msra.mxu0 %v17613_v29  ;;  %6228 = vmatprep.mubr.bf16.mxu0 %v6097_v44 }
 0xad8   : > { %15424 = vmatpush3.bf16.msra.mxu1 %v17611_v12  ;;  %15433 = vmatprep.subr.bf16.mxu0 %v17615_v56 }
 0xad9   : > { %16151 = vmatprep.subr.bf16.mxu1 %v23671_v11 }
 0xadb   : > { %6037 = vmatmul.mubr.bf16.vlgmr.msra.gmra.mrb[56].mxu1 %v5901_v22  ;;  %15434 = vmatpush3.bf16.msra.mxu0 %v17616_v6 }
 0xadc   : > { %16152 = vmatpush3.bf16.msra.mxu1 %v17614_v36  ;;  %16167 = vmatprep.mubr.msk.bf16.mxu1 %vm18101_vm14, %v23671_v11  ;;  %v17643_v36 = vld [vmem:[%s23663_s1 + $0x138] sm:$0xff]  }
 0xadd   : > { %16153 = vmatprep.subr.bf16.mxu1 %v23671_v11  ;;  %15435 = vmatprep.subr.bf16.mxu0 %v17618_v30 }
 0xadf   : > { %15436 = vmatpush3.bf16.msra.mxu0 %v17619_v21 }
 0xae0   : > { %16154 = vmatpush3.bf16.msra.mxu1 %v17617_v51  ;;  %15437 = vmatprep.subr.bf16.mxu0 %v17621_v27 }
 0xae1   : > { %16155 = vmatprep.subr.bf16.mxu1 %v23671_v11 }
 0xae3   : > { %15438 = vmatpush3.bf16.msra.mxu0 %v17622_v52 }
 0xae4   : > { %16156 = vmatpush3.bf16.msra.mxu1 %v17620_v38  ;;  %15439 = vmatprep.subr.bf16.mxu0 %v17624_v8 }
 0xae5   : > { %16157 = vmatprep.subr.bf16.mxu1 %v23671_v11 }
 0xae7   : > { %15440 = vmatpush3.bf16.msra.mxu0 %v17625_v17 }
 0xae8   : > { %16158 = vmatpush3.bf16.msra.mxu1 %v17623_v49  ;;  %15441 = vmatprep.subr.bf16.mxu0 %v17627_v31 }
 0xae9   : > { %16159 = vmatprep.subr.bf16.mxu1 %v23671_v11 }
 0xaeb   : > { %15442 = vmatpush3.bf16.msra.mxu0 %v17628_v24 }
 0xaec   : > { %16160 = vmatpush3.bf16.msra.mxu1 %v17626_v59  ;;  %15443 = vmatprep.subr.bf16.mxu0 %v17630_v43 }
 0xaed   : > { %16161 = vmatprep.subr.bf16.mxu1 %v23671_v11 }
 0xaef   : > { %15444 = vmatpush3.bf16.msra.mxu0 %v17631_v47 }
 0xaf0   : > { %16162 = vmatpush3.bf16.msra.mxu1 %v17629_v13  ;;  %15445 = vmatprep.subr.bf16.mxu0 %v17633_v61 }
 0xaf1   : > { %16163 = vmatprep.subr.bf16.mxu1 %v23671_v11 }
 0xaf3   : > { %15446 = vmatpush3.bf16.msra.mxu0 %v17634_v42 }
 0xaf4   : > { %16164 = vmatpush3.bf16.msra.mxu1 %v17632_v40  ;;  %16171 = vmatprep.subr.bf16.mxu0 %v17636_v3 }
 0xaf5   : > { %16165 = vmatprep.subr.bf16.mxu1 %v23671_v11 }
 0xaf6   : > { %6229 = vmatmul.mubr.bf16.vlgmr.msra.gmra.mrb[60].mxu0 %v20771_v45 }
 0xaf7   : > { %16187 = vmatprep.mubr.bf16.mxu0 %v23669_v2  ;;  %16172 = vmatpush3.bf16.msra.mxu0 %v17636_v3 }
 0xaf8   : > { %16166 = vmatpush3.bf16.msra.mxu1 %v17635_v34  ;;  %16173 = vmatprep.subr.bf16.mxu0 %v17637_v58 }
 0xafb   : > { %16168 = vmatmul.mubr.bf16.vlgmr.msra.gmra.mrb[60].mxu1 %v6265_v39  ;;  %16174 = vmatpush3.bf16.msra.mxu0 %v17637_v58  ;;  %v17641_v39 = vld [vmem:[%s23663_s1 + $0x128] sm:$0xff]  }
 0xafc   : > { %16175 = vmatprep.subr.bf16.mxu0 %v17638_v16 }
 0xaff   : > { %16176 = vmatpush3.bf16.msra.mxu0 %v17638_v16 }
 0xb00   : > { %16177 = vmatprep.subr.bf16.mxu0 %v17639_v10 }
 0xb03   : > { %16178 = vmatpush3.bf16.msra.mxu0 %v17639_v10 }
 0xb04   : > { %16179 = vmatprep.subr.bf16.mxu0 %v17640_v57 }
 0xb07   : > { %16180 = vmatpush3.bf16.msra.mxu0 %v17640_v57 }
 0xb08   : > { %16181 = vmatprep.subr.bf16.mxu0 %v17641_v39 }
 0xb0b   : > { %16182 = vmatpush3.bf16.msra.mxu0 %v17641_v39 }
 0xb0c   : > { %16183 = vmatprep.subr.bf16.mxu0 %v17642_v32 }
 0xb0f   : > { %16184 = vmatpush3.bf16.msra.mxu0 %v17642_v32 }
 0xb10   : > { %16185 = vmatprep.subr.bf16.mxu0 %v17643_v36 }
 0xb13   : > { %16186 = vmatpush3.bf16.msra.mxu0 %v17643_v36  ;;  %v17646_v36 = vld [vmem:[%s23664_s2 + $0xa80] sm:$0xff]  }
 0xb89   : > { %v15359_v9 = vpop.f32.mrb[52].mxu0 }
 0xb8a   : > { %v15360_v35 = vpop.f32.mrb[53].mxu0 }
 0xb8b   : > { %v15361_v26 = vadd.f32 %v15360_v35, %v15359_v9  ;;  %v15362_v22 = vpop.f32.mrb[54].mxu0 }
 0xb8c   : > { %v15363_v33 = vpop.f32.mrb[55].mxu0 }
 0xb8d   : > { %v15364_v4 = vadd.f32 %v15363_v33, %v15362_v22 }
 0xb8e   : > { %v15381_v23 = vpop.f32.mrb[52].mxu1 }
 0xb8f   : > { %v15382_v1 = vpop.f32.mrb[53].mxu1 }
 0xb90   : > { %v15383_v60 = vadd.f32 %v15382_v1, %v15381_v23  ;;  %v15384_v19 = vpop.f32.mrb[54].mxu1 }
 0xb91   : > { %v15385_v15 = vpop.f32.mrb[55].mxu1 }
 0xb92   : > { %v5667_v44 = vadd.f32 %v15383_v60, %v15361_v26  ;;  %v15386_v14 = vadd.f32 %v15385_v15, %v15384_v19 }
 0xb94   : > { %v5670_v45 = vadd.f32 %v15386_v14, %v15364_v4 }
 0xba9   : > { %v15403_v18 = vpop.f32.mrb[56].mxu0 }
 0xbaa   : > { %v15404_v46 = vpop.f32.mrb[57].mxu0 }
 0xbab   : > { %v15405_v63 = vadd.f32 %v15404_v46, %v15403_v18  ;;  %v15406_v41 = vpop.f32.mrb[58].mxu0 }
 0xbac   : > { %v15407_v48 = vpop.f32.mrb[59].mxu0 }
 0xbad   : > { %v5863_v5 = vadd.f32 %v15405_v63, %v5667_v44  ;;  %v15408_v25 = vadd.f32 %v15407_v48, %v15406_v41 }
 0xbae   : > { %v15425_v0 = vpop.f32.mrb[56].mxu1 }
 0xbaf   : > { %v15426_v62 = vpop.f32.mrb[57].mxu1  ;;  %v5864_v12 = vadd.f32 %v15408_v25, %v5670_v45 }
 0xbb0   : > { %v15427_v20 = vadd.f32 %v15426_v62, %v15425_v0  ;;  %v15428_v7 = vpop.f32.mrb[58].mxu1  ;;  %v17644_v62 = vld [vmem:[%s23664_s2 + $0xac0] sm:$0xff]  }
 0xbb1   : > { %v15429_v37 = vpop.f32.mrb[59].mxu1  ;;  %15474 = vmatprep.subr.bf16.mxu1 %v17644_v62  ;;  %v17653_v62 = vld [vmem:[%s23664_s2 + $0xa50] sm:$0xff]  }
 0xbb2   : > { %v6045_v28 = vadd.f32 %v15427_v20, %v5863_v5  ;;  %v15430_v29 = vadd.f32 %v15429_v37, %v15428_v7  ;;  %v17645_v37 = vld [vmem:[%s23664_s2 + $0xa40] sm:$0xff]   ;;  %15475 = vmatpush3.bf16.msra.mxu1 %v17646_v36  ;;  %v17655_v36 = vld [vmem:[%s23664_s2 + $0xa10] sm:$0xff]  }
 0xbb3   : > { %15496 = vmatprep.subr.bf16.mxu0 %v17645_v37 }
 0xbb4   : > { %v6046_v56 = vadd.f32 %v15430_v29, %v5864_v12 }
 0xbc9   : > { %v15447_v6 = vpop.f32.mrb[60].mxu0 }
 0xbca   : > { %v15448_v30 = vpop.f32.mrb[61].mxu0 }
 0xbcb   : > { %v15449_v21 = vadd.f32 %v15448_v30, %v15447_v6  ;;  %v15450_v27 = vpop.f32.mrb[62].mxu0  ;;  %v17647_v6 = vld [vmem:[%s23664_s2 + $0xa00] sm:$0xff]  }
 0xbcc   : > { %v15451_v52 = vpop.f32.mrb[63].mxu0 }
 0xbcd   : > { %v6237_v8 = vadd.f32 %v15449_v21, %v6045_v28  ;;  %v15452_v17 = vadd.f32 %v15451_v52, %v15450_v27 }
 0xbce   : > { %v6365_v51 = vpop.f32.mrb[60].mxu1 }
 0xbcf   : > { %6374 = vrot.lane.b32.xlu0 %v6365_v51, %s18100_s26  ;;  %v16169_v38 = vpop.f32.mrb[61].mxu1  ;;  %v6238_v59 = vadd.f32 %v15452_v17, %v6046_v56  ;;  %v17648_v17 = vld [vmem:[%s23664_s2 + $0xac8] sm:$0xff]  }
 0xbd0   : > { %v6368_v49 = vpop.f32.mrb[62].mxu1  ;;  %15476 = vmatprep.subr.bf16.mxu1 %v17648_v17 }
 0xbd1   : > { %6376 = vrot.lane.b32.xlu1 %v6368_v49, %s18100_s26  ;;  %v16170_v31 = vpop.f32.mrb[63].mxu1 }
 0xbd2   : > { %v17649_v31 = vld [vmem:[%s23664_s2 + $0xa48] sm:$0xff]  }
 0xc41   : > { %v6375_v24 = vpop.permute.xlu0 %6374 }
 0xc42   : > { %v6380_v43 = vsel %vm659_vm11, %v6237_v8, %v6375_v24 }
 0xc43   : > { %v6382_v13 = vmax.f32 %v6380_v43, 0.0  ;;  %v6377_v47 = vpop.permute.xlu1 %6376 }
 0xc44   : > { %v6381_v61 = vsel %vm659_vm11, %v6238_v59, %v6377_v47 }
 0xc45   : > { %v7770_v40 = vrot.slane %v6382_v13, 7  ;;  %v6383_v42 = vmax.f32 %v6381_v61, 0.0  ;;  %v6395_v34 = vpack.c.bf16 %v6382_v13, %v23671_v11  ;;  %v7779_v3 = vrot.slane %v6382_v13, 1 }
 0xc47   : > { %v7771_v58 = vsel %vm608_vm4, %v18572_v50, %v7770_v40  ;;  %v7772_v16 = vrot.slane %v6383_v42, 7  ;;  %v7780_v10 = vrot.slane %v6383_v42, 1  ;;  %16188 = vmatmul.mubr.bf16.vlgmr.msra.gmra.mrb[64].mxu0 %v6395_v34  ;;  %v6396_v57 = vpack.c.bf16 %v23671_v11, %v6383_v42 }
 0xc48   : > { %v7776_v39 = vsel %vm1655_vm7, -inf, %v7771_v58  ;;  %15497 = vmatpush3.bf16.msra.mxu0 %v17647_v6  ;;  %v17651_v58 = vld [vmem:[%s23664_s2 + $0xa08] sm:$0xff]  }
 0xc49   : > { %v7788_v32 = vmax.f32 %v7776_v39, %v6382_v13  ;;  %v7773_v9 = vsel %vm608_vm4, %v7770_v40, %v7772_v16  ;;  %16191 = vmatprep.mubr.bf16.mxu0 %v6396_v57  ;;  %v7781_v35 = vsel %vm413_vm1, %v7779_v3, %v7780_v10  ;;  %v7783_v26 = vsel %vm413_vm1, %v7780_v10, %v18575_v53  ;;  %v17650_v3 = vld [vmem:[%s23664_s2 + $0xa88] sm:$0xff]  }
 0xc4a   : > { %v7789_v22 = vmax.f32 %v7773_v9, %v6383_v42  ;;  %v7787_v33 = vsel %vm1670_vm8, -inf, %v7783_v26  ;;  %15498 = vmatprep.subr.bf16.mxu0 %v17649_v31  ;;  %15477 = vmatpush3.bf16.msra.mxu1 %v17650_v3  ;;  %v17656_v3 = vld [vmem:[%s23664_s2 + $0xad8] sm:$0xff]  }
 0xc4b   : > { %v20939_v23 = vmax.f32 %v7788_v32, %v7781_v35 }
 0xc4c   : > { %v20941_v4 = vmax.f32 %v7789_v22, %v7787_v33  ;;  %15499 = vmatpush3.bf16.msra.mxu0 %v17651_v58  ;;  %v17658_v58 = vld [vmem:[%s23664_s2 + $0xa98] sm:$0xff]  }
 0xc4d   : > { %15500 = vmatprep.subr.bf16.mxu0 %v17653_v62  ;;  %v17659_v62 = vld [vmem:[%s23664_s2 + $0xa18] sm:$0xff]  }
 0xc4f   : > { %16192 = vmatmul.mubr.bf16.gmra.mrb[68].mxu0 %v23669_v2 }
 0xc50   : > { %15501 = vmatpush3.bf16.msra.mxu0 %v17655_v36 }
 0xd1a   : > { %v20946_v60 = vpop.f32.mrb[64].mxu0 }
 0xd1b   : > { %v20948_v19 = vpop.f32.mrb[65].mxu0  ;;  %v6657_v15 = vrot.slane %v20946_v60, 5  ;;  %v6538_v44 = vrot.slane %v20946_v60, 1  ;;  %v6691_v14 = vrot.slane %v20946_v60, 6  ;;  %v6572_v45 = vrot.slane %v20946_v60, 2 }
 0xd1c   : > { %v6535_v18 = vrot.slane %v20948_v19, 1  ;;  %v6569_v46 = vrot.slane %v20948_v19, 2  ;;  %v20956_v0 = vpop.f32.mrb[66].mxu0  ;;  %v6725_v63 = vrot.slane %v20946_v60, 7  ;;  %v6604_v41 = vrot.slane %v20946_v60, 3 }
 0xd1d   : > { %v20963_v48 = vpop.f32.mrb[67].mxu0  ;;  %v6659_v5 = vrot.slane %v20956_v0, 5  ;;  %v6540_v20 = vrot.slane %v20956_v0, 1  ;;  %v6693_v7 = vrot.slane %v20956_v0, 6  ;;  %v6574_v25 = vrot.slane %v20956_v0, 2 }
 0xd1e   : > { %v6656_v28 = vrot.slane %v20963_v48, 5  ;;  %v6536_v12 = vrot.slane %v20963_v48, 1  ;;  %v6690_v29 = vrot.slane %v20963_v48, 6  ;;  %v6570_v56 = vrot.slane %v20963_v48, 2 }
 0xd1f   : > { %v20983_v30 = vsel %vm538_vm0, %v6657_v15, %v6659_v5  ;;  %v20986_v51 = vsel %vm413_vm1, %v6538_v44, %v6540_v20  ;;  %v20989_v21 = vsel %vm573_vm2, %v6691_v14, %v6693_v7  ;;  %v6724_v27 = vrot.slane %v20963_v48, 7 }
 0xd20   : > { %v6658_v38 = vsel %vm538_vm0, %v6656_v28, %v6657_v15  ;;  %v6537_v52 = vsel %vm413_vm1, %v6535_v18, %v6536_v12  ;;  %v6539_v8 = vsel %vm413_vm1, %v6536_v12, %v6538_v44  ;;  %v6692_v49 = vsel %vm573_vm2, %v6690_v29, %v6691_v14  ;;  %v17652_v15 = vld [vmem:[%s23664_s2 + $0xad0] sm:$0xff]  }
 0xd21   : > { %v16832_v59 = vpack.i.bf16 %v6658_v38, %v6656_v28  ;;  %v16837_v24 = vpack.i.bf16 %v6539_v8, %v6537_v52  ;;  %v16842_v43 = vpack.i.bf16 %v6692_v49, %v6690_v29  ;;  %v21003_v13 = vsel %vm448_vm3, %v6569_v46, %v6570_v56  ;;  %15478 = vmatprep.subr.bf16.mxu1 %v17652_v15 }
 0xd22   : > { %v21005_v47 = vpop.f32.mrb[68].mxu0  ;;  %v21008_v61 = vsel %vm448_vm3, %v6570_v56, %v6572_v45  ;;  %v6726_v40 = vsel %vm608_vm4, %v6724_v27, %v6725_v63  ;;  %v21014_v42 = vsel %vm448_vm3, %v6572_v45, %v6574_v25  ;;  %v6603_v34 = vrot.slane %v20963_v48, 3  ;;  %v17654_v56 = vld [vmem:[%s23664_s2 + $0xa90] sm:$0xff]  }
 0xd23   : > { %16833 = vrot.lane.b32.xlu0 %v16832_v59, %s18098_s10  ;;  %v21024_v16 = vpop.f32.mrb[69].mxu0  ;;  %v16847_v10 = vpack.i.bf16 %v21008_v61, %v21003_v13  ;;  %v21028_v57 = vpack.i.bf16 %v6726_v40, %v6724_v27  ;;  %v6727_v39 = vrot.slane %v20956_v0, 7  ;;  %v6665_v32 = vrot.slane %v21005_v47, 5  ;;  %15479 = vmatpush3.bf16.msra.mxu1 %v17654_v56 }
 0xd24   : > { %v21032_v9 = vpop.f32.mrb[70].mxu0  ;;  %v6661_v35 = vrot.slane %v21024_v16, 5  ;;  %v6542_v26 = vrot.slane %v21024_v16, 1  ;;  %v6695_v22 = vrot.slane %v21024_v16, 6  ;;  %v6576_v33 = vrot.slane %v21024_v16, 2  ;;  %15480 = vmatprep.subr.bf16.mxu1 %v17656_v3 }
 0xd25   : > { %v6647_v44 = vrot.slane %v21032_v9, 4  ;;  %v6667_v14 = vrot.slane %v21032_v9, 5  ;;  %v6701_v45 = vrot.slane %v21032_v9, 6  ;;  %v6735_v18 = vrot.slane %v21032_v9, 7  ;;  %v21045_v46 = vpop.f32.mrb[71].mxu0  ;;  %v17671_v9 = vld [vmem:[%s23664_s2 + $0xa30] sm:$0xff]  }
 0xd26   : > { %v6662_v37 = vsel %vm538_vm0, %v6659_v5, %v6661_v35  ;;  %v6543_v28 = vsel %vm413_vm1, %v6540_v20, %v6542_v26  ;;  %v6696_v12 = vsel %vm573_vm2, %v6693_v7, %v6695_v22  ;;  %v21056_v29 = vsel %vm448_vm3, %v6574_v25, %v6576_v33 }
 0xd27   : > { %16838 = vrot.lane.b32.xlu0 %v16837_v24, %s18098_s10  ;;  %v16862_v5 = vpack.i.bf16 %v6662_v37, %v20983_v30  ;;  %v16867_v20 = vpack.i.bf16 %v6543_v28, %v20986_v51  ;;  %v16872_v7 = vpack.i.bf16 %v6696_v12, %v20989_v21  ;;  %v16877_v25 = vpack.i.bf16 %v21056_v29, %v21014_v42  ;;  %v17666_v42 = vld [vmem:[%s23664_s2 + $0xaa8] sm:$0xff]  }
 0xd28   : > { %v6605_v6 = vsel %vm483_vm5, %v6603_v34, %v6604_v41  ;;  %v21076_v27 = vsel %vm608_vm4, %v6725_v63, %v6727_v39  ;;  %v6729_v38 = vrot.slane %v21024_v16, 7  ;;  %v6663_v30 = vrot.slane %v21045_v46, 5  ;;  %15481 = vmatpush3.bf16.msra.mxu1 %v17658_v58  ;;  %v17667_v29 = vld [vmem:[%s23664_s2 + $0xa28] sm:$0xff]  }
 0xd29   : > { %16863 = vrot.lane.b32.xlu1 %v16862_v5, %s18098_s10  ;;  %v21081_v51 = vpack.i.bf16 %v6605_v6, %v6603_v34  ;;  %v6606_v21 = vrot.slane %v20956_v0, 3  ;;  %v6608_v52 = vrot.slane %v21024_v16, 3  ;;  %v6697_v8 = vrot.slane %v21045_v46, 6 }
 0xd2a   : > { %v21087_v63 = vsel %vm608_vm4, %v6727_v39, %v6729_v38  ;;  %v21090_v49 = vsel %vm538_vm0, %v6661_v35, %v6663_v30  ;;  %v21095_v17 = vsel %vm538_vm0, %v6663_v30, %v6665_v32  ;;  %v6699_v31 = vrot.slane %v21005_v47, 6 }
 0xd2b   : > { %16843 = vrot.lane.b32.xlu0 %v16842_v43, %s18099_s20  ;;  %v16882_v59 = vpack.i.bf16 %v21087_v63, %v21076_v27  ;;  %v16892_v24 = vpack.i.bf16 %v21095_v17, %v21090_v49  ;;  %v21106_v40 = vsel %vm483_vm5, %v6604_v41, %v6606_v21  ;;  %v21109_v34 = vsel %vm483_vm5, %v6606_v21, %v6608_v52  ;;  %v17657_v43 = vld [vmem:[%s23664_s2 + $0xa58] sm:$0xff]   ;;  %v17676_v17 = vld [vmem:[%s23664_s2 + $0xb40] sm:$0xff]  }
 0xd2c   : > { %v16887_v39 = vpack.i.bf16 %v21109_v34, %v21106_v40  ;;  %v21123_v41 = vsel %vm573_vm2, %v6695_v22, %v6697_v8  ;;  %v21126_v35 = vsel %vm573_vm2, %v6697_v8, %v6699_v31  ;;  %v6544_v15 = vrot.slane %v21045_v46, 1  ;;  %15502 = vmatprep.subr.bf16.mxu0 %v17657_v43  ;;  %v17661_v43 = vld [vmem:[%s23664_s2 + $0xa60] sm:$0xff]   ;;  %v17673_v27 = vld [vmem:[%s23664_s2 + $0xa78] sm:$0xff]  }
 0xd2d   : > { %16868 = vrot.lane.b32.xlu1 %v16867_v20, %s18098_s10  ;;  %v16902_v37 = vpack.i.bf16 %v21126_v35, %v21123_v41  ;;  %v6546_v28 = vrot.slane %v21005_v47, 1  ;;  %v6731_v12 = vrot.slane %v21045_v46, 7  ;;  %v6733_v22 = vrot.slane %v21005_v47, 7  ;;  %15503 = vmatpush3.bf16.msra.mxu0 %v17659_v62  ;;  %v17674_v63 = vld [vmem:[%s23664_s2 + $0xab8] sm:$0xff]  }
 0xd2e   : > { %v21139_v56 = vsel %vm413_vm1, %v6542_v26, %v6544_v15  ;;  %v6578_v36 = vrot.slane %v21045_v46, 2  ;;  %v6580_v5 = vrot.slane %v21005_v47, 2  ;;  %v6668_v20 = vsel %vm538_vm0, %v6665_v32, %v6667_v14  ;;  %15504 = vmatprep.subr.bf16.mxu0 %v17661_v43  ;;  %v17670_v43 = vld [vmem:[%s23664_s2 + $0xab0] sm:$0xff]   ;;  %v17675_v49 = vld [vmem:[%s23664_s2 + $0xa38] sm:$0xff]  }
 0xd2f   : > { %16848 = vrot.lane.b32.xlu0 %v16847_v10, %s18099_s20  ;;  %v21151_v6 = vsel %vm413_vm1, %v6544_v15, %v6546_v28  ;;  %v21154_v26 = vsel %vm608_vm4, %v6729_v38, %v6731_v12  ;;  %v21157_v30 = vsel %vm608_vm4, %v6731_v12, %v6733_v22  ;;  %v21159_v21 = vpack.i.bf16 %v6546_v28, %v6668_v20  ;;  %v17663_v28 = vld [vmem:[%s23664_s2 + $0xa20] sm:$0xff]   ;;  %v17664_v12 = vld [vmem:[%s23664_s2 + $0xae8] sm:$0xff]  }
 0xd30   : > { %v16897_v32 = vpack.i.bf16 %v21151_v6, %v21139_v56  ;;  %v16912_v14 = vpack.i.bf16 %v21157_v30, %v21154_v26  ;;  %v21168_v13 = vsel %vm448_vm3, %v6576_v33, %v6578_v36  ;;  %v21171_v61 = vsel %vm448_vm3, %v6578_v36, %v6580_v5  ;;  %v17660_v33 = vld [vmem:[%s23664_s2 + $0xae0] sm:$0xff]   ;;  %v17665_v20 = vld [vmem:[%s23664_s2 + $0xa68] sm:$0xff]  }
 0xd31   : > { %16873 = vrot.lane.b32.xlu1 %v16872_v7, %s18099_s20  ;;  %v16907_v10 = vpack.i.bf16 %v21171_v61, %v21168_v13  ;;  %v6610_v38 = vrot.slane %v21045_v46, 3  ;;  %v6612_v8 = vrot.slane %v21005_v47, 3  ;;  %v6736_v3 = vsel %vm608_vm4, %v6733_v22, %v6735_v18  ;;  %v17662_v7 = vld [vmem:[%s23664_s2 + $0xaa0] sm:$0xff]   ;;  %15482 = vmatprep.subr.bf16.mxu1 %v17660_v33  ;;  %v17669_v33 = vld [vmem:[%s23664_s2 + $0xa70] sm:$0xff]  }
 0xd32   : > { %v6702_v58 = vsel %vm573_vm2, %v6699_v31, %v6701_v45  ;;  %v6637_v15 = vrot.slane %v20946_v60, 4  ;;  %v6636_v18 = vrot.slane %v20963_v48, 4  ;;  %v6639_v62 = vrot.slane %v20956_v0, 4  ;;  %15483 = vmatpush3.bf16.msra.mxu1 %v17662_v7  ;;  %15505 = vmatpush3.bf16.msra.mxu0 %v17663_v28 }
 0xd33   : > { %16853 = vrot.lane.b32.xlu0 %v21028_v57, %s18100_s26  ;;  %v6611_v22 = vsel %vm483_vm5, %v6608_v52, %v6610_v38  ;;  %v6613_v45 = vsel %vm483_vm5, %v6610_v38, %v6612_v8  ;;  %v16932_v31 = vpack.i.bf16 %v6612_v8, %v6736_v3  ;;  %v16927_v36 = vpack.i.bf16 %v6580_v5, %v6702_v58 }
 0xd34   : > { %v16917_v2 = vpack.i.bf16 %v6613_v45, %v6611_v22  ;;  %v21212_v1 = vsel %vm517_vm6, %v6636_v18, %v6637_v15  ;;  %v21215_v11 = vsel %vm517_vm6, %v6637_v15, %v6639_v62  ;;  %v6641_v57 = vrot.slane %v21024_v16, 4  ;;  %15484 = vmatprep.subr.bf16.mxu1 %v17664_v12  ;;  %15506 = vmatprep.subr.bf16.mxu0 %v17665_v20 }
 0xd35   : > { %16878 = vrot.lane.b32.xlu1 %v16877_v25, %s18099_s20  ;;  %v6645_v52 = vrot.slane %v21005_v47, 4  ;;  %v6643_v5 = vrot.slane %v21045_v46, 4  ;;  %v17668_v25 = vld [vmem:[%s23664_s2 + $0xaf0] sm:$0xff]  }
 0xd36   : > { %v21225_v38 = vsel %vm517_vm6, %v6639_v62, %v6641_v57  ;;  %15485 = vmatpush3.bf16.msra.mxu1 %v17666_v42  ;;  %15507 = vmatpush3.bf16.msra.mxu0 %v17667_v29 }
 0xd37   : > { %16858 = vrot.lane.b32.xlu0 %v21081_v51, %s18100_s26  ;;  %v21230_v8 = vsel %vm517_vm6, %v6641_v57, %v6643_v5  ;;  %v21233_v3 = vsel %vm517_vm6, %v6643_v5, %v6645_v52  ;;  %v21247_v51 = vsel %vm517_vm6, %v6645_v52, %v6647_v44  ;;  %15486 = vmatprep.subr.bf16.mxu1 %v17668_v25  ;;  %v17672_v44 = vld [vmem:[%s23664_s2 + $0xaf8] sm:$0xff]  }
 0xd38   : > { %15508 = vmatprep.subr.bf16.mxu0 %v17669_v33 }
 0xd39   : > { %16883 = vrot.lane.b32.xlu1 %v16882_v59, %s18100_s26  ;;  %v17677_v59 = vld [vmem:[%s23664_s2 + $0xbc0] sm:$0xff]  }
 0xd3a   : > { %15487 = vmatpush3.bf16.msra.mxu1 %v17670_v43  ;;  %15509 = vmatpush3.bf16.msra.mxu0 %v17671_v9 }
 0xd3b   : > { %16893 = vrot.lane.b32.xlu0 %v16892_v24, %s18098_s10  ;;  %15488 = vmatprep.subr.bf16.mxu1 %v17672_v44 }
 0xd3c   : > { %15510 = vmatprep.subr.bf16.mxu0 %v17673_v27 }
 0xd3d   : > { %16888 = vrot.lane.b32.xlu1 %v16887_v39, %s18100_s26 }
 0xd3e   : > { %15489 = vmatpush3.bf16.msra.mxu1 %v17674_v63  ;;  %15511 = vmatpush3.bf16.msra.mxu0 %v17675_v49 }
 0xd3f   : > { %16903 = vrot.lane.b32.xlu0 %v16902_v37, %s18099_s20  ;;  %15518 = vmatprep.subr.bf16.mxu1 %v17676_v17 }
 0xd40   : > { %15540 = vmatprep.subr.bf16.mxu0 %v17677_v59 }
 0xd41   : > { %16898 = vrot.lane.b32.xlu1 %v16897_v32, %s18098_s10 }
 0xd43   : > { %16913 = vrot.lane.b32.xlu0 %v16912_v14, %s18100_s26 }
 0xd45   : > { %16908 = vrot.lane.b32.xlu1 %v16907_v10, %s18099_s20 }
 0xd47   : > { %16923 = vrot.lane.b32.xlu0 %v21159_v21, %s18098_s10 }
 0xd49   : > { %16918 = vrot.lane.b32.xlu1 %v16917_v2, %s18100_s26 }
 0xd4b   : > { %16933 = vrot.lane.b32.xlu0 %v16932_v31, %s18100_s26 }
 0xd4d   : > { %16928 = vrot.lane.b32.xlu1 %v16927_v36, %s18099_s20 }
 0xd95   : > { %v16834_v24 = vpop.permute.xlu0 %16833 }
 0xd96   : > { %v16836_v35 = vunpack.i.h.bf16 %v16834_v24  ;;  %v16835_v37 = vunpack.i.l.bf16 %v16834_v24 }
 0xd98   : > { %v6779_v61 = vsel %vm643_vm9, %v6636_v18, %v16835_v37  ;;  %v6780_v10 = vsel %vm643_vm9, %v21212_v1, %v16836_v35 }
 0xd99   : > { %v16839_v40 = vpop.permute.xlu0 %16838 }
 0xd9a   : > { %v16841_v56 = vunpack.i.h.bf16 %v16839_v40  ;;  %v16840_v6 = vunpack.i.l.bf16 %v16839_v40 }
 0xd9b   : > { %v16864_v34 = vpop.permute.xlu1 %16863 }
 0xd9c   : > { %v16865_v26 = vunpack.i.l.bf16 %v16864_v34  ;;  %v16866_v32 = vunpack.i.h.bf16 %v16864_v34  ;;  %v6759_v7 = vsel %vm643_vm9, %v20963_v48, %v16841_v56  ;;  %v6758_v58 = vsel %vm643_vm9, %v20948_v19, %v16840_v6 }
 0xd9d   : > { %v16844_v39 = vpop.permute.xlu0 %16843 }
 0xd9e   : > { %v16846_v14 = vunpack.i.h.bf16 %v16844_v39  ;;  %v16845_v21 = vunpack.i.l.bf16 %v16844_v39  ;;  %v6781_v15 = vsel %vm643_vm9, %v21215_v11, %v16865_v26  ;;  %v6782_v1 = vsel %vm643_vm9, %v21225_v38, %v16866_v32 }
 0xd9f   : > { %v16869_v41 = vpop.permute.xlu1 %16868 }
 0xda0   : > { %v16871_v13 = vunpack.i.h.bf16 %v16869_v41  ;;  %v16870_v62 = vunpack.i.l.bf16 %v16869_v41  ;;  %v6787_v20 = vsel %vm651_vm10, %v6780_v10, %v16846_v14  ;;  %v6786_v48 = vsel %vm651_vm10, %v6779_v61, %v16845_v21 }
 0xda1   : > { %v16849_v30 = vpop.permute.xlu0 %16848 }
 0xda2   : > { %v16851_v28 = vunpack.i.h.bf16 %v16849_v30  ;;  %v16850_v12 = vunpack.i.l.bf16 %v16849_v30  ;;  %v6761_v19 = vsel %vm643_vm9, %v20956_v0, %v16871_v13  ;;  %v6760_v29 = vsel %vm643_vm9, %v20946_v60, %v16870_v62 }
 0xda3   : > { %v16874_v2 = vpop.permute.xlu1 %16873 }
 0xda4   : > { %v16876_v45 = vunpack.i.h.bf16 %v16874_v2  ;;  %v16875_v31 = vunpack.i.l.bf16 %v16874_v2  ;;  %v6765_v25 = vsel %vm651_vm10, %v6758_v58, %v16850_v12  ;;  %v6766_v38 = vsel %vm651_vm10, %v6759_v7, %v16851_v28 }
 0xda5   : > { %v16854_v22 = vpop.permute.xlu0 %16853 }
 0xda6   : > { %v16856_v36 = vunpack.i.h.bf16 %v16854_v22  ;;  %v16855_v18 = vunpack.i.l.bf16 %v16854_v22  ;;  %v6789_v9 = vsel %vm651_vm10, %v6782_v1, %v16876_v45  ;;  %v6788_v0 = vsel %vm651_vm10, %v6781_v15, %v16875_v31 }
 0xda7   : > { %v16879_v57 = vpop.permute.xlu1 %16878 }
 0xda8   : > { %v6793_v11 = vsel %vm659_vm11, %v6786_v48, %v16855_v18  ;;  %v6794_v52 = vsel %vm659_vm11, %v6787_v20, %v16856_v36  ;;  %v16881_v5 = vunpack.i.h.bf16 %v16879_v57  ;;  %v16880_v42 = vunpack.i.l.bf16 %v16879_v57 }
 0xda9   : > { %v6801_v33 = vpack.c.bf16 %v6794_v52, %v6793_v11  ;;  %v16859_v43 = vpop.permute.xlu0 %16858 }
 0xdaa   : > { %v16861_v44 = vunpack.i.h.bf16 %v16859_v43  ;;  %v16860_v27 = vunpack.i.l.bf16 %v16859_v43  ;;  %v6767_v17 = vsel %vm651_vm10, %v6760_v29, %v16880_v42  ;;  %v6768_v59 = vsel %vm651_vm10, %v6761_v19, %v16881_v5 }
 0xdab   : > { %v6892_v63 = vshrl.u32 %v6801_v33, 16  ;;  %v6895_v49 = vshll.u32 %v6801_v33, 16  ;;  %v16884_v24 = vpop.permute.xlu1 %16883 }
 0xdac   : > { %v6772_v60 = vsel %vm659_vm11, %v6765_v25, %v16860_v27  ;;  %v6773_v40 = vsel %vm659_vm11, %v6766_v38, %v16861_v44  ;;  %v16886_v34 = vunpack.i.h.bf16 %v16884_v24  ;;  %v16885_v39 = vunpack.i.l.bf16 %v16884_v24 }
 0xdad   : > { %v6800_v41 = vpack.c.bf16 %v6773_v40, %v6772_v60  ;;  %v16894_v35 = vpop.permute.xlu0 %16893  ;;  %v6894_v37 = vrot.slane %v6892_v63, 6  ;;  %v6897_v56 = vrot.slane %v6895_v49, 7  ;;  %v21338_v6 = vrot.slane %v6892_v63, 2 }
 0xdae   : > { %v6795_v26 = vsel %vm659_vm11, %v6788_v0, %v16885_v39  ;;  %v6796_v30 = vsel %vm659_vm11, %v6789_v9, %v16886_v34  ;;  %v16896_v32 = vunpack.i.h.bf16 %v16894_v35  ;;  %v16895_v14 = vunpack.i.l.bf16 %v16894_v35 }
 0xdaf   : > { %v6875_v21 = vshrl.u32 %v6800_v41, 16  ;;  %v6878_v13 = vshll.u32 %v6800_v41, 16  ;;  %v6803_v2 = vpack.c.bf16 %v6796_v30, %v6795_v26  ;;  %v16889_v61 = vpop.permute.xlu1 %16888  ;;  %v6898_v10 = vor.u32 %v6897_v56, %v6894_v37 }
 0xdb0   : > { %v6783_v7 = vsel %vm643_vm9, %v21230_v8, %v16895_v14  ;;  %v6784_v58 = vsel %vm643_vm9, %v21233_v3, %v16896_v32  ;;  %v16891_v15 = vunpack.i.h.bf16 %v16889_v61  ;;  %v16890_v62 = vunpack.i.l.bf16 %v16889_v61 }
 0xdb1   : > { %v21346_v28 = vrot.slane %v6875_v21, 2  ;;  %v21348_v12 = vrot.slane %v6878_v13, 3  ;;  %v6900_v22 = vshrl.u32 %v6803_v2, 16  ;;  %v6903_v45 = vshll.u32 %v6803_v2, 16  ;;  %v16904_v31 = vpop.permute.xlu0 %16903 }
 0xdb2   : > { %v6774_v36 = vsel %vm659_vm11, %v6767_v17, %v16890_v62  ;;  %v6775_v18 = vsel %vm659_vm11, %v6768_v59, %v16891_v15  ;;  %v16906_v1 = vunpack.i.h.bf16 %v16904_v31  ;;  %v16905_v20 = vunpack.i.l.bf16 %v16904_v31 }
 0xdb3   : > { %v6802_v48 = vpack.c.bf16 %v6775_v18, %v6774_v36  ;;  %v16899_v8 = vpop.permute.xlu1 %16898  ;;  %v6902_v19 = vrot.slane %v6900_v22, 6  ;;  %v6905_v57 = vrot.slane %v6903_v45, 7  ;;  %v7055_v3 = vrot.slane %v6895_v49, 3 }
 0xdb4   : > { %v6790_v11 = vsel %vm651_vm10, %v6783_v7, %v16905_v20  ;;  %v6791_v52 = vsel %vm651_vm10, %v6784_v58, %v16906_v1  ;;  %v16901_v5 = vunpack.i.h.bf16 %v16899_v8  ;;  %v16900_v42 = vunpack.i.l.bf16 %v16899_v8  ;;  %v17678_v8 = vld [vmem:[%s23664_s2 + $0xb00] sm:$0xff]  }
 0xdb5   : > { %v6883_v29 = vshrl.u32 %v6802_v48, 16  ;;  %v6886_v25 = vshll.u32 %v6802_v48, 16  ;;  %v16914_v38 = vpop.permute.xlu0 %16913  ;;  %v21354_v33 = vor.u32 %v6905_v57, %v6902_v19  ;;  %v7056_v43 = vor.u32 %v7055_v3, %v21338_v6 }
 0xdb6   : > { %v6763_v9 = vsel %vm643_vm9, %v21045_v46, %v16901_v5  ;;  %v6762_v0 = vsel %vm643_vm9, %v21024_v16, %v16900_v42  ;;  %v16916_v44 = vunpack.i.h.bf16 %v16914_v38  ;;  %v16915_v27 = vunpack.i.l.bf16 %v16914_v38 }
 0xdb7   : > { %v7050_v63 = vrot.slane %v6883_v29, 2  ;;  %v7051_v49 = vrot.slane %v6886_v25, 3  ;;  %v16909_v17 = vpop.permute.xlu1 %16908  ;;  %v6907_v59 = vsel %vm761_vm12, %v6898_v10, %v21354_v33  ;;  %v7057_v24 = vrot.slane %v6900_v22, 2 }
 0xdb8   : > { %v6797_v60 = vsel %vm659_vm11, %v6790_v11, %v16915_v27  ;;  %v6798_v40 = vsel %vm659_vm11, %v6791_v52, %v16916_v44  ;;  %v16911_v34 = vunpack.i.h.bf16 %v16909_v17  ;;  %v16910_v39 = vunpack.i.l.bf16 %v16909_v17  ;;  %7038 = vmatprep.mubr.bf16.mxu1 %v6907_v59  ;;  %v17680_v11 = vld [vmem:[%s23664_s2 + $0xb48] sm:$0xff]  }
 0xdb9   : > { %v6805_v46 = vpack.c.bf16 %v6798_v40, %v6797_v60  ;;  %v7058_v41 = vrot.slane %v6903_v45, 3  ;;  %v16924_v35 = vpop.permute.xlu0 %16923  ;;  %v6877_v16 = vrot.slane %v6875_v21, 6  ;;  %v6880_v37 = vrot.slane %v6878_v13, 7  ;;  %v17683_v44 = vld [vmem:[%s23664_s2 + $0xb88] sm:$0xff]  }
 0xdba   : > { %v6769_v56 = vsel %vm651_vm10, %v6762_v0, %v16910_v39  ;;  %v6770_v6 = vsel %vm651_vm10, %v6763_v9, %v16911_v34  ;;  %v16926_v26 = vunpack.i.h.bf16 %v16924_v35  ;;  %v16925_v30 = vunpack.i.l.bf16 %v16924_v35  ;;  %v17682_v59 = vld [vmem:[%s23664_s2 + $0xb08] sm:$0xff]   ;;  %v17685_v35 = vld [vmem:[%s23664_s2 + $0xbd0] sm:$0xff]  }
 0xdbb   : > { %v7243_v32 = vshrl.u32 %v6805_v46, 16  ;;  %v7246_v14 = vshll.u32 %v6805_v46, 16  ;;  %v7059_v2 = vor.u32 %v7058_v41, %v7057_v24  ;;  %v16919_v61 = vpop.permute.xlu1 %16918  ;;  %v6881_v10 = vor.u32 %v6880_v37, %v6877_v16  ;;  %v17684_v41 = vld [vmem:[%s23664_s2 + $0xb50] sm:$0xff]  }
 0xdbc   : > { %v6764_v7 = vsel %vm643_vm9, %v21005_v47, %v16926_v26  ;;  %v6785_v58 = vsel %vm643_vm9, %v21247_v51, %v16925_v30  ;;  %v16921_v15 = vunpack.i.h.bf16 %v16919_v61  ;;  %v16920_v21 = vunpack.i.l.bf16 %v16919_v61  ;;  %v17679_v47 = vld [vmem:[%s23664_s2 + $0xb80] sm:$0xff]   ;;  %v17687_v26 = vld [vmem:[%s23664_s2 + $0xb90] sm:$0xff]   ;;  %v17689_v61 = vld [vmem:[%s23664_s2 + $0xbd8] sm:$0xff]  }
 0xdbd   : > { %v7060_v13 = vsel %vm935_vm13, %v7056_v43, %v7059_v2  ;;  %v6885_v62 = vrot.slane %v6883_v29, 6  ;;  %v6888_v22 = vrot.slane %v6886_v25, 7  ;;  %v7049_v45 = vor.u32 %v21348_v12, %v21346_v28  ;;  %v16934_v31 = vpop.permute.xlu0 %16933  ;;  %v17681_v28 = vld [vmem:[%s23664_s2 + $0xbc8] sm:$0xff]  }
 0xdbe   : > { %7191 = vmatprep.mubr.bf16.mxu0 %v7060_v13  ;;  %v6776_v36 = vsel %vm659_vm11, %v6769_v56, %v16920_v21  ;;  %v6777_v18 = vsel %vm659_vm11, %v6770_v6, %v16921_v15  ;;  %v7052_v1 = vor.u32 %v7051_v49, %v7050_v63  ;;  %v16936_v51 = vunpack.i.h.bf16 %v16934_v31 }
 0xdbf   : > { %v6804_v20 = vpack.c.bf16 %v6777_v18, %v6776_v36  ;;  %v6889_v48 = vor.u32 %v6888_v22, %v6885_v62  ;;  %v16935_v19 = vunpack.i.l.bf16 %v16934_v31  ;;  %v16929_v12 = vpop.permute.xlu1 %16928  ;;  %v7245_v57 = vrot.slane %v7243_v32, 2  ;;  %v17690_v36 = vld [vmem:[%s23664_s2 + $0xb18] sm:$0xff]   ;;  %v17693_v18 = vld [vmem:[%s23664_s2 + $0xbe0] sm:$0xff]  }
 0xdc0   : > { %v7053_v3 = vsel %vm935_vm13, %v7049_v45, %v7052_v1  ;;  %v16931_v52 = vunpack.i.h.bf16 %v16929_v12  ;;  %v16930_v5 = vunpack.i.l.bf16 %v16929_v12  ;;  %v7248_v42 = vrot.slane %v7246_v14, 3  ;;  %v17691_v45 = vld [vmem:[%s23664_s2 + $0xb98] sm:$0xff]   ;;  %v17699_v12 = vld [vmem:[%s23664_s2 + $0xba8] sm:$0xff]  }
 0xdc1   : > { %v7234_v29 = vshrl.u32 %v6804_v20, 16  ;;  %v7237_v25 = vshll.u32 %v6804_v20, 16  ;;  %v6890_v38 = vsel %vm761_vm12, %v6881_v10, %v6889_v48  ;;  %7192 = vmatmul.mubr.bf16.vlgmr.msra.gmra.mrb[72].mxu0 %v7053_v3  ;;  %v7429_v43 = vrot.slane %v7243_v32, 6  ;;  %v17701_v3 = vld [vmem:[%s23664_s2 + $0xbf0] sm:$0xff]  }
 0xdc2   : > { %7039 = vmatmul.mubr.bf16.vlgmr.msra.gmra.mrb[64].mxu1 %v6890_v38  ;;  %15541 = vmatpush3.bf16.msra.mxu0 %v17679_v47  ;;  %v6771_v9 = vsel %vm651_vm10, %v6764_v7, %v16931_v52  ;;  %v6792_v0 = vsel %vm651_vm10, %v6785_v58, %v16930_v5  ;;  %v7249_v27 = vor.u32 %v7248_v42, %v7245_v57  ;;  %v7430_v63 = vrot.slane %v7246_v14, 7  ;;  %v17688_v58 = vld [vmem:[%s23664_s2 + $0xb58] sm:$0xff]   ;;  %v17692_v47 = vld [vmem:[%s23664_s2 + $0xb60] sm:$0xff]   ;;  %v17698_v57 = vld [vmem:[%s23664_s2 + $0xb28] sm:$0xff]  }
 0xdc3   : > { %15519 = vmatpush3.bf16.msra.mxu1 %v17678_v8  ;;  %15542 = vmatprep.subr.bf16.mxu0 %v17681_v28  ;;  %v6778_v49 = vsel %vm659_vm11, %v6771_v9, %v16936_v51  ;;  %v6799_v17 = vsel %vm659_vm11, %v6792_v0, %v16935_v19  ;;  %v7236_v24 = vrot.slane %v7234_v29, 2  ;;  %v7239_v60 = vrot.slane %v7237_v25, 3  ;;  %v17694_v8 = vld [vmem:[%s23664_s2 + $0xb20] sm:$0xff]   ;;  %v17697_v19 = vld [vmem:[%s23664_s2 + $0xbe8] sm:$0xff]   ;;  %v17703_v52 = vld [vmem:[%s23664_s2 + $0xbb0] sm:$0xff]  }
 0xdc4   : > { %15520 = vmatprep.subr.bf16.mxu1 %v17680_v11  ;;  %v6806_v40 = vpack.c.bf16 %v6778_v49, %v6778_v49  ;;  %v6807_v34 = vpack.c.bf16 %v6799_v17, %v6799_v17  ;;  %v7250_v39 = vsel %vm935_vm13, %v7059_v2, %v7249_v27  ;;  %v7431_v46 = vor.u32 %v7430_v63, %v7429_v43  ;;  %v17686_v2 = vld [vmem:[%s23664_s2 + $0xb10] sm:$0xff]   ;;  %v17696_v28 = vld [vmem:[%s23664_s2 + $0xb68] sm:$0xff]   ;;  %v17705_v42 = vld [vmem:[%s23664_s2 + $0xbf8] sm:$0xff]  }
 0xdc5   : > { %7381 = vmatprep.mubr.bf16.mxu1 %v7250_v39  ;;  %v7240_v16 = vor.u32 %v7239_v60, %v7236_v24  ;;  %v7425_v37 = vrot.slane %v7234_v29, 6  ;;  %v7426_v56 = vrot.slane %v7237_v25, 7  ;;  %v17700_v11 = vld [vmem:[%s23664_s2 + $0xb70] sm:$0xff]   ;;  %v17704_v29 = vld [vmem:[%s23664_s2 + $0xb78] sm:$0xff]   ;;  %v17708_v43 = vld [vmem:[%s23664_s2 + $0xc40] sm:$0xff]   ;;  %v23675_v0 = vmov 0.0  }
 0xdc6   : > { %15543 = vmatpush3.bf16.msra.mxu0 %v17683_v44  ;;  %v7432_v6 = vsel %vm761_vm12, %v21354_v33, %v7431_v46  ;;  %v7617_v30 = vshrl.u32 %v6807_v34, 16  ;;  %v7620_v32 = vshll.u32 %v6807_v34, 16  ;;  %v7608_v14 = vshrl.u32 %v6806_v40, 16  ;;  %v17702_v5 = vld [vmem:[%s23664_s2 + $0xb30] sm:$0xff]   ;;  %v17707_v25 = vld [vmem:[%s23664_s2 + $0xbb8] sm:$0xff]   ;;  %v17710_v9 = vld [vmem:[%s23665_s3 + $0x100] sm:$0xff]  }
 0xdc7   : > { %15521 = vmatpush3.bf16.msra.mxu1 %v17682_v59  ;;  %7563 = vmatprep.mubr.bf16.mxu0 %v7432_v6  ;;  %v7241_v10 = vsel %vm935_vm13, %v7052_v1, %v7240_v16  ;;  %v7427_v33 = vor.u32 %v7426_v56, %v7425_v37  ;;  %v7611_v7 = vshll.u32 %v6806_v40, 16  ;;  %v17706_v38 = vld [vmem:[%s23664_s2 + $0xb38] sm:$0xff]   ;;  %v17709_v44 = vld [vmem:[%s23664_s2 + $0xc00] sm:$0xff]   ;;  %v17713_v63 = vld [vmem:[%s23665_s3 + $0x108] sm:$0xff]  }
 0xdc8   : > { %15522 = vmatprep.subr.bf16.mxu1 %v17684_v41  ;;  %15544 = vmatprep.subr.bf16.mxu0 %v17685_v35  ;;  %v7619_v15 = vrot.slane %v7617_v30, 2  ;;  %v7622_v21 = vrot.slane %v7620_v32, 3  ;;  %v7610_v13 = vrot.slane %v7608_v14, 2  ;;  %v17712_v49 = vld [vmem:[%s23664_s2 + $0xc08] sm:$0xff]   ;;  %v17714_v17 = vld [vmem:[%s23664_s2 + $0xc50] sm:$0xff]   ;;  %v17717_v60 = vld [vmem:[%s23664_s2 + $0xc58] sm:$0xff]  }
 0xdc9   : > { %v7428_v62 = vsel %vm761_vm12, %v6889_v48, %v7427_v33  ;;  %v7613_v22 = vrot.slane %v7611_v7, 3  ;;  %v17695_v48 = vld [vmem:[%s23664_s2 + $0xba0] sm:$0xff]   ;;  %v17716_v59 = vld [vmem:[%s23665_s3 + $0x110] sm:$0xff]   ;;  %v17719_v40 = vld [vmem:[%s23665_s3 + $0x118] sm:$0xff]  }
 0xdca   : > { %15545 = vmatpush3.bf16.msra.mxu0 %v17687_v26  ;;  %v7623_v31 = vor.u32 %v7622_v21, %v7619_v15  ;;  %v17715_v24 = vld [vmem:[%s23664_s2 + $0xc10] sm:$0xff]   ;;  %v17718_v34 = vld [vmem:[%s23664_s2 + $0xc18] sm:$0xff]   ;;  %v17720_v39 = vld [vmem:[%s23664_s2 + $0xc60] sm:$0xff]  }
 0xdcb   : > { %15523 = vmatpush3.bf16.msra.mxu1 %v17686_v2  ;;  %15546 = vmatprep.subr.bf16.mxu0 %v17689_v61  ;;  %v7614_v1 = vor.u32 %v7613_v22, %v7610_v13  ;;  %v17722_v46 = vld [vmem:[%s23665_s3 + $0x120] sm:$0xff]   ;;  %v17723_v35 = vld [vmem:[%s23664_s2 + $0xc68] sm:$0xff]   ;;  %v17726_v56 = vld [vmem:[%s23664_s2 + $0xc70] sm:$0xff]   ;;  %v23676_v2 = vpack.c.bf16 %v20941_v4, %v20939_v23  ;;  %v23677_v61 = vmov 0.0|0.0  }
 0xdcc   : > { %15524 = vmatprep.subr.bf16.mxu1 %v17688_v58  ;;  %v7624_v51 = vsel %vm935_vm13, %v7249_v27, %v7623_v31  ;;  %v17711_v27 = vld [vmem:[%s23664_s2 + $0xc48] sm:$0xff]   ;;  %v17721_v41 = vld [vmem:[%s23664_s2 + $0xc20] sm:$0xff]   ;;  %v17728_v6 = vld [vmem:[%s23665_s3 + $0x130] sm:$0xff]  }
 0xdcd   : > { %v21437_v20 = vsel %vm935_vm13, %v7240_v16, %v7614_v1  ;;  %v17725_v16 = vld [vmem:[%s23665_s3 + $0x128] sm:$0xff]   ;;  %v17727_v26 = vld [vmem:[%s23664_s2 + $0xc30] sm:$0xff]   ;;  %v17729_v30 = vld [vmem:[%s23664_s2 + $0xc78] sm:$0xff]  }
 0xdce   : > { %15547 = vmatpush3.bf16.msra.mxu0 %v17691_v45  ;;  %v17724_v37 = vld [vmem:[%s23664_s2 + $0xc28] sm:$0xff]   ;;  %v17731_v32 = vld [vmem:[%s23665_s3 + $0x138] sm:$0xff]   ;;  %v17734_v23 = vld [vmem:[%s23663_s1 + $0x150] sm:$0xff]  }
 0xdcf   : > { %15525 = vmatpush3.bf16.msra.mxu1 %v17690_v36  ;;  %15548 = vmatprep.subr.bf16.mxu0 %v17693_v18  ;;  %v17730_v14 = vld [vmem:[%s23664_s2 + $0xc38] sm:$0xff]   ;;  %v17733_v33 = vld [vmem:[%s23663_s1 + $0x148] sm:$0xff]   ;;  %v17736_v7 = vld [vmem:[%s23663_s1 + $0x160] sm:$0xff]  }
 0xdd0   : > { %15526 = vmatprep.subr.bf16.mxu1 %v17692_v47  ;;  %v17735_v4 = vld [vmem:[%s23663_s1 + $0x158] sm:$0xff]   ;;  %v17737_v58 = vld [vmem:[%s23663_s1 + $0x168] sm:$0xff]   ;;  %v17738_v15 = vld [vmem:[%s23663_s1 + $0x170] sm:$0xff]  }
 0xdd2   : > { %15549 = vmatpush3.bf16.msra.mxu0 %v17695_v48 }
 0xdd3   : > { %15527 = vmatpush3.bf16.msra.mxu1 %v17694_v8  ;;  %15550 = vmatprep.subr.bf16.mxu0 %v17697_v19 }
 0xdd4   : > { %15528 = vmatprep.subr.bf16.mxu1 %v17696_v28 }
 0xdd6   : > { %15551 = vmatpush3.bf16.msra.mxu0 %v17699_v12 }
 0xdd7   : > { %15529 = vmatpush3.bf16.msra.mxu1 %v17698_v57  ;;  %15552 = vmatprep.subr.bf16.mxu0 %v17701_v3 }
 0xdd8   : > { %15530 = vmatprep.subr.bf16.mxu1 %v17700_v11 }
 0xdda   : > { %15553 = vmatpush3.bf16.msra.mxu0 %v17703_v52 }
 0xddb   : > { %15531 = vmatpush3.bf16.msra.mxu1 %v17702_v5  ;;  %15554 = vmatprep.subr.bf16.mxu0 %v17705_v42 }
 0xddc   : > { %15532 = vmatprep.subr.bf16.mxu1 %v17704_v29 }
 0xdde   : > { %15555 = vmatpush3.bf16.msra.mxu0 %v17707_v25 }
 0xddf   : > { %15533 = vmatpush3.bf16.msra.mxu1 %v17706_v38  ;;  %16195 = vmatprep.subr.bf16.mxu0 %v23675_v0 }
 0xde0   : > { %15562 = vmatprep.subr.bf16.mxu1 %v17708_v43 }
 0xde1   : > { %7564 = vmatmul.mubr.bf16.vlgmr.msra.gmra.mrb[76].mxu0 %v7428_v62 }
 0xde2   : > { %7382 = vmatmul.mubr.bf16.vlgmr.msra.gmra.mrb[68].mxu1 %v7241_v10  ;;  %16196 = vmatpush3.bf16.msra.mxu0 %v17710_v9  ;;  %v17732_v10 = vld [vmem:[%s23663_s1 + $0x140] sm:$0xff]  }
 0xde3   : > { %15563 = vmatpush3.bf16.msra.mxu1 %v17709_v44  ;;  %7755 = vmatprep.mubr.bf16.mxu1 %v7624_v51 }
 0xde4   : > { %15564 = vmatprep.subr.bf16.mxu1 %v17711_v27  ;;  %16197 = vmatprep.subr.bf16.mxu0 %v23675_v0 }
 0xde5   : > { %16211 = vmatprep.mubr.msk.bf16.mxu0 %vm18101_vm14, %v23675_v0 }
 0xde6   : > { %16198 = vmatpush3.bf16.msra.mxu0 %v17713_v63  ;;  %v17739_v63 = vld [vmem:[%s23663_s1 + $0x178] sm:$0xff]  }
 0xde7   : > { %15565 = vmatpush3.bf16.msra.mxu1 %v17712_v49  ;;  %16199 = vmatprep.subr.bf16.mxu0 %v23675_v0 }
 0xde8   : > { %15566 = vmatprep.subr.bf16.mxu1 %v17714_v17 }
 0xdea   : > { %16200 = vmatpush3.bf16.msra.mxu0 %v17716_v59 }
 0xdeb   : > { %15567 = vmatpush3.bf16.msra.mxu1 %v17715_v24  ;;  %16201 = vmatprep.subr.bf16.mxu0 %v23675_v0 }
 0xdec   : > { %15568 = vmatprep.subr.bf16.mxu1 %v17717_v60 }
 0xdee   : > { %16202 = vmatpush3.bf16.msra.mxu0 %v17719_v40 }
 0xdef   : > { %15569 = vmatpush3.bf16.msra.mxu1 %v17718_v34  ;;  %16203 = vmatprep.subr.bf16.mxu0 %v23675_v0 }
 0xdf0   : > { %15570 = vmatprep.subr.bf16.mxu1 %v17720_v39 }
 0xdf2   : > { %16204 = vmatpush3.bf16.msra.mxu0 %v17722_v46 }
 0xdf3   : > { %15571 = vmatpush3.bf16.msra.mxu1 %v17721_v41  ;;  %16205 = vmatprep.subr.bf16.mxu0 %v23675_v0 }
 0xdf4   : > { %15572 = vmatprep.subr.bf16.mxu1 %v17723_v35 }
 0xdf6   : > { %16206 = vmatpush3.bf16.msra.mxu0 %v17725_v16 }
 0xdf7   : > { %15573 = vmatpush3.bf16.msra.mxu1 %v17724_v37  ;;  %16207 = vmatprep.subr.bf16.mxu0 %v23675_v0 }
 0xdf8   : > { %15574 = vmatprep.subr.bf16.mxu1 %v17726_v56 }
 0xdfa   : > { %16208 = vmatpush3.bf16.msra.mxu0 %v17728_v6 }
 0xdfb   : > { %15575 = vmatpush3.bf16.msra.mxu1 %v17727_v26  ;;  %16209 = vmatprep.subr.bf16.mxu0 %v23675_v0 }
 0xdfc   : > { %15576 = vmatprep.subr.bf16.mxu1 %v17729_v30 }
 0xdfe   : > { %16210 = vmatpush3.bf16.msra.mxu0 %v17731_v32 }
 0xdff   : > { %15577 = vmatpush3.bf16.msra.mxu1 %v17730_v14 }
 0xe00   : > { %16215 = vmatprep.subr.bf16.mxu1 %v17732_v10 }
 0xe01   : > { %16212 = vmatmul.mubr.bf16.vlgmr.msra.gmra.mrb[80].mxu0 %v23676_v2 }
 0xe02   : > { %7756 = vmatmul.mubr.bf16.vlgmr.msra.gmra.mrb[72].mxu1 %v21437_v20 }
 0xe03   : > { %16231 = vmatprep.mubr.bf16.mxu1 %v23677_v61  ;;  %16216 = vmatpush3.bf16.msra.mxu1 %v17732_v10 }
 0xe04   : > { %16217 = vmatprep.subr.bf16.mxu1 %v17733_v33 }
 0xe07   : > { %16218 = vmatpush3.bf16.msra.mxu1 %v17733_v33 }
 0xe08   : > { %16219 = vmatprep.subr.bf16.mxu1 %v17734_v23 }
 0xe0b   : > { %16220 = vmatpush3.bf16.msra.mxu1 %v17734_v23 }
 0xe0c   : > { %16221 = vmatprep.subr.bf16.mxu1 %v17735_v4 }
 0xe0f   : > { %16222 = vmatpush3.bf16.msra.mxu1 %v17735_v4 }
 0xe10   : > { %16223 = vmatprep.subr.bf16.mxu1 %v17736_v7 }
 0xe13   : > { %16224 = vmatpush3.bf16.msra.mxu1 %v17736_v7 }
 0xe14   : > { %16225 = vmatprep.subr.bf16.mxu1 %v17737_v58 }
 0xe17   : > { %16226 = vmatpush3.bf16.msra.mxu1 %v17737_v58 }
 0xe18   : > { %16227 = vmatprep.subr.bf16.mxu1 %v17738_v15 }
 0xe1b   : > { %16228 = vmatpush3.bf16.msra.mxu1 %v17738_v15 }
 0xe1c   : > { %16229 = vmatprep.subr.bf16.mxu1 %v17739_v63 }
 0xe1f   : > { %16230 = vmatpush3.bf16.msra.mxu1 %v17739_v63  ;;  %v17742_v63 = vld [vmem:[%s23664_s2 + $0xd00] sm:$0xff]  }
 0xe94   : > { %v15512_v21 = vpop.f32.mrb[72].mxu0 }
 0xe95   : > { %v15490_v13 = vpop.f32.mrb[64].mxu1  ;;  %v15513_v62 = vpop.f32.mrb[73].mxu0 }
 0xe96   : > { %v15491_v22 = vpop.f32.mrb[65].mxu1  ;;  %v15514_v45 = vadd.f32 %v15513_v62, %v15512_v21  ;;  %v15515_v31 = vpop.f32.mrb[74].mxu0 }
 0xe97   : > { %v15492_v36 = vadd.f32 %v15491_v22, %v15490_v13  ;;  %v15493_v18 = vpop.f32.mrb[66].mxu1  ;;  %v15516_v1 = vpop.f32.mrb[75].mxu0 }
 0xe98   : > { %v15494_v47 = vpop.f32.mrb[67].mxu1  ;;  %v15517_v51 = vadd.f32 %v15516_v1, %v15515_v31 }
 0xe99   : > { %v7194_v20 = vadd.f32 %v15514_v45, %v15492_v36  ;;  %v15495_v48 = vadd.f32 %v15494_v47, %v15493_v18 }
 0xe9b   : > { %v7197_v8 = vadd.f32 %v15517_v51, %v15495_v48 }
 0xeb4   : > { %v15556_v19 = vpop.f32.mrb[76].mxu0 }
 0xeb5   : > { %v15534_v28 = vpop.f32.mrb[68].mxu1  ;;  %v15557_v12 = vpop.f32.mrb[77].mxu0 }
 0xeb6   : > { %v15535_v57 = vpop.f32.mrb[69].mxu1  ;;  %v15558_v3 = vadd.f32 %v15557_v12, %v15556_v19  ;;  %v15559_v11 = vpop.f32.mrb[78].mxu0 }
 0xeb7   : > { %v15536_v52 = vadd.f32 %v15535_v57, %v15534_v28  ;;  %v15537_v5 = vpop.f32.mrb[70].mxu1  ;;  %v15560_v42 = vpop.f32.mrb[79].mxu0 }
 0xeb8   : > { %v15538_v29 = vpop.f32.mrb[71].mxu1  ;;  %v15561_v25 = vadd.f32 %v15560_v42, %v15559_v11  ;;  %v17740_v11 = vld [vmem:[%s23664_s2 + $0xd40] sm:$0xff]  }
 0xeb9   : > { %v7390_v38 = vadd.f32 %v15536_v52, %v7194_v20  ;;  %v15539_v43 = vadd.f32 %v15538_v29, %v15537_v5  ;;  %15605 = vmatprep.subr.bf16.mxu0 %v17740_v11  ;;  %v17749_v11 = vld [vmem:[%s23664_s2 + $0xcd0] sm:$0xff]  }
 0xeba   : > { %15606 = vmatpush3.bf16.msra.mxu0 %v17742_v63  ;;  %v17751_v63 = vld [vmem:[%s23664_s2 + $0xc90] sm:$0xff]  }
 0xebb   : > { %v7572_v9 = vadd.f32 %v15558_v3, %v7390_v38  ;;  %v7391_v44 = vadd.f32 %v15539_v43, %v7197_v8  ;;  %v17741_v38 = vld [vmem:[%s23664_s2 + $0xcc0] sm:$0xff]  }
 0xebc   : > { %15627 = vmatprep.subr.bf16.mxu1 %v17741_v38 }
 0xebd   : > { %v7573_v27 = vadd.f32 %v15561_v25, %v7391_v44 }
 0xed4   : > { %v7892_v49 = vpop.f32.mrb[80].mxu0 }
 0xed5   : > { %v15578_v17 = vpop.f32.mrb[72].mxu1  ;;  %7901 = vrot.lane.b32.xlu1 %v7892_v49, %s18100_s26  ;;  %v16213_v59 = vpop.f32.mrb[81].mxu0  ;;  %v17743_v49 = vld [vmem:[%s23664_s2 + $0xc80] sm:$0xff]  }
 0xed6   : > { %v15579_v24 = vpop.f32.mrb[73].mxu1  ;;  %v7895_v60 = vpop.f32.mrb[82].mxu0 }
 0xed7   : > { %v15580_v40 = vadd.f32 %v15579_v24, %v15578_v17  ;;  %v15581_v34 = vpop.f32.mrb[74].mxu1  ;;  %7903 = vrot.lane.b32.xlu0 %v7895_v60, %s18100_s26  ;;  %v16214_v39 = vpop.f32.mrb[83].mxu0 }
 0xed8   : > { %v15582_v46 = vpop.f32.mrb[75].mxu1 }
 0xed9   : > { %v7764_v41 = vadd.f32 %v15580_v40, %v7572_v9  ;;  %v15583_v35 = vadd.f32 %v15582_v46, %v15581_v34 }
 0xedb   : > { %v7765_v16 = vadd.f32 %v15583_v35, %v7573_v27  ;;  %v17745_v35 = vld [vmem:[%s23664_s2 + $0xcc8] sm:$0xff]  }
 0xf47   : > { %v7902_v37 = vpop.permute.xlu1 %7901 }
 0xf48   : > { %v7907_v56 = vsel %vm659_vm11, %v7764_v41, %v7902_v37  ;;  %v17744_v41 = vld [vmem:[%s23664_s2 + $0xd48] sm:$0xff]  }
 0xf49   : > { %v7909_v6 = vmax.f32 %v7907_v56, 0.0  ;;  %v7904_v26 = vpop.permute.xlu0 %7903  ;;  %15607 = vmatprep.subr.bf16.mxu0 %v17744_v41 }
 0xf4a   : > { %v7908_v30 = vsel %vm659_vm11, %v7765_v16, %v7904_v26 }
 0xf4b   : > { %v9297_v32 = vrot.slane %v7909_v6, 7  ;;  %v7910_v14 = vmax.f32 %v7908_v30, 0.0  ;;  %v7922_v2 = vpack.c.bf16 %v7909_v6, %v23675_v0  ;;  %v9306_v10 = vrot.slane %v7909_v6, 1 }
 0xf4d   : > { %v9298_v33 = vsel %vm608_vm4, %v18572_v50, %v9297_v32  ;;  %v9299_v23 = vrot.slane %v7910_v14, 7  ;;  %v9307_v4 = vrot.slane %v7910_v14, 1  ;;  %16232 = vmatmul.mubr.bf16.vlgmr.msra.gmra.mrb[76].mxu1 %v7922_v2  ;;  %v7923_v7 = vpack.c.bf16 %v23675_v0, %v7910_v14 }
 0xf4e   : > { %v9303_v58 = vsel %vm1655_vm7, -inf, %v9298_v33  ;;  %15628 = vmatpush3.bf16.msra.mxu1 %v17743_v49  ;;  %v17747_v33 = vld [vmem:[%s23664_s2 + $0xc88] sm:$0xff]  }
 0xf4f   : > { %v9315_v15 = vmax.f32 %v9303_v58, %v7909_v6  ;;  %v9300_v21 = vsel %vm608_vm4, %v9297_v32, %v9299_v23  ;;  %16235 = vmatprep.mubr.bf16.mxu1 %v7923_v7  ;;  %v9308_v13 = vsel %vm413_vm1, %v9306_v10, %v9307_v4  ;;  %v9310_v62 = vsel %vm413_vm1, %v9307_v4, %v18575_v53  ;;  %v17746_v10 = vld [vmem:[%s23664_s2 + $0xd08] sm:$0xff]  }
 0xf50   : > { %v9316_v22 = vmax.f32 %v9300_v21, %v7910_v14  ;;  %v9314_v45 = vsel %vm1670_vm8, -inf, %v9310_v62  ;;  %15629 = vmatprep.subr.bf16.mxu1 %v17745_v35  ;;  %15608 = vmatpush3.bf16.msra.mxu0 %v17746_v10  ;;  %v17752_v10 = vld [vmem:[%s23664_s2 + $0xd58] sm:$0xff]  }
 0xf51   : > { %v21608_v31 = vmax.f32 %v9315_v15, %v9308_v13 }
 0xf52   : > { %v21610_v36 = vmax.f32 %v9316_v22, %v9314_v45  ;;  %15630 = vmatpush3.bf16.msra.mxu1 %v17747_v33  ;;  %v17754_v33 = vld [vmem:[%s23664_s2 + $0xd18] sm:$0xff]  }
 0xf53   : > { %15631 = vmatprep.subr.bf16.mxu1 %v17749_v11  ;;  %v17755_v11 = vld [vmem:[%s23664_s2 + $0xc98] sm:$0xff]  }
 0xf55   : > { %16236 = vmatmul.mubr.bf16.gmra.mrb[80].mxu1 %v23677_v61 }
 0xf56   : > { %15632 = vmatpush3.bf16.msra.mxu1 %v17751_v63 }
0x1020   : > { %v21615_v1 = vpop.f32.mrb[76].mxu1 }
0x1021   : > { %v21617_v47 = vpop.f32.mrb[77].mxu1  ;;  %v8184_v51 = vrot.slane %v21615_v1, 5  ;;  %v8065_v20 = vrot.slane %v21615_v1, 1  ;;  %v8218_v48 = vrot.slane %v21615_v1, 6  ;;  %v8099_v8 = vrot.slane %v21615_v1, 2 }
0x1022   : > { %v8062_v19 = vrot.slane %v21617_v47, 1  ;;  %v8096_v28 = vrot.slane %v21617_v47, 2  ;;  %v21625_v12 = vpop.f32.mrb[78].mxu1  ;;  %v8252_v57 = vrot.slane %v21615_v1, 7  ;;  %v8131_v3 = vrot.slane %v21615_v1, 3 }
0x1023   : > { %v21632_v52 = vpop.f32.mrb[79].mxu1  ;;  %v8186_v5 = vrot.slane %v21625_v12, 5  ;;  %v8067_v42 = vrot.slane %v21625_v12, 1  ;;  %v8220_v29 = vrot.slane %v21625_v12, 6  ;;  %v8101_v25 = vrot.slane %v21625_v12, 2 }
0x1024   : > { %v8183_v43 = vrot.slane %v21632_v52, 5  ;;  %v8063_v9 = vrot.slane %v21632_v52, 1  ;;  %v8217_v44 = vrot.slane %v21632_v52, 6  ;;  %v8097_v27 = vrot.slane %v21632_v52, 2 }
0x1025   : > { %v21652_v17 = vsel %vm538_vm0, %v8184_v51, %v8186_v5  ;;  %v21655_v59 = vsel %vm413_vm1, %v8065_v20, %v8067_v42  ;;  %v21658_v24 = vsel %vm573_vm2, %v8218_v48, %v8220_v29  ;;  %v8251_v60 = vrot.slane %v21632_v52, 7 }
0x1026   : > { %v8185_v40 = vsel %vm538_vm0, %v8183_v43, %v8184_v51  ;;  %v8064_v34 = vsel %vm413_vm1, %v8062_v19, %v8063_v9  ;;  %v8066_v39 = vsel %vm413_vm1, %v8063_v9, %v8065_v20  ;;  %v8219_v46 = vsel %vm573_vm2, %v8217_v44, %v8218_v48  ;;  %v17748_v51 = vld [vmem:[%s23664_s2 + $0xd50] sm:$0xff]  }
0x1027   : > { %v16937_v16 = vpack.i.bf16 %v8185_v40, %v8183_v43  ;;  %v16942_v37 = vpack.i.bf16 %v8066_v39, %v8064_v34  ;;  %v16947_v56 = vpack.i.bf16 %v8219_v46, %v8217_v44  ;;  %v21672_v6 = vsel %vm448_vm3, %v8096_v28, %v8097_v27  ;;  %15609 = vmatprep.subr.bf16.mxu0 %v17748_v51 }
0x1028   : > { %v21674_v26 = vpop.f32.mrb[80].mxu1  ;;  %v21677_v30 = vsel %vm448_vm3, %v8097_v27, %v8099_v8  ;;  %v8253_v32 = vsel %vm608_vm4, %v8251_v60, %v8252_v57  ;;  %v21683_v14 = vsel %vm448_vm3, %v8099_v8, %v8101_v25  ;;  %v8130_v2 = vrot.slane %v21632_v52, 3  ;;  %v17750_v27 = vld [vmem:[%s23664_s2 + $0xd10] sm:$0xff]  }
0x1029   : > { %16938 = vrot.lane.b32.xlu1 %v16937_v16, %s18098_s10  ;;  %v21693_v23 = vpop.f32.mrb[81].mxu1  ;;  %v16952_v4 = vpack.i.bf16 %v21677_v30, %v21672_v6  ;;  %v21697_v7 = vpack.i.bf16 %v8253_v32, %v8251_v60  ;;  %v8254_v58 = vrot.slane %v21625_v12, 7  ;;  %v8192_v15 = vrot.slane %v21674_v26, 5  ;;  %15610 = vmatpush3.bf16.msra.mxu0 %v17750_v27 }
0x102a   : > { %v21701_v21 = vpop.f32.mrb[82].mxu1  ;;  %v8188_v13 = vrot.slane %v21693_v23, 5  ;;  %v8069_v62 = vrot.slane %v21693_v23, 1  ;;  %v8222_v22 = vrot.slane %v21693_v23, 6  ;;  %v8103_v45 = vrot.slane %v21693_v23, 2  ;;  %15611 = vmatprep.subr.bf16.mxu0 %v17752_v10 }
0x102b   : > { %v8174_v20 = vrot.slane %v21701_v21, 4  ;;  %v8194_v48 = vrot.slane %v21701_v21, 5  ;;  %v8228_v8 = vrot.slane %v21701_v21, 6  ;;  %v8262_v19 = vrot.slane %v21701_v21, 7  ;;  %v21714_v28 = vpop.f32.mrb[83].mxu1  ;;  %v17767_v21 = vld [vmem:[%s23664_s2 + $0xcb0] sm:$0xff]  }
0x102c   : > { %v8189_v38 = vsel %vm538_vm0, %v8186_v5, %v8188_v13  ;;  %v8070_v43 = vsel %vm413_vm1, %v8067_v42, %v8069_v62  ;;  %v8223_v9 = vsel %vm573_vm2, %v8220_v29, %v8222_v22  ;;  %v21725_v44 = vsel %vm448_vm3, %v8101_v25, %v8103_v45 }
0x102d   : > { %16943 = vrot.lane.b32.xlu1 %v16942_v37, %s18098_s10  ;;  %v16967_v5 = vpack.i.bf16 %v8189_v38, %v21652_v17  ;;  %v16972_v42 = vpack.i.bf16 %v8070_v43, %v21655_v59  ;;  %v16977_v29 = vpack.i.bf16 %v8223_v9, %v21658_v24  ;;  %v16982_v25 = vpack.i.bf16 %v21725_v44, %v21683_v14  ;;  %v17762_v14 = vld [vmem:[%s23664_s2 + $0xd28] sm:$0xff]  }
0x102e   : > { %v8132_v49 = vsel %vm483_vm5, %v8130_v2, %v8131_v3  ;;  %v21745_v60 = vsel %vm608_vm4, %v8252_v57, %v8254_v58  ;;  %v8256_v40 = vrot.slane %v21693_v23, 7  ;;  %v8190_v17 = vrot.slane %v21714_v28, 5  ;;  %15612 = vmatpush3.bf16.msra.mxu0 %v17754_v33  ;;  %v17763_v44 = vld [vmem:[%s23664_s2 + $0xca8] sm:$0xff]  }
0x102f   : > { %16968 = vrot.lane.b32.xlu0 %v16967_v5, %s18098_s10  ;;  %v21750_v59 = vpack.i.bf16 %v8132_v49, %v8130_v2  ;;  %v8133_v24 = vrot.slane %v21625_v12, 3  ;;  %v8135_v34 = vrot.slane %v21693_v23, 3  ;;  %v8224_v39 = vrot.slane %v21714_v28, 6 }
0x1030   : > { %v21756_v57 = vsel %vm608_vm4, %v8254_v58, %v8256_v40  ;;  %v21759_v46 = vsel %vm538_vm0, %v8188_v13, %v8190_v17  ;;  %v21764_v41 = vsel %vm538_vm0, %v8190_v17, %v8192_v15  ;;  %v8226_v35 = vrot.slane %v21674_v26, 6 }
0x1031   : > { %16948 = vrot.lane.b32.xlu1 %v16947_v56, %s18099_s20  ;;  %v16987_v16 = vpack.i.bf16 %v21756_v57, %v21745_v60  ;;  %v16997_v37 = vpack.i.bf16 %v21764_v41, %v21759_v46  ;;  %v21775_v32 = vsel %vm483_vm5, %v8131_v3, %v8133_v24  ;;  %v21778_v2 = vsel %vm483_vm5, %v8133_v24, %v8135_v34  ;;  %v17753_v56 = vld [vmem:[%s23664_s2 + $0xcd8] sm:$0xff]   ;;  %v17772_v41 = vld [vmem:[%s23664_s2 + $0xdc0] sm:$0xff]  }
0x1032   : > { %v16992_v58 = vpack.i.bf16 %v21778_v2, %v21775_v32  ;;  %v21792_v3 = vsel %vm573_vm2, %v8222_v22, %v8224_v39  ;;  %v21795_v13 = vsel %vm573_vm2, %v8224_v39, %v8226_v35  ;;  %v8071_v51 = vrot.slane %v21714_v28, 1  ;;  %15633 = vmatprep.subr.bf16.mxu1 %v17753_v56  ;;  %v17757_v56 = vld [vmem:[%s23664_s2 + $0xce0] sm:$0xff]   ;;  %v17769_v60 = vld [vmem:[%s23664_s2 + $0xcf8] sm:$0xff]  }
0x1033   : > { %16973 = vrot.lane.b32.xlu0 %v16972_v42, %s18098_s10  ;;  %v17007_v38 = vpack.i.bf16 %v21795_v13, %v21792_v3  ;;  %v8073_v43 = vrot.slane %v21674_v26, 1  ;;  %v8258_v9 = vrot.slane %v21714_v28, 7  ;;  %v8260_v22 = vrot.slane %v21674_v26, 7  ;;  %15634 = vmatpush3.bf16.msra.mxu1 %v17755_v11  ;;  %v17770_v57 = vld [vmem:[%s23664_s2 + $0xd38] sm:$0xff]  }
0x1034   : > { %v21808_v27 = vsel %vm413_vm1, %v8069_v62, %v8071_v51  ;;  %v8105_v63 = vrot.slane %v21714_v28, 2  ;;  %v8107_v5 = vrot.slane %v21674_v26, 2  ;;  %v8195_v42 = vsel %vm538_vm0, %v8192_v15, %v8194_v48  ;;  %15635 = vmatprep.subr.bf16.mxu1 %v17757_v56  ;;  %v17766_v56 = vld [vmem:[%s23664_s2 + $0xd30] sm:$0xff]   ;;  %v17771_v46 = vld [vmem:[%s23664_s2 + $0xcb8] sm:$0xff]  }
0x1035   : > { %16953 = vrot.lane.b32.xlu1 %v16952_v4, %s18099_s20  ;;  %v21820_v49 = vsel %vm413_vm1, %v8071_v51, %v8073_v43  ;;  %v21823_v62 = vsel %vm608_vm4, %v8256_v40, %v8258_v9  ;;  %v21826_v17 = vsel %vm608_vm4, %v8258_v9, %v8260_v22  ;;  %v21828_v24 = vpack.i.bf16 %v8073_v43, %v8195_v42  ;;  %v17759_v43 = vld [vmem:[%s23664_s2 + $0xca0] sm:$0xff]   ;;  %v17760_v9 = vld [vmem:[%s23664_s2 + $0xd68] sm:$0xff]  }
0x1036   : > { %v17002_v15 = vpack.i.bf16 %v21820_v49, %v21808_v27  ;;  %v21837_v6 = vsel %vm448_vm3, %v8103_v45, %v8105_v63  ;;  %v21840_v30 = vsel %vm448_vm3, %v8105_v63, %v8107_v5  ;;  %v8137_v40 = vrot.slane %v21714_v28, 3  ;;  %v17756_v45 = vld [vmem:[%s23664_s2 + $0xd60] sm:$0xff]   ;;  %v17761_v42 = vld [vmem:[%s23664_s2 + $0xce8] sm:$0xff]  }
0x1037   : > { %16978 = vrot.lane.b32.xlu0 %v16977_v29, %s18099_s20  ;;  %v8139_v39 = vrot.slane %v21674_v26, 3  ;;  %v8263_v10 = vsel %vm608_vm4, %v8260_v22, %v8262_v19  ;;  %v17758_v29 = vld [vmem:[%s23664_s2 + $0xd20] sm:$0xff]   ;;  %v8229_v33 = vsel %vm573_vm2, %v8226_v35, %v8228_v8  ;;  %v8164_v51 = vrot.slane %v21615_v1, 4  ;;  %15613 = vmatprep.subr.bf16.mxu0 %v17756_v45  ;;  %v17765_v45 = vld [vmem:[%s23664_s2 + $0xcf0] sm:$0xff]  }
0x1038   : > { %v8163_v19 = vrot.slane %v21632_v52, 4  ;;  %v8166_v11 = vrot.slane %v21625_v12, 4  ;;  %v8138_v22 = vsel %vm483_vm5, %v8135_v34, %v8137_v40  ;;  %v17032_v63 = vpack.i.bf16 %v8107_v5, %v8229_v33  ;;  %15614 = vmatpush3.bf16.msra.mxu0 %v17758_v29  ;;  %15636 = vmatpush3.bf16.msra.mxu1 %v17759_v43 }
0x1039   : > { %16958 = vrot.lane.b32.xlu1 %v21697_v7, %s18100_s26  ;;  %v8140_v8 = vsel %vm483_vm5, %v8137_v40, %v8139_v39  ;;  %v17037_v35 = vpack.i.bf16 %v8139_v39, %v8263_v10  ;;  %v8168_v7 = vrot.slane %v21693_v23, 4  ;;  %v8172_v34 = vrot.slane %v21674_v26, 4  ;;  %15615 = vmatprep.subr.bf16.mxu0 %v17760_v9 }
0x103a   : > { %v17022_v18 = vpack.i.bf16 %v8140_v8, %v8138_v22  ;;  %v21881_v4 = vsel %vm517_vm6, %v8163_v19, %v8164_v51  ;;  %v21884_v48 = vsel %vm517_vm6, %v8164_v51, %v8166_v11  ;;  %v8170_v5 = vrot.slane %v21714_v28, 4  ;;  %15637 = vmatprep.subr.bf16.mxu1 %v17761_v42 }
0x103b   : > { %16983 = vrot.lane.b32.xlu0 %v16982_v25, %s18099_s20  ;;  %v21894_v40 = vsel %vm517_vm6, %v8166_v11, %v8168_v7  ;;  %v17764_v25 = vld [vmem:[%s23664_s2 + $0xd70] sm:$0xff]   ;;  %v23679_v32 = vpack.i.bf16 %v21840_v30, %v21837_v6 }
0x103c   : > { %v21899_v39 = vsel %vm517_vm6, %v8168_v7, %v8170_v5  ;;  %v21902_v10 = vsel %vm517_vm6, %v8170_v5, %v8172_v34  ;;  %15616 = vmatpush3.bf16.msra.mxu0 %v17762_v14  ;;  %15638 = vmatpush3.bf16.msra.mxu1 %v17763_v44 }
0x103d   : > { %16963 = vrot.lane.b32.xlu1 %v21750_v59, %s18100_s26  ;;  %v21916_v59 = vsel %vm517_vm6, %v8172_v34, %v8174_v20  ;;  %15617 = vmatprep.subr.bf16.mxu0 %v17764_v25  ;;  %v17768_v20 = vld [vmem:[%s23664_s2 + $0xd78] sm:$0xff]  }
0x103e   : > { %15639 = vmatprep.subr.bf16.mxu1 %v17765_v45 }
0x103f   : > { %16988 = vrot.lane.b32.xlu0 %v16987_v16, %s18100_s26  ;;  %v17773_v16 = vld [vmem:[%s23664_s2 + $0xe40] sm:$0xff]  }
0x1040   : > { %15618 = vmatpush3.bf16.msra.mxu0 %v17766_v56  ;;  %15640 = vmatpush3.bf16.msra.mxu1 %v17767_v21 }
0x1041   : > { %16998 = vrot.lane.b32.xlu1 %v16997_v37, %s18098_s10  ;;  %15619 = vmatprep.subr.bf16.mxu0 %v17768_v20  ;;  %v23678_v37 = vpack.i.bf16 %v21826_v17, %v21823_v62 }
0x1042   : > { %15641 = vmatprep.subr.bf16.mxu1 %v17769_v60 }
0x1043   : > { %16993 = vrot.lane.b32.xlu0 %v16992_v58, %s18100_s26 }
0x1044   : > { %15620 = vmatpush3.bf16.msra.mxu0 %v17770_v57  ;;  %15642 = vmatpush3.bf16.msra.mxu1 %v17771_v46 }
0x1045   : > { %17008 = vrot.lane.b32.xlu1 %v17007_v38, %s18099_s20  ;;  %15649 = vmatprep.subr.bf16.mxu0 %v17772_v41 }
0x1046   : > { %15671 = vmatprep.subr.bf16.mxu1 %v17773_v16 }
0x1047   : > { %17003 = vrot.lane.b32.xlu0 %v17002_v15, %s18098_s10 }
0x1049   : > { %17018 = vrot.lane.b32.xlu1 %v23678_v37, %s18100_s26 }
0x104b   : > { %17013 = vrot.lane.b32.xlu0 %v23679_v32, %s18099_s20 }
0x104d   : > { %17028 = vrot.lane.b32.xlu1 %v21828_v24, %s18098_s10 }
0x104f   : > { %17023 = vrot.lane.b32.xlu0 %v17022_v18, %s18100_s26 }
0x1051   : > { %17038 = vrot.lane.b32.xlu1 %v17037_v35, %s18100_s26 }
0x1053   : > { %17033 = vrot.lane.b32.xlu0 %v17032_v63, %s18099_s20 }
0x109b   : > { %v16939_v2 = vpop.permute.xlu1 %16938 }
0x109c   : > { %v16941_v27 = vunpack.i.h.bf16 %v16939_v2  ;;  %v16940_v49 = vunpack.i.l.bf16 %v16939_v2 }
0x109e   : > { %v8306_v51 = vsel %vm643_vm9, %v8163_v19, %v16940_v49  ;;  %v8307_v11 = vsel %vm643_vm9, %v21881_v4, %v16941_v27 }
0x109f   : > { %v16944_v58 = vpop.permute.xlu1 %16943 }
0x10a0   : > { %v16946_v62 = vunpack.i.h.bf16 %v16944_v58  ;;  %v16945_v17 = vunpack.i.l.bf16 %v16944_v58 }
0x10a1   : > { %v16969_v3 = vpop.permute.xlu0 %16968 }
0x10a2   : > { %v16970_v15 = vunpack.i.l.bf16 %v16969_v3  ;;  %v16971_v30 = vunpack.i.h.bf16 %v16969_v3  ;;  %v8286_v43 = vsel %vm643_vm9, %v21632_v52, %v16946_v62  ;;  %v8285_v9 = vsel %vm643_vm9, %v21617_v47, %v16945_v17 }
0x10a3   : > { %v16949_v13 = vpop.permute.xlu1 %16948 }
0x10a4   : > { %v16951_v29 = vunpack.i.h.bf16 %v16949_v13  ;;  %v16950_v24 = vunpack.i.l.bf16 %v16949_v13  ;;  %v8308_v22 = vsel %vm643_vm9, %v21884_v48, %v16970_v15  ;;  %v8309_v4 = vsel %vm643_vm9, %v21894_v40, %v16971_v30 }
0x10a5   : > { %v16974_v38 = vpop.permute.xlu0 %16973 }
0x10a6   : > { %v16976_v33 = vunpack.i.h.bf16 %v16974_v38  ;;  %v16975_v8 = vunpack.i.l.bf16 %v16974_v38  ;;  %v8314_v14 = vsel %vm651_vm10, %v8307_v11, %v16951_v29  ;;  %v8313_v52 = vsel %vm651_vm10, %v8306_v51, %v16950_v24 }
0x10a7   : > { %v16954_v6 = vpop.permute.xlu1 %16953 }
0x10a8   : > { %v16956_v35 = vunpack.i.h.bf16 %v16954_v6  ;;  %v16955_v63 = vunpack.i.l.bf16 %v16954_v6  ;;  %v8288_v47 = vsel %vm643_vm9, %v21625_v12, %v16976_v33  ;;  %v8287_v21 = vsel %vm643_vm9, %v21615_v1, %v16975_v8 }
0x10a9   : > { %v16979_v18 = vpop.permute.xlu0 %16978 }
0x10aa   : > { %v16981_v7 = vunpack.i.h.bf16 %v16979_v18  ;;  %v16980_v34 = vunpack.i.l.bf16 %v16979_v18  ;;  %v8292_v20 = vsel %vm651_vm10, %v8285_v9, %v16955_v63  ;;  %v8293_v40 = vsel %vm651_vm10, %v8286_v43, %v16956_v35 }
0x10ab   : > { %v16959_v42 = vpop.permute.xlu1 %16958 }
0x10ac   : > { %v16961_v5 = vunpack.i.h.bf16 %v16959_v42  ;;  %v16960_v19 = vunpack.i.l.bf16 %v16959_v42  ;;  %v8316_v46 = vsel %vm651_vm10, %v8309_v4, %v16981_v7  ;;  %v8315_v12 = vsel %vm651_vm10, %v8308_v22, %v16980_v34 }
0x10ad   : > { %v16984_v44 = vpop.permute.xlu0 %16983 }
0x10ae   : > { %v8320_v48 = vsel %vm659_vm11, %v8313_v52, %v16960_v19  ;;  %v8321_v25 = vsel %vm659_vm11, %v8314_v14, %v16961_v5  ;;  %v16986_v45 = vunpack.i.h.bf16 %v16984_v44  ;;  %v16985_v56 = vunpack.i.l.bf16 %v16984_v44 }
0x10af   : > { %v8328_v60 = vpack.c.bf16 %v8321_v25, %v8320_v48  ;;  %v16964_v57 = vpop.permute.xlu1 %16963 }
0x10b0   : > { %v16966_v41 = vunpack.i.h.bf16 %v16964_v57  ;;  %v16965_v16 = vunpack.i.l.bf16 %v16964_v57  ;;  %v8294_v2 = vsel %vm651_vm10, %v8287_v21, %v16985_v56  ;;  %v8295_v58 = vsel %vm651_vm10, %v8288_v47, %v16986_v45 }
0x10b1   : > { %v8419_v37 = vshrl.u32 %v8328_v60, 16  ;;  %v8422_v32 = vshll.u32 %v8328_v60, 16  ;;  %v16989_v3 = vpop.permute.xlu0 %16988 }
0x10b2   : > { %v8299_v1 = vsel %vm659_vm11, %v8292_v20, %v16965_v16  ;;  %v8300_v13 = vsel %vm659_vm11, %v8293_v40, %v16966_v41  ;;  %v16991_v38 = vunpack.i.h.bf16 %v16989_v3  ;;  %v16990_v27 = vunpack.i.l.bf16 %v16989_v3 }
0x10b3   : > { %v8327_v49 = vpack.c.bf16 %v8300_v13, %v8299_v1  ;;  %v16999_v62 = vpop.permute.xlu1 %16998  ;;  %v8421_v17 = vrot.slane %v8419_v37, 6  ;;  %v8424_v15 = vrot.slane %v8422_v32, 7  ;;  %v22007_v6 = vrot.slane %v8419_v37, 2 }
0x10b4   : > { %v8322_v30 = vsel %vm659_vm11, %v8315_v12, %v16990_v27  ;;  %v8323_v29 = vsel %vm659_vm11, %v8316_v46, %v16991_v38  ;;  %v17001_v24 = vunpack.i.h.bf16 %v16999_v62  ;;  %v17000_v33 = vunpack.i.l.bf16 %v16999_v62 }
0x10b5   : > { %v8402_v18 = vshrl.u32 %v8327_v49, 16  ;;  %v8405_v51 = vshll.u32 %v8327_v49, 16  ;;  %v8330_v11 = vpack.c.bf16 %v8323_v29, %v8322_v30  ;;  %v16994_v43 = vpop.permute.xlu0 %16993  ;;  %v8425_v9 = vor.u32 %v8424_v15, %v8421_v17 }
0x10b6   : > { %v8310_v22 = vsel %vm643_vm9, %v21899_v39, %v17000_v33  ;;  %v8311_v8 = vsel %vm643_vm9, %v21902_v10, %v17001_v24  ;;  %v16996_v35 = vunpack.i.h.bf16 %v16994_v43  ;;  %v16995_v63 = vunpack.i.l.bf16 %v16994_v43 }
0x10b7   : > { %v22015_v42 = vrot.slane %v8402_v18, 2  ;;  %v22017_v7 = vrot.slane %v8405_v51, 3  ;;  %v8427_v34 = vshrl.u32 %v8330_v11, 16  ;;  %v8430_v5 = vshll.u32 %v8330_v11, 16  ;;  %v17009_v19 = vpop.permute.xlu1 %17008 }
0x10b8   : > { %v8301_v4 = vsel %vm659_vm11, %v8294_v2, %v16995_v63  ;;  %v8302_v14 = vsel %vm659_vm11, %v8295_v58, %v16996_v35  ;;  %v17011_v52 = vunpack.i.h.bf16 %v17009_v19  ;;  %v17010_v47 = vunpack.i.l.bf16 %v17009_v19 }
0x10b9   : > { %v8329_v44 = vpack.c.bf16 %v8302_v14, %v8301_v4  ;;  %v17004_v39 = vpop.permute.xlu0 %17003  ;;  %v8429_v48 = vrot.slane %v8427_v34, 6  ;;  %v8432_v25 = vrot.slane %v8430_v5, 7  ;;  %v8582_v10 = vrot.slane %v8422_v32, 3 }
0x10ba   : > { %v8317_v45 = vsel %vm651_vm10, %v8310_v22, %v17010_v47  ;;  %v8318_v56 = vsel %vm651_vm10, %v8311_v8, %v17011_v52  ;;  %v17006_v21 = vunpack.i.h.bf16 %v17004_v39  ;;  %v17005_v20 = vunpack.i.l.bf16 %v17004_v39 }
0x10bb   : > { %v8410_v40 = vshrl.u32 %v8329_v44, 16  ;;  %v8413_v60 = vshll.u32 %v8329_v44, 16  ;;  %v17019_v57 = vpop.permute.xlu1 %17018  ;;  %v22023_v46 = vor.u32 %v8432_v25, %v8429_v48  ;;  %v8583_v12 = vor.u32 %v8582_v10, %v22007_v6  ;;  %v17774_v25 = vld [vmem:[%s23664_s2 + $0xd80] sm:$0xff]  }
0x10bc   : > { %v8290_v41 = vsel %vm643_vm9, %v21714_v28, %v17006_v21  ;;  %v8289_v16 = vsel %vm643_vm9, %v21693_v23, %v17005_v20  ;;  %v17021_v37 = vunpack.i.h.bf16 %v17019_v57  ;;  %v17020_v32 = vunpack.i.l.bf16 %v17019_v57  ;;  %v17776_v21 = vld [vmem:[%s23664_s2 + $0xdc8] sm:$0xff]  }
0x10bd   : > { %v8577_v2 = vrot.slane %v8410_v40, 2  ;;  %v8578_v58 = vrot.slane %v8413_v60, 3  ;;  %v17014_v3 = vpop.permute.xlu0 %17013  ;;  %v8434_v1 = vsel %vm761_vm12, %v8425_v9, %v22023_v46  ;;  %v8584_v13 = vrot.slane %v8427_v34, 2 }
0x10be   : > { %v8324_v38 = vsel %vm659_vm11, %v8317_v45, %v17020_v32  ;;  %v8325_v27 = vsel %vm659_vm11, %v8318_v56, %v17021_v37  ;;  %v17016_v49 = vunpack.i.h.bf16 %v17014_v3  ;;  %v17015_v62 = vunpack.i.l.bf16 %v17014_v3  ;;  %8565 = vmatprep.mubr.bf16.mxu0 %v8434_v1 }
0x10bf   : > { %v8332_v28 = vpack.c.bf16 %v8325_v27, %v8324_v38  ;;  %v8585_v17 = vrot.slane %v8430_v5, 3  ;;  %v17029_v15 = vpop.permute.xlu1 %17028  ;;  %v8404_v23 = vrot.slane %v8402_v18, 6  ;;  %v8407_v6 = vrot.slane %v8405_v51, 7  ;;  %v17778_v38 = vld [vmem:[%s23664_s2 + $0xd88] sm:$0xff]  }
0x10c0   : > { %v8296_v30 = vsel %vm651_vm10, %v8289_v16, %v17015_v62  ;;  %v8297_v29 = vsel %vm651_vm10, %v8290_v41, %v17016_v49  ;;  %v17031_v24 = vunpack.i.h.bf16 %v17029_v15  ;;  %v17030_v33 = vunpack.i.l.bf16 %v17029_v15 }
0x10c1   : > { %v8770_v11 = vshrl.u32 %v8332_v28, 16  ;;  %v8773_v43 = vshll.u32 %v8332_v28, 16  ;;  %v8586_v9 = vor.u32 %v8585_v17, %v8584_v13  ;;  %v17024_v22 = vpop.permute.xlu0 %17023  ;;  %v8408_v8 = vor.u32 %v8407_v6, %v8404_v23  ;;  %v17780_v23 = vld [vmem:[%s23664_s2 + $0xdd0] sm:$0xff]  }
0x10c2   : > { %v8291_v35 = vsel %vm643_vm9, %v21674_v26, %v17031_v24  ;;  %v8312_v63 = vsel %vm643_vm9, %v21916_v59, %v17030_v33  ;;  %v17026_v34 = vunpack.i.h.bf16 %v17024_v22  ;;  %v17025_v18 = vunpack.i.l.bf16 %v17024_v22  ;;  %v17775_v26 = vld [vmem:[%s23664_s2 + $0xe00] sm:$0xff]   ;;  %v17781_v6 = vld [vmem:[%s23664_s2 + $0xe50] sm:$0xff]  }
0x10c3   : > { %v8587_v51 = vsel %vm935_vm13, %v8583_v12, %v8586_v9  ;;  %v8412_v5 = vrot.slane %v8410_v40, 6  ;;  %v8415_v19 = vrot.slane %v8413_v60, 7  ;;  %v8576_v4 = vor.u32 %v22017_v7, %v22015_v42  ;;  %v17039_v14 = vpop.permute.xlu1 %17038  ;;  %v17777_v42 = vld [vmem:[%s23664_s2 + $0xe48] sm:$0xff]  }
0x10c4   : > { %8718 = vmatprep.mubr.bf16.mxu1 %v8587_v51  ;;  %v8303_v52 = vsel %vm659_vm11, %v8296_v30, %v17025_v18  ;;  %v8304_v47 = vsel %vm659_vm11, %v8297_v29, %v17026_v34  ;;  %v8579_v44 = vor.u32 %v8578_v58, %v8577_v2  ;;  %v17041_v59 = vunpack.i.h.bf16 %v17039_v14  ;;  %v17779_v2 = vld [vmem:[%s23664_s2 + $0xe08] sm:$0xff]   ;;  %v17784_v18 = vld [vmem:[%s23664_s2 + $0xdd8] sm:$0xff]  }
0x10c5   : > { %v8331_v39 = vpack.c.bf16 %v8304_v47, %v8303_v52  ;;  %v8416_v48 = vor.u32 %v8415_v19, %v8412_v5  ;;  %v17040_v10 = vunpack.i.l.bf16 %v17039_v14  ;;  %v17034_v7 = vpop.permute.xlu0 %17033  ;;  %v8772_v45 = vrot.slane %v8770_v11, 2  ;;  %v17787_v52 = vld [vmem:[%s23664_s2 + $0xe18] sm:$0xff]  }
0x10c6   : > { %v8580_v56 = vsel %vm935_vm13, %v8576_v4, %v8579_v44  ;;  %v17036_v20 = vunpack.i.h.bf16 %v17034_v7  ;;  %v17035_v40 = vunpack.i.l.bf16 %v17034_v7  ;;  %v8775_v60 = vrot.slane %v8773_v43, 3  ;;  %v17793_v7 = vld [vmem:[%s23664_s2 + $0xe68] sm:$0xff]  }
0x10c7   : > { %v8761_v57 = vshrl.u32 %v8331_v39, 16  ;;  %v8764_v12 = vshll.u32 %v8331_v39, 16  ;;  %v8417_v41 = vsel %vm761_vm12, %v8408_v8, %v8416_v48  ;;  %8719 = vmatmul.mubr.bf16.vlgmr.msra.gmra.mrb[84].mxu1 %v8580_v56  ;;  %v8956_v16 = vrot.slane %v8770_v11, 6  ;;  %v17783_v11 = vld [vmem:[%s23664_s2 + $0xe10] sm:$0xff]   ;;  %v17788_v39 = vld [vmem:[%s23664_s2 + $0xde0] sm:$0xff]   ;;  %v17795_v56 = vld [vmem:[%s23664_s2 + $0xe28] sm:$0xff]  }
0x10c8   : > { %8566 = vmatmul.mubr.bf16.vlgmr.msra.gmra.mrb[84].mxu0 %v8417_v41  ;;  %15672 = vmatpush3.bf16.msra.mxu1 %v17775_v26  ;;  %v8298_v37 = vsel %vm651_vm10, %v8291_v35, %v17036_v20  ;;  %v8319_v32 = vsel %vm651_vm10, %v8312_v63, %v17035_v40  ;;  %v8776_v58 = vor.u32 %v8775_v60, %v8772_v45  ;;  %v8957_v3 = vrot.slane %v8773_v43, 7  ;;  %v17782_v8 = vld [vmem:[%s23664_s2 + $0xd90] sm:$0xff]   ;;  %v17785_v35 = vld [vmem:[%s23664_s2 + $0xe58] sm:$0xff]   ;;  %v17789_v26 = vld [vmem:[%s23664_s2 + $0xe60] sm:$0xff]  }
0x10c9   : > { %15650 = vmatpush3.bf16.msra.mxu0 %v17774_v25  ;;  %15673 = vmatprep.subr.bf16.mxu1 %v17777_v42  ;;  %v8305_v1 = vsel %vm659_vm11, %v8298_v37, %v17041_v59  ;;  %v8326_v13 = vsel %vm659_vm11, %v8319_v32, %v17040_v10  ;;  %v8763_v27 = vrot.slane %v8761_v57, 2  ;;  %v8766_v49 = vrot.slane %v8764_v12, 3  ;;  %v17791_v10 = vld [vmem:[%s23664_s2 + $0xe20] sm:$0xff]   ;;  %v17792_v45 = vld [vmem:[%s23664_s2 + $0xde8] sm:$0xff]   ;;  %v17797_v20 = vld [vmem:[%s23664_s2 + $0xe70] sm:$0xff]  }
0x10ca   : > { %15651 = vmatprep.subr.bf16.mxu0 %v17776_v21  ;;  %v8333_v62 = vpack.c.bf16 %v8305_v1, %v8305_v1  ;;  %v8334_v28 = vpack.c.bf16 %v8326_v13, %v8326_v13  ;;  %v8777_v17 = vsel %vm935_vm13, %v8586_v9, %v8776_v58  ;;  %v8958_v15 = vor.u32 %v8957_v3, %v8956_v16  ;;  %v17790_v42 = vld [vmem:[%s23664_s2 + $0xda0] sm:$0xff]   ;;  %v17794_v21 = vld [vmem:[%s23664_s2 + $0xda8] sm:$0xff]   ;;  %v17796_v40 = vld [vmem:[%s23664_s2 + $0xdf0] sm:$0xff]  }
0x10cb   : > { %8908 = vmatprep.mubr.bf16.mxu0 %v8777_v17  ;;  %v8767_v30 = vor.u32 %v8766_v49, %v8763_v27  ;;  %v8952_v29 = vrot.slane %v8761_v57, 6  ;;  %v8953_v24 = vrot.slane %v8764_v12, 7  ;;  %v17799_v60 = vld [vmem:[%s23664_s2 + $0xe30] sm:$0xff]   ;;  %v17801_v12 = vld [vmem:[%s23664_s2 + $0xe78] sm:$0xff]   ;;  %v17804_v32 = vld [vmem:[%s23664_s2 + $0xec0] sm:$0xff]  }
0x10cc   : > { %15674 = vmatpush3.bf16.msra.mxu1 %v17779_v2  ;;  %v8959_v33 = vsel %vm761_vm12, %v22023_v46, %v8958_v15  ;;  %v9144_v43 = vshrl.u32 %v8334_v28, 16  ;;  %v9147_v9 = vshll.u32 %v8334_v28, 16  ;;  %v9135_v22 = vshrl.u32 %v8333_v62, 16  ;;  %v17798_v57 = vld [vmem:[%s23664_s2 + $0xdb0] sm:$0xff]   ;;  %v17800_v41 = vld [vmem:[%s23664_s2 + $0xdf8] sm:$0xff]   ;;  %v17806_v2 = vld [vmem:[%s23665_s3 + $0x140] sm:$0xff]  }
0x10cd   : > { %15652 = vmatpush3.bf16.msra.mxu0 %v17778_v38  ;;  %9090 = vmatprep.mubr.bf16.mxu1 %v8959_v33  ;;  %v8768_v63 = vsel %vm935_vm13, %v8579_v44, %v8767_v30  ;;  %v8954_v46 = vor.u32 %v8953_v24, %v8952_v29  ;;  %v9138_v34 = vshll.u32 %v8333_v62, 16  ;;  %v17786_v44 = vld [vmem:[%s23664_s2 + $0xd98] sm:$0xff]   ;;  %v17807_v3 = vld [vmem:[%s23664_s2 + $0xec8] sm:$0xff]   ;;  %v17810_v38 = vld [vmem:[%s23664_s2 + $0xed0] sm:$0xff]  }
0x10ce   : > { %15653 = vmatprep.subr.bf16.mxu0 %v17780_v23  ;;  %15675 = vmatprep.subr.bf16.mxu1 %v17781_v6  ;;  %v9146_v51 = vrot.slane %v9144_v43, 2  ;;  %v9149_v5 = vrot.slane %v9147_v9, 3  ;;  %v9137_v19 = vrot.slane %v9135_v22, 2  ;;  %v17803_v16 = vld [vmem:[%s23664_s2 + $0xe38] sm:$0xff]   ;;  %v17809_v1 = vld [vmem:[%s23665_s3 + $0x148] sm:$0xff]   ;;  %v17812_v27 = vld [vmem:[%s23665_s3 + $0x150] sm:$0xff]  }
0x10cf   : > { %v8955_v4 = vsel %vm761_vm12, %v8416_v48, %v8954_v46  ;;  %v9140_v14 = vrot.slane %v9138_v34, 3  ;;  %v17802_v37 = vld [vmem:[%s23664_s2 + $0xdb8] sm:$0xff]   ;;  %v17808_v13 = vld [vmem:[%s23664_s2 + $0xe88] sm:$0xff]   ;;  %v17811_v49 = vld [vmem:[%s23664_s2 + $0xe90] sm:$0xff]  }
0x10d0   : > { %15676 = vmatpush3.bf16.msra.mxu1 %v17783_v11  ;;  %v9150_v47 = vor.u32 %v9149_v5, %v9146_v51  ;;  %v17813_v62 = vld [vmem:[%s23664_s2 + $0xed8] sm:$0xff]   ;;  %v17816_v15 = vld [vmem:[%s23664_s2 + $0xee0] sm:$0xff]   ;;  %v17821_v29 = vld [vmem:[%s23665_s3 + $0x168] sm:$0xff]  }
0x10d1   : > { %15654 = vmatpush3.bf16.msra.mxu0 %v17782_v8  ;;  %15677 = vmatprep.subr.bf16.mxu1 %v17785_v35  ;;  %v9141_v59 = vor.u32 %v9140_v14, %v9137_v19  ;;  %v17815_v28 = vld [vmem:[%s23665_s3 + $0x158] sm:$0xff]   ;;  %v17818_v23 = vld [vmem:[%s23665_s3 + $0x160] sm:$0xff]   ;;  %v17820_v24 = vld [vmem:[%s23664_s2 + $0xea8] sm:$0xff]   ;;  %v23680_v35 = vpack.c.bf16 %v21610_v36, %v21608_v31 }
0x10d2   : > { %15655 = vmatprep.subr.bf16.mxu0 %v17784_v18  ;;  %v9151_v48 = vsel %vm935_vm13, %v8776_v58, %v9150_v47  ;;  %v17805_v58 = vld [vmem:[%s23664_s2 + $0xe80] sm:$0xff]   ;;  %v17814_v17 = vld [vmem:[%s23664_s2 + $0xe98] sm:$0xff]   ;;  %v17822_v33 = vld [vmem:[%s23664_s2 + $0xef0] sm:$0xff]  }
0x10d3   : > { %v22106_v25 = vsel %vm935_vm13, %v8767_v30, %v9141_v59  ;;  %v17817_v6 = vld [vmem:[%s23664_s2 + $0xea0] sm:$0xff]   ;;  %v17819_v30 = vld [vmem:[%s23664_s2 + $0xee8] sm:$0xff]   ;;  %v17824_v11 = vld [vmem:[%s23665_s3 + $0x170] sm:$0xff]  }
0x10d4   : > { %15678 = vmatpush3.bf16.msra.mxu1 %v17787_v52  ;;  %v17823_v43 = vld [vmem:[%s23664_s2 + $0xeb0] sm:$0xff]   ;;  %v17825_v9 = vld [vmem:[%s23664_s2 + $0xef8] sm:$0xff]   ;;  %v17829_v46 = vld [vmem:[%s23663_s1 + $0x188] sm:$0xff]  }
0x10d5   : > { %15656 = vmatpush3.bf16.msra.mxu0 %v17786_v44  ;;  %15679 = vmatprep.subr.bf16.mxu1 %v17789_v26  ;;  %v17827_v22 = vld [vmem:[%s23665_s3 + $0x178] sm:$0xff]   ;;  %v17830_v31 = vld [vmem:[%s23663_s1 + $0x190] sm:$0xff]   ;;  %v17832_v34 = vld [vmem:[%s23663_s1 + $0x1a0] sm:$0xff]  }
0x10d6   : > { %15657 = vmatprep.subr.bf16.mxu0 %v17788_v39  ;;  %v17826_v8 = vld [vmem:[%s23664_s2 + $0xeb8] sm:$0xff]   ;;  %v17833_v18 = vld [vmem:[%s23663_s1 + $0x1a8] sm:$0xff]   ;;  %v17834_v51 = vld [vmem:[%s23663_s1 + $0x1b0] sm:$0xff]  }
0x10d7   : > { %v17831_v36 = vld [vmem:[%s23663_s1 + $0x198] sm:$0xff]  }
0x10d8   : > { %15680 = vmatpush3.bf16.msra.mxu1 %v17791_v10 }
0x10d9   : > { %15658 = vmatpush3.bf16.msra.mxu0 %v17790_v42  ;;  %15681 = vmatprep.subr.bf16.mxu1 %v17793_v7 }
0x10da   : > { %15659 = vmatprep.subr.bf16.mxu0 %v17792_v45 }
0x10dc   : > { %15682 = vmatpush3.bf16.msra.mxu1 %v17795_v56 }
0x10dd   : > { %15660 = vmatpush3.bf16.msra.mxu0 %v17794_v21  ;;  %15683 = vmatprep.subr.bf16.mxu1 %v17797_v20 }
0x10de   : > { %15661 = vmatprep.subr.bf16.mxu0 %v17796_v40 }
0x10e0   : > { %15684 = vmatpush3.bf16.msra.mxu1 %v17799_v60 }
0x10e1   : > { %15662 = vmatpush3.bf16.msra.mxu0 %v17798_v57  ;;  %15685 = vmatprep.subr.bf16.mxu1 %v17801_v12 }
0x10e2   : > { %15663 = vmatprep.subr.bf16.mxu0 %v17800_v41 }
0x10e4   : > { %15686 = vmatpush3.bf16.msra.mxu1 %v17803_v16 }
0x10e5   : > { %15664 = vmatpush3.bf16.msra.mxu0 %v17802_v37  ;;  %16239 = vmatprep.subr.bf16.mxu1 %v23675_v0 }
0x10e6   : > { %15693 = vmatprep.subr.bf16.mxu0 %v17804_v32 }
0x10e7   : > { %9091 = vmatmul.mubr.bf16.vlgmr.msra.gmra.mrb[88].mxu1 %v8955_v4 }
0x10e8   : > { %8909 = vmatmul.mubr.bf16.vlgmr.msra.gmra.mrb[88].mxu0 %v8768_v63  ;;  %16240 = vmatpush3.bf16.msra.mxu1 %v17806_v2  ;;  %v17828_v63 = vld [vmem:[%s23663_s1 + $0x180] sm:$0xff]  }
0x10e9   : > { %15694 = vmatpush3.bf16.msra.mxu0 %v17805_v58  ;;  %9282 = vmatprep.mubr.bf16.mxu0 %v9151_v48 }
0x10ea   : > { %15695 = vmatprep.subr.bf16.mxu0 %v17807_v3  ;;  %16241 = vmatprep.subr.bf16.mxu1 %v23675_v0 }
0x10eb   : > { %16255 = vmatprep.mubr.msk.bf16.mxu1 %vm18101_vm14, %v23675_v0 }
0x10ec   : > { %16242 = vmatpush3.bf16.msra.mxu1 %v17809_v1  ;;  %v17835_v1 = vld [vmem:[%s23663_s1 + $0x1b8] sm:$0xff]  }
0x10ed   : > { %15696 = vmatpush3.bf16.msra.mxu0 %v17808_v13  ;;  %16243 = vmatprep.subr.bf16.mxu1 %v23675_v0 }
0x10ee   : > { %15697 = vmatprep.subr.bf16.mxu0 %v17810_v38 }
0x10f0   : > { %16244 = vmatpush3.bf16.msra.mxu1 %v17812_v27 }
0x10f1   : > { %15698 = vmatpush3.bf16.msra.mxu0 %v17811_v49  ;;  %16245 = vmatprep.subr.bf16.mxu1 %v23675_v0 }
0x10f2   : > { %15699 = vmatprep.subr.bf16.mxu0 %v17813_v62 }
0x10f4   : > { %16246 = vmatpush3.bf16.msra.mxu1 %v17815_v28 }
0x10f5   : > { %15700 = vmatpush3.bf16.msra.mxu0 %v17814_v17  ;;  %16247 = vmatprep.subr.bf16.mxu1 %v23675_v0 }
0x10f6   : > { %15701 = vmatprep.subr.bf16.mxu0 %v17816_v15 }
0x10f8   : > { %16248 = vmatpush3.bf16.msra.mxu1 %v17818_v23 }
0x10f9   : > { %15702 = vmatpush3.bf16.msra.mxu0 %v17817_v6  ;;  %16249 = vmatprep.subr.bf16.mxu1 %v23675_v0 }
0x10fa   : > { %15703 = vmatprep.subr.bf16.mxu0 %v17819_v30 }
0x10fc   : > { %16250 = vmatpush3.bf16.msra.mxu1 %v17821_v29 }
0x10fd   : > { %15704 = vmatpush3.bf16.msra.mxu0 %v17820_v24  ;;  %16251 = vmatprep.subr.bf16.mxu1 %v23675_v0 }
0x10fe   : > { %15705 = vmatprep.subr.bf16.mxu0 %v17822_v33 }
0x1100   : > { %16252 = vmatpush3.bf16.msra.mxu1 %v17824_v11 }
0x1101   : > { %15706 = vmatpush3.bf16.msra.mxu0 %v17823_v43  ;;  %16253 = vmatprep.subr.bf16.mxu1 %v23675_v0 }
0x1102   : > { %15707 = vmatprep.subr.bf16.mxu0 %v17825_v9 }
0x1104   : > { %16254 = vmatpush3.bf16.msra.mxu1 %v17827_v22 }
0x1105   : > { %15708 = vmatpush3.bf16.msra.mxu0 %v17826_v8 }
0x1106   : > { %16259 = vmatprep.subr.bf16.mxu0 %v17828_v63 }
0x1107   : > { %16256 = vmatmul.mubr.bf16.vlgmr.msra.gmra.mrb[92].mxu1 %v23680_v35 }
0x1108   : > { %9283 = vmatmul.mubr.bf16.vlgmr.msra.gmra.mrb[92].mxu0 %v22106_v25 }
0x1109   : > { %16275 = vmatprep.mubr.bf16.mxu0 %v23677_v61  ;;  %16260 = vmatpush3.bf16.msra.mxu0 %v17828_v63 }
0x110a   : > { %16261 = vmatprep.subr.bf16.mxu0 %v17829_v46 }
0x110d   : > { %16262 = vmatpush3.bf16.msra.mxu0 %v17829_v46 }
0x110e   : > { %16263 = vmatprep.subr.bf16.mxu0 %v17830_v31 }
0x1111   : > { %16264 = vmatpush3.bf16.msra.mxu0 %v17830_v31 }
0x1112   : > { %16265 = vmatprep.subr.bf16.mxu0 %v17831_v36 }
0x1115   : > { %16266 = vmatpush3.bf16.msra.mxu0 %v17831_v36 }
0x1116   : > { %16267 = vmatprep.subr.bf16.mxu0 %v17832_v34 }
0x1119   : > { %16268 = vmatpush3.bf16.msra.mxu0 %v17832_v34 }
0x111a   : > { %16269 = vmatprep.subr.bf16.mxu0 %v17833_v18 }
0x111d   : > { %16270 = vmatpush3.bf16.msra.mxu0 %v17833_v18 }
0x111e   : > { %16271 = vmatprep.subr.bf16.mxu0 %v17834_v51 }
0x1121   : > { %16272 = vmatpush3.bf16.msra.mxu0 %v17834_v51 }
0x1122   : > { %16273 = vmatprep.subr.bf16.mxu0 %v17835_v1 }
0x1125   : > { %16274 = vmatpush3.bf16.msra.mxu0 %v17835_v1  ;;  %v17838_v1 = vld [vmem:[%s23664_s2 + $0xf80] sm:$0xff]  }
0x119a   : > { %v15643_v5 = vpop.f32.mrb[84].mxu1 }
0x119b   : > { %v15621_v19 = vpop.f32.mrb[84].mxu0  ;;  %v15644_v4 = vpop.f32.mrb[85].mxu1 }
0x119c   : > { %v15622_v14 = vpop.f32.mrb[85].mxu0  ;;  %v15645_v52 = vadd.f32 %v15644_v4, %v15643_v5  ;;  %v15646_v47 = vpop.f32.mrb[86].mxu1 }
0x119d   : > { %v15623_v44 = vadd.f32 %v15622_v14, %v15621_v19  ;;  %v15624_v26 = vpop.f32.mrb[86].mxu0  ;;  %v15647_v59 = vpop.f32.mrb[87].mxu1 }
0x119e   : > { %v15625_v39 = vpop.f32.mrb[87].mxu0  ;;  %v15648_v48 = vadd.f32 %v15647_v59, %v15646_v47 }
0x119f   : > { %v8721_v25 = vadd.f32 %v15645_v52, %v15623_v44  ;;  %v15626_v10 = vadd.f32 %v15625_v39, %v15624_v26 }
0x11a1   : > { %v8724_v42 = vadd.f32 %v15648_v48, %v15626_v10 }
0x11ba   : > { %v15687_v7 = vpop.f32.mrb[88].mxu1 }
0x11bb   : > { %v15665_v45 = vpop.f32.mrb[88].mxu0  ;;  %v15688_v56 = vpop.f32.mrb[89].mxu1 }
0x11bc   : > { %v15666_v21 = vpop.f32.mrb[89].mxu0  ;;  %v15689_v20 = vadd.f32 %v15688_v56, %v15687_v7  ;;  %v15690_v40 = vpop.f32.mrb[90].mxu1 }
0x11bd   : > { %v15667_v60 = vadd.f32 %v15666_v21, %v15665_v45  ;;  %v15668_v57 = vpop.f32.mrb[90].mxu0  ;;  %v15691_v12 = vpop.f32.mrb[91].mxu1 }
0x11be   : > { %v15669_v41 = vpop.f32.mrb[91].mxu0  ;;  %v15692_v16 = vadd.f32 %v15691_v12, %v15690_v40  ;;  %v17836_v40 = vld [vmem:[%s23664_s2 + $0xfc0] sm:$0xff]  }
0x11bf   : > { %v8917_v37 = vadd.f32 %v15667_v60, %v8721_v25  ;;  %v15670_v32 = vadd.f32 %v15669_v41, %v15668_v57  ;;  %15736 = vmatprep.subr.bf16.mxu1 %v17836_v40  ;;  %v17845_v40 = vld [vmem:[%s23664_s2 + $0xf50] sm:$0xff]  }
0x11c0   : > { %15737 = vmatpush3.bf16.msra.mxu1 %v17838_v1  ;;  %v17847_v1 = vld [vmem:[%s23664_s2 + $0xf10] sm:$0xff]  }
0x11c1   : > { %v9099_v2 = vadd.f32 %v15689_v20, %v8917_v37  ;;  %v8918_v58 = vadd.f32 %v15670_v32, %v8724_v42  ;;  %v17837_v37 = vld [vmem:[%s23664_s2 + $0xf40] sm:$0xff]  }
0x11c2   : > { %15758 = vmatprep.subr.bf16.mxu0 %v17837_v37 }
0x11c3   : > { %v9100_v3 = vadd.f32 %v15692_v16, %v8918_v58 }
0x11da   : > { %v9419_v13 = vpop.f32.mrb[92].mxu1 }
0x11db   : > { %v15709_v38 = vpop.f32.mrb[92].mxu0  ;;  %9428 = vrot.lane.b32.xlu0 %v9419_v13, %s18100_s26  ;;  %v16257_v27 = vpop.f32.mrb[93].mxu1  ;;  %v17839_v13 = vld [vmem:[%s23664_s2 + $0xf00] sm:$0xff]  }
0x11dc   : > { %v15710_v49 = vpop.f32.mrb[93].mxu0  ;;  %v9422_v62 = vpop.f32.mrb[94].mxu1 }
0x11dd   : > { %v15711_v28 = vadd.f32 %v15710_v49, %v15709_v38  ;;  %v15712_v17 = vpop.f32.mrb[94].mxu0  ;;  %9430 = vrot.lane.b32.xlu1 %v9422_v62, %s18100_s26  ;;  %v16258_v15 = vpop.f32.mrb[95].mxu1 }
0x11de   : > { %v15713_v23 = vpop.f32.mrb[95].mxu0 }
0x11df   : > { %v9291_v6 = vadd.f32 %v15711_v28, %v9099_v2  ;;  %v15714_v30 = vadd.f32 %v15713_v23, %v15712_v17 }
0x11e1   : > { %v9292_v29 = vadd.f32 %v15714_v30, %v9100_v3  ;;  %v17841_v30 = vld [vmem:[%s23664_s2 + $0xf48] sm:$0xff]  }
0x124d   : > { %v9429_v24 = vpop.permute.xlu0 %9428 }
0x124e   : > { %v9434_v33 = vsel %vm659_vm11, %v9291_v6, %v9429_v24  ;;  %v17840_v6 = vld [vmem:[%s23664_s2 + $0xfc8] sm:$0xff]  }
0x124f   : > { %v9436_v11 = vmax.f32 %v9434_v33, 0.0  ;;  %v9431_v43 = vpop.permute.xlu1 %9430  ;;  %15738 = vmatprep.subr.bf16.mxu1 %v17840_v6 }
0x1250   : > { %v9435_v9 = vsel %vm659_vm11, %v9292_v29, %v9431_v43 }
0x1251   : > { %v10824_v22 = vrot.slane %v9436_v11, 7  ;;  %v9437_v8 = vmax.f32 %v9435_v9, 0.0  ;;  %v9449_v35 = vpack.c.bf16 %v9436_v11, %v23675_v0  ;;  %v10833_v63 = vrot.slane %v9436_v11, 1 }
0x1253   : > { %v10825_v46 = vsel %vm608_vm4, %v18572_v50, %v10824_v22  ;;  %v10826_v31 = vrot.slane %v9437_v8, 7  ;;  %v10834_v36 = vrot.slane %v9437_v8, 1  ;;  %16276 = vmatmul.mubr.bf16.vlgmr.msra.gmra.mrb[96].mxu0 %v9449_v35  ;;  %v9450_v34 = vpack.c.bf16 %v23675_v0, %v9437_v8 }
0x1254   : > { %v10830_v18 = vsel %vm1655_vm7, -inf, %v10825_v46  ;;  %15759 = vmatpush3.bf16.msra.mxu0 %v17839_v13  ;;  %v17843_v46 = vld [vmem:[%s23664_s2 + $0xf08] sm:$0xff]  }
0x1255   : > { %v10842_v51 = vmax.f32 %v10830_v18, %v9436_v11  ;;  %v10827_v5 = vsel %vm608_vm4, %v10824_v22, %v10826_v31  ;;  %16279 = vmatprep.mubr.bf16.mxu0 %v9450_v34  ;;  %v10835_v19 = vsel %vm413_vm1, %v10833_v63, %v10834_v36  ;;  %v10837_v4 = vsel %vm413_vm1, %v10834_v36, %v18575_v53  ;;  %v17842_v63 = vld [vmem:[%s23664_s2 + $0xf88] sm:$0xff]  }
0x1256   : > { %v10843_v14 = vmax.f32 %v10827_v5, %v9437_v8  ;;  %v10841_v52 = vsel %vm1670_vm8, -inf, %v10837_v4  ;;  %15760 = vmatprep.subr.bf16.mxu0 %v17841_v30  ;;  %15739 = vmatpush3.bf16.msra.mxu1 %v17842_v63  ;;  %v17848_v63 = vld [vmem:[%s23664_s2 + $0xfd8] sm:$0xff]  }
0x1257   : > { %v22277_v47 = vmax.f32 %v10842_v51, %v10835_v19 }
0x1258   : > { %v22279_v44 = vmax.f32 %v10843_v14, %v10841_v52  ;;  %15761 = vmatpush3.bf16.msra.mxu0 %v17843_v46  ;;  %v17850_v46 = vld [vmem:[%s23664_s2 + $0xf98] sm:$0xff]  }
0x1259   : > { %15762 = vmatprep.subr.bf16.mxu0 %v17845_v40  ;;  %v17851_v40 = vld [vmem:[%s23664_s2 + $0xf18] sm:$0xff]  }
0x125b   : > { %16280 = vmatmul.mubr.bf16.gmra.mrb[100].mxu0 %v23677_v61 }
0x125c   : > { %15763 = vmatpush3.bf16.msra.mxu0 %v17847_v1 }
0x1326   : > { %v22284_v59 = vpop.f32.mrb[96].mxu0 }
0x1327   : > { %v22286_v39 = vpop.f32.mrb[97].mxu0  ;;  %v9711_v48 = vrot.slane %v22284_v59, 5  ;;  %v9592_v25 = vrot.slane %v22284_v59, 1  ;;  %v9745_v10 = vrot.slane %v22284_v59, 6  ;;  %v9626_v42 = vrot.slane %v22284_v59, 2 }
0x1328   : > { %v9589_v7 = vrot.slane %v22286_v39, 1  ;;  %v9623_v45 = vrot.slane %v22286_v39, 2  ;;  %v22294_v56 = vpop.f32.mrb[98].mxu0  ;;  %v9779_v21 = vrot.slane %v22284_v59, 7  ;;  %v9658_v20 = vrot.slane %v22284_v59, 3 }
0x1329   : > { %v22301_v60 = vpop.f32.mrb[99].mxu0  ;;  %v9713_v57 = vrot.slane %v22294_v56, 5  ;;  %v9594_v12 = vrot.slane %v22294_v56, 1  ;;  %v9747_v41 = vrot.slane %v22294_v56, 6  ;;  %v9628_v16 = vrot.slane %v22294_v56, 2 }
0x132a   : > { %v9710_v32 = vrot.slane %v22301_v60, 5  ;;  %v9590_v2 = vrot.slane %v22301_v60, 1  ;;  %v9744_v58 = vrot.slane %v22301_v60, 6  ;;  %v9624_v3 = vrot.slane %v22301_v60, 2 }
0x132b   : > { %v22321_v38 = vsel %vm538_vm0, %v9711_v48, %v9713_v57  ;;  %v22324_v27 = vsel %vm413_vm1, %v9592_v25, %v9594_v12  ;;  %v22327_v49 = vsel %vm573_vm2, %v9745_v10, %v9747_v41  ;;  %v9778_v62 = vrot.slane %v22301_v60, 7 }
0x132c   : > { %v9712_v28 = vsel %vm538_vm0, %v9710_v32, %v9711_v48  ;;  %v9591_v17 = vsel %vm413_vm1, %v9589_v7, %v9590_v2  ;;  %v9593_v15 = vsel %vm413_vm1, %v9590_v2, %v9592_v25  ;;  %v9746_v23 = vsel %vm573_vm2, %v9744_v58, %v9745_v10  ;;  %v17844_v48 = vld [vmem:[%s23664_s2 + $0xfd0] sm:$0xff]  }
0x132d   : > { %v17042_v29 = vpack.i.bf16 %v9712_v28, %v9710_v32  ;;  %v17047_v24 = vpack.i.bf16 %v9593_v15, %v9591_v17  ;;  %v17052_v33 = vpack.i.bf16 %v9746_v23, %v9744_v58  ;;  %v22341_v11 = vsel %vm448_vm3, %v9623_v45, %v9624_v3  ;;  %15740 = vmatprep.subr.bf16.mxu1 %v17844_v48 }
0x132e   : > { %v22343_v43 = vpop.f32.mrb[100].mxu0  ;;  %v22346_v9 = vsel %vm448_vm3, %v9624_v3, %v9626_v42  ;;  %v9780_v22 = vsel %vm608_vm4, %v9778_v62, %v9779_v21  ;;  %v22352_v8 = vsel %vm448_vm3, %v9626_v42, %v9628_v16  ;;  %v9657_v35 = vrot.slane %v22301_v60, 3  ;;  %v17846_v3 = vld [vmem:[%s23664_s2 + $0xf90] sm:$0xff]  }
0x132f   : > { %17043 = vrot.lane.b32.xlu0 %v17042_v29, %s18098_s10  ;;  %v22362_v31 = vpop.f32.mrb[101].mxu0  ;;  %v17057_v36 = vpack.i.bf16 %v22346_v9, %v22341_v11  ;;  %v22366_v34 = vpack.i.bf16 %v9780_v22, %v9778_v62  ;;  %v9781_v18 = vrot.slane %v22294_v56, 7  ;;  %v9719_v51 = vrot.slane %v22343_v43, 5  ;;  %15741 = vmatpush3.bf16.msra.mxu1 %v17846_v3 }
0x1330   : > { %v22370_v5 = vpop.f32.mrb[102].mxu0  ;;  %v9715_v19 = vrot.slane %v22362_v31, 5  ;;  %v9596_v4 = vrot.slane %v22362_v31, 1  ;;  %v9749_v14 = vrot.slane %v22362_v31, 6  ;;  %v9630_v52 = vrot.slane %v22362_v31, 2  ;;  %15742 = vmatprep.subr.bf16.mxu1 %v17848_v63 }
0x1331   : > { %v9701_v25 = vrot.slane %v22370_v5, 4  ;;  %v9721_v10 = vrot.slane %v22370_v5, 5  ;;  %v9755_v42 = vrot.slane %v22370_v5, 6  ;;  %v9789_v7 = vrot.slane %v22370_v5, 7  ;;  %v22383_v45 = vpop.f32.mrb[103].mxu0  ;;  %v17863_v5 = vld [vmem:[%s23664_s2 + $0xf30] sm:$0xff]  }
0x1332   : > { %v9716_v37 = vsel %vm538_vm0, %v9713_v57, %v9715_v19  ;;  %v9597_v32 = vsel %vm413_vm1, %v9594_v12, %v9596_v4  ;;  %v9750_v2 = vsel %vm573_vm2, %v9747_v41, %v9749_v14  ;;  %v22394_v58 = vsel %vm448_vm3, %v9628_v16, %v9630_v52 }
0x1333   : > { %17048 = vrot.lane.b32.xlu0 %v17047_v24, %s18098_s10  ;;  %v17072_v57 = vpack.i.bf16 %v9716_v37, %v22321_v38  ;;  %v17077_v12 = vpack.i.bf16 %v9597_v32, %v22324_v27  ;;  %v17082_v41 = vpack.i.bf16 %v9750_v2, %v22327_v49  ;;  %v17087_v16 = vpack.i.bf16 %v22394_v58, %v22352_v8  ;;  %v17858_v8 = vld [vmem:[%s23664_s2 + $0xfa8] sm:$0xff]  }
0x1334   : > { %v9659_v13 = vsel %vm483_vm5, %v9657_v35, %v9658_v20  ;;  %v22414_v62 = vsel %vm608_vm4, %v9779_v21, %v9781_v18  ;;  %v9783_v28 = vrot.slane %v22362_v31, 7  ;;  %v9717_v38 = vrot.slane %v22383_v45, 5  ;;  %15743 = vmatpush3.bf16.msra.mxu1 %v17850_v46  ;;  %v17859_v58 = vld [vmem:[%s23664_s2 + $0xf28] sm:$0xff]  }
0x1335   : > { %17073 = vrot.lane.b32.xlu1 %v17072_v57, %s18098_s10  ;;  %v22419_v27 = vpack.i.bf16 %v9659_v13, %v9657_v35  ;;  %v9660_v49 = vrot.slane %v22294_v56, 3  ;;  %v9662_v17 = vrot.slane %v22362_v31, 3  ;;  %v9751_v15 = vrot.slane %v22383_v45, 6 }
0x1336   : > { %v22425_v21 = vsel %vm608_vm4, %v9781_v18, %v9783_v28  ;;  %v22428_v23 = vsel %vm538_vm0, %v9715_v19, %v9717_v38  ;;  %v22433_v6 = vsel %vm538_vm0, %v9717_v38, %v9719_v51  ;;  %v9753_v30 = vrot.slane %v22343_v43, 6 }
0x1337   : > { %17053 = vrot.lane.b32.xlu0 %v17052_v33, %s18099_s20  ;;  %v17092_v29 = vpack.i.bf16 %v22425_v21, %v22414_v62  ;;  %v17102_v24 = vpack.i.bf16 %v22433_v6, %v22428_v23  ;;  %v22444_v22 = vsel %vm483_vm5, %v9658_v20, %v9660_v49  ;;  %v22447_v35 = vsel %vm483_vm5, %v9660_v49, %v9662_v17  ;;  %v17849_v33 = vld [vmem:[%s23664_s2 + $0xf58] sm:$0xff]   ;;  %v17868_v6 = vld [vmem:[%s23664_s2 + $0x1040] sm:$0xff]  }
0x1338   : > { %v17097_v18 = vpack.i.bf16 %v22447_v35, %v22444_v22  ;;  %v22461_v20 = vsel %vm573_vm2, %v9749_v14, %v9751_v15  ;;  %v22464_v19 = vsel %vm573_vm2, %v9751_v15, %v9753_v30  ;;  %v9598_v48 = vrot.slane %v22383_v45, 1  ;;  %15764 = vmatprep.subr.bf16.mxu0 %v17849_v33  ;;  %v17853_v33 = vld [vmem:[%s23664_s2 + $0xf60] sm:$0xff]   ;;  %v17865_v62 = vld [vmem:[%s23664_s2 + $0xf78] sm:$0xff]  }
0x1339   : > { %17078 = vrot.lane.b32.xlu1 %v17077_v12, %s18098_s10  ;;  %v17112_v37 = vpack.i.bf16 %v22464_v19, %v22461_v20  ;;  %v9600_v32 = vrot.slane %v22343_v43, 1  ;;  %v9785_v2 = vrot.slane %v22383_v45, 7  ;;  %v9787_v14 = vrot.slane %v22343_v43, 7  ;;  %15765 = vmatpush3.bf16.msra.mxu0 %v17851_v40  ;;  %v17866_v21 = vld [vmem:[%s23664_s2 + $0xfb8] sm:$0xff]  }
0x133a   : > { %v22477_v3 = vsel %vm413_vm1, %v9596_v4, %v9598_v48  ;;  %v9632_v1 = vrot.slane %v22383_v45, 2  ;;  %v9634_v57 = vrot.slane %v22343_v43, 2  ;;  %v9722_v12 = vsel %vm538_vm0, %v9719_v51, %v9721_v10  ;;  %15766 = vmatprep.subr.bf16.mxu0 %v17853_v33  ;;  %v17862_v33 = vld [vmem:[%s23664_s2 + $0xfb0] sm:$0xff]   ;;  %v17867_v23 = vld [vmem:[%s23664_s2 + $0xf38] sm:$0xff]  }
0x133b   : > { %17058 = vrot.lane.b32.xlu0 %v17057_v36, %s18099_s20  ;;  %v22489_v13 = vsel %vm413_vm1, %v9598_v48, %v9600_v32  ;;  %v22492_v4 = vsel %vm608_vm4, %v9783_v28, %v9785_v2  ;;  %v22495_v38 = vsel %vm608_vm4, %v9785_v2, %v9787_v14  ;;  %v22497_v49 = vpack.i.bf16 %v9600_v32, %v9722_v12  ;;  %v17855_v32 = vld [vmem:[%s23664_s2 + $0xf20] sm:$0xff]   ;;  %v17856_v2 = vld [vmem:[%s23664_s2 + $0xfe8] sm:$0xff]  }
0x133c   : > { %v17107_v51 = vpack.i.bf16 %v22489_v13, %v22477_v3  ;;  %v22506_v11 = vsel %vm448_vm3, %v9630_v52, %v9632_v1  ;;  %v22509_v9 = vsel %vm448_vm3, %v9632_v1, %v9634_v57  ;;  %v9664_v28 = vrot.slane %v22383_v45, 3  ;;  %v17852_v52 = vld [vmem:[%s23664_s2 + $0xfe0] sm:$0xff]   ;;  %v17857_v12 = vld [vmem:[%s23664_s2 + $0xf68] sm:$0xff]  }
0x133d   : > { %17083 = vrot.lane.b32.xlu1 %v17082_v41, %s18099_s20  ;;  %v9666_v15 = vrot.slane %v22343_v43, 3  ;;  %v9790_v63 = vsel %vm608_vm4, %v9787_v14, %v9789_v7  ;;  %v17854_v41 = vld [vmem:[%s23664_s2 + $0xfa0] sm:$0xff]   ;;  %v9756_v46 = vsel %vm573_vm2, %v9753_v30, %v9755_v42  ;;  %v9691_v48 = vrot.slane %v22284_v59, 4  ;;  %15744 = vmatprep.subr.bf16.mxu1 %v17852_v52  ;;  %v17861_v52 = vld [vmem:[%s23664_s2 + $0xf70] sm:$0xff]  }
0x133e   : > { %v9690_v7 = vrot.slane %v22301_v60, 4  ;;  %v9693_v40 = vrot.slane %v22294_v56, 4  ;;  %v9665_v14 = vsel %vm483_vm5, %v9662_v17, %v9664_v28  ;;  %v17137_v1 = vpack.i.bf16 %v9634_v57, %v9756_v46  ;;  %15745 = vmatpush3.bf16.msra.mxu1 %v17854_v41  ;;  %15767 = vmatpush3.bf16.msra.mxu0 %v17855_v32 }
0x133f   : > { %17063 = vrot.lane.b32.xlu0 %v22366_v34, %s18100_s26  ;;  %v9667_v42 = vsel %vm483_vm5, %v9664_v28, %v9666_v15  ;;  %v17142_v30 = vpack.i.bf16 %v9666_v15, %v9790_v63  ;;  %v9695_v34 = vrot.slane %v22362_v31, 4  ;;  %v9699_v17 = vrot.slane %v22343_v43, 4  ;;  %15746 = vmatprep.subr.bf16.mxu1 %v17856_v2 }
0x1340   : > { %v17127_v26 = vpack.i.bf16 %v9667_v42, %v9665_v14  ;;  %v22550_v36 = vsel %vm517_vm6, %v9690_v7, %v9691_v48  ;;  %v22553_v10 = vsel %vm517_vm6, %v9691_v48, %v9693_v40  ;;  %v9697_v57 = vrot.slane %v22383_v45, 4  ;;  %15768 = vmatprep.subr.bf16.mxu0 %v17857_v12 }
0x1341   : > { %17088 = vrot.lane.b32.xlu1 %v17087_v16, %s18099_s20  ;;  %v22563_v28 = vsel %vm517_vm6, %v9693_v40, %v9695_v34  ;;  %v17860_v16 = vld [vmem:[%s23664_s2 + $0xff0] sm:$0xff]   ;;  %v23682_v22 = vpack.i.bf16 %v22509_v9, %v22506_v11 }
0x1342   : > { %v22568_v15 = vsel %vm517_vm6, %v9695_v34, %v9697_v57  ;;  %v22571_v63 = vsel %vm517_vm6, %v9697_v57, %v9699_v17  ;;  %15747 = vmatpush3.bf16.msra.mxu1 %v17858_v8  ;;  %15769 = vmatpush3.bf16.msra.mxu0 %v17859_v58 }
0x1343   : > { %17068 = vrot.lane.b32.xlu0 %v22419_v27, %s18100_s26  ;;  %v22585_v27 = vsel %vm517_vm6, %v9699_v17, %v9701_v25  ;;  %15748 = vmatprep.subr.bf16.mxu1 %v17860_v16  ;;  %v17864_v25 = vld [vmem:[%s23664_s2 + $0xff8] sm:$0xff]  }
0x1344   : > { %15770 = vmatprep.subr.bf16.mxu0 %v17861_v52 }
0x1345   : > { %17093 = vrot.lane.b32.xlu1 %v17092_v29, %s18100_s26  ;;  %v17869_v29 = vld [vmem:[%s23664_s2 + $0x10c0] sm:$0xff]  }
0x1346   : > { %15749 = vmatpush3.bf16.msra.mxu1 %v17862_v33  ;;  %15771 = vmatpush3.bf16.msra.mxu0 %v17863_v5 }
0x1347   : > { %17103 = vrot.lane.b32.xlu0 %v17102_v24, %s18098_s10  ;;  %15750 = vmatprep.subr.bf16.mxu1 %v17864_v25  ;;  %v23681_v24 = vpack.i.bf16 %v22495_v38, %v22492_v4 }
0x1348   : > { %15772 = vmatprep.subr.bf16.mxu0 %v17865_v62 }
0x1349   : > { %17098 = vrot.lane.b32.xlu1 %v17097_v18, %s18100_s26 }
0x134a   : > { %15751 = vmatpush3.bf16.msra.mxu1 %v17866_v21  ;;  %15773 = vmatpush3.bf16.msra.mxu0 %v17867_v23 }
0x134b   : > { %17113 = vrot.lane.b32.xlu0 %v17112_v37, %s18099_s20  ;;  %15780 = vmatprep.subr.bf16.mxu1 %v17868_v6 }
0x134c   : > { %15802 = vmatprep.subr.bf16.mxu0 %v17869_v29 }
0x134d   : > { %17108 = vrot.lane.b32.xlu1 %v17107_v51, %s18098_s10 }
0x134f   : > { %17123 = vrot.lane.b32.xlu0 %v23681_v24, %s18100_s26 }
0x1351   : > { %17118 = vrot.lane.b32.xlu1 %v23682_v22, %s18099_s20 }
0x1353   : > { %17133 = vrot.lane.b32.xlu0 %v22497_v49, %s18098_s10 }
0x1355   : > { %17128 = vrot.lane.b32.xlu1 %v17127_v26, %s18100_s26 }
0x1357   : > { %17143 = vrot.lane.b32.xlu0 %v17142_v30, %s18100_s26 }
0x1359   : > { %17138 = vrot.lane.b32.xlu1 %v17137_v1, %s18099_s20 }
0x13a1   : > { %v17044_v35 = vpop.permute.xlu0 %17043 }
0x13a2   : > { %v17046_v3 = vunpack.i.h.bf16 %v17044_v35  ;;  %v17045_v13 = vunpack.i.l.bf16 %v17044_v35 }
0x13a4   : > { %v9833_v48 = vsel %vm643_vm9, %v9690_v7, %v17045_v13  ;;  %v9834_v40 = vsel %vm643_vm9, %v22550_v36, %v17046_v3 }
0x13a5   : > { %v17049_v18 = vpop.permute.xlu0 %17048 }
0x13a6   : > { %v17051_v4 = vunpack.i.h.bf16 %v17049_v18  ;;  %v17050_v38 = vunpack.i.l.bf16 %v17049_v18 }
0x13a7   : > { %v17074_v20 = vpop.permute.xlu1 %17073 }
0x13a8   : > { %v17075_v51 = vunpack.i.l.bf16 %v17074_v20  ;;  %v17076_v9 = vunpack.i.h.bf16 %v17074_v20  ;;  %v9813_v32 = vsel %vm643_vm9, %v22301_v60, %v17051_v4  ;;  %v9812_v2 = vsel %vm643_vm9, %v22286_v39, %v17050_v38 }
0x13a9   : > { %v17054_v19 = vpop.permute.xlu0 %17053 }
0x13aa   : > { %v17056_v41 = vunpack.i.h.bf16 %v17054_v19  ;;  %v17055_v49 = vunpack.i.l.bf16 %v17054_v19  ;;  %v9835_v14 = vsel %vm643_vm9, %v22553_v10, %v17075_v51  ;;  %v9836_v36 = vsel %vm643_vm9, %v22563_v28, %v17076_v9 }
0x13ab   : > { %v17079_v37 = vpop.permute.xlu1 %17078 }
0x13ac   : > { %v17081_v46 = vunpack.i.h.bf16 %v17079_v37  ;;  %v17080_v42 = vunpack.i.l.bf16 %v17079_v37  ;;  %v9841_v8 = vsel %vm651_vm10, %v9834_v40, %v17056_v41  ;;  %v9840_v60 = vsel %vm651_vm10, %v9833_v48, %v17055_v49 }
0x13ad   : > { %v17059_v11 = vpop.permute.xlu0 %17058 }
0x13ae   : > { %v17061_v30 = vunpack.i.h.bf16 %v17059_v11  ;;  %v17060_v1 = vunpack.i.l.bf16 %v17059_v11  ;;  %v9815_v39 = vsel %vm643_vm9, %v22294_v56, %v17081_v46  ;;  %v9814_v5 = vsel %vm643_vm9, %v22284_v59, %v17080_v42 }
0x13af   : > { %v17084_v26 = vpop.permute.xlu1 %17083 }
0x13b0   : > { %v17086_v34 = vunpack.i.h.bf16 %v17084_v26  ;;  %v17085_v17 = vunpack.i.l.bf16 %v17084_v26  ;;  %v9819_v25 = vsel %vm651_vm10, %v9812_v2, %v17060_v1  ;;  %v9820_v28 = vsel %vm651_vm10, %v9813_v32, %v17061_v30 }
0x13b1   : > { %v17064_v12 = vpop.permute.xlu0 %17063 }
0x13b2   : > { %v17066_v57 = vunpack.i.h.bf16 %v17064_v12  ;;  %v17065_v7 = vunpack.i.l.bf16 %v17064_v12  ;;  %v9843_v23 = vsel %vm651_vm10, %v9836_v36, %v17086_v34  ;;  %v9842_v56 = vsel %vm651_vm10, %v9835_v14, %v17085_v17 }
0x13b3   : > { %v17089_v58 = vpop.permute.xlu1 %17088 }
0x13b4   : > { %v9847_v10 = vsel %vm659_vm11, %v9840_v60, %v17065_v7  ;;  %v9848_v16 = vsel %vm659_vm11, %v9841_v8, %v17066_v57  ;;  %v17091_v52 = vunpack.i.h.bf16 %v17089_v58  ;;  %v17090_v33 = vunpack.i.l.bf16 %v17089_v58 }
0x13b5   : > { %v9855_v62 = vpack.c.bf16 %v9848_v16, %v9847_v10  ;;  %v17069_v21 = vpop.permute.xlu0 %17068 }
0x13b6   : > { %v17071_v6 = vunpack.i.h.bf16 %v17069_v21  ;;  %v17070_v29 = vunpack.i.l.bf16 %v17069_v21  ;;  %v9821_v35 = vsel %vm651_vm10, %v9814_v5, %v17090_v33  ;;  %v9822_v18 = vsel %vm651_vm10, %v9815_v39, %v17091_v52 }
0x13b7   : > { %v9946_v24 = vshrl.u32 %v9855_v62, 16  ;;  %v9949_v22 = vshll.u32 %v9855_v62, 16  ;;  %v17094_v20 = vpop.permute.xlu1 %17093 }
0x13b8   : > { %v9826_v59 = vsel %vm659_vm11, %v9819_v25, %v17070_v29  ;;  %v9827_v19 = vsel %vm659_vm11, %v9820_v28, %v17071_v6  ;;  %v17096_v37 = vunpack.i.h.bf16 %v17094_v20  ;;  %v17095_v3 = vunpack.i.l.bf16 %v17094_v20 }
0x13b9   : > { %v9854_v13 = vpack.c.bf16 %v9827_v19, %v9826_v59  ;;  %v17104_v4 = vpop.permute.xlu0 %17103  ;;  %v9948_v38 = vrot.slane %v9946_v24, 6  ;;  %v9951_v51 = vrot.slane %v9949_v22, 7  ;;  %v22676_v11 = vrot.slane %v9946_v24, 2 }
0x13ba   : > { %v9849_v9 = vsel %vm659_vm11, %v9842_v56, %v17095_v3  ;;  %v9850_v41 = vsel %vm659_vm11, %v9843_v23, %v17096_v37  ;;  %v17106_v49 = vunpack.i.h.bf16 %v17104_v4  ;;  %v17105_v46 = vunpack.i.l.bf16 %v17104_v4 }
0x13bb   : > { %v9929_v26 = vshrl.u32 %v9854_v13, 16  ;;  %v9932_v48 = vshll.u32 %v9854_v13, 16  ;;  %v9857_v40 = vpack.c.bf16 %v9850_v41, %v9849_v9  ;;  %v17099_v32 = vpop.permute.xlu1 %17098  ;;  %v9952_v2 = vor.u32 %v9951_v51, %v9948_v38 }
0x13bc   : > { %v9837_v14 = vsel %vm643_vm9, %v22568_v15, %v17105_v46  ;;  %v9838_v42 = vsel %vm643_vm9, %v22571_v63, %v17106_v49  ;;  %v17101_v30 = vunpack.i.h.bf16 %v17099_v32  ;;  %v17100_v1 = vunpack.i.l.bf16 %v17099_v32 }
0x13bd   : > { %v22684_v12 = vrot.slane %v9929_v26, 2  ;;  %v22686_v34 = vrot.slane %v9932_v48, 3  ;;  %v9954_v17 = vshrl.u32 %v9857_v40, 16  ;;  %v9957_v57 = vshll.u32 %v9857_v40, 16  ;;  %v17114_v7 = vpop.permute.xlu0 %17113 }
0x13be   : > { %v9828_v36 = vsel %vm659_vm11, %v9821_v35, %v17100_v1  ;;  %v9829_v8 = vsel %vm659_vm11, %v9822_v18, %v17101_v30  ;;  %v17116_v60 = vunpack.i.h.bf16 %v17114_v7  ;;  %v17115_v39 = vunpack.i.l.bf16 %v17114_v7 }
0x13bf   : > { %v9856_v58 = vpack.c.bf16 %v9829_v8, %v9828_v36  ;;  %v17109_v15 = vpop.permute.xlu1 %17108  ;;  %v9956_v10 = vrot.slane %v9954_v17, 6  ;;  %v9959_v16 = vrot.slane %v9957_v57, 7  ;;  %v10109_v63 = vrot.slane %v9949_v22, 3 }
0x13c0   : > { %v9844_v52 = vsel %vm651_vm10, %v9837_v14, %v17115_v39  ;;  %v9845_v33 = vsel %vm651_vm10, %v9838_v42, %v17116_v60  ;;  %v17111_v5 = vunpack.i.h.bf16 %v17109_v15  ;;  %v17110_v25 = vunpack.i.l.bf16 %v17109_v15 }
0x13c1   : > { %v9937_v28 = vshrl.u32 %v9856_v58, 16  ;;  %v9940_v62 = vshll.u32 %v9856_v58, 16  ;;  %v17124_v21 = vpop.permute.xlu0 %17123  ;;  %v22692_v23 = vor.u32 %v9959_v16, %v9956_v10  ;;  %v10110_v56 = vor.u32 %v10109_v63, %v22676_v11  ;;  %v17870_v16 = vld [vmem:[%s23664_s2 + $0x1000] sm:$0xff]  }
0x13c2   : > { %v9817_v6 = vsel %vm643_vm9, %v22383_v45, %v17111_v5  ;;  %v9816_v29 = vsel %vm643_vm9, %v22362_v31, %v17110_v25  ;;  %v17126_v24 = vunpack.i.h.bf16 %v17124_v21  ;;  %v17125_v22 = vunpack.i.l.bf16 %v17124_v21  ;;  %v17872_v5 = vld [vmem:[%s23664_s2 + $0x1048] sm:$0xff]  }
0x13c3   : > { %v10104_v35 = vrot.slane %v9937_v28, 2  ;;  %v10105_v18 = vrot.slane %v9940_v62, 3  ;;  %v17119_v20 = vpop.permute.xlu1 %17118  ;;  %v9961_v59 = vsel %vm761_vm12, %v9952_v2, %v22692_v23  ;;  %v10111_v19 = vrot.slane %v9954_v17, 2 }
0x13c4   : > { %v9851_v37 = vsel %vm659_vm11, %v9844_v52, %v17125_v22  ;;  %v9852_v3 = vsel %vm659_vm11, %v9845_v33, %v17126_v24  ;;  %v17121_v13 = vunpack.i.h.bf16 %v17119_v20  ;;  %v17120_v4 = vunpack.i.l.bf16 %v17119_v20  ;;  %10092 = vmatprep.mubr.bf16.mxu1 %v9961_v59 }
0x13c5   : > { %v9859_v45 = vpack.c.bf16 %v9852_v3, %v9851_v37  ;;  %v10112_v38 = vrot.slane %v9957_v57, 3  ;;  %v17134_v51 = vpop.permute.xlu0 %17133  ;;  %v9931_v31 = vrot.slane %v9929_v26, 6  ;;  %v9934_v11 = vrot.slane %v9932_v48, 7  ;;  %v17874_v37 = vld [vmem:[%s23664_s2 + $0x1008] sm:$0xff]  }
0x13c6   : > { %v9823_v9 = vsel %vm651_vm10, %v9816_v29, %v17120_v4  ;;  %v9824_v41 = vsel %vm651_vm10, %v9817_v6, %v17121_v13  ;;  %v17136_v49 = vunpack.i.h.bf16 %v17134_v51  ;;  %v17135_v46 = vunpack.i.l.bf16 %v17134_v51 }
0x13c7   : > { %v10297_v40 = vshrl.u32 %v9859_v45, 16  ;;  %v10300_v32 = vshll.u32 %v9859_v45, 16  ;;  %v10113_v2 = vor.u32 %v10112_v38, %v10111_v19  ;;  %v17129_v14 = vpop.permute.xlu1 %17128  ;;  %v9935_v42 = vor.u32 %v9934_v11, %v9931_v31  ;;  %v17876_v31 = vld [vmem:[%s23664_s2 + $0x1050] sm:$0xff]  }
0x13c8   : > { %v9818_v30 = vsel %vm643_vm9, %v22343_v43, %v17136_v49  ;;  %v9839_v1 = vsel %vm643_vm9, %v22585_v27, %v17135_v46  ;;  %v17131_v17 = vunpack.i.h.bf16 %v17129_v14  ;;  %v17130_v26 = vunpack.i.l.bf16 %v17129_v14  ;;  %v17871_v43 = vld [vmem:[%s23664_s2 + $0x1080] sm:$0xff]   ;;  %v17877_v11 = vld [vmem:[%s23664_s2 + $0x10d0] sm:$0xff]  }
0x13c9   : > { %v10114_v48 = vsel %vm935_vm13, %v10110_v56, %v10113_v2  ;;  %v9939_v57 = vrot.slane %v9937_v28, 6  ;;  %v9942_v7 = vrot.slane %v9940_v62, 7  ;;  %v10103_v36 = vor.u32 %v22686_v34, %v22684_v12  ;;  %v17144_v8 = vpop.permute.xlu0 %17143  ;;  %v17873_v12 = vld [vmem:[%s23664_s2 + $0x10c8] sm:$0xff]  }
0x13ca   : > { %10245 = vmatprep.mubr.bf16.mxu0 %v10114_v48  ;;  %v9830_v60 = vsel %vm659_vm11, %v9823_v9, %v17130_v26  ;;  %v9831_v39 = vsel %vm659_vm11, %v9824_v41, %v17131_v17  ;;  %v10106_v58 = vor.u32 %v10105_v18, %v10104_v35  ;;  %v17146_v27 = vunpack.i.h.bf16 %v17144_v8  ;;  %v17875_v35 = vld [vmem:[%s23664_s2 + $0x1088] sm:$0xff]   ;;  %v17880_v26 = vld [vmem:[%s23664_s2 + $0x1058] sm:$0xff]  }
0x13cb   : > { %v9858_v15 = vpack.c.bf16 %v9831_v39, %v9830_v60  ;;  %v9943_v10 = vor.u32 %v9942_v7, %v9939_v57  ;;  %v17145_v63 = vunpack.i.l.bf16 %v17144_v8  ;;  %v17139_v34 = vpop.permute.xlu1 %17138  ;;  %v10299_v52 = vrot.slane %v10297_v40, 2  ;;  %v17883_v60 = vld [vmem:[%s23664_s2 + $0x1098] sm:$0xff]  }
0x13cc   : > { %v10107_v33 = vsel %vm935_vm13, %v10103_v36, %v10106_v58  ;;  %v17141_v25 = vunpack.i.h.bf16 %v17139_v34  ;;  %v17140_v28 = vunpack.i.l.bf16 %v17139_v34  ;;  %v10302_v62 = vrot.slane %v10300_v32, 3  ;;  %v17889_v34 = vld [vmem:[%s23664_s2 + $0x10e8] sm:$0xff]  }
0x13cd   : > { %v10288_v21 = vshrl.u32 %v9858_v15, 16  ;;  %v10291_v56 = vshll.u32 %v9858_v15, 16  ;;  %v9944_v6 = vsel %vm761_vm12, %v9935_v42, %v9943_v10  ;;  %10246 = vmatmul.mubr.bf16.vlgmr.msra.gmra.mrb[104].mxu0 %v10107_v33  ;;  %v10483_v29 = vrot.slane %v10297_v40, 6  ;;  %v17879_v40 = vld [vmem:[%s23664_s2 + $0x1090] sm:$0xff]   ;;  %v17884_v15 = vld [vmem:[%s23664_s2 + $0x1060] sm:$0xff]   ;;  %v17891_v33 = vld [vmem:[%s23664_s2 + $0x10a8] sm:$0xff]  }
0x13ce   : > { %10093 = vmatmul.mubr.bf16.vlgmr.msra.gmra.mrb[96].mxu1 %v9944_v6  ;;  %15803 = vmatpush3.bf16.msra.mxu0 %v17871_v43  ;;  %v9825_v24 = vsel %vm651_vm10, %v9818_v30, %v17141_v25  ;;  %v9846_v22 = vsel %vm651_vm10, %v9839_v1, %v17140_v28  ;;  %v10303_v18 = vor.u32 %v10302_v62, %v10299_v52  ;;  %v10484_v20 = vrot.slane %v10300_v32, 7  ;;  %v17878_v42 = vld [vmem:[%s23664_s2 + $0x1010] sm:$0xff]   ;;  %v17881_v30 = vld [vmem:[%s23664_s2 + $0x10d8] sm:$0xff]   ;;  %v17885_v43 = vld [vmem:[%s23664_s2 + $0x10e0] sm:$0xff]  }
0x13cf   : > { %15781 = vmatpush3.bf16.msra.mxu1 %v17870_v16  ;;  %15804 = vmatprep.subr.bf16.mxu0 %v17873_v12  ;;  %v9832_v59 = vsel %vm659_vm11, %v9825_v24, %v17146_v27  ;;  %v9853_v19 = vsel %vm659_vm11, %v9846_v22, %v17145_v63  ;;  %v10290_v3 = vrot.slane %v10288_v21, 2  ;;  %v10293_v13 = vrot.slane %v10291_v56, 3  ;;  %v17887_v63 = vld [vmem:[%s23664_s2 + $0x10a0] sm:$0xff]   ;;  %v17888_v52 = vld [vmem:[%s23664_s2 + $0x1068] sm:$0xff]   ;;  %v17893_v25 = vld [vmem:[%s23664_s2 + $0x10f0] sm:$0xff]  }
0x13d0   : > { %15782 = vmatprep.subr.bf16.mxu1 %v17872_v5  ;;  %v9860_v4 = vpack.c.bf16 %v9832_v59, %v9832_v59  ;;  %v9861_v45 = vpack.c.bf16 %v9853_v19, %v9853_v19  ;;  %v10304_v38 = vsel %vm935_vm13, %v10113_v2, %v10303_v18  ;;  %v10485_v51 = vor.u32 %v10484_v20, %v10483_v29  ;;  %v17886_v12 = vld [vmem:[%s23664_s2 + $0x1020] sm:$0xff]   ;;  %v17890_v5 = vld [vmem:[%s23664_s2 + $0x1028] sm:$0xff]   ;;  %v17892_v28 = vld [vmem:[%s23664_s2 + $0x1070] sm:$0xff]  }
0x13d1   : > { %10435 = vmatprep.mubr.bf16.mxu1 %v10304_v38  ;;  %v10294_v9 = vor.u32 %v10293_v13, %v10290_v3  ;;  %v10479_v41 = vrot.slane %v10288_v21, 6  ;;  %v10480_v49 = vrot.slane %v10291_v56, 7  ;;  %v17895_v62 = vld [vmem:[%s23664_s2 + $0x10b0] sm:$0xff]   ;;  %v17897_v56 = vld [vmem:[%s23664_s2 + $0x10f8] sm:$0xff]   ;;  %v17900_v22 = vld [vmem:[%s23664_s2 + $0x1140] sm:$0xff]  }
0x13d2   : > { %15805 = vmatpush3.bf16.msra.mxu0 %v17875_v35  ;;  %v10486_v46 = vsel %vm761_vm12, %v22692_v23, %v10485_v51  ;;  %v10671_v32 = vshrl.u32 %v9861_v45, 16  ;;  %v10674_v2 = vshll.u32 %v9861_v45, 16  ;;  %v10662_v14 = vshrl.u32 %v9860_v4, 16  ;;  %v17894_v21 = vld [vmem:[%s23664_s2 + $0x1030] sm:$0xff]   ;;  %v17896_v6 = vld [vmem:[%s23664_s2 + $0x1078] sm:$0xff]   ;;  %v17902_v35 = vld [vmem:[%s23665_s3 + $0x180] sm:$0xff]  }
0x13d3   : > { %15783 = vmatpush3.bf16.msra.mxu1 %v17874_v37  ;;  %10617 = vmatprep.mubr.bf16.mxu0 %v10486_v46  ;;  %v10295_v1 = vsel %vm935_vm13, %v10106_v58, %v10294_v9  ;;  %v10481_v23 = vor.u32 %v10480_v49, %v10479_v41  ;;  %v10665_v17 = vshll.u32 %v9860_v4, 16  ;;  %v17882_v58 = vld [vmem:[%s23664_s2 + $0x1018] sm:$0xff]   ;;  %v17903_v20 = vld [vmem:[%s23664_s2 + $0x1148] sm:$0xff]   ;;  %v17906_v37 = vld [vmem:[%s23664_s2 + $0x1150] sm:$0xff]  }
0x13d4   : > { %15784 = vmatprep.subr.bf16.mxu1 %v17876_v31  ;;  %15806 = vmatprep.subr.bf16.mxu0 %v17877_v11  ;;  %v10673_v48 = vrot.slane %v10671_v32, 2  ;;  %v10676_v57 = vrot.slane %v10674_v2, 3  ;;  %v10664_v7 = vrot.slane %v10662_v14, 2  ;;  %v17899_v29 = vld [vmem:[%s23664_s2 + $0x10b8] sm:$0xff]   ;;  %v17905_v59 = vld [vmem:[%s23665_s3 + $0x188] sm:$0xff]   ;;  %v17908_v3 = vld [vmem:[%s23665_s3 + $0x190] sm:$0xff]  }
0x13d5   : > { %v10482_v36 = vsel %vm761_vm12, %v9943_v10, %v10481_v23  ;;  %v10667_v8 = vrot.slane %v10665_v17, 3  ;;  %v17898_v24 = vld [vmem:[%s23664_s2 + $0x1038] sm:$0xff]   ;;  %v17904_v19 = vld [vmem:[%s23664_s2 + $0x1108] sm:$0xff]   ;;  %v17907_v13 = vld [vmem:[%s23664_s2 + $0x1110] sm:$0xff]  }
0x13d6   : > { %15807 = vmatpush3.bf16.msra.mxu0 %v17879_v40  ;;  %v10677_v39 = vor.u32 %v10676_v57, %v10673_v48  ;;  %v17909_v4 = vld [vmem:[%s23664_s2 + $0x1158] sm:$0xff]   ;;  %v17912_v51 = vld [vmem:[%s23664_s2 + $0x1160] sm:$0xff]   ;;  %v17917_v41 = vld [vmem:[%s23665_s3 + $0x1a8] sm:$0xff]  }
0x13d7   : > { %15785 = vmatpush3.bf16.msra.mxu1 %v17878_v42  ;;  %15808 = vmatprep.subr.bf16.mxu0 %v17881_v30  ;;  %v10668_v27 = vor.u32 %v10667_v8, %v10664_v7  ;;  %v17911_v45 = vld [vmem:[%s23665_s3 + $0x198] sm:$0xff]   ;;  %v17914_v31 = vld [vmem:[%s23665_s3 + $0x1a0] sm:$0xff]   ;;  %v17916_v49 = vld [vmem:[%s23664_s2 + $0x1128] sm:$0xff]   ;;  %v23683_v30 = vpack.c.bf16 %v22279_v44, %v22277_v47 }
0x13d8   : > { %15786 = vmatprep.subr.bf16.mxu1 %v17880_v26  ;;  %v10678_v10 = vsel %vm935_vm13, %v10303_v18, %v10677_v39  ;;  %v17901_v18 = vld [vmem:[%s23664_s2 + $0x1100] sm:$0xff]   ;;  %v17910_v38 = vld [vmem:[%s23664_s2 + $0x1118] sm:$0xff]   ;;  %v17918_v46 = vld [vmem:[%s23664_s2 + $0x1170] sm:$0xff]  }
0x13d9   : > { %v22775_v16 = vsel %vm935_vm13, %v10294_v9, %v10668_v27  ;;  %v17913_v11 = vld [vmem:[%s23664_s2 + $0x1120] sm:$0xff]   ;;  %v17915_v9 = vld [vmem:[%s23664_s2 + $0x1168] sm:$0xff]   ;;  %v17920_v40 = vld [vmem:[%s23665_s3 + $0x1b0] sm:$0xff]  }
0x13da   : > { %15809 = vmatpush3.bf16.msra.mxu0 %v17883_v60  ;;  %v17919_v32 = vld [vmem:[%s23664_s2 + $0x1130] sm:$0xff]   ;;  %v17921_v2 = vld [vmem:[%s23664_s2 + $0x1178] sm:$0xff]   ;;  %v17925_v23 = vld [vmem:[%s23663_s1 + $0x1c8] sm:$0xff]  }
0x13db   : > { %15787 = vmatpush3.bf16.msra.mxu1 %v17882_v58  ;;  %15810 = vmatprep.subr.bf16.mxu0 %v17885_v43  ;;  %v17923_v14 = vld [vmem:[%s23665_s3 + $0x1b8] sm:$0xff]   ;;  %v17926_v47 = vld [vmem:[%s23663_s1 + $0x1d0] sm:$0xff]   ;;  %v17928_v17 = vld [vmem:[%s23663_s1 + $0x1e0] sm:$0xff]  }
0x13dc   : > { %15788 = vmatprep.subr.bf16.mxu1 %v17884_v15  ;;  %v17922_v42 = vld [vmem:[%s23664_s2 + $0x1138] sm:$0xff]   ;;  %v17929_v26 = vld [vmem:[%s23663_s1 + $0x1e8] sm:$0xff]   ;;  %v17930_v48 = vld [vmem:[%s23663_s1 + $0x1f0] sm:$0xff]  }
0x13dd   : > { %v17927_v44 = vld [vmem:[%s23663_s1 + $0x1d8] sm:$0xff]  }
0x13de   : > { %15811 = vmatpush3.bf16.msra.mxu0 %v17887_v63 }
0x13df   : > { %15789 = vmatpush3.bf16.msra.mxu1 %v17886_v12  ;;  %15812 = vmatprep.subr.bf16.mxu0 %v17889_v34 }
0x13e0   : > { %15790 = vmatprep.subr.bf16.mxu1 %v17888_v52 }
0x13e2   : > { %15813 = vmatpush3.bf16.msra.mxu0 %v17891_v33 }
0x13e3   : > { %15791 = vmatpush3.bf16.msra.mxu1 %v17890_v5  ;;  %15814 = vmatprep.subr.bf16.mxu0 %v17893_v25 }
0x13e4   : > { %15792 = vmatprep.subr.bf16.mxu1 %v17892_v28 }
0x13e6   : > { %15815 = vmatpush3.bf16.msra.mxu0 %v17895_v62 }
0x13e7   : > { %15793 = vmatpush3.bf16.msra.mxu1 %v17894_v21  ;;  %15816 = vmatprep.subr.bf16.mxu0 %v17897_v56 }
0x13e8   : > { %15794 = vmatprep.subr.bf16.mxu1 %v17896_v6 }
0x13ea   : > { %15817 = vmatpush3.bf16.msra.mxu0 %v17899_v29 }
0x13eb   : > { %15795 = vmatpush3.bf16.msra.mxu1 %v17898_v24  ;;  %16283 = vmatprep.subr.bf16.mxu0 %v23675_v0 }
0x13ec   : > { %15824 = vmatprep.subr.bf16.mxu1 %v17900_v22 }
0x13ed   : > { %10618 = vmatmul.mubr.bf16.vlgmr.msra.gmra.mrb[108].mxu0 %v10482_v36 }
0x13ee   : > { %10436 = vmatmul.mubr.bf16.vlgmr.msra.gmra.mrb[100].mxu1 %v10295_v1  ;;  %16284 = vmatpush3.bf16.msra.mxu0 %v17902_v35  ;;  %v17924_v1 = vld [vmem:[%s23663_s1 + $0x1c0] sm:$0xff]  }
0x13ef   : > { %15825 = vmatpush3.bf16.msra.mxu1 %v17901_v18  ;;  %10809 = vmatprep.mubr.bf16.mxu1 %v10678_v10 }
0x13f0   : > { %15826 = vmatprep.subr.bf16.mxu1 %v17903_v20  ;;  %16285 = vmatprep.subr.bf16.mxu0 %v23675_v0 }
0x13f1   : > { %16299 = vmatprep.mubr.msk.bf16.mxu0 %vm18101_vm14, %v23675_v0 }
0x13f2   : > { %16286 = vmatpush3.bf16.msra.mxu0 %v17905_v59  ;;  %v17931_v59 = vld [vmem:[%s23663_s1 + $0x1f8] sm:$0xff]  }
0x13f3   : > { %15827 = vmatpush3.bf16.msra.mxu1 %v17904_v19  ;;  %16287 = vmatprep.subr.bf16.mxu0 %v23675_v0 }
0x13f4   : > { %15828 = vmatprep.subr.bf16.mxu1 %v17906_v37 }
0x13f6   : > { %16288 = vmatpush3.bf16.msra.mxu0 %v17908_v3 }
0x13f7   : > { %15829 = vmatpush3.bf16.msra.mxu1 %v17907_v13  ;;  %16289 = vmatprep.subr.bf16.mxu0 %v23675_v0 }
0x13f8   : > { %15830 = vmatprep.subr.bf16.mxu1 %v17909_v4 }
0x13fa   : > { %16290 = vmatpush3.bf16.msra.mxu0 %v17911_v45 }
0x13fb   : > { %15831 = vmatpush3.bf16.msra.mxu1 %v17910_v38  ;;  %16291 = vmatprep.subr.bf16.mxu0 %v23675_v0 }
0x13fc   : > { %15832 = vmatprep.subr.bf16.mxu1 %v17912_v51 }
0x13fe   : > { %16292 = vmatpush3.bf16.msra.mxu0 %v17914_v31 }
0x13ff   : > { %15833 = vmatpush3.bf16.msra.mxu1 %v17913_v11  ;;  %16293 = vmatprep.subr.bf16.mxu0 %v23675_v0 }
0x1400   : > { %15834 = vmatprep.subr.bf16.mxu1 %v17915_v9 }
0x1402   : > { %16294 = vmatpush3.bf16.msra.mxu0 %v17917_v41 }
0x1403   : > { %15835 = vmatpush3.bf16.msra.mxu1 %v17916_v49  ;;  %16295 = vmatprep.subr.bf16.mxu0 %v23675_v0 }
0x1404   : > { %15836 = vmatprep.subr.bf16.mxu1 %v17918_v46 }
0x1406   : > { %16296 = vmatpush3.bf16.msra.mxu0 %v17920_v40 }
0x1407   : > { %15837 = vmatpush3.bf16.msra.mxu1 %v17919_v32  ;;  %16297 = vmatprep.subr.bf16.mxu0 %v23675_v0 }
0x1408   : > { %15838 = vmatprep.subr.bf16.mxu1 %v17921_v2 }
0x140a   : > { %16298 = vmatpush3.bf16.msra.mxu0 %v17923_v14 }
0x140b   : > { %15839 = vmatpush3.bf16.msra.mxu1 %v17922_v42 }
0x140c   : > { %16303 = vmatprep.subr.bf16.mxu1 %v17924_v1 }
0x140d   : > { %16300 = vmatmul.mubr.bf16.vlgmr.msra.gmra.mrb[112].mxu0 %v23683_v30 }
0x140e   : > { %10810 = vmatmul.mubr.bf16.vlgmr.msra.gmra.mrb[104].mxu1 %v22775_v16 }
0x140f   : > { %16319 = vmatprep.mubr.bf16.mxu1 %v23677_v61  ;;  %16304 = vmatpush3.bf16.msra.mxu1 %v17924_v1 }
0x1410   : > { %16305 = vmatprep.subr.bf16.mxu1 %v17925_v23 }
0x1413   : > { %16306 = vmatpush3.bf16.msra.mxu1 %v17925_v23 }
0x1414   : > { %16307 = vmatprep.subr.bf16.mxu1 %v17926_v47 }
0x1417   : > { %16308 = vmatpush3.bf16.msra.mxu1 %v17926_v47 }
0x1418   : > { %16309 = vmatprep.subr.bf16.mxu1 %v17927_v44 }
0x141b   : > { %16310 = vmatpush3.bf16.msra.mxu1 %v17927_v44 }
0x141c   : > { %16311 = vmatprep.subr.bf16.mxu1 %v17928_v17 }
0x141f   : > { %16312 = vmatpush3.bf16.msra.mxu1 %v17928_v17 }
0x1420   : > { %16313 = vmatprep.subr.bf16.mxu1 %v17929_v26 }
0x1423   : > { %16314 = vmatpush3.bf16.msra.mxu1 %v17929_v26 }
0x1424   : > { %16315 = vmatprep.subr.bf16.mxu1 %v17930_v48 }
0x1427   : > { %16316 = vmatpush3.bf16.msra.mxu1 %v17930_v48 }
0x1428   : > { %16317 = vmatprep.subr.bf16.mxu1 %v17931_v59 }
0x142b   : > { %16318 = vmatpush3.bf16.msra.mxu1 %v17931_v59 }
0x14a0   : > { %v15774_v57 = vpop.f32.mrb[104].mxu0 }
0x14a1   : > { %v15752_v7 = vpop.f32.mrb[96].mxu1  ;;  %v15775_v36 = vpop.f32.mrb[105].mxu0 }
0x14a2   : > { %v15753_v8 = vpop.f32.mrb[97].mxu1  ;;  %v15776_v60 = vadd.f32 %v15775_v36, %v15774_v57  ;;  %v15777_v39 = vpop.f32.mrb[106].mxu0 }
0x14a3   : > { %v15754_v58 = vadd.f32 %v15753_v8, %v15752_v7  ;;  %v15755_v43 = vpop.f32.mrb[98].mxu1  ;;  %v15778_v27 = vpop.f32.mrb[107].mxu0 }
0x14a4   : > { %v15756_v15 = vpop.f32.mrb[99].mxu1  ;;  %v15779_v10 = vadd.f32 %v15778_v27, %v15777_v39 }
0x14a5   : > { %v10248_v16 = vadd.f32 %v15776_v60, %v15754_v58  ;;  %v15757_v63 = vadd.f32 %v15756_v15, %v15755_v43 }
0x14a7   : > { %v10251_v12 = vadd.f32 %v15779_v10, %v15757_v63 }
0x14c0   : > { %v15818_v34 = vpop.f32.mrb[108].mxu0 }
0x14c1   : > { %v15796_v52 = vpop.f32.mrb[100].mxu1  ;;  %v15819_v33 = vpop.f32.mrb[109].mxu0 }
0x14c2   : > { %v15797_v5 = vpop.f32.mrb[101].mxu1  ;;  %v15820_v25 = vadd.f32 %v15819_v33, %v15818_v34  ;;  %v15821_v28 = vpop.f32.mrb[110].mxu0  ;;  %v17932_v34 = vld [vmem:[%s23664_s2 + $0x1240] sm:$0xff]  }
0x14c3   : > { %v15798_v62 = vadd.f32 %v15797_v5, %v15796_v52  ;;  %v15799_v21 = vpop.f32.mrb[102].mxu1  ;;  %v15822_v56 = vpop.f32.mrb[111].mxu0  ;;  %15867 = vmatprep.subr.bf16.mxu0 %v17932_v34  ;;  %v17942_v34 = vld [vmem:[%s23664_s2 + $0x1210] sm:$0xff]  }
0x14c4   : > { %v15800_v6 = vpop.f32.mrb[103].mxu1  ;;  %v15823_v29 = vadd.f32 %v15822_v56, %v15821_v28 }
0x14c5   : > { %v10444_v24 = vadd.f32 %v15798_v62, %v10248_v16  ;;  %v15801_v22 = vadd.f32 %v15800_v6, %v15799_v21  ;;  %v17933_v62 = vld [vmem:[%s23664_s2 + $0x11c0] sm:$0xff]  }
0x14c6   : > { %15889 = vmatprep.subr.bf16.mxu1 %v17933_v62  ;;  %v17943_v62 = vld [vmem:[%s23664_s2 + $0x1190] sm:$0xff]  }
0x14c7   : > { %v10626_v35 = vadd.f32 %v15820_v25, %v10444_v24  ;;  %v10445_v18 = vadd.f32 %v15801_v22, %v10251_v12  ;;  %v17934_v24 = vld [vmem:[%s23664_s2 + $0x1200] sm:$0xff]  }
0x14c8   : > { %v17935_v22 = vld [vmem:[%s23664_s2 + $0x1180] sm:$0xff]   ;;  %15868 = vmatpush3.bf16.msra.mxu0 %v17934_v24 }
0x14c9   : > { %v10627_v20 = vadd.f32 %v15823_v29, %v10445_v18 }
0x14e0   : > { %v10946_v19 = vpop.f32.mrb[112].mxu0 }
0x14e1   : > { %v15840_v37 = vpop.f32.mrb[104].mxu1  ;;  %10955 = vrot.lane.b32.xlu1 %v10946_v19, %s18100_s26  ;;  %v16301_v3 = vpop.f32.mrb[113].mxu0 }
0x14e2   : > { %v15841_v13 = vpop.f32.mrb[105].mxu1  ;;  %v10949_v4 = vpop.f32.mrb[114].mxu0 }
0x14e3   : > { %v15842_v45 = vadd.f32 %v15841_v13, %v15840_v37  ;;  %v15843_v38 = vpop.f32.mrb[106].mxu1  ;;  %10957 = vrot.lane.b32.xlu0 %v10949_v4, %s18100_s26  ;;  %v16302_v51 = vpop.f32.mrb[115].mxu0  ;;  %v17936_v4 = vld [vmem:[%s23664_s2 + $0x1248] sm:$0xff]  }
0x14e4   : > { %v15844_v31 = vpop.f32.mrb[107].mxu1  ;;  %15869 = vmatprep.subr.bf16.mxu0 %v17936_v4 }
0x14e5   : > { %v10818_v11 = vadd.f32 %v15842_v45, %v10626_v35  ;;  %v15845_v9 = vadd.f32 %v15844_v31, %v15843_v38  ;;  %v17937_v45 = vld [vmem:[%s23664_s2 + $0x11c8] sm:$0xff]  }
0x14e7   : > { %v10819_v41 = vadd.f32 %v15845_v9, %v10627_v20 }
0x1553   : > { %v10956_v49 = vpop.permute.xlu1 %10955 }
0x1554   : > { %v10961_v46 = vsel %vm659_vm11, %v10818_v11, %v10956_v49 }
0x1555   : > { %v10963_v40 = vmax.f32 %v10961_v46, 0.0  ;;  %v10958_v32 = vpop.permute.xlu0 %10957 }
0x1556   : > { %v10962_v2 = vsel %vm659_vm11, %v10819_v41, %v10958_v32  ;;  %v17938_v32 = vld [vmem:[%s23664_s2 + $0x1208] sm:$0xff]  }
0x1557   : > { %v12351_v14 = vrot.slane %v10963_v40, 7  ;;  %v10964_v42 = vmax.f32 %v10962_v2, 0.0  ;;  %v10976_v30 = vpack.c.bf16 %v10963_v40, %v23675_v0  ;;  %v12360_v1 = vrot.slane %v10963_v40, 1  ;;  %v17939_v2 = vld [vmem:[%s23664_s2 + $0x1188] sm:$0xff]   ;;  %15870 = vmatpush3.bf16.msra.mxu0 %v17938_v32  ;;  %v17947_v32 = vld [vmem:[%s23664_s2 + $0x1198] sm:$0xff]  }
0x1559   : > { %v12352_v23 = vsel %vm608_vm4, %v18572_v50, %v12351_v14  ;;  %v12353_v47 = vrot.slane %v10964_v42, 7  ;;  %v12361_v44 = vrot.slane %v10964_v42, 1  ;;  %16320 = vmatmul.mubr.bf16.vlgmr.msra.gmra.mrb[108].mxu1 %v10976_v30  ;;  %v10977_v17 = vpack.c.bf16 %v23675_v0, %v10964_v42 }
0x155a   : > { %v12357_v26 = vsel %vm1655_vm7, -inf, %v12352_v23  ;;  %15890 = vmatpush3.bf16.msra.mxu1 %v17935_v22 }
0x155b   : > { %v12369_v48 = vmax.f32 %v12357_v26, %v10963_v40  ;;  %v12354_v57 = vsel %vm608_vm4, %v12351_v14, %v12353_v47  ;;  %16323 = vmatprep.mubr.bf16.mxu1 %v10977_v17  ;;  %v12362_v7 = vsel %vm413_vm1, %v12360_v1, %v12361_v44  ;;  %v12364_v36 = vsel %vm413_vm1, %v12361_v44, %v18575_v53 }
0x155c   : > { %v12370_v8 = vmax.f32 %v12354_v57, %v10964_v42  ;;  %v12368_v50 = vsel %vm1670_vm8, -inf, %v12364_v36  ;;  %15891 = vmatprep.subr.bf16.mxu1 %v17937_v45  ;;  %v17940_v57 = vld [vmem:[%s23664_s2 + $0x1250] sm:$0xff]   ;;  %v17944_v45 = vld [vmem:[%s23664_s2 + $0x1258] sm:$0xff]  }
0x155d   : > { %v22946_v60 = vmax.f32 %v12369_v48, %v12362_v7  ;;  %15871 = vmatprep.subr.bf16.mxu0 %v17940_v57 }
0x155e   : > { %v22948_v39 = vmax.f32 %v12370_v8, %v12368_v50  ;;  %15892 = vmatpush3.bf16.msra.mxu1 %v17939_v2  ;;  %15872 = vmatpush3.bf16.msra.mxu0 %v17942_v34 }
0x155f   : > { %15873 = vmatprep.subr.bf16.mxu0 %v17944_v45  ;;  %v17951_v45 = vld [vmem:[%s23664_s2 + $0x11a0] sm:$0xff]  }
0x1560   : > { %v12373_v54 = vpack.c.bf16 %v22948_v39, %v22946_v60 }
0x1561   : > { %16324 = vmatmul.mubr.bf16.gmra.mrb[112].mxu1 %v23677_v61 }
0x162c   : > { %v22953_v58 = vpop.f32.mrb[108].mxu1 }
0x162d   : > { %v22955_v43 = vpop.f32.mrb[109].mxu1  ;;  %v11238_v27 = vrot.slane %v22953_v58, 5  ;;  %v11119_v53 = vrot.slane %v22953_v58, 1  ;;  %v11272_v55 = vrot.slane %v22953_v58, 6  ;;  %v11153_v15 = vrot.slane %v22953_v58, 2 }
0x162e   : > { %v11116_v10 = vrot.slane %v22955_v43, 1  ;;  %v11150_v16 = vrot.slane %v22955_v43, 2  ;;  %v22963_v63 = vpop.f32.mrb[110].mxu1  ;;  %v11306_v61 = vrot.slane %v22953_v58, 7  ;;  %v11185_v12 = vrot.slane %v22953_v58, 3 }
0x162f   : > { %v22970_v52 = vpop.f32.mrb[111].mxu1  ;;  %v11240_v33 = vrot.slane %v22963_v63, 5  ;;  %v11121_v5 = vrot.slane %v22963_v63, 1  ;;  %v11274_v25 = vrot.slane %v22963_v63, 6  ;;  %v11155_v28 = vrot.slane %v22963_v63, 2 }
0x1630   : > { %v11237_v21 = vrot.slane %v22970_v52, 5  ;;  %v11117_v56 = vrot.slane %v22970_v52, 1  ;;  %v11271_v6 = vrot.slane %v22970_v52, 6  ;;  %v11151_v29 = vrot.slane %v22970_v52, 2 }
0x1631   : > { %v22990_v35 = vsel %vm538_vm0, %v11238_v27, %v11240_v33  ;;  %v22993_v18 = vsel %vm413_vm1, %v11119_v53, %v11121_v5  ;;  %v22996_v20 = vsel %vm573_vm2, %v11272_v55, %v11274_v25  ;;  %v11305_v59 = vrot.slane %v22970_v52, 7 }
0x1632   : > { %v11239_v19 = vsel %vm538_vm0, %v11237_v21, %v11238_v27  ;;  %v11118_v37 = vsel %vm413_vm1, %v11116_v10, %v11117_v56  ;;  %v11120_v3 = vsel %vm413_vm1, %v11117_v56, %v11119_v53  ;;  %v11273_v13 = vsel %vm573_vm2, %v11271_v6, %v11272_v55  ;;  %v17941_v53 = vld [vmem:[%s23664_s2 + $0x11d0] sm:$0xff]  }
0x1633   : > { %v17147_v38 = vpack.i.bf16 %v11239_v19, %v11237_v21  ;;  %v17152_v51 = vpack.i.bf16 %v11120_v3, %v11118_v37  ;;  %v17157_v31 = vpack.i.bf16 %v11273_v13, %v11271_v6  ;;  %v23010_v11 = vsel %vm448_vm3, %v11150_v16, %v11151_v29  ;;  %15893 = vmatprep.subr.bf16.mxu1 %v17941_v53 }
0x1634   : > { %v23012_v9 = vpop.f32.mrb[112].mxu1  ;;  %v23015_v41 = vsel %vm448_vm3, %v11151_v29, %v11153_v15  ;;  %v11307_v49 = vsel %vm608_vm4, %v11305_v59, %v11306_v61  ;;  %v23021_v46 = vsel %vm448_vm3, %v11153_v15, %v11155_v28  ;;  %v11184_v40 = vrot.slane %v22970_v52, 3  ;;  %15894 = vmatpush3.bf16.msra.mxu1 %v17943_v62 }
0x1635   : > { %17148 = vrot.lane.b32.xlu1 %v17147_v38, %s18098_s10  ;;  %v23031_v14 = vpop.f32.mrb[113].mxu1  ;;  %v17162_v42 = vpack.i.bf16 %v23015_v41, %v23010_v11  ;;  %v23035_v30 = vpack.i.bf16 %v11307_v49, %v11305_v59  ;;  %v11308_v1 = vrot.slane %v22963_v63, 7  ;;  %v11246_v23 = vrot.slane %v23012_v9, 5  ;;  %v17945_v38 = vld [vmem:[%s23664_s2 + $0x11d8] sm:$0xff]  }
0x1636   : > { %v23039_v47 = vpop.f32.mrb[114].mxu1  ;;  %v11242_v44 = vrot.slane %v23031_v14, 5  ;;  %v11123_v17 = vrot.slane %v23031_v14, 1  ;;  %v11276_v26 = vrot.slane %v23031_v14, 6  ;;  %v11157_v48 = vrot.slane %v23031_v14, 2  ;;  %15895 = vmatprep.subr.bf16.mxu1 %v17945_v38  ;;  %v17952_v38 = vld [vmem:[%s23664_s2 + $0x1268] sm:$0xff]  }
0x1637   : > { %v11228_v7 = vrot.slane %v23039_v47, 4  ;;  %v11248_v36 = vrot.slane %v23039_v47, 5  ;;  %v11282_v8 = vrot.slane %v23039_v47, 6  ;;  %v11316_v50 = vrot.slane %v23039_v47, 7  ;;  %v23052_v27 = vpop.f32.mrb[115].mxu1  ;;  %v17959_v47 = vld [vmem:[%s23664_s2 + $0x11b0] sm:$0xff]  }
0x1638   : > { %v11243_v55 = vsel %vm538_vm0, %v11240_v33, %v11242_v44  ;;  %v11124_v15 = vsel %vm413_vm1, %v11121_v5, %v11123_v17  ;;  %v11277_v10 = vsel %vm573_vm2, %v11274_v25, %v11276_v26  ;;  %v23063_v16 = vsel %vm448_vm3, %v11155_v28, %v11157_v48  ;;  %15896 = vmatpush3.bf16.msra.mxu1 %v17947_v32  ;;  %v17953_v32 = vld [vmem:[%s23664_s2 + $0x11e8] sm:$0xff]  }
0x1639   : > { %17153 = vrot.lane.b32.xlu1 %v17152_v51, %s18098_s10  ;;  %v17177_v33 = vpack.i.bf16 %v11243_v55, %v22990_v35  ;;  %v17182_v5 = vpack.i.bf16 %v11124_v15, %v22993_v18  ;;  %v17187_v25 = vpack.i.bf16 %v11277_v10, %v22996_v20  ;;  %v17192_v28 = vpack.i.bf16 %v23063_v16, %v23021_v46  ;;  %v17946_v51 = vld [vmem:[%s23664_s2 + $0x1218] sm:$0xff]   ;;  %v17954_v46 = vld [vmem:[%s23664_s2 + $0x1228] sm:$0xff]  }
0x163a   : > { %v11186_v21 = vsel %vm483_vm5, %v11184_v40, %v11185_v12  ;;  %v23083_v56 = vsel %vm608_vm4, %v11306_v61, %v11308_v1  ;;  %v11310_v6 = vrot.slane %v23031_v14, 7  ;;  %v11244_v29 = vrot.slane %v23052_v27, 5  ;;  %15874 = vmatpush3.bf16.msra.mxu0 %v17946_v51  ;;  %v17955_v16 = vld [vmem:[%s23664_s2 + $0x11a8] sm:$0xff]  }
0x163b   : > { %17178 = vrot.lane.b32.xlu0 %v17177_v33, %s18098_s10  ;;  %v23088_v24 = vpack.i.bf16 %v11186_v21, %v11184_v40  ;;  %v11187_v22 = vrot.slane %v22963_v63, 3  ;;  %v11189_v35 = vrot.slane %v23031_v14, 3  ;;  %v11278_v18 = vrot.slane %v23052_v27, 6 }
0x163c   : > { %v23094_v61 = vsel %vm608_vm4, %v11308_v1, %v11310_v6  ;;  %v23097_v20 = vsel %vm538_vm0, %v11242_v44, %v11244_v29  ;;  %v23102_v59 = vsel %vm538_vm0, %v11244_v29, %v11246_v23  ;;  %v11280_v19 = vrot.slane %v23012_v9, 6 }
0x163d   : > { %17158 = vrot.lane.b32.xlu1 %v17157_v31, %s18099_s20  ;;  %v17197_v37 = vpack.i.bf16 %v23094_v61, %v23083_v56  ;;  %v17207_v3 = vpack.i.bf16 %v23102_v59, %v23097_v20  ;;  %v23113_v13 = vsel %vm483_vm5, %v11185_v12, %v11187_v22  ;;  %v23116_v4 = vsel %vm483_vm5, %v11187_v22, %v11189_v35  ;;  %v17961_v56 = vld [vmem:[%s23664_s2 + $0x11f8] sm:$0xff]   ;;  %v17964_v59 = vld [vmem:[%s23664_s2 + $0x12c0] sm:$0xff]  }
0x163e   : > { %v17202_v31 = vpack.i.bf16 %v23116_v4, %v23113_v13  ;;  %v23130_v12 = vsel %vm573_vm2, %v11276_v26, %v11278_v18  ;;  %v23133_v49 = vsel %vm573_vm2, %v11278_v18, %v11280_v19  ;;  %v11125_v40 = vrot.slane %v23052_v27, 1  ;;  %v17962_v61 = vld [vmem:[%s23664_s2 + $0x1238] sm:$0xff]  }
0x163f   : > { %17183 = vrot.lane.b32.xlu0 %v17182_v5, %s18098_s10  ;;  %v17217_v2 = vpack.i.bf16 %v23133_v49, %v23130_v12  ;;  %v11127_v1 = vrot.slane %v23012_v9, 1  ;;  %v11312_v44 = vrot.slane %v23052_v27, 7  ;;  %v11314_v26 = vrot.slane %v23012_v9, 7  ;;  %v17963_v20 = vld [vmem:[%s23664_s2 + $0x11b8] sm:$0xff]  }
0x1640   : > { %v23146_v57 = vsel %vm413_vm1, %v11123_v17, %v11125_v40  ;;  %v11159_v53 = vrot.slane %v23052_v27, 2  ;;  %v11161_v55 = vrot.slane %v23012_v9, 2  ;;  %v11249_v15 = vsel %vm538_vm0, %v11246_v23, %v11248_v36 }
0x1641   : > { %17163 = vrot.lane.b32.xlu1 %v17162_v42, %s18099_s20  ;;  %v23158_v10 = vsel %vm413_vm1, %v11125_v40, %v11127_v1  ;;  %v23161_v17 = vsel %vm608_vm4, %v11310_v6, %v11312_v44  ;;  %v23164_v34 = vsel %vm608_vm4, %v11312_v44, %v11314_v26  ;;  %v23166_v62 = vpack.i.bf16 %v11127_v1, %v11249_v15  ;;  %v17949_v6 = vld [vmem:[%s23664_s2 + $0x11e0] sm:$0xff]  }
0x1642   : > { %v17212_v23 = vpack.i.bf16 %v23158_v10, %v23146_v57  ;;  %v17227_v36 = vpack.i.bf16 %v23164_v34, %v23161_v17  ;;  %v23175_v11 = vsel %vm448_vm3, %v11157_v48, %v11159_v53  ;;  %v23178_v41 = vsel %vm448_vm3, %v11159_v53, %v11161_v55  ;;  %v17948_v48 = vld [vmem:[%s23664_s2 + $0x1260] sm:$0xff]   ;;  %15897 = vmatprep.subr.bf16.mxu1 %v17949_v6 }
0x1643   : > { %17188 = vrot.lane.b32.xlu0 %v17187_v25, %s18099_s20  ;;  %v17222_v42 = vpack.i.bf16 %v23178_v41, %v23175_v11  ;;  %v11191_v33 = vrot.slane %v23052_v27, 3  ;;  %v11193_v5 = vrot.slane %v23012_v9, 3  ;;  %v11317_v21 = vsel %vm608_vm4, %v11314_v26, %v11316_v50  ;;  %v17950_v25 = vld [vmem:[%s23664_s2 + $0x1220] sm:$0xff]   ;;  %15875 = vmatprep.subr.bf16.mxu0 %v17948_v48 }
0x1644   : > { %v11283_v29 = vsel %vm573_vm2, %v11280_v19, %v11282_v8  ;;  %v11218_v22 = vrot.slane %v22953_v58, 4  ;;  %v11217_v50 = vrot.slane %v22970_v52, 4  ;;  %v11220_v18 = vrot.slane %v22963_v63, 4  ;;  %15876 = vmatpush3.bf16.msra.mxu0 %v17950_v25  ;;  %15898 = vmatpush3.bf16.msra.mxu1 %v17951_v45 }
0x1645   : > { %17168 = vrot.lane.b32.xlu1 %v23035_v30, %s18100_s26  ;;  %v11192_v51 = vsel %vm483_vm5, %v11189_v35, %v11191_v33  ;;  %v11194_v8 = vsel %vm483_vm5, %v11191_v33, %v11193_v5  ;;  %v17247_v19 = vpack.i.bf16 %v11193_v5, %v11317_v21  ;;  %v17242_v40 = vpack.i.bf16 %v11161_v55, %v11283_v29  ;;  %v17957_v5 = vld [vmem:[%s23664_s2 + $0x11f0] sm:$0xff]  }
0x1646   : > { %v17232_v1 = vpack.i.bf16 %v11194_v8, %v11192_v51  ;;  %v23219_v44 = vsel %vm517_vm6, %v11217_v50, %v11218_v22  ;;  %v23222_v26 = vsel %vm517_vm6, %v11218_v22, %v11220_v18  ;;  %v11222_v30 = vrot.slane %v23031_v14, 4  ;;  %15877 = vmatprep.subr.bf16.mxu0 %v17952_v38  ;;  %15899 = vmatprep.subr.bf16.mxu1 %v17953_v32  ;;  %v17958_v21 = vld [vmem:[%s23664_s2 + $0x1230] sm:$0xff]  }
0x1647   : > { %17193 = vrot.lane.b32.xlu0 %v17192_v28, %s18099_s20  ;;  %v11226_v35 = vrot.slane %v23012_v9, 4  ;;  %v11224_v53 = vrot.slane %v23052_v27, 4  ;;  %v17956_v28 = vld [vmem:[%s23664_s2 + $0x1270] sm:$0xff]  }
0x1648   : > { %v23232_v55 = vsel %vm517_vm6, %v11220_v18, %v11222_v30  ;;  %15878 = vmatpush3.bf16.msra.mxu0 %v17954_v46  ;;  %15900 = vmatpush3.bf16.msra.mxu1 %v17955_v16 }
0x1649   : > { %17173 = vrot.lane.b32.xlu1 %v23088_v24, %s18100_s26  ;;  %v23237_v15 = vsel %vm517_vm6, %v11222_v30, %v11224_v53  ;;  %v23240_v33 = vsel %vm517_vm6, %v11224_v53, %v11226_v35  ;;  %v23254_v24 = vsel %vm517_vm6, %v11226_v35, %v11228_v7  ;;  %15879 = vmatprep.subr.bf16.mxu0 %v17956_v28  ;;  %v17960_v7 = vld [vmem:[%s23664_s2 + $0x1278] sm:$0xff]  }
0x164a   : > { %15901 = vmatprep.subr.bf16.mxu1 %v17957_v5 }
0x164b   : > { %17198 = vrot.lane.b32.xlu0 %v17197_v37, %s18100_s26  ;;  %v17965_v37 = vld [vmem:[%s23664_s2 + $0x1340] sm:$0xff]  }
0x164c   : > { %15880 = vmatpush3.bf16.msra.mxu0 %v17958_v21  ;;  %15902 = vmatpush3.bf16.msra.mxu1 %v17959_v47 }
0x164d   : > { %17208 = vrot.lane.b32.xlu1 %v17207_v3, %s18098_s10  ;;  %15881 = vmatprep.subr.bf16.mxu0 %v17960_v7 }
0x164e   : > { %15903 = vmatprep.subr.bf16.mxu1 %v17961_v56 }
0x164f   : > { %17203 = vrot.lane.b32.xlu0 %v17202_v31, %s18100_s26 }
0x1650   : > { %15882 = vmatpush3.bf16.msra.mxu0 %v17962_v61  ;;  %15904 = vmatpush3.bf16.msra.mxu1 %v17963_v20 }
0x1651   : > { %17218 = vrot.lane.b32.xlu1 %v17217_v2, %s18099_s20  ;;  %15911 = vmatprep.subr.bf16.mxu0 %v17964_v59 }
0x1652   : > { %15933 = vmatprep.subr.bf16.mxu1 %v17965_v37 }
0x1653   : > { %17213 = vrot.lane.b32.xlu0 %v17212_v23, %s18098_s10 }
0x1655   : > { %17228 = vrot.lane.b32.xlu1 %v17227_v36, %s18100_s26 }
0x1657   : > { %17223 = vrot.lane.b32.xlu0 %v17222_v42, %s18099_s20 }
0x1659   : > { %17238 = vrot.lane.b32.xlu1 %v23166_v62, %s18098_s10  ;;  %s14934_s10 = sshll.u32 %s18159_s25, 4  ;;  %s12613_s25 = scalar_lea.sflag [#allocation4], %s242_s17 }
0x165a   : > { %s23620_s9 = scalar_lea.hbm %s23668_s6, %s14934_s10 }
0x165b   : > { %17233 = vrot.lane.b32.xlu0 %v17232_v1, %s18100_s26 }
0x165d   : > { %17248 = vrot.lane.b32.xlu1 %v17247_v19, %s18100_s26 }
0x165f   : > { %17243 = vrot.lane.b32.xlu0 %v17242_v40, %s18099_s20  ;;  %s243_s20 = scalar_lea.vmem [#allocation3], %s242_s17 }
0x1660   : > { %s12625_s14 = sshll.u32 %s243_s20, 4  ;;  %s23622_s14 = int_to_ptr.vmem [resolvable:$true] %s12625_s14 }
0x1661   : > { %s18032_s11 = scalar_lea.vmem %s23622_s14, 16 }
0x1662   : > { %p18033_p11 = scmp.ne.s32.totalorder %s23622_s14, %s18032_s11 }
0x1664   : > { %p18034_p12 = pnand %p18033_p11, %p18176_p5 }
0x1666   : > { %p18035_p13 = pneg %p18034_p12 }
0x16a7   : > { %v17149_v3 = vpop.permute.xlu1 %17148 }
0x16a8   : > { %v17151_v49 = vunpack.i.h.bf16 %v17149_v3  ;;  %v17150_v2 = vunpack.i.l.bf16 %v17149_v3 }
0x16aa   : > { %v11360_v42 = vsel %vm643_vm9, %v11217_v50, %v17150_v2  ;;  %v11361_v48 = vsel %vm643_vm9, %v23219_v44, %v17151_v49 }
0x16ab   : > { %v17154_v13 = vpop.permute.xlu1 %17153 }
0x16ac   : > { %v17156_v57 = vunpack.i.h.bf16 %v17154_v13  ;;  %v17155_v10 = vunpack.i.l.bf16 %v17154_v13 }
0x16ad   : > { %v17179_v4 = vpop.permute.xlu0 %17178 }
0x16ae   : > { %v17180_v17 = vunpack.i.l.bf16 %v17179_v4  ;;  %v17181_v23 = vunpack.i.h.bf16 %v17179_v4  ;;  %v11340_v6 = vsel %vm643_vm9, %v22970_v52, %v17156_v57  ;;  %v11339_v25 = vsel %vm643_vm9, %v22955_v43, %v17155_v10 }
0x16af   : > { %v17159_v31 = vpop.permute.xlu1 %17158 }
0x16b0   : > { %v17161_v36 = vunpack.i.h.bf16 %v17159_v31  ;;  %v17160_v62 = vunpack.i.l.bf16 %v17159_v31  ;;  %v11362_v29 = vsel %vm643_vm9, %v23222_v26, %v17180_v17  ;;  %v11363_v40 = vsel %vm643_vm9, %v23232_v55, %v17181_v23 }
0x16b1   : > { %v17184_v12 = vpop.permute.xlu0 %17183 }
0x16b2   : > { %v17186_v11 = vunpack.i.h.bf16 %v17184_v12  ;;  %v17185_v22 = vunpack.i.l.bf16 %v17184_v12  ;;  %v11368_v32 = vsel %vm651_vm10, %v11361_v48, %v17161_v36  ;;  %v11367_v52 = vsel %vm651_vm10, %v11360_v42, %v17160_v62 }
0x16b3   : > { %v17164_v34 = vpop.permute.xlu1 %17163 }
0x16b4   : > { %v17166_v18 = vunpack.i.h.bf16 %v17164_v34  ;;  %v17165_v45 = vunpack.i.l.bf16 %v17164_v34  ;;  %v11342_v43 = vsel %vm643_vm9, %v22963_v63, %v17186_v11  ;;  %v11341_v53 = vsel %vm643_vm9, %v22953_v58, %v17185_v22 }
0x16b5   : > { %v17189_v41 = vpop.permute.xlu0 %17188 }
0x16b6   : > { %v17191_v51 = vunpack.i.h.bf16 %v17189_v41  ;;  %v17190_v8 = vunpack.i.l.bf16 %v17189_v41  ;;  %v11346_v46 = vsel %vm651_vm10, %v11339_v25, %v17165_v45  ;;  %v11347_v55 = vsel %vm651_vm10, %v11340_v6, %v17166_v18 }
0x16b7   : > { %v17169_v38 = vpop.permute.xlu1 %17168 }
0x16b8   : > { %v17171_v19 = vunpack.i.h.bf16 %v17169_v38  ;;  %v17170_v50 = vunpack.i.l.bf16 %v17169_v38  ;;  %v11370_v5 = vsel %vm651_vm10, %v11363_v40, %v17191_v51  ;;  %v11369_v63 = vsel %vm651_vm10, %v11362_v29, %v17190_v8 }
0x16b9   : > { %v17194_v1 = vpop.permute.xlu0 %17193 }
0x16ba   : > { %v11374_v44 = vsel %vm659_vm11, %v11367_v52, %v17170_v50  ;;  %v11375_v26 = vsel %vm659_vm11, %v11368_v32, %v17171_v19  ;;  %v17196_v30 = vunpack.i.h.bf16 %v17194_v1  ;;  %v17195_v35 = vunpack.i.l.bf16 %v17194_v1 }
0x16bb   : > { %v11382_v16 = vpack.c.bf16 %v11375_v26, %v11374_v44  ;;  %v17174_v28 = vpop.permute.xlu1 %17173 }
0x16bc   : > { %v17176_v21 = vunpack.i.h.bf16 %v17174_v28  ;;  %v17175_v47 = vunpack.i.l.bf16 %v17174_v28  ;;  %v11348_v61 = vsel %vm651_vm10, %v11341_v53, %v17195_v35  ;;  %v11349_v20 = vsel %vm651_vm10, %v11342_v43, %v17196_v30 }
0x16bd   : > { %v11473_v7 = vshrl.u32 %v11382_v16, 16  ;;  %v11476_v56 = vshll.u32 %v11382_v16, 16  ;;  %v17199_v59 = vpop.permute.xlu0 %17198 }
0x16be   : > { %v11353_v58 = vsel %vm659_vm11, %v11346_v46, %v17175_v47  ;;  %v11354_v37 = vsel %vm659_vm11, %v11347_v55, %v17176_v21  ;;  %v17201_v3 = vunpack.i.h.bf16 %v17199_v59  ;;  %v17200_v13 = vunpack.i.l.bf16 %v17199_v59 }
0x16bf   : > { %v11381_v4 = vpack.c.bf16 %v11354_v37, %v11353_v58  ;;  %v17209_v31 = vpop.permute.xlu1 %17208  ;;  %v11475_v12 = vrot.slane %v11473_v7, 6  ;;  %v11478_v49 = vrot.slane %v11476_v56, 7  ;;  %v23345_v2 = vrot.slane %v11473_v7, 2 }
0x16c0   : > { %v11376_v57 = vsel %vm659_vm11, %v11369_v63, %v17200_v13  ;;  %v11377_v10 = vsel %vm659_vm11, %v11370_v5, %v17201_v3  ;;  %v17211_v17 = vunpack.i.h.bf16 %v17209_v31  ;;  %v17210_v34 = vunpack.i.l.bf16 %v17209_v31 }
0x16c1   : > { %v11456_v23 = vshrl.u32 %v11381_v4, 16  ;;  %v11459_v36 = vshll.u32 %v11381_v4, 16  ;;  %v11384_v62 = vpack.c.bf16 %v11377_v10, %v11376_v57  ;;  %v17204_v11 = vpop.permute.xlu0 %17203  ;;  %v11479_v41 = vor.u32 %v11478_v49, %v11475_v12 }
0x16c2   : > { %v11364_v42 = vsel %vm643_vm9, %v23237_v15, %v17210_v34  ;;  %v11365_v48 = vsel %vm643_vm9, %v23240_v33, %v17211_v17  ;;  %v17206_v6 = vunpack.i.h.bf16 %v17204_v11  ;;  %v17205_v25 = vunpack.i.l.bf16 %v17204_v11 }
0x16c3   : > { %v23353_v29 = vrot.slane %v11456_v23, 2  ;;  %v23355_v22 = vrot.slane %v11459_v36, 3  ;;  %v11481_v18 = vshrl.u32 %v11384_v62, 16  ;;  %v11484_v45 = vshll.u32 %v11384_v62, 16  ;;  %v17219_v38 = vpop.permute.xlu1 %17218 }
0x16c4   : > { %v11355_v51 = vsel %vm659_vm11, %v11348_v61, %v17205_v25  ;;  %v11356_v8 = vsel %vm659_vm11, %v11349_v20, %v17206_v6  ;;  %v17221_v19 = vunpack.i.h.bf16 %v17219_v38  ;;  %v17220_v50 = vunpack.i.l.bf16 %v17219_v38 }
0x16c5   : > { %v11383_v40 = vpack.c.bf16 %v11356_v8, %v11355_v51  ;;  %v17214_v15 = vpop.permute.xlu0 %17213  ;;  %v11483_v32 = vrot.slane %v11481_v18, 6  ;;  %v11486_v52 = vrot.slane %v11484_v45, 7  ;;  %v11636_v33 = vrot.slane %v11476_v56, 3 }
0x16c6   : > { %v11371_v43 = vsel %vm651_vm10, %v11364_v42, %v17220_v50  ;;  %v11372_v1 = vsel %vm651_vm10, %v11365_v48, %v17221_v19  ;;  %v17216_v44 = vunpack.i.h.bf16 %v17214_v15  ;;  %v17215_v26 = vunpack.i.l.bf16 %v17214_v15  ;;  %v17966_v50 = vld [vmem:[%s23664_s2 + $0x1280] sm:$0xff]  }
0x16c7   : > { %v11464_v30 = vshrl.u32 %v11383_v40, 16  ;;  %v11467_v35 = vshll.u32 %v11383_v40, 16  ;;  %v17229_v53 = vpop.permute.xlu1 %17228  ;;  %v23361_v46 = vor.u32 %v11486_v52, %v11483_v32  ;;  %v11637_v55 = vor.u32 %v11636_v33, %v23345_v2  ;;  %v17968_v52 = vld [vmem:[%s23664_s2 + $0x12c8] sm:$0xff]  }
0x16c8   : > { %v11344_v16 = vsel %vm643_vm9, %v23052_v27, %v17216_v44  ;;  %v11343_v28 = vsel %vm643_vm9, %v23031_v14, %v17215_v26  ;;  %v17231_v5 = vunpack.i.h.bf16 %v17229_v53  ;;  %v17230_v63 = vunpack.i.l.bf16 %v17229_v53 }
0x16c9   : > { %v11631_v21 = vrot.slane %v11464_v30, 2  ;;  %v11632_v47 = vrot.slane %v11467_v35, 3  ;;  %v17224_v7 = vpop.permute.xlu0 %17223  ;;  %v11488_v56 = vsel %vm761_vm12, %v11479_v41, %v23361_v46  ;;  %v11638_v61 = vrot.slane %v11481_v18, 2 }
0x16ca   : > { %v11378_v20 = vsel %vm659_vm11, %v11371_v43, %v17230_v63  ;;  %v11379_v59 = vsel %vm659_vm11, %v11372_v1, %v17231_v5  ;;  %v17226_v58 = vunpack.i.h.bf16 %v17224_v7  ;;  %v17225_v37 = vunpack.i.l.bf16 %v17224_v7  ;;  %11619 = vmatprep.mubr.bf16.mxu0 %v11488_v56 }
0x16cb   : > { %v11386_v27 = vpack.c.bf16 %v11379_v59, %v11378_v20  ;;  %v11639_v3 = vrot.slane %v11484_v45, 3  ;;  %v17239_v13 = vpop.permute.xlu1 %17238  ;;  %v11458_v14 = vrot.slane %v11456_v23, 6  ;;  %v11461_v4 = vrot.slane %v11459_v36, 7 }
0x16cc   : > { %v11350_v31 = vsel %vm651_vm10, %v11343_v28, %v17225_v37  ;;  %v11351_v12 = vsel %vm651_vm10, %v11344_v16, %v17226_v58  ;;  %v17241_v49 = vunpack.i.h.bf16 %v17239_v13  ;;  %v17240_v2 = vunpack.i.l.bf16 %v17239_v13  ;;  %v17971_v16 = vld [vmem:[%s23664_s2 + $0x1308] sm:$0xff]   ;;  %v17972_v37 = vld [vmem:[%s23664_s2 + $0x12d0] sm:$0xff]  }
0x16cd   : > { %v11824_v57 = vshrl.u32 %v11386_v27, 16  ;;  %v11827_v10 = vshll.u32 %v11386_v27, 16  ;;  %v11640_v17 = vor.u32 %v11639_v3, %v11638_v61  ;;  %v17234_v34 = vpop.permute.xlu0 %17233  ;;  %v11462_v62 = vor.u32 %v11461_v4, %v11458_v14  ;;  %v17973_v27 = vld [vmem:[%s23664_s2 + $0x1350] sm:$0xff]  }
0x16ce   : > { %v11345_v11 = vsel %vm643_vm9, %v23012_v9, %v17241_v49  ;;  %v11366_v41 = vsel %vm643_vm9, %v23254_v24, %v17240_v2  ;;  %v17236_v42 = vunpack.i.h.bf16 %v17234_v34  ;;  %v17235_v23 = vunpack.i.l.bf16 %v17234_v34  ;;  %v17967_v9 = vld [vmem:[%s23664_s2 + $0x1300] sm:$0xff]  }
0x16cf   : > { %v11641_v36 = vsel %vm935_vm13, %v11637_v55, %v11640_v17  ;;  %v11466_v48 = vrot.slane %v11464_v30, 6  ;;  %v11469_v6 = vrot.slane %v11467_v35, 7  ;;  %v11630_v25 = vor.u32 %v23355_v22, %v23353_v29  ;;  %v17249_v18 = vpop.permute.xlu1 %17248  ;;  %v17969_v29 = vld [vmem:[%s23664_s2 + $0x1348] sm:$0xff]  }
0x16d0   : > { %11772 = vmatprep.mubr.bf16.mxu1 %v11641_v36  ;;  %v11357_v45 = vsel %vm659_vm11, %v11350_v31, %v17235_v23  ;;  %v11358_v38 = vsel %vm659_vm11, %v11351_v12, %v17236_v42  ;;  %v11633_v51 = vor.u32 %v11632_v47, %v11631_v21  ;;  %v17251_v24 = vunpack.i.h.bf16 %v17249_v18  ;;  %v17970_v47 = vld [vmem:[%s23664_s2 + $0x1288] sm:$0xff]   ;;  %v17975_v31 = vld [vmem:[%s23664_s2 + $0x1310] sm:$0xff]  }
0x16d1   : > { %v11385_v8 = vpack.c.bf16 %v11358_v38, %v11357_v45  ;;  %v11470_v19 = vor.u32 %v11469_v6, %v11466_v48  ;;  %v17250_v40 = vunpack.i.l.bf16 %v17249_v18  ;;  %v17244_v22 = vpop.permute.xlu0 %17243  ;;  %v11826_v15 = vrot.slane %v11824_v57, 2  ;;  %v17979_v48 = vld [vmem:[%s23664_s2 + $0x1318] sm:$0xff]   ;;  %v17981_v18 = vld [vmem:[%s23664_s2 + $0x1360] sm:$0xff]  }
0x16d2   : > { %v11634_v32 = vsel %vm935_vm13, %v11630_v25, %v11633_v51  ;;  %v17246_v33 = vunpack.i.h.bf16 %v17244_v22  ;;  %v17245_v43 = vunpack.i.l.bf16 %v17244_v22  ;;  %v11829_v1 = vrot.slane %v11827_v10, 3  ;;  %v17978_v25 = vld [vmem:[%s23664_s2 + $0x1298] sm:$0xff]   ;;  %v17980_v38 = vld [vmem:[%s23664_s2 + $0x12e0] sm:$0xff]   ;;  %v17989_v22 = vld [vmem:[%s23664_s2 + $0x1370] sm:$0xff]  }
0x16d3   : > { %v11815_v44 = vshrl.u32 %v11385_v8, 16  ;;  %v11818_v26 = vshll.u32 %v11385_v8, 16  ;;  %v11471_v30 = vsel %vm761_vm12, %v11462_v62, %v11470_v19  ;;  %11773 = vmatmul.mubr.bf16.vlgmr.msra.gmra.mrb[116].mxu1 %v11634_v32  ;;  %v12010_v35 = vrot.slane %v11824_v57, 6  ;;  %v17974_v57 = vld [vmem:[%s23664_s2 + $0x1290] sm:$0xff]   ;;  %v17976_v62 = vld [vmem:[%s23664_s2 + $0x12d8] sm:$0xff]   ;;  %v17982_v8 = vld [vmem:[%s23664_s2 + $0x12a0] sm:$0xff]  }
0x16d4   : > { %11620 = vmatmul.mubr.bf16.vlgmr.msra.gmra.mrb[116].mxu0 %v11471_v30  ;;  %15934 = vmatpush3.bf16.msra.mxu1 %v17967_v9  ;;  %v11352_v53 = vsel %vm651_vm10, %v11345_v11, %v17246_v33  ;;  %v11373_v55 = vsel %vm651_vm10, %v11366_v41, %v17245_v43  ;;  %v11830_v28 = vor.u32 %v11829_v1, %v11826_v15  ;;  %v12011_v5 = vrot.slane %v11827_v10, 7  ;;  %v17977_v10 = vld [vmem:[%s23664_s2 + $0x1358] sm:$0xff]   ;;  %v17988_v15 = vld [vmem:[%s23664_s2 + $0x12f0] sm:$0xff]   ;;  %v17998_v30 = vld [vmem:[%s23665_s3 + $0x1c0] sm:$0xff]  }
0x16d5   : > { %15912 = vmatpush3.bf16.msra.mxu0 %v17966_v50  ;;  %15935 = vmatprep.subr.bf16.mxu1 %v17969_v29  ;;  %v11359_v63 = vsel %vm659_vm11, %v11352_v53, %v17251_v24  ;;  %v11380_v21 = vsel %vm659_vm11, %v11373_v55, %v17250_v40  ;;  %v11817_v7 = vrot.slane %v11815_v44, 2  ;;  %v11820_v56 = vrot.slane %v11818_v26, 3  ;;  %v17983_v24 = vld [vmem:[%s23664_s2 + $0x1320] sm:$0xff]   ;;  %v17984_v50 = vld [vmem:[%s23664_s2 + $0x12e8] sm:$0xff]   ;;  %v17991_v32 = vld [vmem:[%s23664_s2 + $0x1330] sm:$0xff]  }
0x16d6   : > { %15913 = vmatprep.subr.bf16.mxu0 %v17968_v52  ;;  %v11387_v61 = vpack.c.bf16 %v11359_v63, %v11359_v63  ;;  %v11388_v20 = vpack.c.bf16 %v11380_v21, %v11380_v21  ;;  %v11831_v59 = vsel %vm935_vm13, %v11640_v17, %v11830_v28  ;;  %v12012_v58 = vor.u32 %v12011_v5, %v12010_v35  ;;  %v17987_v40 = vld [vmem:[%s23664_s2 + $0x1328] sm:$0xff]   ;;  %v17990_v52 = vld [vmem:[%s23664_s2 + $0x12b0] sm:$0xff]   ;;  %v17993_v33 = vld [vmem:[%s23664_s2 + $0x1378] sm:$0xff]  }
0x16d7   : > { %11962 = vmatprep.mubr.bf16.mxu0 %v11831_v59  ;;  %v11821_v3 = vor.u32 %v11820_v56, %v11817_v7  ;;  %v12006_v13 = vrot.slane %v11815_v44, 6  ;;  %v12007_v14 = vrot.slane %v11818_v26, 7  ;;  %v17986_v29 = vld [vmem:[%s23664_s2 + $0x12a8] sm:$0xff]   ;;  %v17992_v43 = vld [vmem:[%s23664_s2 + $0x12f8] sm:$0xff]   ;;  %v17996_v26 = vld [vmem:[%s23664_s2 + $0x13c0] sm:$0xff]  }
0x16d8   : > { %15936 = vmatpush3.bf16.msra.mxu1 %v17971_v16  ;;  %v12013_v4 = vsel %vm761_vm12, %v23361_v46, %v12012_v58  ;;  %v12198_v12 = vshrl.u32 %v11388_v20, 16  ;;  %v12201_v49 = vshll.u32 %v11388_v20, 16  ;;  %v12189_v2 = vshrl.u32 %v11387_v61, 16  ;;  %v17995_v1 = vld [vmem:[%s23664_s2 + $0x1338] sm:$0xff]   ;;  %v17997_v35 = vld [vmem:[%s23664_s2 + $0x1380] sm:$0xff]   ;;  %v17999_v53 = vld [vmem:[%s23664_s2 + $0x13c8] sm:$0xff]  }
0x16d9   : > { %15914 = vmatpush3.bf16.msra.mxu0 %v17970_v47  ;;  %12144 = vmatprep.mubr.bf16.mxu1 %v12013_v4  ;;  %v11822_v17 = vsel %vm935_vm13, %v11633_v51, %v11821_v3  ;;  %v12008_v46 = vor.u32 %v12007_v14, %v12006_v13  ;;  %v12192_v34 = vshll.u32 %v11387_v61, 16  ;;  %v17994_v44 = vld [vmem:[%s23664_s2 + $0x12b8] sm:$0xff]   ;;  %v18001_v55 = vld [vmem:[%s23665_s3 + $0x1c8] sm:$0xff]   ;;  %v18004_v5 = vld [vmem:[%s23665_s3 + $0x1d0] sm:$0xff]  }
0x16da   : > { %15915 = vmatprep.subr.bf16.mxu0 %v17972_v37  ;;  %15937 = vmatprep.subr.bf16.mxu1 %v17973_v27  ;;  %v12200_v11 = vrot.slane %v12198_v12, 2  ;;  %v12203_v41 = vrot.slane %v12201_v49, 3  ;;  %v12191_v42 = vrot.slane %v12189_v2, 2  ;;  %v18000_v16 = vld [vmem:[%s23664_s2 + $0x1388] sm:$0xff]   ;;  %v18003_v63 = vld [vmem:[%s23664_s2 + $0x1390] sm:$0xff]   ;;  %v18005_v21 = vld [vmem:[%s23664_s2 + $0x13d8] sm:$0xff]  }
0x16db   : > { %v12009_v23 = vsel %vm761_vm12, %v11470_v19, %v12008_v46  ;;  %v12194_v36 = vrot.slane %v12192_v34, 3  ;;  %v17985_v19 = vld [vmem:[%s23664_s2 + $0x1368] sm:$0xff]   ;;  %v18007_v47 = vld [vmem:[%s23665_s3 + $0x1d8] sm:$0xff]   ;;  %v18008_v56 = vld [vmem:[%s23664_s2 + $0x13e0] sm:$0xff]  }
0x16dc   : > { %15938 = vmatpush3.bf16.msra.mxu1 %v17975_v31  ;;  %v12204_v6 = vor.u32 %v12203_v41, %v12200_v11  ;;  %v18006_v7 = vld [vmem:[%s23664_s2 + $0x1398] sm:$0xff]   ;;  %v18010_v61 = vld [vmem:[%s23665_s3 + $0x1e0] sm:$0xff]   ;;  %v18011_v59 = vld [vmem:[%s23664_s2 + $0x13e8] sm:$0xff]  }
0x16dd   : > { %15916 = vmatpush3.bf16.msra.mxu0 %v17974_v57  ;;  %15939 = vmatprep.subr.bf16.mxu1 %v17977_v10  ;;  %v12195_v45 = vor.u32 %v12194_v36, %v12191_v42  ;;  %v18009_v20 = vld [vmem:[%s23664_s2 + $0x13a0] sm:$0xff]   ;;  %v18013_v58 = vld [vmem:[%s23665_s3 + $0x1e8] sm:$0xff]   ;;  %v18014_v27 = vld [vmem:[%s23664_s2 + $0x13f0] sm:$0xff]  }
0x16de   : > { %15917 = vmatprep.subr.bf16.mxu0 %v17976_v62  ;;  %v12205_v51 = vsel %vm935_vm13, %v11830_v28, %v12204_v6  ;;  %v18002_v28 = vld [vmem:[%s23664_s2 + $0x13d0] sm:$0xff]   ;;  %v18012_v37 = vld [vmem:[%s23664_s2 + $0x13a8] sm:$0xff]   ;;  %v18017_v14 = vld [vmem:[%s23664_s2 + $0x13f8] sm:$0xff]  }
0x16df   : > { %v23444_v9 = vsel %vm935_vm13, %v11821_v3, %v12195_v45  ;;  %v18016_v3 = vld [vmem:[%s23665_s3 + $0x1f0] sm:$0xff]   ;;  %v18019_v4 = vld [vmem:[%s23665_s3 + $0x1f8] sm:$0xff]   ;;  %v18020_v12 = vld [vmem:[%s23666_s4] sm:$0xff]  }
0x16e0   : > { %15940 = vmatpush3.bf16.msra.mxu1 %v17979_v48  ;;  %v18015_v13 = vld [vmem:[%s23664_s2 + $0x13b0] sm:$0xff]   ;;  %v18018_v31 = vld [vmem:[%s23664_s2 + $0x13b8] sm:$0xff]   ;;  %v18021_v49 = vld [vmem:[%s23666_s4 + $0x8] sm:$0xff]  }
0x16e1   : > { %15918 = vmatpush3.bf16.msra.mxu0 %v17978_v25  ;;  %15941 = vmatprep.subr.bf16.mxu1 %v17981_v18 }
0x16e2   : > { %15919 = vmatprep.subr.bf16.mxu0 %v17980_v38 }
0x16e4   : > { %15942 = vmatpush3.bf16.msra.mxu1 %v17983_v24 }
0x16e5   : > { %15920 = vmatpush3.bf16.msra.mxu0 %v17982_v8  ;;  %15943 = vmatprep.subr.bf16.mxu1 %v17985_v19 }
0x16e6   : > { %15921 = vmatprep.subr.bf16.mxu0 %v17984_v50 }
0x16e8   : > { %15944 = vmatpush3.bf16.msra.mxu1 %v17987_v40 }
0x16e9   : > { %15922 = vmatpush3.bf16.msra.mxu0 %v17986_v29  ;;  %15945 = vmatprep.subr.bf16.mxu1 %v17989_v22 }
0x16ea   : > { %15923 = vmatprep.subr.bf16.mxu0 %v17988_v15  ;;  %v18022_v15 = vld [vmem:[%s23666_s4 + $0x10] sm:$0xff]  }
0x16ec   : > { %15946 = vmatpush3.bf16.msra.mxu1 %v17991_v32 }
0x16ed   : > { %15924 = vmatpush3.bf16.msra.mxu0 %v17990_v52  ;;  %15947 = vmatprep.subr.bf16.mxu1 %v17993_v33 }
0x16ee   : > { %15925 = vmatprep.subr.bf16.mxu0 %v17992_v43 }
0x16f0   : > { %15948 = vmatpush3.bf16.msra.mxu1 %v17995_v1 }
0x16f1   : > { %15926 = vmatpush3.bf16.msra.mxu0 %v17994_v44  ;;  %16327 = vmatprep.subr.bf16.mxu1 %v23675_v0 }
0x16f2   : > { %15955 = vmatprep.subr.bf16.mxu0 %v17996_v26 }
0x16f3   : > { %12145 = vmatmul.mubr.bf16.vlgmr.msra.gmra.mrb[120].mxu1 %v12009_v23 }
0x16f4   : > { %11963 = vmatmul.mubr.bf16.vlgmr.msra.gmra.mrb[120].mxu0 %v11822_v17  ;;  %16328 = vmatpush3.bf16.msra.mxu1 %v17998_v30 }
0x16f5   : > { %15956 = vmatpush3.bf16.msra.mxu0 %v17997_v35  ;;  %12336 = vmatprep.mubr.bf16.mxu0 %v12205_v51  ;;  %v18023_v35 = vld [vmem:[%s23666_s4 + $0x18] sm:$0xff]  }
0x16f6   : > { %15957 = vmatprep.subr.bf16.mxu0 %v17999_v53  ;;  %16329 = vmatprep.subr.bf16.mxu1 %v23675_v0 }
0x16f7   : > { %16343 = vmatprep.mubr.msk.bf16.mxu1 %vm18101_vm14, %v23675_v0 }
0x16f8   : > { %16330 = vmatpush3.bf16.msra.mxu1 %v18001_v55 }
0x16f9   : > { %15958 = vmatpush3.bf16.msra.mxu0 %v18000_v16  ;;  %16331 = vmatprep.subr.bf16.mxu1 %v23675_v0 }
0x16fa   : > { %15959 = vmatprep.subr.bf16.mxu0 %v18002_v28  ;;  %v18024_v28 = vld [vmem:[%s23666_s4 + $0x20] sm:$0xff]  }
0x16fc   : > { %16332 = vmatpush3.bf16.msra.mxu1 %v18004_v5 }
0x16fd   : > { %15960 = vmatpush3.bf16.msra.mxu0 %v18003_v63  ;;  %16333 = vmatprep.subr.bf16.mxu1 %v23675_v0  ;;  %v18025_v63 = vld [vmem:[%s23666_s4 + $0x28] sm:$0xff]  }
0x16fe   : > { %15961 = vmatprep.subr.bf16.mxu0 %v18005_v21  ;;  %v18026_v21 = vld [vmem:[%s23666_s4 + $0x30] sm:$0xff]  }
0x1700   : > { %16334 = vmatpush3.bf16.msra.mxu1 %v18007_v47  ;;  %v18027_v47 = vld [vmem:[%s23666_s4 + $0x38] sm:$0xff]  }
0x1701   : > { %15962 = vmatpush3.bf16.msra.mxu0 %v18006_v7  ;;  %16335 = vmatprep.subr.bf16.mxu1 %v23675_v0 }
0x1702   : > { %15963 = vmatprep.subr.bf16.mxu0 %v18008_v56 }
0x1704   : > { %16336 = vmatpush3.bf16.msra.mxu1 %v18010_v61 }
0x1705   : > { %15964 = vmatpush3.bf16.msra.mxu0 %v18009_v20  ;;  %16337 = vmatprep.subr.bf16.mxu1 %v23675_v0 }
0x1706   : > { %15965 = vmatprep.subr.bf16.mxu0 %v18011_v59 }
0x1708   : > { %16338 = vmatpush3.bf16.msra.mxu1 %v18013_v58 }
0x1709   : > { %15966 = vmatpush3.bf16.msra.mxu0 %v18012_v37  ;;  %16339 = vmatprep.subr.bf16.mxu1 %v23675_v0 }
0x170a   : > { %15967 = vmatprep.subr.bf16.mxu0 %v18014_v27 }
0x170c   : > { %16340 = vmatpush3.bf16.msra.mxu1 %v18016_v3 }
0x170d   : > { %15968 = vmatpush3.bf16.msra.mxu0 %v18015_v13  ;;  %16341 = vmatprep.subr.bf16.mxu1 %v23675_v0 }
0x170e   : > { %15969 = vmatprep.subr.bf16.mxu0 %v18017_v14 }
0x1710   : > { %16342 = vmatpush3.bf16.msra.mxu1 %v18019_v4 }
0x1711   : > { %15970 = vmatpush3.bf16.msra.mxu0 %v18018_v31 }
0x1712   : > { %16347 = vmatprep.subr.bf16.mxu0 %v23675_v0 }
0x1713   : > { %16344 = vmatmul.mubr.bf16.vlgmr.msra.gmra.mrb[124].mxu1 %v12373_v54 }
0x1714   : > { %12337 = vmatmul.mubr.bf16.vlgmr.msra.gmra.mrb[124].mxu0 %v23444_v9 }
0x1715   : > { %16363 = vmatprep.mubr.msk.bf16.mxu0 %vm18101_vm14, %v23675_v0  ;;  %16348 = vmatpush3.bf16.msra.mxu0 %v18020_v12 }
0x1716   : > { %16349 = vmatprep.subr.bf16.mxu0 %v23675_v0 }
0x1719   : > { %16350 = vmatpush3.bf16.msra.mxu0 %v18021_v49  ;;  %v12521_v49 = vld [vmem:[%s23667_s5] sm:$0x1] }
0x171a   : > { %16351 = vmatprep.subr.bf16.mxu0 %v23675_v0 }
0x171d   : > { %16352 = vmatpush3.bf16.msra.mxu0 %v18022_v15 }
0x171e   : > { %16353 = vmatprep.subr.bf16.mxu0 %v23675_v0 }
0x1721   : > { %16354 = vmatpush3.bf16.msra.mxu0 %v18023_v35 }
0x1722   : > { %16355 = vmatprep.subr.bf16.mxu0 %v23675_v0 }
0x1725   : > { %16356 = vmatpush3.bf16.msra.mxu0 %v18024_v28 }
0x1726   : > { %16357 = vmatprep.subr.bf16.mxu0 %v23675_v0 }
0x1729   : > { %16358 = vmatpush3.bf16.msra.mxu0 %v18025_v63 }
0x172a   : > { %16359 = vmatprep.subr.bf16.mxu0 %v23675_v0 }
0x172d   : > { %16360 = vmatpush3.bf16.msra.mxu0 %v18026_v21 }
0x172e   : > { %16361 = vmatprep.subr.bf16.mxu0 %v23675_v0 }
0x1731   : > { %16362 = vmatpush3.bf16.msra.mxu0 %v18027_v47 }
0x17a6   : > { %v15905_v60 = vpop.f32.mrb[116].mxu1 }
0x17a7   : > { %v15883_v39 = vpop.f32.mrb[116].mxu0  ;;  %v15906_v54 = vpop.f32.mrb[117].mxu1 }
0x17a8   : > { %v15884_v2 = vpop.f32.mrb[117].mxu0  ;;  %v15907_v57 = vadd.f32 %v15906_v54, %v15905_v60  ;;  %v15908_v10 = vpop.f32.mrb[118].mxu1 }
0x17a9   : > { %v15885_v17 = vadd.f32 %v15884_v2, %v15883_v39  ;;  %v15886_v46 = vpop.f32.mrb[118].mxu0  ;;  %v15909_v34 = vpop.f32.mrb[119].mxu1 }
0x17aa   : > { %v15887_v62 = vpop.f32.mrb[119].mxu0  ;;  %v15910_v11 = vadd.f32 %v15909_v34, %v15908_v10 }
0x17ab   : > { %v11775_v41 = vadd.f32 %v15907_v57, %v15885_v17  ;;  %v15888_v42 = vadd.f32 %v15887_v62, %v15886_v46 }
0x17ad   : > { %v11778_v23 = vadd.f32 %v15910_v11, %v15888_v42 }
0x17c6   : > { %v15949_v36 = vpop.f32.mrb[120].mxu1 }
0x17c7   : > { %v15927_v48 = vpop.f32.mrb[120].mxu0  ;;  %v15950_v6 = vpop.f32.mrb[121].mxu1 }
0x17c8   : > { %v15928_v25 = vpop.f32.mrb[121].mxu0  ;;  %v15951_v18 = vadd.f32 %v15950_v6, %v15949_v36  ;;  %v15952_v45 = vpop.f32.mrb[122].mxu1 }
0x17c9   : > { %v15929_v38 = vadd.f32 %v15928_v25, %v15927_v48  ;;  %v15930_v51 = vpop.f32.mrb[122].mxu0  ;;  %v15953_v9 = vpop.f32.mrb[123].mxu1 }
0x17ca   : > { %v15931_v24 = vpop.f32.mrb[123].mxu0  ;;  %v15954_v8 = vadd.f32 %v15953_v9, %v15952_v45 }
0x17cb   : > { %v11971_v19 = vadd.f32 %v15929_v38, %v11775_v41  ;;  %v15932_v50 = vadd.f32 %v15931_v24, %v15930_v51 }
0x17cd   : > { %v12153_v40 = vadd.f32 %v15951_v18, %v11971_v19  ;;  %v11972_v29 = vadd.f32 %v15932_v50, %v11778_v23 }
0x17cf   : > { %v12154_v22 = vadd.f32 %v15954_v8, %v11972_v29 }
0x17e6   : > { %v12473_v32 = vpop.f32.mrb[124].mxu1 }
0x17e7   : > { %v15971_v52 = vpop.f32.mrb[124].mxu0  ;;  %12482 = vrot.lane.b32.xlu0 %v12473_v32, %s18100_s26  ;;  %v16345_v33 = vpop.f32.mrb[125].mxu1 }
0x17e8   : > { %v15972_v43 = vpop.f32.mrb[125].mxu0  ;;  %v12476_v1 = vpop.f32.mrb[126].mxu1 }
0x17e9   : > { %v15973_v44 = vadd.f32 %v15972_v43, %v15971_v52  ;;  %v15974_v26 = vpop.f32.mrb[126].mxu0  ;;  %12484 = vrot.lane.b32.xlu1 %v12476_v1, %s18100_s26  ;;  %v16346_v30 = vpop.f32.mrb[127].mxu1  ;;  %s18036_s26 = sshll.u32 %s18102_s12, 4  ;;  %s18037_s26 = int_to_ptr.vmem [resolvable:$false] %s18036_s26 }
0x17ea   : > { %v15975_v53 = vpop.f32.mrb[127].mxu0  ;;  %s18038_s13 = scalar_lea.vmem %s18037_s26, 32  ;;  %p18039_p0 = scmp.lt.s32.totalorder %s23622_s14, %s18037_s26 }
0x17eb   : > { %v12345_v55 = vadd.f32 %v15973_v44, %v12153_v40  ;;  %v15976_v16 = vadd.f32 %v15975_v53, %v15974_v26  ;;  %p18040_p1 = scmp.lt.s32.totalorder %s18038_s13, %s18032_s11 }
0x17ed   : > { %v12346_v5 = vadd.f32 %v15976_v16, %v12154_v22  ;;  %p18041_p2 = por %p18040_p1, %p18039_p0 }
0x17ef   : > { %p18042_p3 = pnand %p18041_p2, %p18035_p13 }
0x1859   : > { %v12483_v7 = vpop.permute.xlu0 %12482 }
0x185a   : > { %v12488_v56 = vsel %vm659_vm11, %v12345_v55, %v12483_v7 }
0x185b   : > { %v12485_v61 = vpop.permute.xlu1 %12484  ;;  %v12490_v59 = vmax.f32 %v12488_v56, 0.0 }
0x185c   : > { %v12489_v20 = vsel %vm659_vm11, %v12346_v5, %v12485_v61 }
0x185d   : > { %v12491_v58 = vmax.f32 %v12489_v20, 0.0 }
0x185f   : > { %v12496_v37 = vadd.f32 %v12491_v58, %v12490_v59 }
0x1861   : > { %v12497_v27 = vrot.slane %v12496_v37, 4 }
0x1863   : > { %v12498_v3 = vadd.f32 %v12497_v27, %v12496_v37 }
0x1865   : > { %v12499_v13 = vrot.slane %v12498_v3, 2 }
0x1867   : > { %v12500_v14 = vadd.f32 %v12499_v13, %v12498_v3 }
0x1869   : > { %v12501_v4 = vrot.slane %v12500_v14, 1 }
0x186b   : > { %v12502_v31 = vadd.f32 %v12501_v4, %v12500_v14 }
0x186d   : > { %v12503_v12 = vmul.f32 0.0625, %v12502_v31 }
0x186f   : > { %v12504_v0 = vpack.c.bf16 %v12503_v12, %v12503_v12 }
0x1871   : > { %16364 = vmatmul.mubr.bf16.vlgmr.msra.gmra.mrb[128].mxu0 %v12504_v0 }
0x1944   : > { %v12604_v60 = vpop.f32.mrb[128].mxu0 }
0x1945   : > { %v12605_v39 = vadd.f32 %v12604_v60, %v12521_v49  ;;  %v16365_v54 = vpop.f32.mrb[129].mxu0 }
0x1946   : > { %v12607_v2 = vpop.f32.mrb[130].mxu0 }
0x1947   : > { %v16366_v57 = vpop.f32.mrb[131].mxu0  ;;  %12611 = vst.msk [vmem:[%s243_s20] sm:$0x1] %vm12610_vm15, %v12605_v39 }
0x1948   : > { %18045 = shalt.err (!%p18042_p3)
}
0x1949   : > { %s18046_s15 = scalar_lea.hbm %s23620_s9, 16  ;;  %s18050_s18 = scalar_lea.hbm %s23668_s6, 32 }
0x194a   : > { %p18047_p4 = scmp.ne.s32.totalorder %s23620_s9, %s18046_s15  ;;  %p18051_p9 = scmp.lt.u32.totalorder %s23620_s9, %s23668_s6 }
0x194b   : > { %p18052_p10 = scmp.lt.u32.totalorder %s18050_s18, %s18046_s15  ;;  %p18054_p12 = scmp.lt.u32.totalorder %s18046_s15, %s23620_s9 }
0x194c   : > { %p18048_p7 = pnand %p18047_p4, %p18176_p5 }
0x194d   : > { %p18053_p11 = por %p18052_p10, %p18051_p9 }
0x194e   : > { %p18049_p8 = pneg %p18048_p7 }
0x194f   : > { %p18055_p13 = por %p18054_p12, %p18053_p11 }
0x1951   : > { %p18056_p0 = pnand %p18055_p13, %p18049_p8 }
0x1953   : > { %18059 = shalt.err (!%p18056_p0)
}
0x1954   : > { %16367 = dma.vmem_to_hbm [thread:$0]  (%p18176_p5), %s23622_s14, 16, %s23620_s9, %s12613_s25  }
0x1955 PF: > { %p16373_p1 = scmp.ge.s32.totalorder %s18094_s24, 2  ;;  %s12637_s20 = sand.u32 1, %s18082_s21  }
0x1956   : > { %s12638_s28 = scalar_lea.sflag [#allocation4], %s12637_s20 }
0x1957   : > { %p16370_p2 = pnand %p16373_p1, %p18180_p6 }
0x1959   : > { %18077 = dma.done.wait (!%p16370_p2), %s12638_s28, 16  }
0x195a   : > { %18079 = vsyncadd (!%p16370_p2), %s12638_s28, 4294967280  ;;  %p16_p3 = scmp.ge.s32.totalorder %s18163_s27, 4   ;;  %s23684_s21 = smov %s18086_s22 }
0x195b   : > { %s23685_s22 = smov %s18090_s23  ;;  %s23686_s23 = smov %s18174_s30 }
0x195c   : > { %s23687_s24 = smov %s18163_s27  ;;  %18 = sbr.rel (!%p16_p3) target bundleno = 3 (0x3), region = 132 }
0x1963   :  { %12642 = vsyncpa [#allocation4], 1 }
0x1964   :  { %12644 = vsyncpa [#allocation4 + $0x1], 1 }

</bundles_post_ra>
